<compile_context>
chip_gen: v6e
topology: v6e:2x2x1
jax: 0.10.0
libtpu: 0.0.40
codegen_flags: <defaults>
</compile_context>

<pallas_src>
import math
from functools import partial

import numpy as np
import jax
import jax.numpy as jnp
from jax import lax
from jax.experimental import pallas as pl
from jax.experimental.pallas import tpu as pltpu

_EPS = 1e-5
_VMEM_LIMIT = 32 * 1024 * 1024   # safe on v5e/v6e (128 MiB phys) and v7x (64 MiB)
_MAX_ROW_TILE = 256              # v5e-friendly default row tile


def _compiler_params(n_axes=1):
    return pltpu.CompilerParams(
        dimension_semantics=("parallel",) * n_axes,
        vmem_limit_bytes=_VMEM_LIMIT)


def _pick_row_tile(R, max_tile=_MAX_ROW_TILE):
    """Row tile: multiple of 8, <= max_tile, and >= 2 grid steps when R allows."""
    if R <= 16:
        return R
    half = -(-R // 2)
    half = ((half + 7) // 8) * 8
    return min(max_tile, half)


def _pad_rows(x, Rp):
    R = x.shape[0]
    if Rp == R:
        return x
    return jnp.pad(x, ((0, Rp - R),) + ((0, 0),) * (x.ndim - 1))


def _bn_affine(stats, count, gamma, beta):
    """Finalize two-pass BN: partial (sum, sumsq) -> per-channel scale/shift."""
    s = jnp.sum(stats[:, 0, :], axis=0)
    sq = jnp.sum(stats[:, 1, :], axis=0)
    mean = s / count
    var = jnp.maximum(sq / count - mean * mean, 0.0)
    inv = lax.rsqrt(var + _EPS)
    scale = gamma * inv
    shift = beta - mean * scale
    return scale.reshape(1, -1), shift.reshape(1, -1)


# --------------------------------------------------------------------------
# kernel: plain dense  (y = x @ W + b) -- kv_embed patch projection (sr > 1)
# --------------------------------------------------------------------------
def _dense_kernel(x_ref, w_ref, b_ref, o_ref):
    o_ref[...] = (jnp.dot(x_ref[...], w_ref[...],
                          preferred_element_type=jnp.float32) + b_ref[...])


def dense(x, w, b):
    R, Cin = x.shape
    Cout = w.shape[1]
    tile = _pick_row_tile(R)
    Rp = -(-R // tile) * tile
    out = pl.pallas_call(
        _dense_kernel,
        out_shape=jax.ShapeDtypeStruct((Rp, Cout), jnp.float32),
        grid_spec=pltpu.PrefetchScalarGridSpec(
            num_scalar_prefetch=0,
            grid=(Rp // tile,),
            in_specs=[pl.BlockSpec((tile, Cin), lambda i: (i, 0)),
                      pl.BlockSpec((Cin, Cout), lambda i: (0, 0)),
                      pl.BlockSpec((1, Cout), lambda i: (0, 0))],
            out_specs=pl.BlockSpec((tile, Cout), lambda i: (i, 0))),
        compiler_params=_compiler_params(),
    )(_pad_rows(x, Rp), w, b.reshape(1, Cout))
    return out[:R]


# --------------------------------------------------------------------------
# reduce (1x1 conv) pass 1: 4-plane matmul + masked partial BN statistics
#   input rows are (b, h2, w2); columns hold the 2x2 pixel block [a|b|c|d],
#   each of width C.  Output y_pre is the pre-BN conv result [ya|yb|yc|yd].
# --------------------------------------------------------------------------
def _reduce_pass1_kernel(xq_ref, w_ref, b_ref, y_ref, stats_ref, *,
                         C, tile, n_rows):
    xq = xq_ref[...]                       # (tile, 4C)
    w = w_ref[...]                         # (C, C4)
    b = b_ref[...]                         # (1, C4)
    planes = [jnp.dot(xq[:, k * C:(k + 1) * C], w,
                      preferred_element_type=jnp.float32) + b
              for k in range(4)]
    y_ref[...] = jnp.concatenate(planes, axis=-1)

    # partial BN stats over the 4 planes, masking padded rows
    C4 = w.shape[1]
    row0 = pl.program_id(0) * tile
    rid = lax.broadcasted_iota(jnp.int32, (tile, C4), 0) + row0
    valid = (rid < n_rows).astype(jnp.float32)
    pm = [p * valid for p in planes]
    s = jnp.sum(pm[0] + pm[1] + pm[2] + pm[3], axis=0, keepdims=True)
    sq = jnp.sum(pm[0] * planes[0] + pm[1] * planes[1]
                 + pm[2] * planes[2] + pm[3] * planes[3],
                 axis=0, keepdims=True)
    stats_ref[0, 0:1, :] = s
    stats_ref[0, 1:2, :] = sq


def reduce_pass1(xq, w, b):
    R = xq.shape[0]
    C, C4 = w.shape
    tile = _pick_row_tile(R)
    Rp = -(-R // tile) * tile
    nt = Rp // tile
    y, stats = pl.pallas_call(
        partial(_reduce_pass1_kernel, C=C, tile=tile, n_rows=R),
        out_shape=(jax.ShapeDtypeStruct((Rp, 4 * C4), jnp.float32),
                   jax.ShapeDtypeStruct((nt, 2, C4), jnp.float32)),
        grid_spec=pltpu.PrefetchScalarGridSpec(
            num_scalar_prefetch=0,
            grid=(nt,),
            in_specs=[pl.BlockSpec((tile, 4 * C), lambda i: (i, 0)),
                      pl.BlockSpec((C, C4), lambda i: (0, 0)),
                      pl.BlockSpec((1, C4), lambda i: (0, 0))],
            out_specs=(pl.BlockSpec((tile, 4 * C4), lambda i: (i, 0)),
                       pl.BlockSpec((1, 2, C4), lambda i: (i, 0, 0)))),
        compiler_params=_compiler_params(),
    )(_pad_rows(xq, Rp), w, b.reshape(1, C4))
    return y[:R], stats


# --------------------------------------------------------------------------
# reduce pass 2: BN normalize + ReLU + Haar DWT epilogue (lane-dense output)
# --------------------------------------------------------------------------
def _bn_relu_dwt_kernel(y_ref, scale_ref, shift_ref, o_ref, *, C4):
    y = y_ref[...]
    scale = scale_ref[...]
    shift = shift_ref[...]
    r = [jnp.maximum(y[:, k * C4:(k + 1) * C4] * scale + shift, 0.0)
         for k in range(4)]
    ra, rb, rc, rd = r
    ll = 0.5 * (ra + rb + rc + rd)
    lh = 0.5 * (ra + rb - rc - rd)
    hl = 0.5 * (ra - rb + rc - rd)
    hh = 0.5 * (ra - rb - rc + rd)
    o_ref[...] = jnp.concatenate([ll, lh, hl, hh], axis=-1)


def bn_relu_dwt(y, scale, shift):
    R, C = y.shape
    C4 = C // 4
    tile = _pick_row_tile(R)
    Rp = -(-R // tile) * tile
    out = pl.pallas_call(
        partial(_bn_relu_dwt_kernel, C4=C4),
        out_shape=jax.ShapeDtypeStruct((Rp, C), jnp.float32),
        grid_spec=pltpu.PrefetchScalarGridSpec(
            num_scalar_prefetch=0,
            grid=(Rp // tile,),
            in_specs=[pl.BlockSpec((tile, C), lambda i: (i, 0)),
                      pl.BlockSpec((1, C4), lambda i: (0, 0)),
                      pl.BlockSpec((1, C4), lambda i: (0, 0))],
            out_specs=pl.BlockSpec((tile, C), lambda i: (i, 0))),
        compiler_params=_compiler_params(),
    )(_pad_rows(y, Rp), scale, shift)
    return out[:R]


# --------------------------------------------------------------------------
# filter (3x3 conv) pass 1: 9 accumulated matmuls on a spatially-flattened,
# 1-px padded image (no im2col) + per-batch partial BN statistics.
# --------------------------------------------------------------------------
def _filter_conv_kernel(xpf_ref, w_ref, b_ref, mask_ref, y_ref, stats_ref, *,
                        H2, W2):
    P = W2 + 2
    L = H2 * P - 2
    xflat = xpf_ref[0]                     # ((H2+2)*P, C)
    acc = None
    for t in range(9):
        dy, dx = divmod(t, 3)
        start = dy * P + dx
        win = xflat[start:start + L, :]    # (L, C) shifted window
        contrib = jnp.dot(win, w_ref[t], preferred_element_type=jnp.float32)
        acc = contrib if acc is None else acc + contrib
    acc = acc + b_ref[...]
    y_ref[0] = acc
    # partial BN stats; mask kills the padded-width garbage rows
    m = mask_ref[...]                      # (L, 1)
    am = acc * m
    stats_ref[0, 0:1, :] = jnp.sum(am, axis=0, keepdims=True)
    stats_ref[0, 1:2, :] = jnp.sum(am * acc, axis=0, keepdims=True)


def filter_conv(x_img, w9, b):
    """x_img: (B, H2, W2, C).  Returns (y_pre (B*H2*W2, C), stats (B, 2, C))."""
    B, H2, W2, C = x_img.shape
    P = W2 + 2
    L = H2 * P - 2
    xp = jnp.pad(x_img, ((0, 0), (1, 1), (1, 1), (0, 0)))
    xpf = xp.reshape(B, (H2 + 2) * P, C)
    mask = jnp.asarray(((np.arange(L) % P) < W2)
                       .astype(np.float32).reshape(L, 1))

    y_flat, stats = pl.pallas_call(
        partial(_filter_conv_kernel, H2=H2, W2=W2),
        out_shape=(jax.ShapeDtypeStruct((B, L, C), jnp.float32),
                   jax.ShapeDtypeStruct((B, 2, C), jnp.float32)),
        grid_spec=pltpu.PrefetchScalarGridSpec(
            num_scalar_prefetch=0,
            grid=(B,),
            in_specs=[pl.BlockSpec((1, (H2 + 2) * P, C), lambda i: (i, 0, 0)),
                      pl.BlockSpec((9, C, C), lambda i: (0, 0, 0)),
                      pl.BlockSpec((1, C), lambda i: (0, 0)),
                      pl.BlockSpec((L, 1), lambda i: (0, 0))],
            out_specs=(pl.BlockSpec((1, L, C), lambda i: (i, 0, 0)),
                       pl.BlockSpec((1, 2, C), lambda i: (i, 0, 0)))),
        compiler_params=_compiler_params(),
    )(xpf, w9, b.reshape(1, C), mask)

    # drop the padded-width columns -> valid (B*H2*W2, C) rows
    y_full = jnp.pad(y_flat, ((0, 0), (0, 2), (0, 0)))
    y_pre = y_full.reshape(B, H2, P, C)[:, :, :W2, :].reshape(B * H2 * W2, C)
    return y_pre, stats


# --------------------------------------------------------------------------
# filter pass 2 (fused, sr_ratio == 1):
#   BN normalize + ReLU + Haar IDWT epilogue + LayerNorm + kv Linear.
#   Outputs the (tile, 2C) kv rows and the (tile, C) IDWT pixel-planes; the
#   intermediate x_filt never leaves VMEM.
# --------------------------------------------------------------------------
def _bn_idwt_ln_kv_kernel(y_ref, bscale_ref, bshift_ref, g_ref, b_ref,
                          w_ref, bias_ref, kv_ref, planes_ref, *, C4):
    z = jnp.maximum(y_ref[...] * bscale_ref[...] + bshift_ref[...], 0.0)
    ll = z[:, 0 * C4:1 * C4]
    lh = z[:, 1 * C4:2 * C4]
    hl = z[:, 2 * C4:3 * C4]
    hh = z[:, 3 * C4:4 * C4]
    y00 = 0.5 * (ll + lh + hl + hh)   # (2i  , 2j  )
    y01 = 0.5 * (ll + lh - hl - hh)   # (2i  , 2j+1)
    y10 = 0.5 * (ll - lh + hl - hh)   # (2i+1, 2j  )
    y11 = 0.5 * (ll - lh - hl + hh)   # (2i+1, 2j+1)
    planes_ref[...] = jnp.concatenate([y00, y01, y10, y11], axis=-1)
    # LayerNorm over channels, then the kv projection (x_filt stays in VMEM)
    mu = jnp.mean(z, axis=-1, keepdims=True)
    var = jnp.mean((z - mu) * (z - mu), axis=-1, keepdims=True)
    zn = (z - mu) * lax.rsqrt(var + _EPS) * g_ref[...] + b_ref[...]
    kv_ref[...] = (jnp.dot(zn, w_ref[...],
                           preferred_element_type=jnp.float32) + bias_ref[...])


def bn_idwt_ln_kv(y, bscale, bshift, g, b, w, bias):
    R, C = y.shape
    C4 = C // 4
    C2 = w.shape[1]
    tile = _pick_row_tile(R)
    Rp = -(-R // tile) * tile
    kv, planes = pl.pallas_call(
        partial(_bn_idwt_ln_kv_kernel, C4=C4),
        out_shape=(jax.ShapeDtypeStruct((Rp, C2), jnp.float32),
                   jax.ShapeDtypeStruct((Rp, C), jnp.float32)),
        grid_spec=pltpu.PrefetchScalarGridSpec(
            num_scalar_prefetch=0,
            grid=(Rp // tile,),
            in_specs=[pl.BlockSpec((tile, C), lambda i: (i, 0)),
                      pl.BlockSpec((1, C), lambda i: (0, 0)),
                      pl.BlockSpec((1, C), lambda i: (0, 0)),
                      pl.BlockSpec((1, C), lambda i: (0, 0)),
                      pl.BlockSpec((1, C), lambda i: (0, 0)),
                      pl.BlockSpec((C, C2), lambda i: (0, 0)),
                      pl.BlockSpec((1, C2), lambda i: (0, 0))],
            out_specs=(pl.BlockSpec((tile, C2), lambda i: (i, 0)),
                       pl.BlockSpec((tile, C), lambda i: (i, 0)))),
        compiler_params=_compiler_params(),
    )(_pad_rows(y, Rp), bscale, bshift, g.reshape(1, C), b.reshape(1, C),
      w, bias.reshape(1, C2))
    return kv[:R], planes[:R]


# --------------------------------------------------------------------------
# filter pass 2 (unfused, sr_ratio > 1): BN + ReLU + IDWT epilogue.
# --------------------------------------------------------------------------
def _bn_relu_idwt_kernel(y_ref, scale_ref, shift_ref, xf_ref, planes_ref, *, C4):
    z = jnp.maximum(y_ref[...] * scale_ref[...] + shift_ref[...], 0.0)
    xf_ref[...] = z
    ll = z[:, 0 * C4:1 * C4]
    lh = z[:, 1 * C4:2 * C4]
    hl = z[:, 2 * C4:3 * C4]
    hh = z[:, 3 * C4:4 * C4]
    y00 = 0.5 * (ll + lh + hl + hh)
    y01 = 0.5 * (ll + lh - hl - hh)
    y10 = 0.5 * (ll - lh + hl - hh)
    y11 = 0.5 * (ll - lh - hl + hh)
    planes_ref[...] = jnp.concatenate([y00, y01, y10, y11], axis=-1)


def bn_relu_idwt(y, scale, shift):
    R, C = y.shape
    C4 = C // 4
    tile = _pick_row_tile(R)
    Rp = -(-R // tile) * tile
    xf, planes = pl.pallas_call(
        partial(_bn_relu_idwt_kernel, C4=C4),
        out_shape=(jax.ShapeDtypeStruct((Rp, C), jnp.float32),
                   jax.ShapeDtypeStruct((Rp, C), jnp.float32)),
        grid_spec=pltpu.PrefetchScalarGridSpec(
            num_scalar_prefetch=0,
            grid=(Rp // tile,),
            in_specs=[pl.BlockSpec((tile, C), lambda i: (i, 0)),
                      pl.BlockSpec((1, C), lambda i: (0, 0)),
                      pl.BlockSpec((1, C), lambda i: (0, 0))],
            out_specs=(pl.BlockSpec((tile, C), lambda i: (i, 0)),
                       pl.BlockSpec((tile, C), lambda i: (i, 0)))),
        compiler_params=_compiler_params(),
    )(_pad_rows(y, Rp), scale, shift)
    return xf[:R], planes[:R]


# --------------------------------------------------------------------------
# kernel: LayerNorm + Linear (the `kv` projection), row tiled (sr_ratio > 1)
# --------------------------------------------------------------------------
def _ln_dense_kernel(x_ref, g_ref, b_ref, w_ref, bias_ref, o_ref):
    x = x_ref[...]
    mu = jnp.mean(x, axis=-1, keepdims=True)
    var = jnp.mean((x - mu) * (x - mu), axis=-1, keepdims=True)
    xn = (x - mu) * lax.rsqrt(var + _EPS)
    xn = xn * g_ref[...] + b_ref[...]
    o_ref[...] = (jnp.dot(xn, w_ref[...],
                          preferred_element_type=jnp.float32) + bias_ref[...])


def ln_dense(x, gamma, beta, w, bias):
    R, Cin = x.shape
    Cout = w.shape[1]
    tile = _pick_row_tile(R)
    Rp = -(-R // tile) * tile
    out = pl.pallas_call(
        _ln_dense_kernel,
        out_shape=jax.ShapeDtypeStruct((Rp, Cout), jnp.float32),
        grid_spec=pltpu.PrefetchScalarGridSpec(
            num_scalar_prefetch=0,
            grid=(Rp // tile,),
            in_specs=[pl.BlockSpec((tile, Cin), lambda i: (i, 0)),
                      pl.BlockSpec((1, Cin), lambda i: (0, 0)),
                      pl.BlockSpec((1, Cin), lambda i: (0, 0)),
                      pl.BlockSpec((Cin, Cout), lambda i: (0, 0)),
                      pl.BlockSpec((1, Cout), lambda i: (0, 0))],
            out_specs=pl.BlockSpec((tile, Cout), lambda i: (i, 0))),
        compiler_params=_compiler_params(),
    )(_pad_rows(x, Rp), gamma.reshape(1, Cin), beta.reshape(1, Cin),
      w, bias.reshape(1, Cout))
    return out[:R]


# --------------------------------------------------------------------------
# fused kernel: q projection + multi-head attention + softmax + final proj
#   over [attn_out | x_idwt], one batch image per grid step, all heads fused.
#   q / kv keep the head-major column layout of the linear layers; the
#   attention output and the concat never leave VMEM (per-head accumulation
#   into the proj result).  Output is one lane-dense (N, C) block per batch.
# --------------------------------------------------------------------------
def _qattn_proj_kernel(x_ref, kv_ref, idwt_ref, qw_ref, qb_ref,
                       w1_ref, w2_ref, b_ref, o_ref, *,
                       num_heads, head_dim, scale):
    C = num_heads * head_dim
    q = (jnp.dot(x_ref[0], qw_ref[...],
                 preferred_element_type=jnp.float32) + qb_ref[...])   # (N, C)
    kv = kv_ref[0]                                                    # (M, 2C)
    acc = (jnp.dot(idwt_ref[0], w2_ref[...],
                   preferred_element_type=jnp.float32) + b_ref[...])  # (N, C)
    for h in range(num_heads):                 # static unrolled head loop
        qh = q[:, h * head_dim:(h + 1) * head_dim]
        kh = kv[:, h * head_dim:(h + 1) * head_dim]
        vh = kv[:, C + h * head_dim:C + (h + 1) * head_dim]
        s = lax.dot_general(qh, kh, (((1,), (1,)), ((), ())),
                            preferred_element_type=jnp.float32) * scale
        m = jnp.max(s, axis=-1, keepdims=True)
        p = jnp.exp(s - m)
        inv = pl.reciprocal(jnp.sum(p, axis=-1, keepdims=True), approx=True)
        oh = jnp.dot(p, vh, preferred_element_type=jnp.float32) * inv
        acc = acc + jnp.dot(oh, w1_ref[h * head_dim:(h + 1) * head_dim, :],
                            preferred_element_type=jnp.float32)
    o_ref[0] = acc


def qattn_proj(x_tok, kv, idwt, q_w, q_b, w1, w2, b, *, num_heads, scale):
    B, N, C = x_tok.shape
    M = kv.shape[1]
    C4 = idwt.shape[2]
    hd = C // num_heads
    return pl.pallas_call(
        partial(_qattn_proj_kernel, num_heads=num_heads, head_dim=hd,
                scale=scale),
        out_shape=jax.ShapeDtypeStruct((B, N, C), jnp.float32),
        grid_spec=pltpu.PrefetchScalarGridSpec(
            num_scalar_prefetch=0,
            grid=(B,),
            in_specs=[pl.BlockSpec((1, N, C), lambda i: (i, 0, 0)),
                      pl.BlockSpec((1, M, 2 * C), lambda i: (i, 0, 0)),
                      pl.BlockSpec((1, N, C4), lambda i: (i, 0, 0)),
                      pl.BlockSpec((C, C), lambda i: (0, 0)),
                      pl.BlockSpec((1, C), lambda i: (0, 0)),
                      pl.BlockSpec((C, C), lambda i: (0, 0)),
                      pl.BlockSpec((C4, C), lambda i: (0, 0)),
                      pl.BlockSpec((1, C), lambda i: (0, 0))],
            out_specs=pl.BlockSpec((1, N, C), lambda i: (i, 0, 0))),
        compiler_params=_compiler_params(),
    )(x_tok, kv, idwt, q_w, q_b.reshape(1, C), w1, w2, b.reshape(1, C))


# --------------------------------------------------------------------------
# full WaveAttention forward
# --------------------------------------------------------------------------
def wave_attention_forward(x, p, *, num_heads, sr_ratio):
    B, C, H, W = x.shape
    C4 = C // 4
    hd = C // num_heads
    N = H * W
    H2, W2 = H // 2, W // 2
    R2 = B * H2 * W2
    scale = hd ** (-0.5)

    # NCHW -> NHWC once at the module boundary (layout glue, plain XLA)
    x_nhwc = jnp.transpose(x, (0, 2, 3, 1))                  # (B, H, W, C)
    x_tok = x_nhwc.reshape(B, N, C)

    # ---- reduce (1x1 conv) + BN + ReLU + DWT (fused two-pass)
    # plane-interleaved layout: each row (b,h2,w2) holds its 2x2 pixel block
    xq = (x_nhwc.reshape(B, H2, 2, W2, 2, C)
          .transpose(0, 1, 3, 2, 4, 5)
          .reshape(R2, 4 * C))
    y_r, stats_r = reduce_pass1(xq, p['reduce_w'], p['reduce_b'])
    scale_r, shift_r = _bn_affine(stats_r, 4.0 * R2,
                                  p['reduce_bn_g'], p['reduce_bn_b'])
    x_dwt = bn_relu_dwt(y_r, scale_r, shift_r)               # (R2, C)=[LL|LH|HL|HH]

    # ---- filter (3x3 conv) + BN (two-pass); pass 2 fused with IDWT (+LN+kv)
    x_dwt_img = x_dwt.reshape(B, H2, W2, C)
    w9 = p['filter_w'].reshape(9, C, C)
    y_f, stats_f = filter_conv(x_dwt_img, w9, p['filter_b'])
    scale_f, shift_f = _bn_affine(stats_f, float(R2),
                                  p['filter_bn_g'], p['filter_bn_b'])

    if sr_ratio == 1:
        # fused BN+ReLU+IDWT+LayerNorm+kv: x_filt never touches HBM
        kv_rows, idwt_planes = bn_idwt_ln_kv(
            y_f, scale_f, shift_f, p['ln_g'], p['ln_b'], p['kv_w'], p['kv_b'])
        M = H2 * W2
    else:
        x_filt, idwt_planes = bn_relu_idwt(y_f, scale_f, shift_f)   # each (R2, C)
        sr = sr_ratio
        Hs, Ws = H2 // sr, W2 // sr
        patches = (x_filt.reshape(B, Hs, sr, Ws, sr, C)
                   .transpose(0, 1, 3, 2, 4, 5)
                   .reshape(B * Hs * Ws, sr * sr * C))
        we = p['kv_embed_w'].reshape(sr * sr * C, C)
        kv_in = dense(patches, we, p['kv_embed_b'])
        M = Hs * Ws
        kv_rows = ln_dense(kv_in, p['ln_g'], p['ln_b'], p['kv_w'], p['kv_b'])
    kv = kv_rows.reshape(B, M, 2 * C)

    # reassemble the IDWT pixel planes to token order (small, C4 channels)
    x_idwt = (idwt_planes.reshape(B, H2, W2, 2, 2, C4)
              .transpose(0, 1, 3, 2, 4, 5)
              .reshape(B, N, C4))

    # ---- q projection + attention + proj over [attn | x_idwt], one kernel
    out = qattn_proj(x_tok, kv, x_idwt, p['q_w'], p['q_b'],
                     p['proj_w'][:C, :], p['proj_w'][C:, :], p['proj_b'],
                     num_heads=num_heads, scale=scale)        # (B, N, C)
    return jnp.transpose(out, (0, 2, 1)).reshape(B, C, H, W)


# --------------------------------------------------------------------------
# deterministic synthetic parameters (shapes follow WaveAttention.__init__)
# --------------------------------------------------------------------------
def init_params(key, dim, num_heads, sr_ratio):
    C, C4 = dim, dim // 4
    ks = jax.random.split(key, 8)
    f32 = jnp.float32
    p = {
        'q_w': 0.02 * jax.random.normal(ks[0], (C, C), f32),
        'q_b': jnp.zeros((C,), f32),
        'reduce_w': math.sqrt(2.0 / C4) * jax.random.normal(ks[1], (C, C4), f32),
        'reduce_b': jnp.zeros((C4,), f32),
        'reduce_bn_g': jnp.ones((C4,), f32),
        'reduce_bn_b': jnp.zeros((C4,), f32),
        'filter_w': math.sqrt(2.0 / (9 * C)) * jax.random.normal(ks[2], (3, 3, C, C), f32),
        'filter_b': jnp.zeros((C,), f32),
        'filter_bn_g': jnp.ones((C,), f32),
        'filter_bn_b': jnp.zeros((C,), f32),
        'ln_g': jnp.ones((C,), f32),
        'ln_b': jnp.zeros((C,), f32),
        'kv_w': 0.02 * jax.random.normal(ks[3], (C, 2 * C), f32),
        'kv_b': jnp.zeros((2 * C,), f32),
        'proj_w': 0.02 * jax.random.normal(ks[4], (C + C4, C), f32),
        'proj_b': jnp.zeros((C,), f32),
    }
    if sr_ratio > 1:
        p['kv_embed_w'] = (math.sqrt(2.0 / (sr_ratio * sr_ratio * C)) *
                           jax.random.normal(ks[5], (sr_ratio, sr_ratio, C, C), f32))
        p['kv_embed_b'] = jnp.zeros((C,), f32)
    return p


if __name__ == "__main__":
    B, dim, H, W = 2, 32, 16, 16
    num_heads, sr_ratio = 4, 1

    key = jax.random.PRNGKey(0)
    kx, kp = jax.random.split(key)
    x = jax.random.normal(kx, (B, dim, H, W), jnp.float32)
    params = init_params(kp, dim, num_heads, sr_ratio)

    fwd = jax.jit(partial(wave_attention_forward,
                          num_heads=num_heads, sr_ratio=sr_ratio))
    out = fwd(x, params)
    jax.block_until_ready(out)
    assert out.shape == (B, dim, H, W)
    assert bool(jnp.all(jnp.isfinite(out)))
    print("KERNEL_OK")
</pallas_src>

<mosaic_0001>
module attributes {stable_mosaic.version = 11 : i64} {
  func.func @_reduce_pass1_kernel(%arg0: i32, %arg1: memref<64x128xf32, #tpu.memory_space<vmem>>, %arg2: memref<32x8xf32, #tpu.memory_space<vmem>>, %arg3: memref<1x8xf32, #tpu.memory_space<vmem>>, %arg4: memref<64x32xf32, #tpu.memory_space<vmem>>, %arg5: memref<1x2x8xf32, #tpu.memory_space<vmem>>) attributes {dimension_semantics = [#tpu.dimension_semantics<parallel>], iteration_bounds = array<i64: 2>, scalar_prefetch = 0 : i64, scratch_operands = 0 : i64, tpu.core_type = #tpu.core_type<tc>, window_params = [{transform_indices = @transform_0, window_bounds = array<i64: 64, 128>}, {pipeline_mode = #tpu.pipeline_mode<synchronous>, transform_indices = @transform_1, window_bounds = array<i64: 32, 8>}, {pipeline_mode = #tpu.pipeline_mode<synchronous>, transform_indices = @transform_2, window_bounds = array<i64: 1, 8>}, {transform_indices = @transform_3, window_bounds = array<i64: 64, 32>}, {transform_indices = @transform_4, window_bounds = array<i64: 1, 2, 8>}]} {
    %c0 = arith.constant 0 : index
    %c0_0 = arith.constant 0 : index
    %0 = vector.load %arg1[%c0, %c0_0] : memref<64x128xf32, #tpu.memory_space<vmem>>, vector<64x128xf32>
    %c0_1 = arith.constant 0 : index
    %c0_2 = arith.constant 0 : index
    %1 = vector.load %arg2[%c0_1, %c0_2] : memref<32x8xf32, #tpu.memory_space<vmem>>, vector<32x8xf32>
    %c0_3 = arith.constant 0 : index
    %c0_4 = arith.constant 0 : index
    %2 = vector.load %arg3[%c0_3, %c0_4] : memref<1x8xf32, #tpu.memory_space<vmem>>, vector<1x8xf32>
    %3 = vector.extract_strided_slice %0 {offsets = [0, 0], sizes = [64, 32], strides = [1, 1]} : vector<64x128xf32> to vector<64x32xf32>
    %cst = arith.constant dense<0.000000e+00> : vector<64x8xf32>
    %4 = tpu.matmul %3, %1, %cst {dimension_numbers = #tpu.dot_dimension_numbers<[1], [0], [0], [1], [0, 0, 1, 1], [], []>} : vector<64x32xf32>, vector<32x8xf32>, vector<64x8xf32> -> vector<64x8xf32>
    %5 = vector.broadcast %2 : vector<1x8xf32> to vector<64x8xf32>
    %6 = arith.addf %4, %5 : vector<64x8xf32>
    %7 = vector.extract_strided_slice %0 {offsets = [0, 32], sizes = [64, 32], strides = [1, 1]} : vector<64x128xf32> to vector<64x32xf32>
    %cst_5 = arith.constant dense<0.000000e+00> : vector<64x8xf32>
    %8 = tpu.matmul %7, %1, %cst_5 {dimension_numbers = #tpu.dot_dimension_numbers<[1], [0], [0], [1], [0, 0, 1, 1], [], []>} : vector<64x32xf32>, vector<32x8xf32>, vector<64x8xf32> -> vector<64x8xf32>
    %9 = vector.broadcast %2 : vector<1x8xf32> to vector<64x8xf32>
    %10 = arith.addf %8, %9 : vector<64x8xf32>
    %11 = vector.extract_strided_slice %0 {offsets = [0, 64], sizes = [64, 32], strides = [1, 1]} : vector<64x128xf32> to vector<64x32xf32>
    %cst_6 = arith.constant dense<0.000000e+00> : vector<64x8xf32>
    %12 = tpu.matmul %11, %1, %cst_6 {dimension_numbers = #tpu.dot_dimension_numbers<[1], [0], [0], [1], [0, 0, 1, 1], [], []>} : vector<64x32xf32>, vector<32x8xf32>, vector<64x8xf32> -> vector<64x8xf32>
    %13 = vector.broadcast %2 : vector<1x8xf32> to vector<64x8xf32>
    %14 = arith.addf %12, %13 : vector<64x8xf32>
    %15 = vector.extract_strided_slice %0 {offsets = [0, 96], sizes = [64, 32], strides = [1, 1]} : vector<64x128xf32> to vector<64x32xf32>
    %cst_7 = arith.constant dense<0.000000e+00> : vector<64x8xf32>
    %16 = tpu.matmul %15, %1, %cst_7 {dimension_numbers = #tpu.dot_dimension_numbers<[1], [0], [0], [1], [0, 0, 1, 1], [], []>} : vector<64x32xf32>, vector<32x8xf32>, vector<64x8xf32> -> vector<64x8xf32>
    %17 = vector.broadcast %2 : vector<1x8xf32> to vector<64x8xf32>
    %18 = arith.addf %16, %17 : vector<64x8xf32>
    %19 = tpu.concatenate %6, %10, %14, %18 in 1 : vector<64x8xf32>, vector<64x8xf32>, vector<64x8xf32>, vector<64x8xf32> -> vector<64x32xf32>
    %c0_8 = arith.constant 0 : index
    %c0_9 = arith.constant 0 : index
    %20 = vector.load %arg4[%c0_8, %c0_9] : memref<64x32xf32, #tpu.memory_space<vmem>>, vector<64x32xf32>
    tpu.vector_store %arg4[%c0_8, %c0_9], %19 {strides = array<i32>} : memref<64x32xf32, #tpu.memory_space<vmem>>, vector<64x32xf32>,
    %c64_i32 = arith.constant 64 : i32
    %21 = arith.muli %arg0, %c64_i32 : i32
    %22 = tpu.iota {dimensions = array<i32: 0>} : vector<64x8xi32>
    %23 = vector.broadcast %21 : i32 to vector<64x8xi32>
    %24 = arith.addi %22, %23 : vector<64x8xi32>
    %c128_i32 = arith.constant 128 : i32
    %25 = vector.broadcast %c128_i32 : i32 to vector<64x8xi32>
    %26 = arith.cmpi slt, %24, %25 : vector<64x8xi32>
    %27 = arith.extui %26 : vector<64x8xi1> to vector<64x8xi32>
    %28 = arith.sitofp %27 : vector<64x8xi32> to vector<64x8xf32>
    %29 = arith.mulf %6, %28 : vector<64x8xf32>
    %30 = arith.mulf %10, %28 : vector<64x8xf32>
    %31 = arith.mulf %14, %28 : vector<64x8xf32>
    %32 = arith.mulf %18, %28 : vector<64x8xf32>
    %33 = arith.addf %29, %30 : vector<64x8xf32>
    %34 = arith.addf %33, %31 : vector<64x8xf32>
    %35 = arith.addf %34, %32 : vector<64x8xf32>
    %cst_10 = arith.constant dense<0.000000e+00> : vector<8xf32>
    %36 = vector.multi_reduction <add>, %35, %cst_10 [0] : vector<64x8xf32> to vector<8xf32>
    %37 = vector.shape_cast %36 : vector<8xf32> to vector<1x8xf32>
    %38 = arith.mulf %29, %6 : vector<64x8xf32>
    %39 = arith.mulf %30, %10 : vector<64x8xf32>
    %40 = arith.addf %38, %39 : vector<64x8xf32>
    %41 = arith.mulf %31, %14 : vector<64x8xf32>
    %42 = arith.addf %40, %41 : vector<64x8xf32>
    %43 = arith.mulf %32, %18 : vector<64x8xf32>
    %44 = arith.addf %42, %43 : vector<64x8xf32>
    %cst_11 = arith.constant dense<0.000000e+00> : vector<8xf32>
    %45 = vector.multi_reduction <add>, %44, %cst_11 [0] : vector<64x8xf32> to vector<8xf32>
    %46 = vector.shape_cast %45 : vector<8xf32> to vector<1x8xf32>
    %c0_12 = arith.constant 0 : index
    %c0_13 = arith.constant 0 : index
    %c0_14 = arith.constant 0 : index
    %47 = vector.load %arg5[%c0_12, %c0_13, %c0_14] : memref<1x2x8xf32, #tpu.memory_space<vmem>>, vector<1x1x8xf32>
    %48 = vector.shape_cast %47 : vector<1x1x8xf32> to vector<1x8xf32>
    %49 = vector.shape_cast %37 : vector<1x8xf32> to vector<1x1x8xf32>
    tpu.vector_store %arg5[%c0_12, %c0_13, %c0_14], %49 {strides = array<i32>} : memref<1x2x8xf32, #tpu.memory_space<vmem>>, vector<1x1x8xf32>,
    %c0_15 = arith.constant 0 : index
    %c1 = arith.constant 1 : index
    %c0_16 = arith.constant 0 : index
    %50 = vector.load %arg5[%c0_15, %c1, %c0_16] : memref<1x2x8xf32, #tpu.memory_space<vmem>>, vector<1x1x8xf32>
    %51 = vector.shape_cast %50 : vector<1x1x8xf32> to vector<1x8xf32>
    %52 = vector.shape_cast %46 : vector<1x8xf32> to vector<1x1x8xf32>
    tpu.vector_store %arg5[%c0_15, %c1, %c0_16], %52 {strides = array<i32>} : memref<1x2x8xf32, #tpu.memory_space<vmem>>, vector<1x1x8xf32>,
    return
  }
  func.func @transform_0(%arg0: i32) -> (i32, i32) {
    %c0_i32 = arith.constant 0 : i32
    %c0_i32_0 = arith.constant 0 : i32
    return %arg0, %c0_i32 : i32, i32
  }
  func.func @transform_1(%arg0: i32) -> (i32, i32) {
    %c0_i32 = arith.constant 0 : i32
    %c0_i32_0 = arith.constant 0 : i32
    %c0_i32_1 = arith.constant 0 : i32
    return %c0_i32, %c0_i32_0 : i32, i32
  }
  func.func @transform_2(%arg0: i32) -> (i32, i32) {
    %c0_i32 = arith.constant 0 : i32
    %c0_i32_0 = arith.constant 0 : i32
    %c0_i32_1 = arith.constant 0 : i32
    return %c0_i32, %c0_i32_0 : i32, i32
  }
  func.func @transform_3(%arg0: i32) -> (i32, i32) {
    %c0_i32 = arith.constant 0 : i32
    %c0_i32_0 = arith.constant 0 : i32
    return %arg0, %c0_i32 : i32, i32
  }
  func.func @transform_4(%arg0: i32) -> (i32, i32, i32) {
    %c0_i32 = arith.constant 0 : i32
    %c0_i32_0 = arith.constant 0 : i32
    %c0_i32_1 = arith.constant 0 : i32
    return %arg0, %c0_i32, %c0_i32_0 : i32, i32, i32
  }
}

module attributes {stable_mosaic.version = 11 : i64} {
  func.func @_bn_relu_dwt_kernel(%arg0: i32, %arg1: memref<64x32xf32, #tpu.memory_space<vmem>>, %arg2: memref<1x8xf32, #tpu.memory_space<vmem>>, %arg3: memref<1x8xf32, #tpu.memory_space<vmem>>, %arg4: memref<64x32xf32, #tpu.memory_space<vmem>>) attributes {dimension_semantics = [#tpu.dimension_semantics<parallel>], iteration_bounds = array<i64: 2>, scalar_prefetch = 0 : i64, scratch_operands = 0 : i64, tpu.core_type = #tpu.core_type<tc>, window_params = [{transform_indices = @transform_0, window_bounds = array<i64: 64, 32>}, {pipeline_mode = #tpu.pipeline_mode<synchronous>, transform_indices = @transform_1, window_bounds = array<i64: 1, 8>}, {pipeline_mode = #tpu.pipeline_mode<synchronous>, transform_indices = @transform_2, window_bounds = array<i64: 1, 8>}, {transform_indices = @transform_3, window_bounds = array<i64: 64, 32>}]} {
    %c0 = arith.constant 0 : index
    %c0_0 = arith.constant 0 : index
    %0 = vector.load %arg1[%c0, %c0_0] : memref<64x32xf32, #tpu.memory_space<vmem>>, vector<64x32xf32>
    %c0_1 = arith.constant 0 : index
    %c0_2 = arith.constant 0 : index
    %1 = vector.load %arg2[%c0_1, %c0_2] : memref<1x8xf32, #tpu.memory_space<vmem>>, vector<1x8xf32>
    %c0_3 = arith.constant 0 : index
    %c0_4 = arith.constant 0 : index
    %2 = vector.load %arg3[%c0_3, %c0_4] : memref<1x8xf32, #tpu.memory_space<vmem>>, vector<1x8xf32>
    %3 = vector.extract_strided_slice %0 {offsets = [0, 0], sizes = [64, 8], strides = [1, 1]} : vector<64x32xf32> to vector<64x8xf32>
    %4 = vector.broadcast %1 : vector<1x8xf32> to vector<64x8xf32>
    %5 = arith.mulf %3, %4 : vector<64x8xf32>
    %6 = vector.broadcast %2 : vector<1x8xf32> to vector<64x8xf32>
    %7 = arith.addf %5, %6 : vector<64x8xf32>
    %cst = arith.constant 0.000000e+00 : f32
    %8 = vector.broadcast %cst : f32 to vector<64x8xf32>
    %9 = arith.maximumf %7, %8 : vector<64x8xf32>
    %10 = vector.extract_strided_slice %0 {offsets = [0, 8], sizes = [64, 8], strides = [1, 1]} : vector<64x32xf32> to vector<64x8xf32>
    %11 = vector.broadcast %1 : vector<1x8xf32> to vector<64x8xf32>
    %12 = arith.mulf %10, %11 : vector<64x8xf32>
    %13 = vector.broadcast %2 : vector<1x8xf32> to vector<64x8xf32>
    %14 = arith.addf %12, %13 : vector<64x8xf32>
    %cst_5 = arith.constant 0.000000e+00 : f32
    %15 = vector.broadcast %cst_5 : f32 to vector<64x8xf32>
    %16 = arith.maximumf %14, %15 : vector<64x8xf32>
    %17 = vector.extract_strided_slice %0 {offsets = [0, 16], sizes = [64, 8], strides = [1, 1]} : vector<64x32xf32> to vector<64x8xf32>
    %18 = vector.broadcast %1 : vector<1x8xf32> to vector<64x8xf32>
    %19 = arith.mulf %17, %18 : vector<64x8xf32>
    %20 = vector.broadcast %2 : vector<1x8xf32> to vector<64x8xf32>
    %21 = arith.addf %19, %20 : vector<64x8xf32>
    %cst_6 = arith.constant 0.000000e+00 : f32
    %22 = vector.broadcast %cst_6 : f32 to vector<64x8xf32>
    %23 = arith.maximumf %21, %22 : vector<64x8xf32>
    %24 = vector.extract_strided_slice %0 {offsets = [0, 24], sizes = [64, 8], strides = [1, 1]} : vector<64x32xf32> to vector<64x8xf32>
    %25 = vector.broadcast %1 : vector<1x8xf32> to vector<64x8xf32>
    %26 = arith.mulf %24, %25 : vector<64x8xf32>
    %27 = vector.broadcast %2 : vector<1x8xf32> to vector<64x8xf32>
    %28 = arith.addf %26, %27 : vector<64x8xf32>
    %cst_7 = arith.constant 0.000000e+00 : f32
    %29 = vector.broadcast %cst_7 : f32 to vector<64x8xf32>
    %30 = arith.maximumf %28, %29 : vector<64x8xf32>
    %31 = arith.addf %9, %16 : vector<64x8xf32>
    %32 = arith.addf %31, %23 : vector<64x8xf32>
    %33 = arith.addf %32, %30 : vector<64x8xf32>
    %cst_8 = arith.constant 5.000000e-01 : f32
    %34 = vector.broadcast %cst_8 : f32 to vector<64x8xf32>
    %35 = arith.mulf %34, %33 : vector<64x8xf32>
    %36 = arith.addf %9, %16 : vector<64x8xf32>
    %37 = arith.subf %36, %23 : vector<64x8xf32>
    %38 = arith.subf %37, %30 : vector<64x8xf32>
    %cst_9 = arith.constant 5.000000e-01 : f32
    %39 = vector.broadcast %cst_9 : f32 to vector<64x8xf32>
    %40 = arith.mulf %39, %38 : vector<64x8xf32>
    %41 = arith.subf %9, %16 : vector<64x8xf32>
    %42 = arith.addf %41, %23 : vector<64x8xf32>
    %43 = arith.subf %42, %30 : vector<64x8xf32>
    %cst_10 = arith.constant 5.000000e-01 : f32
    %44 = vector.broadcast %cst_10 : f32 to vector<64x8xf32>
    %45 = arith.mulf %44, %43 : vector<64x8xf32>
    %46 = arith.subf %9, %16 : vector<64x8xf32>
    %47 = arith.subf %46, %23 : vector<64x8xf32>
    %48 = arith.addf %47, %30 : vector<64x8xf32>
    %cst_11 = arith.constant 5.000000e-01 : f32
    %49 = vector.broadcast %cst_11 : f32 to vector<64x8xf32>
    %50 = arith.mulf %49, %48 : vector<64x8xf32>
    %51 = tpu.concatenate %35, %40, %45, %50 in 1 : vector<64x8xf32>, vector<64x8xf32>, vector<64x8xf32>, vector<64x8xf32> -> vector<64x32xf32>
    %c0_12 = arith.constant 0 : index
    %c0_13 = arith.constant 0 : index
    %52 = vector.load %arg4[%c0_12, %c0_13] : memref<64x32xf32, #tpu.memory_space<vmem>>, vector<64x32xf32>
    tpu.vector_store %arg4[%c0_12, %c0_13], %51 {strides = array<i32>} : memref<64x32xf32, #tpu.memory_space<vmem>>, vector<64x32xf32>,
    return
  }
  func.func @transform_0(%arg0: i32) -> (i32, i32) {
    %c0_i32 = arith.constant 0 : i32
    %c0_i32_0 = arith.constant 0 : i32
    return %arg0, %c0_i32 : i32, i32
  }
  func.func @transform_1(%arg0: i32) -> (i32, i32) {
    %c0_i32 = arith.constant 0 : i32
    %c0_i32_0 = arith.constant 0 : i32
    %c0_i32_1 = arith.constant 0 : i32
    return %c0_i32, %c0_i32_0 : i32, i32
  }
  func.func @transform_2(%arg0: i32) -> (i32, i32) {
    %c0_i32 = arith.constant 0 : i32
    %c0_i32_0 = arith.constant 0 : i32
    %c0_i32_1 = arith.constant 0 : i32
    return %c0_i32, %c0_i32_0 : i32, i32
  }
  func.func @transform_3(%arg0: i32) -> (i32, i32) {
    %c0_i32 = arith.constant 0 : i32
    %c0_i32_0 = arith.constant 0 : i32
    return %arg0, %c0_i32 : i32, i32
  }
}

module attributes {stable_mosaic.version = 11 : i64} {
  func.func @_filter_conv_kernel(%arg0: i32, %arg1: memref<1x100x32xf32, #tpu.memory_space<vmem>>, %arg2: memref<9x32x32xf32, #tpu.memory_space<vmem>>, %arg3: memref<1x32xf32, #tpu.memory_space<vmem>>, %arg4: memref<78x1xf32, #tpu.memory_space<vmem>>, %arg5: memref<1x78x32xf32, #tpu.memory_space<vmem>>, %arg6: memref<1x2x32xf32, #tpu.memory_space<vmem>>) attributes {dimension_semantics = [#tpu.dimension_semantics<parallel>], iteration_bounds = array<i64: 2>, scalar_prefetch = 0 : i64, scratch_operands = 0 : i64, tpu.core_type = #tpu.core_type<tc>, window_params = [{transform_indices = @transform_0, window_bounds = array<i64: 1, 100, 32>}, {pipeline_mode = #tpu.pipeline_mode<synchronous>, transform_indices = @transform_1, window_bounds = array<i64: 9, 32, 32>}, {pipeline_mode = #tpu.pipeline_mode<synchronous>, transform_indices = @transform_2, window_bounds = array<i64: 1, 32>}, {pipeline_mode = #tpu.pipeline_mode<synchronous>, transform_indices = @transform_3, window_bounds = array<i64: 78, 1>}, {transform_indices = @transform_4, window_bounds = array<i64: 1, 78, 32>}, {transform_indices = @transform_5, window_bounds = array<i64: 1, 2, 32>}]} {
    %c0 = arith.constant 0 : index
    %c0_0 = arith.constant 0 : index
    %c0_1 = arith.constant 0 : index
    %0 = vector.load %arg1[%c0, %c0_0, %c0_1] : memref<1x100x32xf32, #tpu.memory_space<vmem>>, vector<1x100x32xf32>
    %1 = vector.shape_cast %0 : vector<1x100x32xf32> to vector<100x32xf32>
    %2 = vector.extract_strided_slice %1 {offsets = [0, 0], sizes = [78, 32], strides = [1, 1]} : vector<100x32xf32> to vector<78x32xf32>
    %c0_2 = arith.constant 0 : index
    %c0_3 = arith.constant 0 : index
    %c0_4 = arith.constant 0 : index
    %3 = vector.load %arg2[%c0_2, %c0_3, %c0_4] : memref<9x32x32xf32, #tpu.memory_space<vmem>>, vector<1x32x32xf32>
    %4 = vector.shape_cast %3 : vector<1x32x32xf32> to vector<32x32xf32>
    %cst = arith.constant dense<0.000000e+00> : vector<78x32xf32>
    %5 = tpu.matmul %2, %4, %cst {dimension_numbers = #tpu.dot_dimension_numbers<[1], [0], [0], [1], [0, 0, 1, 1], [], []>} : vector<78x32xf32>, vector<32x32xf32>, vector<78x32xf32> -> vector<78x32xf32>
    %6 = vector.extract_strided_slice %1 {offsets = [1, 0], sizes = [78, 32], strides = [1, 1]} : vector<100x32xf32> to vector<78x32xf32>
    %c1 = arith.constant 1 : index
    %c0_5 = arith.constant 0 : index
    %c0_6 = arith.constant 0 : index
    %7 = vector.load %arg2[%c1, %c0_5, %c0_6] : memref<9x32x32xf32, #tpu.memory_space<vmem>>, vector<1x32x32xf32>
    %8 = vector.shape_cast %7 : vector<1x32x32xf32> to vector<32x32xf32>
    %cst_7 = arith.constant dense<0.000000e+00> : vector<78x32xf32>
    %9 = tpu.matmul %6, %8, %cst_7 {dimension_numbers = #tpu.dot_dimension_numbers<[1], [0], [0], [1], [0, 0, 1, 1], [], []>} : vector<78x32xf32>, vector<32x32xf32>, vector<78x32xf32> -> vector<78x32xf32>
    %10 = arith.addf %5, %9 : vector<78x32xf32>
    %11 = vector.extract_strided_slice %1 {offsets = [2, 0], sizes = [78, 32], strides = [1, 1]} : vector<100x32xf32> to vector<78x32xf32>
    %c2 = arith.constant 2 : index
    %c0_8 = arith.constant 0 : index
    %c0_9 = arith.constant 0 : index
    %12 = vector.load %arg2[%c2, %c0_8, %c0_9] : memref<9x32x32xf32, #tpu.memory_space<vmem>>, vector<1x32x32xf32>
    %13 = vector.shape_cast %12 : vector<1x32x32xf32> to vector<32x32xf32>
    %cst_10 = arith.constant dense<0.000000e+00> : vector<78x32xf32>
    %14 = tpu.matmul %11, %13, %cst_10 {dimension_numbers = #tpu.dot_dimension_numbers<[1], [0], [0], [1], [0, 0, 1, 1], [], []>} : vector<78x32xf32>, vector<32x32xf32>, vector<78x32xf32> -> vector<78x32xf32>
    %15 = arith.addf %10, %14 : vector<78x32xf32>
    %16 = vector.extract_strided_slice %1 {offsets = [10, 0], sizes = [78, 32], strides = [1, 1]} : vector<100x32xf32> to vector<78x32xf32>
    %c3 = arith.constant 3 : index
    %c0_11 = arith.constant 0 : index
    %c0_12 = arith.constant 0 : index
    %17 = vector.load %arg2[%c3, %c0_11, %c0_12] : memref<9x32x32xf32, #tpu.memory_space<vmem>>, vector<1x32x32xf32>
    %18 = vector.shape_cast %17 : vector<1x32x32xf32> to vector<32x32xf32>
    %cst_13 = arith.constant dense<0.000000e+00> : vector<78x32xf32>
    %19 = tpu.matmul %16, %18, %cst_13 {dimension_numbers = #tpu.dot_dimension_numbers<[1], [0], [0], [1], [0, 0, 1, 1], [], []>} : vector<78x32xf32>, vector<32x32xf32>, vector<78x32xf32> -> vector<78x32xf32>
    %20 = arith.addf %15, %19 : vector<78x32xf32>
    %21 = vector.extract_strided_slice %1 {offsets = [11, 0], sizes = [78, 32], strides = [1, 1]} : vector<100x32xf32> to vector<78x32xf32>
    %c4 = arith.constant 4 : index
    %c0_14 = arith.constant 0 : index
    %c0_15 = arith.constant 0 : index
    %22 = vector.load %arg2[%c4, %c0_14, %c0_15] : memref<9x32x32xf32, #tpu.memory_space<vmem>>, vector<1x32x32xf32>
    %23 = vector.shape_cast %22 : vector<1x32x32xf32> to vector<32x32xf32>
    %cst_16 = arith.constant dense<0.000000e+00> : vector<78x32xf32>
    %24 = tpu.matmul %21, %23, %cst_16 {dimension_numbers = #tpu.dot_dimension_numbers<[1], [0], [0], [1], [0, 0, 1, 1], [], []>} : vector<78x32xf32>, vector<32x32xf32>, vector<78x32xf32> -> vector<78x32xf32>
    %25 = arith.addf %20, %24 : vector<78x32xf32>
    %26 = vector.extract_strided_slice %1 {offsets = [12, 0], sizes = [78, 32], strides = [1, 1]} : vector<100x32xf32> to vector<78x32xf32>
    %c5 = arith.constant 5 : index
    %c0_17 = arith.constant 0 : index
    %c0_18 = arith.constant 0 : index
    %27 = vector.load %arg2[%c5, %c0_17, %c0_18] : memref<9x32x32xf32, #tpu.memory_space<vmem>>, vector<1x32x32xf32>
    %28 = vector.shape_cast %27 : vector<1x32x32xf32> to vector<32x32xf32>
    %cst_19 = arith.constant dense<0.000000e+00> : vector<78x32xf32>
    %29 = tpu.matmul %26, %28, %cst_19 {dimension_numbers = #tpu.dot_dimension_numbers<[1], [0], [0], [1], [0, 0, 1, 1], [], []>} : vector<78x32xf32>, vector<32x32xf32>, vector<78x32xf32> -> vector<78x32xf32>
    %30 = arith.addf %25, %29 : vector<78x32xf32>
    %31 = vector.extract_strided_slice %1 {offsets = [20, 0], sizes = [78, 32], strides = [1, 1]} : vector<100x32xf32> to vector<78x32xf32>
    %c6 = arith.constant 6 : index
    %c0_20 = arith.constant 0 : index
    %c0_21 = arith.constant 0 : index
    %32 = vector.load %arg2[%c6, %c0_20, %c0_21] : memref<9x32x32xf32, #tpu.memory_space<vmem>>, vector<1x32x32xf32>
    %33 = vector.shape_cast %32 : vector<1x32x32xf32> to vector<32x32xf32>
    %cst_22 = arith.constant dense<0.000000e+00> : vector<78x32xf32>
    %34 = tpu.matmul %31, %33, %cst_22 {dimension_numbers = #tpu.dot_dimension_numbers<[1], [0], [0], [1], [0, 0, 1, 1], [], []>} : vector<78x32xf32>, vector<32x32xf32>, vector<78x32xf32> -> vector<78x32xf32>
    %35 = arith.addf %30, %34 : vector<78x32xf32>
    %36 = vector.extract_strided_slice %1 {offsets = [21, 0], sizes = [78, 32], strides = [1, 1]} : vector<100x32xf32> to vector<78x32xf32>
    %c7 = arith.constant 7 : index
    %c0_23 = arith.constant 0 : index
    %c0_24 = arith.constant 0 : index
    %37 = vector.load %arg2[%c7, %c0_23, %c0_24] : memref<9x32x32xf32, #tpu.memory_space<vmem>>, vector<1x32x32xf32>
    %38 = vector.shape_cast %37 : vector<1x32x32xf32> to vector<32x32xf32>
    %cst_25 = arith.constant dense<0.000000e+00> : vector<78x32xf32>
    %39 = tpu.matmul %36, %38, %cst_25 {dimension_numbers = #tpu.dot_dimension_numbers<[1], [0], [0], [1], [0, 0, 1, 1], [], []>} : vector<78x32xf32>, vector<32x32xf32>, vector<78x32xf32> -> vector<78x32xf32>
    %40 = arith.addf %35, %39 : vector<78x32xf32>
    %41 = vector.extract_strided_slice %1 {offsets = [22, 0], sizes = [78, 32], strides = [1, 1]} : vector<100x32xf32> to vector<78x32xf32>
    %c8 = arith.constant 8 : index
    %c0_26 = arith.constant 0 : index
    %c0_27 = arith.constant 0 : index
    %42 = vector.load %arg2[%c8, %c0_26, %c0_27] : memref<9x32x32xf32, #tpu.memory_space<vmem>>, vector<1x32x32xf32>
    %43 = vector.shape_cast %42 : vector<1x32x32xf32> to vector<32x32xf32>
    %cst_28 = arith.constant dense<0.000000e+00> : vector<78x32xf32>
    %44 = tpu.matmul %41, %43, %cst_28 {dimension_numbers = #tpu.dot_dimension_numbers<[1], [0], [0], [1], [0, 0, 1, 1], [], []>} : vector<78x32xf32>, vector<32x32xf32>, vector<78x32xf32> -> vector<78x32xf32>
    %45 = arith.addf %40, %44 : vector<78x32xf32>
    %c0_29 = arith.constant 0 : index
    %c0_30 = arith.constant 0 : index
    %46 = vector.load %arg3[%c0_29, %c0_30] : memref<1x32xf32, #tpu.memory_space<vmem>>, vector<1x32xf32>
    %47 = vector.broadcast %46 : vector<1x32xf32> to vector<78x32xf32>
    %48 = arith.addf %45, %47 : vector<78x32xf32>
    %c0_31 = arith.constant 0 : index
    %c0_32 = arith.constant 0 : index
    %c0_33 = arith.constant 0 : index
    %49 = vector.load %arg5[%c0_31, %c0_32, %c0_33] : memref<1x78x32xf32, #tpu.memory_space<vmem>>, vector<1x78x32xf32>
    %50 = vector.shape_cast %49 : vector<1x78x32xf32> to vector<78x32xf32>
    %51 = vector.shape_cast %48 : vector<78x32xf32> to vector<1x78x32xf32>
    tpu.vector_store %arg5[%c0_31, %c0_32, %c0_33], %51 {strides = array<i32>} : memref<1x78x32xf32, #tpu.memory_space<vmem>>, vector<1x78x32xf32>,
    %c0_34 = arith.constant 0 : index
    %c0_35 = arith.constant 0 : index
    %52 = vector.load %arg4[%c0_34, %c0_35] : memref<78x1xf32, #tpu.memory_space<vmem>>, vector<78x1xf32>
    %53 = vector.broadcast %52 : vector<78x1xf32> to vector<78x32xf32>
    %54 = arith.mulf %48, %53 : vector<78x32xf32>
    %cst_36 = arith.constant dense<0.000000e+00> : vector<32xf32>
    %55 = vector.multi_reduction <add>, %54, %cst_36 [0] : vector<78x32xf32> to vector<32xf32>
    %56 = vector.shape_cast %55 : vector<32xf32> to vector<1x32xf32>
    %c0_37 = arith.constant 0 : index
    %c0_38 = arith.constant 0 : index
    %c0_39 = arith.constant 0 : index
    %57 = vector.load %arg6[%c0_37, %c0_38, %c0_39] : memref<1x2x32xf32, #tpu.memory_space<vmem>>, vector<1x1x32xf32>
    %58 = vector.shape_cast %57 : vector<1x1x32xf32> to vector<1x32xf32>
    %59 = vector.shape_cast %56 : vector<1x32xf32> to vector<1x1x32xf32>
    tpu.vector_store %arg6[%c0_37, %c0_38, %c0_39], %59 {strides = array<i32>} : memref<1x2x32xf32, #tpu.memory_space<vmem>>, vector<1x1x32xf32>,
    %60 = arith.mulf %54, %48 : vector<78x32xf32>
    %cst_40 = arith.constant dense<0.000000e+00> : vector<32xf32>
    %61 = vector.multi_reduction <add>, %60, %cst_40 [0] : vector<78x32xf32> to vector<32xf32>
    %62 = vector.shape_cast %61 : vector<32xf32> to vector<1x32xf32>
    %c0_41 = arith.constant 0 : index
    %c1_42 = arith.constant 1 : index
    %c0_43 = arith.constant 0 : index
    %63 = vector.load %arg6[%c0_41, %c1_42, %c0_43] : memref<1x2x32xf32, #tpu.memory_space<vmem>>, vector<1x1x32xf32>
    %64 = vector.shape_cast %63 : vector<1x1x32xf32> to vector<1x32xf32>
    %65 = vector.shape_cast %62 : vector<1x32xf32> to vector<1x1x32xf32>
    tpu.vector_store %arg6[%c0_41, %c1_42, %c0_43], %65 {strides = array<i32>} : memref<1x2x32xf32, #tpu.memory_space<vmem>>, vector<1x1x32xf32>,
    return
  }
  func.func @transform_0(%arg0: i32) -> (i32, i32, i32) {
    %c0_i32 = arith.constant 0 : i32
    %c0_i32_0 = arith.constant 0 : i32
    %c0_i32_1 = arith.constant 0 : i32
    return %arg0, %c0_i32, %c0_i32_0 : i32, i32, i32
  }
  func.func @transform_1(%arg0: i32) -> (i32, i32, i32) {
    %c0_i32 = arith.constant 0 : i32
    %c0_i32_0 = arith.constant 0 : i32
    %c0_i32_1 = arith.constant 0 : i32
    %c0_i32_2 = arith.constant 0 : i32
    return %c0_i32, %c0_i32_0, %c0_i32_1 : i32, i32, i32
  }
  func.func @transform_2(%arg0: i32) -> (i32, i32) {
    %c0_i32 = arith.constant 0 : i32
    %c0_i32_0 = arith.constant 0 : i32
    %c0_i32_1 = arith.constant 0 : i32
    return %c0_i32, %c0_i32_0 : i32, i32
  }
  func.func @transform_3(%arg0: i32) -> (i32, i32) {
    %c0_i32 = arith.constant 0 : i32
    %c0_i32_0 = arith.constant 0 : i32
    %c0_i32_1 = arith.constant 0 : i32
    return %c0_i32, %c0_i32_0 : i32, i32
  }
  func.func @transform_4(%arg0: i32) -> (i32, i32, i32) {
    %c0_i32 = arith.constant 0 : i32
    %c0_i32_0 = arith.constant 0 : i32
    %c0_i32_1 = arith.constant 0 : i32
    return %arg0, %c0_i32, %c0_i32_0 : i32, i32, i32
  }
  func.func @transform_5(%arg0: i32) -> (i32, i32, i32) {
    %c0_i32 = arith.constant 0 : i32
    %c0_i32_0 = arith.constant 0 : i32
    %c0_i32_1 = arith.constant 0 : i32
    return %arg0, %c0_i32, %c0_i32_0 : i32, i32, i32
  }
}

module attributes {stable_mosaic.version = 11 : i64} {
  func.func @_bn_idwt_ln_kv_kernel(%arg0: i32, %arg1: memref<64x32xf32, #tpu.memory_space<vmem>>, %arg2: memref<1x32xf32, #tpu.memory_space<vmem>>, %arg3: memref<1x32xf32, #tpu.memory_space<vmem>>, %arg4: memref<1x32xf32, #tpu.memory_space<vmem>>, %arg5: memref<1x32xf32, #tpu.memory_space<vmem>>, %arg6: memref<32x64xf32, #tpu.memory_space<vmem>>, %arg7: memref<1x64xf32, #tpu.memory_space<vmem>>, %arg8: memref<64x64xf32, #tpu.memory_space<vmem>>, %arg9: memref<64x32xf32, #tpu.memory_space<vmem>>) attributes {dimension_semantics = [#tpu.dimension_semantics<parallel>], iteration_bounds = array<i64: 2>, scalar_prefetch = 0 : i64, scratch_operands = 0 : i64, tpu.core_type = #tpu.core_type<tc>, window_params = [{transform_indices = @transform_0, window_bounds = array<i64: 64, 32>}, {pipeline_mode = #tpu.pipeline_mode<synchronous>, transform_indices = @transform_1, window_bounds = array<i64: 1, 32>}, {pipeline_mode = #tpu.pipeline_mode<synchronous>, transform_indices = @transform_2, window_bounds = array<i64: 1, 32>}, {pipeline_mode = #tpu.pipeline_mode<synchronous>, transform_indices = @transform_3, window_bounds = array<i64: 1, 32>}, {pipeline_mode = #tpu.pipeline_mode<synchronous>, transform_indices = @transform_4, window_bounds = array<i64: 1, 32>}, {pipeline_mode = #tpu.pipeline_mode<synchronous>, transform_indices = @transform_5, window_bounds = array<i64: 32, 64>}, {pipeline_mode = #tpu.pipeline_mode<synchronous>, transform_indices = @transform_6, window_bounds = array<i64: 1, 64>}, {transform_indices = @transform_7, window_bounds = array<i64: 64, 64>}, {transform_indices = @transform_8, window_bounds = array<i64: 64, 32>}]} {
    %c0 = arith.constant 0 : index
    %c0_0 = arith.constant 0 : index
    %0 = vector.load %arg1[%c0, %c0_0] : memref<64x32xf32, #tpu.memory_space<vmem>>, vector<64x32xf32>
    %c0_1 = arith.constant 0 : index
    %c0_2 = arith.constant 0 : index
    %1 = vector.load %arg2[%c0_1, %c0_2] : memref<1x32xf32, #tpu.memory_space<vmem>>, vector<1x32xf32>
    %2 = vector.broadcast %1 : vector<1x32xf32> to vector<64x32xf32>
    %3 = arith.mulf %0, %2 : vector<64x32xf32>
    %c0_3 = arith.constant 0 : index
    %c0_4 = arith.constant 0 : index
    %4 = vector.load %arg3[%c0_3, %c0_4] : memref<1x32xf32, #tpu.memory_space<vmem>>, vector<1x32xf32>
    %5 = vector.broadcast %4 : vector<1x32xf32> to vector<64x32xf32>
    %6 = arith.addf %3, %5 : vector<64x32xf32>
    %cst = arith.constant 0.000000e+00 : f32
    %7 = vector.broadcast %cst : f32 to vector<64x32xf32>
    %8 = arith.maximumf %6, %7 : vector<64x32xf32>
    %9 = vector.extract_strided_slice %8 {offsets = [0, 0], sizes = [64, 8], strides = [1, 1]} : vector<64x32xf32> to vector<64x8xf32>
    %10 = vector.extract_strided_slice %8 {offsets = [0, 8], sizes = [64, 8], strides = [1, 1]} : vector<64x32xf32> to vector<64x8xf32>
    %11 = vector.extract_strided_slice %8 {offsets = [0, 16], sizes = [64, 8], strides = [1, 1]} : vector<64x32xf32> to vector<64x8xf32>
    %12 = vector.extract_strided_slice %8 {offsets = [0, 24], sizes = [64, 8], strides = [1, 1]} : vector<64x32xf32> to vector<64x8xf32>
    %13 = arith.addf %9, %10 : vector<64x8xf32>
    %14 = arith.addf %13, %11 : vector<64x8xf32>
    %15 = arith.addf %14, %12 : vector<64x8xf32>
    %cst_5 = arith.constant 5.000000e-01 : f32
    %16 = vector.broadcast %cst_5 : f32 to vector<64x8xf32>
    %17 = arith.mulf %16, %15 : vector<64x8xf32>
    %18 = arith.addf %9, %10 : vector<64x8xf32>
    %19 = arith.subf %18, %11 : vector<64x8xf32>
    %20 = arith.subf %19, %12 : vector<64x8xf32>
    %cst_6 = arith.constant 5.000000e-01 : f32
    %21 = vector.broadcast %cst_6 : f32 to vector<64x8xf32>
    %22 = arith.mulf %21, %20 : vector<64x8xf32>
    %23 = arith.subf %9, %10 : vector<64x8xf32>
    %24 = arith.addf %23, %11 : vector<64x8xf32>
    %25 = arith.subf %24, %12 : vector<64x8xf32>
    %cst_7 = arith.constant 5.000000e-01 : f32
    %26 = vector.broadcast %cst_7 : f32 to vector<64x8xf32>
    %27 = arith.mulf %26, %25 : vector<64x8xf32>
    %28 = arith.subf %9, %10 : vector<64x8xf32>
    %29 = arith.subf %28, %11 : vector<64x8xf32>
    %30 = arith.addf %29, %12 : vector<64x8xf32>
    %cst_8 = arith.constant 5.000000e-01 : f32
    %31 = vector.broadcast %cst_8 : f32 to vector<64x8xf32>
    %32 = arith.mulf %31, %30 : vector<64x8xf32>
    %33 = tpu.concatenate %17, %22, %27, %32 in 1 : vector<64x8xf32>, vector<64x8xf32>, vector<64x8xf32>, vector<64x8xf32> -> vector<64x32xf32>
    %c0_9 = arith.constant 0 : index
    %c0_10 = arith.constant 0 : index
    %34 = vector.load %arg9[%c0_9, %c0_10] : memref<64x32xf32, #tpu.memory_space<vmem>>, vector<64x32xf32>
    tpu.vector_store %arg9[%c0_9, %c0_10], %33 {strides = array<i32>} : memref<64x32xf32, #tpu.memory_space<vmem>>, vector<64x32xf32>,
    %cst_11 = arith.constant dense<0.000000e+00> : vector<64xf32>
    %35 = vector.multi_reduction <add>, %8, %cst_11 [1] : vector<64x32xf32> to vector<64xf32>
    %36 = vector.shape_cast %35 : vector<64xf32> to vector<64x1xf32>
    %cst_12 = arith.constant 3.200000e+01 : f32
    %37 = vector.broadcast %cst_12 : f32 to vector<64x1xf32>
    %38 = arith.divf %36, %37 : vector<64x1xf32>
    %39 = vector.broadcast %38 : vector<64x1xf32> to vector<64x32xf32>
    %40 = arith.subf %8, %39 : vector<64x32xf32>
    %41 = vector.broadcast %38 : vector<64x1xf32> to vector<64x32xf32>
    %42 = arith.subf %8, %41 : vector<64x32xf32>
    %43 = arith.mulf %40, %42 : vector<64x32xf32>
    %cst_13 = arith.constant dense<0.000000e+00> : vector<64xf32>
    %44 = vector.multi_reduction <add>, %43, %cst_13 [1] : vector<64x32xf32> to vector<64xf32>
    %45 = vector.shape_cast %44 : vector<64xf32> to vector<64x1xf32>
    %cst_14 = arith.constant 3.200000e+01 : f32
    %46 = vector.broadcast %cst_14 : f32 to vector<64x1xf32>
    %47 = arith.divf %45, %46 : vector<64x1xf32>
    %48 = vector.broadcast %38 : vector<64x1xf32> to vector<64x32xf32>
    %49 = arith.subf %8, %48 : vector<64x32xf32>
    %cst_15 = arith.constant 9.99999974E-6 : f32
    %50 = vector.broadcast %cst_15 : f32 to vector<64x1xf32>
    %51 = arith.addf %47, %50 : vector<64x1xf32>
    %52 = math.rsqrt %51 : vector<64x1xf32>
    %53 = vector.broadcast %52 : vector<64x1xf32> to vector<64x32xf32>
    %54 = arith.mulf %49, %53 : vector<64x32xf32>
    %c0_16 = arith.constant 0 : index
    %c0_17 = arith.constant 0 : index
    %55 = vector.load %arg4[%c0_16, %c0_17] : memref<1x32xf32, #tpu.memory_space<vmem>>, vector<1x32xf32>
    %56 = vector.broadcast %55 : vector<1x32xf32> to vector<64x32xf32>
    %57 = arith.mulf %54, %56 : vector<64x32xf32>
    %c0_18 = arith.constant 0 : index
    %c0_19 = arith.constant 0 : index
    %58 = vector.load %arg5[%c0_18, %c0_19] : memref<1x32xf32, #tpu.memory_space<vmem>>, vector<1x32xf32>
    %59 = vector.broadcast %58 : vector<1x32xf32> to vector<64x32xf32>
    %60 = arith.addf %57, %59 : vector<64x32xf32>
    %c0_20 = arith.constant 0 : index
    %c0_21 = arith.constant 0 : index
    %61 = vector.load %arg6[%c0_20, %c0_21] : memref<32x64xf32, #tpu.memory_space<vmem>>, vector<32x64xf32>
    %cst_22 = arith.constant dense<0.000000e+00> : vector<64x64xf32>
    %62 = tpu.matmul %60, %61, %cst_22 {dimension_numbers = #tpu.dot_dimension_numbers<[1], [0], [0], [1], [0, 0, 1, 1], [], []>} : vector<64x32xf32>, vector<32x64xf32>, vector<64x64xf32> -> vector<64x64xf32>
    %c0_23 = arith.constant 0 : index
    %c0_24 = arith.constant 0 : index
    %63 = vector.load %arg7[%c0_23, %c0_24] : memref<1x64xf32, #tpu.memory_space<vmem>>, vector<1x64xf32>
    %64 = vector.broadcast %63 : vector<1x64xf32> to vector<64x64xf32>
    %65 = arith.addf %62, %64 : vector<64x64xf32>
    %c0_25 = arith.constant 0 : index
    %c0_26 = arith.constant 0 : index
    %66 = vector.load %arg8[%c0_25, %c0_26] : memref<64x64xf32, #tpu.memory_space<vmem>>, vector<64x64xf32>
    tpu.vector_store %arg8[%c0_25, %c0_26], %65 {strides = array<i32>} : memref<64x64xf32, #tpu.memory_space<vmem>>, vector<64x64xf32>,
    return
  }
  func.func @transform_0(%arg0: i32) -> (i32, i32) {
    %c0_i32 = arith.constant 0 : i32
    %c0_i32_0 = arith.constant 0 : i32
    return %arg0, %c0_i32 : i32, i32
  }
  func.func @transform_1(%arg0: i32) -> (i32, i32) {
    %c0_i32 = arith.constant 0 : i32
    %c0_i32_0 = arith.constant 0 : i32
    %c0_i32_1 = arith.constant 0 : i32
    return %c0_i32, %c0_i32_0 : i32, i32
  }
  func.func @transform_2(%arg0: i32) -> (i32, i32) {
    %c0_i32 = arith.constant 0 : i32
    %c0_i32_0 = arith.constant 0 : i32
    %c0_i32_1 = arith.constant 0 : i32
    return %c0_i32, %c0_i32_0 : i32, i32
  }
  func.func @transform_3(%arg0: i32) -> (i32, i32) {
    %c0_i32 = arith.constant 0 : i32
    %c0_i32_0 = arith.constant 0 : i32
    %c0_i32_1 = arith.constant 0 : i32
    return %c0_i32, %c0_i32_0 : i32, i32
  }
  func.func @transform_4(%arg0: i32) -> (i32, i32) {
    %c0_i32 = arith.constant 0 : i32
    %c0_i32_0 = arith.constant 0 : i32
    %c0_i32_1 = arith.constant 0 : i32
    return %c0_i32, %c0_i32_0 : i32, i32
  }
  func.func @transform_5(%arg0: i32) -> (i32, i32) {
    %c0_i32 = arith.constant 0 : i32
    %c0_i32_0 = arith.constant 0 : i32
    %c0_i32_1 = arith.constant 0 : i32
    return %c0_i32, %c0_i32_0 : i32, i32
  }
  func.func @transform_6(%arg0: i32) -> (i32, i32) {
    %c0_i32 = arith.constant 0 : i32
    %c0_i32_0 = arith.constant 0 : i32
    %c0_i32_1 = arith.constant 0 : i32
    return %c0_i32, %c0_i32_0 : i32, i32
  }
  func.func @transform_7(%arg0: i32) -> (i32, i32) {
    %c0_i32 = arith.constant 0 : i32
    %c0_i32_0 = arith.constant 0 : i32
    return %arg0, %c0_i32 : i32, i32
  }
  func.func @transform_8(%arg0: i32) -> (i32, i32) {
    %c0_i32 = arith.constant 0 : i32
    %c0_i32_0 = arith.constant 0 : i32
    return %arg0, %c0_i32 : i32, i32
  }
}

module attributes {stable_mosaic.version = 11 : i64} {
  func.func @_qattn_proj_kernel(%arg0: i32, %arg1: memref<1x256x32xf32, #tpu.memory_space<vmem>>, %arg2: memref<1x64x64xf32, #tpu.memory_space<vmem>>, %arg3: memref<1x256x8xf32, #tpu.memory_space<vmem>>, %arg4: memref<32x32xf32, #tpu.memory_space<vmem>>, %arg5: memref<1x32xf32, #tpu.memory_space<vmem>>, %arg6: memref<32x32xf32, #tpu.memory_space<vmem>>, %arg7: memref<8x32xf32, #tpu.memory_space<vmem>>, %arg8: memref<1x32xf32, #tpu.memory_space<vmem>>, %arg9: memref<1x256x32xf32, #tpu.memory_space<vmem>>) attributes {dimension_semantics = [#tpu.dimension_semantics<parallel>], iteration_bounds = array<i64: 2>, scalar_prefetch = 0 : i64, scratch_operands = 0 : i64, tpu.core_type = #tpu.core_type<tc>, window_params = [{transform_indices = @transform_0, window_bounds = array<i64: 1, 256, 32>}, {transform_indices = @transform_1, window_bounds = array<i64: 1, 64, 64>}, {transform_indices = @transform_2, window_bounds = array<i64: 1, 256, 8>}, {pipeline_mode = #tpu.pipeline_mode<synchronous>, transform_indices = @transform_3, window_bounds = array<i64: 32, 32>}, {pipeline_mode = #tpu.pipeline_mode<synchronous>, transform_indices = @transform_4, window_bounds = array<i64: 1, 32>}, {pipeline_mode = #tpu.pipeline_mode<synchronous>, transform_indices = @transform_5, window_bounds = array<i64: 32, 32>}, {pipeline_mode = #tpu.pipeline_mode<synchronous>, transform_indices = @transform_6, window_bounds = array<i64: 8, 32>}, {pipeline_mode = #tpu.pipeline_mode<synchronous>, transform_indices = @transform_7, window_bounds = array<i64: 1, 32>}, {transform_indices = @transform_8, window_bounds = array<i64: 1, 256, 32>}]} {
    %c0 = arith.constant 0 : index
    %c0_0 = arith.constant 0 : index
    %c0_1 = arith.constant 0 : index
    %0 = vector.load %arg1[%c0, %c0_0, %c0_1] : memref<1x256x32xf32, #tpu.memory_space<vmem>>, vector<1x256x32xf32>
    %1 = vector.shape_cast %0 : vector<1x256x32xf32> to vector<256x32xf32>
    %c0_2 = arith.constant 0 : index
    %c0_3 = arith.constant 0 : index
    %2 = vector.load %arg4[%c0_2, %c0_3] : memref<32x32xf32, #tpu.memory_space<vmem>>, vector<32x32xf32>
    %cst = arith.constant dense<0.000000e+00> : vector<256x32xf32>
    %3 = tpu.matmul %1, %2, %cst {dimension_numbers = #tpu.dot_dimension_numbers<[1], [0], [0], [1], [0, 0, 1, 1], [], []>} : vector<256x32xf32>, vector<32x32xf32>, vector<256x32xf32> -> vector<256x32xf32>
    %c0_4 = arith.constant 0 : index
    %c0_5 = arith.constant 0 : index
    %4 = vector.load %arg5[%c0_4, %c0_5] : memref<1x32xf32, #tpu.memory_space<vmem>>, vector<1x32xf32>
    %5 = vector.broadcast %4 : vector<1x32xf32> to vector<256x32xf32>
    %6 = arith.addf %3, %5 : vector<256x32xf32>
    %c0_6 = arith.constant 0 : index
    %c0_7 = arith.constant 0 : index
    %c0_8 = arith.constant 0 : index
    %7 = vector.load %arg2[%c0_6, %c0_7, %c0_8] : memref<1x64x64xf32, #tpu.memory_space<vmem>>, vector<1x64x64xf32>
    %8 = vector.shape_cast %7 : vector<1x64x64xf32> to vector<64x64xf32>
    %c0_9 = arith.constant 0 : index
    %c0_10 = arith.constant 0 : index
    %c0_11 = arith.constant 0 : index
    %9 = vector.load %arg3[%c0_9, %c0_10, %c0_11] : memref<1x256x8xf32, #tpu.memory_space<vmem>>, vector<1x256x8xf32>
    %10 = vector.shape_cast %9 : vector<1x256x8xf32> to vector<256x8xf32>
    %c0_12 = arith.constant 0 : index
    %c0_13 = arith.constant 0 : index
    %11 = vector.load %arg7[%c0_12, %c0_13] : memref<8x32xf32, #tpu.memory_space<vmem>>, vector<8x32xf32>
    %cst_14 = arith.constant dense<0.000000e+00> : vector<256x32xf32>
    %12 = tpu.matmul %10, %11, %cst_14 {dimension_numbers = #tpu.dot_dimension_numbers<[1], [0], [0], [1], [0, 0, 1, 1], [], []>} : vector<256x8xf32>, vector<8x32xf32>, vector<256x32xf32> -> vector<256x32xf32>
    %c0_15 = arith.constant 0 : index
    %c0_16 = arith.constant 0 : index
    %13 = vector.load %arg8[%c0_15, %c0_16] : memref<1x32xf32, #tpu.memory_space<vmem>>, vector<1x32xf32>
    %14 = vector.broadcast %13 : vector<1x32xf32> to vector<256x32xf32>
    %15 = arith.addf %12, %14 : vector<256x32xf32>
    %16 = vector.extract_strided_slice %6 {offsets = [0, 0], sizes = [256, 8], strides = [1, 1]} : vector<256x32xf32> to vector<256x8xf32>
    %17 = vector.extract_strided_slice %8 {offsets = [0, 0], sizes = [64, 8], strides = [1, 1]} : vector<64x64xf32> to vector<64x8xf32>
    %18 = vector.extract_strided_slice %8 {offsets = [0, 32], sizes = [64, 8], strides = [1, 1]} : vector<64x64xf32> to vector<64x8xf32>
    %cst_17 = arith.constant dense<0.000000e+00> : vector<256x64xf32>
    %19 = tpu.matmul %16, %17, %cst_17 {dimension_numbers = #tpu.dot_dimension_numbers<[1], [1], [0], [0], [0, 0, 1, 0], [], []>} : vector<256x8xf32>, vector<64x8xf32>, vector<256x64xf32> -> vector<256x64xf32>
    %cst_18 = arith.constant 0.353553385 : f32
    %20 = vector.broadcast %cst_18 : f32 to vector<256x64xf32>
    %21 = arith.mulf %19, %20 : vector<256x64xf32>
    %cst_19 = arith.constant dense<0xFF800000> : vector<256xf32>
    %22 = vector.multi_reduction <maximumf>, %21, %cst_19 [1] : vector<256x64xf32> to vector<256xf32>
    %23 = vector.shape_cast %22 : vector<256xf32> to vector<256x1xf32>
    %24 = vector.broadcast %23 : vector<256x1xf32> to vector<256x64xf32>
    %25 = arith.subf %21, %24 : vector<256x64xf32>
    %26 = math.exp %25 : vector<256x64xf32>
    %cst_20 = arith.constant dense<0.000000e+00> : vector<256xf32>
    %27 = vector.multi_reduction <add>, %26, %cst_20 [1] : vector<256x64xf32> to vector<256xf32>
    %28 = vector.shape_cast %27 : vector<256xf32> to vector<256x1xf32>
    %29 = tpu.reciprocal %28 {approx = true} : vector<256x1xf32> -> vector<256x1xf32>
    %cst_21 = arith.constant dense<0.000000e+00> : vector<256x8xf32>
    %30 = tpu.matmul %26, %18, %cst_21 {dimension_numbers = #tpu.dot_dimension_numbers<[1], [0], [0], [1], [0, 0, 1, 1], [], []>} : vector<256x64xf32>, vector<64x8xf32>, vector<256x8xf32> -> vector<256x8xf32>
    %31 = vector.broadcast %29 : vector<256x1xf32> to vector<256x8xf32>
    %32 = arith.mulf %30, %31 : vector<256x8xf32>
    %c0_22 = arith.constant 0 : index
    %c0_23 = arith.constant 0 : index
    %33 = vector.load %arg6[%c0_22, %c0_23] : memref<32x32xf32, #tpu.memory_space<vmem>>, vector<8x32xf32>
    %cst_24 = arith.constant dense<0.000000e+00> : vector<256x32xf32>
    %34 = tpu.matmul %32, %33, %cst_24 {dimension_numbers = #tpu.dot_dimension_numbers<[1], [0], [0], [1], [0, 0, 1, 1], [], []>} : vector<256x8xf32>, vector<8x32xf32>, vector<256x32xf32> -> vector<256x32xf32>
    %35 = arith.addf %15, %34 : vector<256x32xf32>
    %36 = vector.extract_strided_slice %6 {offsets = [0, 8], sizes = [256, 8], strides = [1, 1]} : vector<256x32xf32> to vector<256x8xf32>
    %37 = vector.extract_strided_slice %8 {offsets = [0, 8], sizes = [64, 8], strides = [1, 1]} : vector<64x64xf32> to vector<64x8xf32>
    %38 = vector.extract_strided_slice %8 {offsets = [0, 40], sizes = [64, 8], strides = [1, 1]} : vector<64x64xf32> to vector<64x8xf32>
    %cst_25 = arith.constant dense<0.000000e+00> : vector<256x64xf32>
    %39 = tpu.matmul %36, %37, %cst_25 {dimension_numbers = #tpu.dot_dimension_numbers<[1], [1], [0], [0], [0, 0, 1, 0], [], []>} : vector<256x8xf32>, vector<64x8xf32>, vector<256x64xf32> -> vector<256x64xf32>
    %cst_26 = arith.constant 0.353553385 : f32
    %40 = vector.broadcast %cst_26 : f32 to vector<256x64xf32>
    %41 = arith.mulf %39, %40 : vector<256x64xf32>
    %cst_27 = arith.constant dense<0xFF800000> : vector<256xf32>
    %42 = vector.multi_reduction <maximumf>, %41, %cst_27 [1] : vector<256x64xf32> to vector<256xf32>
    %43 = vector.shape_cast %42 : vector<256xf32> to vector<256x1xf32>
    %44 = vector.broadcast %43 : vector<256x1xf32> to vector<256x64xf32>
    %45 = arith.subf %41, %44 : vector<256x64xf32>
    %46 = math.exp %45 : vector<256x64xf32>
    %cst_28 = arith.constant dense<0.000000e+00> : vector<256xf32>
    %47 = vector.multi_reduction <add>, %46, %cst_28 [1] : vector<256x64xf32> to vector<256xf32>
    %48 = vector.shape_cast %47 : vector<256xf32> to vector<256x1xf32>
    %49 = tpu.reciprocal %48 {approx = true} : vector<256x1xf32> -> vector<256x1xf32>
    %cst_29 = arith.constant dense<0.000000e+00> : vector<256x8xf32>
    %50 = tpu.matmul %46, %38, %cst_29 {dimension_numbers = #tpu.dot_dimension_numbers<[1], [0], [0], [1], [0, 0, 1, 1], [], []>} : vector<256x64xf32>, vector<64x8xf32>, vector<256x8xf32> -> vector<256x8xf32>
    %51 = vector.broadcast %49 : vector<256x1xf32> to vector<256x8xf32>
    %52 = arith.mulf %50, %51 : vector<256x8xf32>
    %c8 = arith.constant 8 : index
    %c0_30 = arith.constant 0 : index
    %53 = vector.load %arg6[%c8, %c0_30] : memref<32x32xf32, #tpu.memory_space<vmem>>, vector<8x32xf32>
    %cst_31 = arith.constant dense<0.000000e+00> : vector<256x32xf32>
    %54 = tpu.matmul %52, %53, %cst_31 {dimension_numbers = #tpu.dot_dimension_numbers<[1], [0], [0], [1], [0, 0, 1, 1], [], []>} : vector<256x8xf32>, vector<8x32xf32>, vector<256x32xf32> -> vector<256x32xf32>
    %55 = arith.addf %35, %54 : vector<256x32xf32>
    %56 = vector.extract_strided_slice %6 {offsets = [0, 16], sizes = [256, 8], strides = [1, 1]} : vector<256x32xf32> to vector<256x8xf32>
    %57 = vector.extract_strided_slice %8 {offsets = [0, 16], sizes = [64, 8], strides = [1, 1]} : vector<64x64xf32> to vector<64x8xf32>
    %58 = vector.extract_strided_slice %8 {offsets = [0, 48], sizes = [64, 8], strides = [1, 1]} : vector<64x64xf32> to vector<64x8xf32>
    %cst_32 = arith.constant dense<0.000000e+00> : vector<256x64xf32>
    %59 = tpu.matmul %56, %57, %cst_32 {dimension_numbers = #tpu.dot_dimension_numbers<[1], [1], [0], [0], [0, 0, 1, 0], [], []>} : vector<256x8xf32>, vector<64x8xf32>, vector<256x64xf32> -> vector<256x64xf32>
    %cst_33 = arith.constant 0.353553385 : f32
    %60 = vector.broadcast %cst_33 : f32 to vector<256x64xf32>
    %61 = arith.mulf %59, %60 : vector<256x64xf32>
    %cst_34 = arith.constant dense<0xFF800000> : vector<256xf32>
    %62 = vector.multi_reduction <maximumf>, %61, %cst_34 [1] : vector<256x64xf32> to vector<256xf32>
    %63 = vector.shape_cast %62 : vector<256xf32> to vector<256x1xf32>
    %64 = vector.broadcast %63 : vector<256x1xf32> to vector<256x64xf32>
    %65 = arith.subf %61, %64 : vector<256x64xf32>
    %66 = math.exp %65 : vector<256x64xf32>
    %cst_35 = arith.constant dense<0.000000e+00> : vector<256xf32>
    %67 = vector.multi_reduction <add>, %66, %cst_35 [1] : vector<256x64xf32> to vector<256xf32>
    %68 = vector.shape_cast %67 : vector<256xf32> to vector<256x1xf32>
    %69 = tpu.reciprocal %68 {approx = true} : vector<256x1xf32> -> vector<256x1xf32>
    %cst_36 = arith.constant dense<0.000000e+00> : vector<256x8xf32>
    %70 = tpu.matmul %66, %58, %cst_36 {dimension_numbers = #tpu.dot_dimension_numbers<[1], [0], [0], [1], [0, 0, 1, 1], [], []>} : vector<256x64xf32>, vector<64x8xf32>, vector<256x8xf32> -> vector<256x8xf32>
    %71 = vector.broadcast %69 : vector<256x1xf32> to vector<256x8xf32>
    %72 = arith.mulf %70, %71 : vector<256x8xf32>
    %c16 = arith.constant 16 : index
    %c0_37 = arith.constant 0 : index
    %73 = vector.load %arg6[%c16, %c0_37] : memref<32x32xf32, #tpu.memory_space<vmem>>, vector<8x32xf32>
    %cst_38 = arith.constant dense<0.000000e+00> : vector<256x32xf32>
    %74 = tpu.matmul %72, %73, %cst_38 {dimension_numbers = #tpu.dot_dimension_numbers<[1], [0], [0], [1], [0, 0, 1, 1], [], []>} : vector<256x8xf32>, vector<8x32xf32>, vector<256x32xf32> -> vector<256x32xf32>
    %75 = arith.addf %55, %74 : vector<256x32xf32>
    %76 = vector.extract_strided_slice %6 {offsets = [0, 24], sizes = [256, 8], strides = [1, 1]} : vector<256x32xf32> to vector<256x8xf32>
    %77 = vector.extract_strided_slice %8 {offsets = [0, 24], sizes = [64, 8], strides = [1, 1]} : vector<64x64xf32> to vector<64x8xf32>
    %78 = vector.extract_strided_slice %8 {offsets = [0, 56], sizes = [64, 8], strides = [1, 1]} : vector<64x64xf32> to vector<64x8xf32>
    %cst_39 = arith.constant dense<0.000000e+00> : vector<256x64xf32>
    %79 = tpu.matmul %76, %77, %cst_39 {dimension_numbers = #tpu.dot_dimension_numbers<[1], [1], [0], [0], [0, 0, 1, 0], [], []>} : vector<256x8xf32>, vector<64x8xf32>, vector<256x64xf32> -> vector<256x64xf32>
    %cst_40 = arith.constant 0.353553385 : f32
    %80 = vector.broadcast %cst_40 : f32 to vector<256x64xf32>
    %81 = arith.mulf %79, %80 : vector<256x64xf32>
    %cst_41 = arith.constant dense<0xFF800000> : vector<256xf32>
    %82 = vector.multi_reduction <maximumf>, %81, %cst_41 [1] : vector<256x64xf32> to vector<256xf32>
    %83 = vector.shape_cast %82 : vector<256xf32> to vector<256x1xf32>
    %84 = vector.broadcast %83 : vector<256x1xf32> to vector<256x64xf32>
    %85 = arith.subf %81, %84 : vector<256x64xf32>
    %86 = math.exp %85 : vector<256x64xf32>
    %cst_42 = arith.constant dense<0.000000e+00> : vector<256xf32>
    %87 = vector.multi_reduction <add>, %86, %cst_42 [1] : vector<256x64xf32> to vector<256xf32>
    %88 = vector.shape_cast %87 : vector<256xf32> to vector<256x1xf32>
    %89 = tpu.reciprocal %88 {approx = true} : vector<256x1xf32> -> vector<256x1xf32>
    %cst_43 = arith.constant dense<0.000000e+00> : vector<256x8xf32>
    %90 = tpu.matmul %86, %78, %cst_43 {dimension_numbers = #tpu.dot_dimension_numbers<[1], [0], [0], [1], [0, 0, 1, 1], [], []>} : vector<256x64xf32>, vector<64x8xf32>, vector<256x8xf32> -> vector<256x8xf32>
    %91 = vector.broadcast %89 : vector<256x1xf32> to vector<256x8xf32>
    %92 = arith.mulf %90, %91 : vector<256x8xf32>
    %c24 = arith.constant 24 : index
    %c0_44 = arith.constant 0 : index
    %93 = vector.load %arg6[%c24, %c0_44] : memref<32x32xf32, #tpu.memory_space<vmem>>, vector<8x32xf32>
    %cst_45 = arith.constant dense<0.000000e+00> : vector<256x32xf32>
    %94 = tpu.matmul %92, %93, %cst_45 {dimension_numbers = #tpu.dot_dimension_numbers<[1], [0], [0], [1], [0, 0, 1, 1], [], []>} : vector<256x8xf32>, vector<8x32xf32>, vector<256x32xf32> -> vector<256x32xf32>
    %95 = arith.addf %75, %94 : vector<256x32xf32>
    %c0_46 = arith.constant 0 : index
    %c0_47 = arith.constant 0 : index
    %c0_48 = arith.constant 0 : index
    %96 = vector.load %arg9[%c0_46, %c0_47, %c0_48] : memref<1x256x32xf32, #tpu.memory_space<vmem>>, vector<1x256x32xf32>
    %97 = vector.shape_cast %96 : vector<1x256x32xf32> to vector<256x32xf32>
    %98 = vector.shape_cast %95 : vector<256x32xf32> to vector<1x256x32xf32>
    tpu.vector_store %arg9[%c0_46, %c0_47, %c0_48], %98 {strides = array<i32>} : memref<1x256x32xf32, #tpu.memory_space<vmem>>, vector<1x256x32xf32>,
    return
  }
  func.func @transform_0(%arg0: i32) -> (i32, i32, i32) {
    %c0_i32 = arith.constant 0 : i32
    %c0_i32_0 = arith.constant 0 : i32
    %c0_i32_1 = arith.constant 0 : i32
    return %arg0, %c0_i32, %c0_i32_0 : i32, i32, i32
  }
  func.func @transform_1(%arg0: i32) -> (i32, i32, i32) {
    %c0_i32 = arith.constant 0 : i32
    %c0_i32_0 = arith.constant 0 : i32
    %c0_i32_1 = arith.constant 0 : i32
    return %arg0, %c0_i32, %c0_i32_0 : i32, i32, i32
  }
  func.func @transform_2(%arg0: i32) -> (i32, i32, i32) {
    %c0_i32 = arith.constant 0 : i32
    %c0_i32_0 = arith.constant 0 : i32
    %c0_i32_1 = arith.constant 0 : i32
    return %arg0, %c0_i32, %c0_i32_0 : i32, i32, i32
  }
  func.func @transform_3(%arg0: i32) -> (i32, i32) {
    %c0_i32 = arith.constant 0 : i32
    %c0_i32_0 = arith.constant 0 : i32
    %c0_i32_1 = arith.constant 0 : i32
    return %c0_i32, %c0_i32_0 : i32, i32
  }
  func.func @transform_4(%arg0: i32) -> (i32, i32) {
    %c0_i32 = arith.constant 0 : i32
    %c0_i32_0 = arith.constant 0 : i32
    %c0_i32_1 = arith.constant 0 : i32
    return %c0_i32, %c0_i32_0 : i32, i32
  }
  func.func @transform_5(%arg0: i32) -> (i32, i32) {
    %c0_i32 = arith.constant 0 : i32
    %c0_i32_0 = arith.constant 0 : i32
    %c0_i32_1 = arith.constant 0 : i32
    return %c0_i32, %c0_i32_0 : i32, i32
  }
  func.func @transform_6(%arg0: i32) -> (i32, i32) {
    %c0_i32 = arith.constant 0 : i32
    %c0_i32_0 = arith.constant 0 : i32
    %c0_i32_1 = arith.constant 0 : i32
    return %c0_i32, %c0_i32_0 : i32, i32
  }
  func.func @transform_7(%arg0: i32) -> (i32, i32) {
    %c0_i32 = arith.constant 0 : i32
    %c0_i32_0 = arith.constant 0 : i32
    %c0_i32_1 = arith.constant 0 : i32
    return %c0_i32, %c0_i32_0 : i32, i32
  }
  func.func @transform_8(%arg0: i32) -> (i32, i32, i32) {
    %c0_i32 = arith.constant 0 : i32
    %c0_i32_0 = arith.constant 0 : i32
    %c0_i32_1 = arith.constant 0 : i32
    return %arg0, %c0_i32, %c0_i32_0 : i32, i32, i32
  }
}

</mosaic_0001>

<bundles_post_ra>
// kernel: wave_attention_forward.6
= control target key start
LH: loop header
LB: loop body
LE: loop exit
PB: predicated region body
PF: predicated region fallthrough
CT: control target
= control target key end

     0   :  { %s767_s12 = smov 0   ;;  %s1159_s0 = inlined_call_operand.vmem [shape: f32[128,32], index: 0, kind: input, shape index: {}]   ;;  %s1160_s1 = inlined_call_operand.vmem [shape: f32[1,8], index: 1, kind: input, shape index: {}]   ;;  %s1161_s2 = inlined_call_operand.vmem [shape: f32[1,8], index: 2, kind: input, shape index: {}]   ;;  %s1162_s3 = inlined_call_operand.vmem [shape: f32[128,32], index: 3, kind: output, shape index: {}]  }
   0x1 LB: > { %s706_s13 = sadd.s32 4294967295, %s739_s12   ;;  %p710_p0 = scmp.ge.s32.totalorder %s739_s12, 1  ;;  %s739_s12 = sphi %s767_s12, %s13_s12  }
   0x2   : > { %p138_p1 = scmp.lt.s32.totalorder %s739_s12, 3 }
   0x4   : > { %p139_p2 = pnand %p710_p0, %p138_p1 }
   0x5   : > { %s741_s16 = smov (!%p139_p2), 8   ;;  %s742_s17 = smov (!%p139_p2), 16  }
   0x6   : > { %142 = sbr.rel (%p139_p2) target bundleno = 448 (0x1c0), region = 32  ;;  %s743_s20 = smov (!%p139_p2), 24  }
   0x7   : > { %s711_s21 = sshll.u32 (!%p139_p2), %s706_s13, 3  ;;  %s744_s26 = smov (!%p139_p2), 120  }
   0x8   : > { %p163_p3 = scmp.lt.s32.totalorder (!%p139_p2), %s711_s21, 15  ;;  %s745_s27 = smov (!%p139_p2), 112  }
   0x9   : > { %s746_s28 = smov (!%p139_p2), 104  }
   0xb   : > { %v778_v0 = vld [vmem:[%s1160_s1] ss:$0 sm:$0xff]  ;;  %s1164_s21 = smov (!%p163_p3, %s711_s21), 15  ;;  %vm614_vm0 = vcmask 64512   ;;  %vm623_vm1 = vcmask 130048   ;;  %vm632_vm2 = vcmask 195584  }
   0xc   : > { %220 = vrot.lane.b32.xlu0 %v778_v0, %s741_s16  ;;  %250 = vrot.lane.b32.xlu1 %v778_v0, %s742_s17  ;;  %v787_v1 = vld [vmem:[%s1161_s2] ss:$0 sm:$0xff]  ;;  %s712_s22 = sshll.u32 %s1164_s21, 3  ;;  %vm641_vm3 = vcmask 261120  }
   0xd   : > { %s166_s25 = scalar_lea.vmem %s1159_s0, %s712_s22  ;;  %s1107_s4 = scalar_lea.vmem %s1162_s3, %s712_s22 }
   0xe   : > { %v805_v3 = vld [vmem:[%s166_s25 + $0x8] sm:$0xff]  ;;  %v807_v4 = vld [vmem:[%s166_s25] sm:$0xff]  ;;  %v809_v5 = vld [vmem:[%s166_s25 + $0x18] sm:$0xff] }
   0xf   : > { %v811_v6 = vld [vmem:[%s166_s25 + $0x10] sm:$0xff]  ;;  %v817_v14 = vld [vmem:[%s166_s25 + $0x28] sm:$0xff]  ;;  %v819_v15 = vld [vmem:[%s166_s25 + $0x20] sm:$0xff] }
  0x10   : > { %231 = vrot.lane.b32.xlu0 %v787_v1, %s741_s16  ;;  %261 = vrot.lane.b32.xlu1 %v787_v1, %s742_s17  ;;  %v825_v23 = vld [vmem:[%s166_s25 + $0x38] sm:$0xff]  ;;  %v827_v24 = vld [vmem:[%s166_s25 + $0x30] sm:$0xff] }
  0x14   : > { %280 = vrot.lane.b32.xlu0 %v778_v0, %s743_s20  ;;  %291 = vrot.lane.b32.xlu1 %v787_v1, %s743_s20 }
  0x7e   : > { %v221_v2 = vpop.permute.xlu0 %220  ;;  %v251_v22 = vpop.permute.xlu1 %250 }
  0x7f   : > { %v224_v7 = vmul.f32 %v221_v2, %v805_v3  ;;  %v223_v8 = vmul.f32 %v221_v2, %v807_v4  ;;  %v226_v12 = vmul.f32 %v221_v2, %v809_v5  ;;  %v225_v13 = vmul.f32 %v221_v2, %v811_v6 }
  0x80   : > { %v228_v20 = vmul.f32 %v221_v2, %v817_v14  ;;  %v227_v21 = vmul.f32 %v221_v2, %v819_v15  ;;  %v230_v29 = vmul.f32 %v221_v2, %v825_v23  ;;  %v229_v30 = vmul.f32 %v221_v2, %v827_v24 }
  0x81   : > { %v254_v31 = vmul.f32 %v251_v22, %v805_v3  ;;  %v253_v32 = vmul.f32 %v251_v22, %v807_v4  ;;  %v256_v38 = vmul.f32 %v251_v22, %v809_v5  ;;  %v255_v39 = vmul.f32 %v251_v22, %v811_v6 }
  0x82   : > { %v232_v9 = vpop.permute.xlu0 %231  ;;  %v262_v37 = vpop.permute.xlu1 %261  ;;  %v258_v44 = vmul.f32 %v251_v22, %v817_v14  ;;  %v257_v45 = vmul.f32 %v251_v22, %v819_v15  ;;  %v260_v51 = vmul.f32 %v251_v22, %v825_v23  ;;  %v259_v52 = vmul.f32 %v251_v22, %v827_v24 }
  0x83   : > { %v235_v10 = vadd.f32 %v232_v9, %v224_v7  ;;  %v234_v11 = vadd.f32 %v232_v9, %v223_v8  ;;  %v237_v18 = vadd.f32 %v232_v9, %v226_v12  ;;  %v236_v19 = vadd.f32 %v232_v9, %v225_v13 }
  0x84   : > { %v239_v27 = vadd.f32 %v232_v9, %v228_v20  ;;  %v238_v28 = vadd.f32 %v232_v9, %v227_v21  ;;  %v241_v35 = vadd.f32 %v232_v9, %v230_v29  ;;  %v240_v36 = vadd.f32 %v232_v9, %v229_v30 }
  0x85   : > { %v243_v16 = vmax.f32 %v235_v10, 0.0  ;;  %v242_v17 = vmax.f32 %v234_v11, 0.0  ;;  %v245_v25 = vmax.f32 %v237_v18, 0.0  ;;  %v244_v26 = vmax.f32 %v236_v19, 0.0 }
  0x86   : > { %v247_v33 = vmax.f32 %v239_v27, 0.0  ;;  %v246_v34 = vmax.f32 %v238_v28, 0.0  ;;  %v249_v40 = vmax.f32 %v241_v35, 0.0  ;;  %v248_v41 = vmax.f32 %v240_v36, 0.0  ;;  %v281_v50 = vpop.permute.xlu0 %280  ;;  %v292_v59 = vpop.permute.xlu1 %291 }
  0x87   : > { %320 = vrot.lane.b32.xlu1 %v243_v16, %s744_s26  ;;  %318 = vrot.lane.b32.xlu0 %v242_v17, %s744_s26  ;;  %v265_v42 = vadd.f32 %v262_v37, %v254_v31  ;;  %v264_v43 = vadd.f32 %v262_v37, %v253_v32  ;;  %v267_v48 = vadd.f32 %v262_v37, %v256_v38 }
  0x88   : > { %v266_v49 = vadd.f32 %v262_v37, %v255_v39  ;;  %v269_v55 = vadd.f32 %v262_v37, %v258_v44  ;;  %v268_v56 = vadd.f32 %v262_v37, %v257_v45  ;;  %v284_v57 = vmul.f32 %v281_v50, %v805_v3 }
  0x89   : > { %v273_v46 = vmax.f32 %v265_v42, 0.0  ;;  %v272_v47 = vmax.f32 %v264_v43, 0.0  ;;  %v275_v53 = vmax.f32 %v267_v48, 0.0  ;;  %v283_v58 = vmul.f32 %v281_v50, %v807_v4 }
  0x8a   : > { %v274_v54 = vmax.f32 %v266_v49, 0.0  ;;  %v277_v60 = vmax.f32 %v269_v55, 0.0  ;;  %v276_v61 = vmax.f32 %v268_v56, 0.0  ;;  %v271_v62 = vadd.f32 %v262_v37, %v260_v51 }
  0x8b   : > { %324 = vrot.lane.b32.xlu1 %v245_v25, %s744_s26  ;;  %322 = vrot.lane.b32.xlu0 %v244_v26, %s744_s26  ;;  %v270_v63 = vadd.f32 %v262_v37, %v259_v52  ;;  %v295_v2 = vadd.f32 %v292_v59, %v284_v57  ;;  %v294_v7 = vadd.f32 %v292_v59, %v283_v58 }
  0x8c   : > { %v279_v8 = vmax.f32 %v271_v62, 0.0  ;;  %v286_v10 = vmul.f32 %v281_v50, %v809_v5  ;;  %v285_v11 = vmul.f32 %v281_v50, %v811_v6  ;;  %v288_v18 = vmul.f32 %v281_v50, %v817_v14 }
  0x8d   : > { %v278_v9 = vmax.f32 %v270_v63, 0.0  ;;  %v303_v12 = vmax.f32 %v295_v2, 0.0  ;;  %v302_v13 = vmax.f32 %v294_v7, 0.0  ;;  %v287_v19 = vmul.f32 %v281_v50, %v819_v15 }
  0x8e   : > { %v297_v16 = vadd.f32 %v292_v59, %v286_v10  ;;  %v296_v17 = vadd.f32 %v292_v59, %v285_v11  ;;  %v290_v20 = vmul.f32 %v281_v50, %v825_v23  ;;  %v289_v21 = vmul.f32 %v281_v50, %v827_v24 }
  0x8f   : > { %328 = vrot.lane.b32.xlu1 %v247_v33, %s744_s26  ;;  %326 = vrot.lane.b32.xlu0 %v246_v34, %s744_s26  ;;  %v299_v26 = vadd.f32 %v292_v59, %v288_v18  ;;  %v298_v27 = vadd.f32 %v292_v59, %v287_v19  ;;  %v191_v36 = vmul.f32 %v778_v0, %v805_v3 }
  0x90   : > { %v305_v22 = vmax.f32 %v297_v16, 0.0  ;;  %v304_v25 = vmax.f32 %v296_v17, 0.0  ;;  %v301_v30 = vadd.f32 %v292_v59, %v290_v20  ;;  %v300_v31 = vadd.f32 %v292_v59, %v289_v21 }
  0x91   : > { %v307_v28 = vmax.f32 %v299_v26, 0.0  ;;  %v306_v29 = vmax.f32 %v298_v27, 0.0  ;;  %v190_v37 = vmul.f32 %v778_v0, %v807_v4  ;;  %v192_v43 = vmul.f32 %v778_v0, %v811_v6 }
  0x92   : > { %v309_v32 = vmax.f32 %v301_v30, 0.0  ;;  %v308_v33 = vmax.f32 %v300_v31, 0.0  ;;  %v194_v6 = vmul.f32 %v778_v0, %v819_v15  ;;  %v197_v52 = vmul.f32 %v778_v0, %v825_v23 }
  0x93   : > { %332 = vrot.lane.b32.xlu1 %v249_v40, %s744_s26  ;;  %330 = vrot.lane.b32.xlu0 %v248_v41, %s744_s26  ;;  %v866_v40 = vadd.f32 %v787_v1, %v191_v36  ;;  %v193_v41 = vmul.f32 %v778_v0, %v809_v5  ;;  %v871_v42 = vadd.f32 %v787_v1, %v190_v37 }
  0x94   : > { %v196_v55 = vmul.f32 %v778_v0, %v827_v24 }
  0x95   : > { %v213_v4 = vmax.f32 %v866_v40, 0.0  ;;  %v881_v45 = vadd.f32 %v787_v1, %v193_v41  ;;  %v212_v5 = vmax.f32 %v871_v42, 0.0 }
  0x96   : > { %v931_v62 = vadd.f32 %v787_v1, %v196_v55 }
  0x97   : > { %360 = vrot.lane.b32.xlu1 %v273_v46, %s745_s27  ;;  %358 = vrot.lane.b32.xlu0 %v272_v47, %s745_s27  ;;  %v195_v46 = vmul.f32 %v778_v0, %v817_v14  ;;  %v887_v47 = vadd.f32 %v787_v1, %v192_v43  ;;  %v215_v51 = vmax.f32 %v881_v45, 0.0 }
  0x99   : > { %v900_v14 = vadd.f32 %v787_v1, %v195_v46 }
  0x9b   : > { %364 = vrot.lane.b32.xlu1 %v275_v53, %s745_s27  ;;  %362 = vrot.lane.b32.xlu0 %v274_v54, %s745_s27  ;;  %v214_v53 = vmax.f32 %v887_v47, 0.0  ;;  %v909_v54 = vadd.f32 %v787_v1, %v194_v6 }
  0x9d   : > { %v216_v24 = vmax.f32 %v909_v54, 0.0 }
  0x9f   : > { %368 = vrot.lane.b32.xlu1 %v277_v60, %s745_s27  ;;  %366 = vrot.lane.b32.xlu0 %v276_v61, %s745_s27  ;;  %v217_v60 = vmax.f32 %v900_v14, 0.0  ;;  %v924_v61 = vadd.f32 %v787_v1, %v197_v52  ;;  %v218_v1 = vmax.f32 %v931_v62, 0.0 }
  0xa1   : > { %v219_v10 = vmax.f32 %v924_v61, 0.0 }
  0xa3   : > { %372 = vrot.lane.b32.xlu1 %v279_v8, %s745_s27  ;;  %370 = vrot.lane.b32.xlu0 %v278_v9, %s745_s27 }
  0xa7   : > { %400 = vrot.lane.b32.xlu1 %v303_v12, %s746_s28  ;;  %398 = vrot.lane.b32.xlu0 %v302_v13, %s746_s28 }
  0xab   : > { %404 = vrot.lane.b32.xlu1 %v305_v22, %s746_s28  ;;  %402 = vrot.lane.b32.xlu0 %v304_v25, %s746_s28 }
  0xaf   : > { %408 = vrot.lane.b32.xlu1 %v307_v28, %s746_s28  ;;  %406 = vrot.lane.b32.xlu0 %v306_v29, %s746_s28 }
  0xb3   : > { %412 = vrot.lane.b32.xlu1 %v309_v32, %s746_s28  ;;  %410 = vrot.lane.b32.xlu0 %v308_v33, %s746_s28 }
  0xf9   : > { %v853_v34 = vpop.permute.xlu1 %320  ;;  %v855_v35 = vpop.permute.xlu0 %318 }
  0xfa   : > { %v343_v50 = vadd.f32 %v853_v34, %v213_v4  ;;  %v342_v15 = vadd.f32 %v855_v35, %v212_v5 }
  0xfd   : > { %v861_v38 = vpop.permute.xlu1 %324  ;;  %v863_v39 = vpop.permute.xlu0 %322 }
  0xfe   : > { %v345_v59 = vadd.f32 %v861_v38, %v215_v51  ;;  %v344_v0 = vadd.f32 %v863_v39, %v214_v53 }
 0x101   : > { %v875_v3 = vpop.permute.xlu1 %328  ;;  %v877_v44 = vpop.permute.xlu0 %326 }
 0x102   : > { %v347_v9 = vadd.f32 %v875_v3, %v217_v60  ;;  %v346_v11 = vadd.f32 %v877_v44, %v216_v24 }
 0x105   : > { %v891_v48 = vpop.permute.xlu1 %332  ;;  %v893_v49 = vpop.permute.xlu0 %330 }
 0x106   : > { %v349_v18 = vadd.f32 %v891_v48, %v219_v10  ;;  %v348_v19 = vadd.f32 %v893_v49, %v218_v1 }
 0x109   : > { %v913_v56 = vpop.permute.xlu1 %360  ;;  %v915_v57 = vpop.permute.xlu0 %358 }
 0x10a   : > { %v383_v58 = vadd.f32 %v913_v56, %v343_v50  ;;  %v382_v23 = vadd.f32 %v915_v57, %v342_v15  ;;  %v439_v26 = vsub.f32 %v343_v50, %v913_v56  ;;  %v438_v27 = vsub.f32 %v342_v15, %v915_v57 }
 0x10d   : > { %v933_v63 = vpop.permute.xlu1 %364  ;;  %v935_v2 = vpop.permute.xlu0 %362 }
 0x10e   : > { %v385_v7 = vadd.f32 %v933_v63, %v345_v59  ;;  %v384_v8 = vadd.f32 %v935_v2, %v344_v0  ;;  %v441_v36 = vsub.f32 %v345_v59, %v933_v63  ;;  %v440_v43 = vsub.f32 %v344_v0, %v935_v2 }
 0x111   : > { %v947_v12 = vpop.permute.xlu1 %368  ;;  %v949_v13 = vpop.permute.xlu0 %366 }
 0x112   : > { %v387_v16 = vadd.f32 %v947_v12, %v347_v9  ;;  %v386_v17 = vadd.f32 %v949_v13, %v346_v11 }
 0x115   : > { %v959_v20 = vpop.permute.xlu1 %372  ;;  %v961_v21 = vpop.permute.xlu0 %370 }
 0x116   : > { %v964_v22 = vadd.f32 %v959_v20, %v349_v18  ;;  %v967_v25 = vadd.f32 %v961_v21, %v348_v19 }
 0x119   : > { %v971_v28 = vpop.permute.xlu1 %400  ;;  %v973_v29 = vpop.permute.xlu0 %398 }
 0x11a   : > { %v976_v30 = vadd.f32 %v971_v28, %v383_v58  ;;  %v979_v31 = vadd.f32 %v973_v29, %v382_v23  ;;  %v447_v32 = vsub.f32 %v439_v26, %v971_v28  ;;  %v446_v33 = vsub.f32 %v438_v27, %v973_v29 }
 0x11b   : > { %v443_v58 = vsub.f32 %v347_v9, %v947_v12  ;;  %v442_v23 = vsub.f32 %v346_v11, %v949_v13  ;;  %v463_v11 = vsub.f32 %v213_v4, %v853_v34 }
 0x11c   : > { %v455_v37 = vmul.f32 0.5, %v447_v32  ;;  %v454_v41 = vmul.f32 0.5, %v446_v33  ;;  %v445_v33 = vsub.f32 %v349_v18, %v959_v20 }
 0x11d   : > { %v985_v46 = vpop.permute.xlu1 %404  ;;  %v987_v6 = vpop.permute.xlu0 %402  ;;  %v495_v62 = vsub.f32 %v463_v11, %v913_v56 }
 0x11e   : > { %v990_v50 = vadd.f32 %v985_v46, %v385_v7  ;;  %v993_v52 = vadd.f32 %v987_v6, %v384_v8  ;;  %528 = vrot.lane.b32.xlu1 %v455_v37, %s741_s16  ;;  %526 = vrot.lane.b32.xlu0 %v454_v41, %s741_s16  ;;  %v449_v15 = vsub.f32 %v441_v36, %v985_v46 }
 0x11f   : > { %v448_v55 = vsub.f32 %v440_v43, %v987_v6 }
 0x120   : > { %v457_v59 = vmul.f32 0.5, %v449_v15  ;;  %v471_v15 = vadd.f32 %v463_v11, %v913_v56 }
 0x121   : > { %v1001_v0 = vpop.permute.xlu1 %408  ;;  %v1003_v7 = vpop.permute.xlu0 %406  ;;  %v456_v26 = vmul.f32 0.5, %v448_v55 }
 0x122   : > { %v1006_v8 = vadd.f32 %v1001_v0, %v387_v16  ;;  %v1009_v27 = vadd.f32 %v1003_v7, %v386_v17  ;;  %532 = vrot.lane.b32.xlu1 %v457_v59, %s741_s16  ;;  %v451_v32 = vsub.f32 %v443_v58, %v1001_v0  ;;  %v450_v9 = vsub.f32 %v442_v23, %v1003_v7 }
 0x123   : > { %530 = vrot.lane.b32.xlu0 %v456_v26, %s741_s16  ;;  %v444_v16 = vsub.f32 %v348_v19, %v961_v21  ;;  %v462_v17 = vsub.f32 %v212_v5, %v855_v35  ;;  %v465_v35 = vsub.f32 %v215_v51, %v861_v38  ;;  %v479_v18 = vsub.f32 %v471_v15, %v971_v28 }
 0x124   : > { %v459_v36 = vmul.f32 0.5, %v451_v32  ;;  %v458_v37 = vmul.f32 0.5, %v450_v9  ;;  %v464_v19 = vsub.f32 %v214_v53, %v863_v39  ;;  %v467_v38 = vsub.f32 %v217_v60, %v875_v3 }
 0x125   : > { %v1023_v41 = vpop.permute.xlu1 %412  ;;  %v1025_v43 = vpop.permute.xlu0 %410  ;;  %v470_v4 = vadd.f32 %v462_v17, %v915_v57  ;;  %v473_v58 = vadd.f32 %v465_v35, %v933_v63  ;;  %v487_v45 = vmul.f32 0.5, %v479_v18  ;;  %v466_v39 = vsub.f32 %v216_v24, %v877_v44 }
 0x126   : > { %536 = vrot.lane.b32.xlu1 %v459_v36, %s741_s16  ;;  %v453_v34 = vsub.f32 %v445_v33, %v1023_v41  ;;  %v452_v40 = vsub.f32 %v444_v16, %v1025_v43  ;;  %v472_v23 = vadd.f32 %v464_v19, %v935_v2  ;;  %v475_v59 = vadd.f32 %v467_v38, %v947_v12 }
 0x127   : > { %534 = vrot.lane.b32.xlu0 %v458_v37, %s741_s16  ;;  %v478_v55 = vsub.f32 %v470_v4, %v973_v29  ;;  %v481_v51 = vsub.f32 %v473_v58, %v985_v46  ;;  %v474_v26 = vadd.f32 %v466_v39, %v949_v13  ;;  %v469_v3 = vsub.f32 %v219_v10, %v891_v48 }
 0x128   : > { %v461_v42 = vmul.f32 0.5, %v453_v34  ;;  %v460_v5 = vmul.f32 0.5, %v452_v40  ;;  %v480_v53 = vsub.f32 %v472_v23, %v987_v6  ;;  %v483_v60 = vsub.f32 %v475_v59, %v1001_v0 }
 0x129   : > { %v486_v47 = vmul.f32 0.5, %v478_v55  ;;  %v489_v14 = vmul.f32 0.5, %v481_v51  ;;  %v468_v44 = vsub.f32 %v218_v1, %v893_v49  ;;  %v482_v24 = vsub.f32 %v474_v26, %v1003_v7 }
 0x12a   : > { %540 = vrot.lane.b32.xlu1 %v461_v42, %s741_s16  ;;  %v488_v54 = vmul.f32 0.5, %v480_v53  ;;  %v477_v32 = vadd.f32 %v469_v3, %v959_v20  ;;  %v491_v61 = vmul.f32 0.5, %v483_v60  ;;  %v494_v49 = vsub.f32 %v462_v17, %v915_v57 }
 0x12b   : > { %538 = vrot.lane.b32.xlu0 %v460_v5, %s741_s16  ;;  %v476_v9 = vadd.f32 %v468_v44, %v961_v21  ;;  %v490_v10 = vmul.f32 0.5, %v482_v24  ;;  %v503_v16 = vadd.f32 %v495_v62, %v971_v28  ;;  %v497_v15 = vsub.f32 %v465_v35, %v933_v63 }
 0x12c   : > { %v485_v48 = vsub.f32 %v477_v32, %v1023_v41  ;;  %v502_v37 = vadd.f32 %v494_v49, %v973_v29  ;;  %v496_v34 = vsub.f32 %v464_v19, %v935_v2  ;;  %v499_v40 = vsub.f32 %v467_v38, %v947_v12 }
 0x12d   : > { %v484_v33 = vsub.f32 %v476_v9, %v1025_v43  ;;  %v511_v56 = vmul.f32 0.5, %v503_v16  ;;  %v505_v11 = vadd.f32 %v497_v15, %v985_v46  ;;  %v498_v28 = vsub.f32 %v466_v39, %v949_v13 }
 0x12e   : > { %560 = vrot.lane.b32.xlu1 %v487_v45, %s742_s17  ;;  %v493_v1 = vmul.f32 0.5, %v485_v48  ;;  %v510_v57 = vmul.f32 0.5, %v502_v37  ;;  %v504_v17 = vadd.f32 %v496_v34, %v987_v6  ;;  %v507_v29 = vadd.f32 %v499_v40, %v1001_v0 }
 0x12f   : > { %558 = vrot.lane.b32.xlu0 %v486_v47, %s742_s17  ;;  %v492_v36 = vmul.f32 0.5, %v484_v33  ;;  %v513_v63 = vmul.f32 0.5, %v505_v11  ;;  %v506_v4 = vadd.f32 %v498_v28, %v1003_v7  ;;  %v501_v35 = vsub.f32 %v469_v3, %v959_v20 }
 0x130   : > { %v512_v2 = vmul.f32 0.5, %v504_v17  ;;  %v500_v46 = vsub.f32 %v468_v44, %v961_v21  ;;  %v515_v12 = vmul.f32 0.5, %v507_v29  ;;  %v431_v26 = vmul.f32 0.5, %v976_v30 }
 0x131   : > { %v509_v6 = vadd.f32 %v501_v35, %v1023_v41  ;;  %v514_v13 = vmul.f32 0.5, %v506_v4  ;;  %v433_v24 = vmul.f32 0.5, %v990_v50  ;;  %v429_v49 = vadd.f32 %v1023_v41, %v964_v22 }
 0x132   : > { %564 = vrot.lane.b32.xlu1 %v489_v14, %s742_s17  ;;  %v508_v42 = vadd.f32 %v500_v46, %v1025_v43  ;;  %v430_v14 = vmul.f32 0.5, %v979_v31  ;;  %v428_v37 = vadd.f32 %v1025_v43, %v967_v25  ;;  %v434_v15 = vmul.f32 0.5, %v1009_v27 }
 0x133   : > { %562 = vrot.lane.b32.xlu0 %v488_v54, %s742_s17  ;;  %v517_v0 = vmul.f32 0.5, %v509_v6  ;;  %v437_v11 = vmul.f32 0.5, %v429_v49 }
 0x134   : > { %v516_v7 = vmul.f32 0.5, %v508_v42 }
 0x136   : > { %568 = vrot.lane.b32.xlu1 %v491_v61, %s742_s17  ;;  %v432_v61 = vmul.f32 0.5, %v993_v52 }
 0x137   : > { %566 = vrot.lane.b32.xlu0 %v490_v10, %s742_s17 }
 0x13a   : > { %572 = vrot.lane.b32.xlu1 %v493_v1, %s742_s17  ;;  %v435_v1 = vmul.f32 0.5, %v1006_v8 }
 0x13b   : > { %570 = vrot.lane.b32.xlu0 %v492_v36, %s742_s17 }
 0x13e   : > { %592 = vrot.lane.b32.xlu1 %v511_v56, %s743_s20 }
 0x13f   : > { %590 = vrot.lane.b32.xlu0 %v510_v57, %s743_s20  ;;  %v436_v57 = vmul.f32 0.5, %v428_v37 }
 0x142   : > { %596 = vrot.lane.b32.xlu1 %v513_v63, %s743_s20 }
 0x143   : > { %594 = vrot.lane.b32.xlu0 %v512_v2, %s743_s20 }
 0x146   : > { %600 = vrot.lane.b32.xlu1 %v515_v12, %s743_s20 }
 0x147   : > { %598 = vrot.lane.b32.xlu0 %v514_v13, %s743_s20 }
 0x14a   : > { %604 = vrot.lane.b32.xlu1 %v517_v0, %s743_s20 }
 0x14b   : > { %602 = vrot.lane.b32.xlu0 %v516_v7, %s743_s20 }
 0x190   : > { %v529_v20 = vpop.permute.xlu1 %528  ;;  %v527_v21 = vpop.permute.xlu0 %526 }
 0x191   : > { %v616_v60 = vsel %vm614_vm0, %v431_v26, %v529_v20  ;;  %v615_v44 = vsel %vm614_vm0, %v430_v14, %v527_v21 }
 0x194   : > { %v533_v5 = vpop.permute.xlu1 %532 }
 0x195   : > { %v531_v18 = vpop.permute.xlu0 %530  ;;  %v618_v10 = vsel %vm614_vm0, %v433_v24, %v533_v5 }
 0x196   : > { %v617_v33 = vsel %vm614_vm0, %v432_v61, %v531_v18 }
 0x198   : > { %v537_v19 = vpop.permute.xlu1 %536 }
 0x199   : > { %v535_v55 = vpop.permute.xlu0 %534  ;;  %v620_v22 = vsel %vm614_vm0, %v435_v1, %v537_v19 }
 0x19a   : > { %v619_v8 = vsel %vm614_vm0, %v434_v15, %v535_v55 }
 0x19c   : > { %v541_v58 = vpop.permute.xlu1 %540 }
 0x19d   : > { %v539_v23 = vpop.permute.xlu0 %538  ;;  %v622_v40 = vsel %vm614_vm0, %v437_v11, %v541_v58 }
 0x19e   : > { %v621_v28 = vsel %vm614_vm0, %v436_v57, %v539_v23 }
 0x1a0   : > { %v561_v38 = vpop.permute.xlu1 %560 }
 0x1a1   : > { %v559_v45 = vpop.permute.xlu0 %558  ;;  %v625_v30 = vsel %vm623_vm1, %v616_v60, %v561_v38 }
 0x1a2   : > { %v624_v31 = vsel %vm623_vm1, %v615_v44, %v559_v45 }
 0x1a4   : > { %v565_v51 = vpop.permute.xlu1 %564 }
 0x1a5   : > { %v563_v39 = vpop.permute.xlu0 %562  ;;  %v627_v50 = vsel %vm623_vm1, %v618_v10, %v565_v51 }
 0x1a6   : > { %v626_v52 = vsel %vm623_vm1, %v617_v33, %v563_v39 }
 0x1a8   : > { %v569_v47 = vpop.permute.xlu1 %568 }
 0x1a9   : > { %v567_v53 = vpop.permute.xlu0 %566  ;;  %v629_v41 = vsel %vm623_vm1, %v620_v22, %v569_v47 }
 0x1aa   : > { %v628_v25 = vsel %vm623_vm1, %v619_v8, %v567_v53 }
 0x1ac   : > { %v573_v59 = vpop.permute.xlu1 %572 }
 0x1ad   : > { %v571_v3 = vpop.permute.xlu0 %570  ;;  %v631_v63 = vsel %vm623_vm1, %v622_v40, %v573_v59 }
 0x1ae   : > { %v630_v2 = vsel %vm623_vm1, %v621_v28, %v571_v3 }
 0x1b0   : > { %v593_v54 = vpop.permute.xlu1 %592 }
 0x1b1   : > { %v634_v32 = vsel %vm632_vm2, %v625_v30, %v593_v54  ;;  %v591_v9 = vpop.permute.xlu0 %590 }
 0x1b2   : > { %643 = vst.msk [vmem:[%s1107_s4 + $0x8] sm:$0xff] %vm641_vm3, %v634_v32  ;;  %v633_v48 = vsel %vm632_vm2, %v624_v31, %v591_v9 }
 0x1b3   : > { %642 = vst.msk [vmem:[%s1107_s4] sm:$0xff] %vm641_vm3, %v633_v48 }
 0x1b4   : > { %v597_v62 = vpop.permute.xlu1 %596 }
 0x1b5   : > { %v636_v16 = vsel %vm632_vm2, %v627_v50, %v597_v62  ;;  %v595_v36 = vpop.permute.xlu0 %594 }
 0x1b6   : > { %645 = vst.msk [vmem:[%s1107_s4 + $0x18] sm:$0xff] %vm641_vm3, %v636_v16  ;;  %v635_v34 = vsel %vm632_vm2, %v626_v52, %v595_v36 }
 0x1b7   : > { %644 = vst.msk [vmem:[%s1107_s4 + $0x10] sm:$0xff] %vm641_vm3, %v635_v34 }
 0x1b8   : > { %v601_v56 = vpop.permute.xlu1 %600 }
 0x1b9   : > { %v638_v27 = vsel %vm632_vm2, %v629_v41, %v601_v56  ;;  %v599_v43 = vpop.permute.xlu0 %598 }
 0x1ba   : > { %647 = vst.msk [vmem:[%s1107_s4 + $0x28] sm:$0xff] %vm641_vm3, %v638_v27  ;;  %v637_v17 = vsel %vm632_vm2, %v628_v25, %v599_v43 }
 0x1bb   : > { %646 = vst.msk [vmem:[%s1107_s4 + $0x20] sm:$0xff] %vm641_vm3, %v637_v17 }
 0x1bc   : > { %v605_v29 = vpop.permute.xlu1 %604 }
 0x1bd   : > { %v640_v4 = vsel %vm632_vm2, %v631_v63, %v605_v29  ;;  %v603_v35 = vpop.permute.xlu0 %602 }
 0x1be   : > { %649 = vst.msk [vmem:[%s1107_s4 + $0x38] sm:$0xff] %vm641_vm3, %v640_v4  ;;  %v639_v46 = vsel %vm632_vm2, %v630_v2, %v603_v35 }
 0x1bf   : > { %648 = vst.msk [vmem:[%s1107_s4 + $0x30] sm:$0xff] %vm641_vm3, %v639_v46 }
 0x1c0 PF: > { %s13_s12 = sadd.s32 1, %s739_s12  }
 0x1c1   : > { %p10_p4 = scmp.ge.s32.totalorder %s13_s12, 4  }
 0x1c3   :  { %12 = sbr.rel (!%p10_p4) target bundleno = 1 (0x1), region = 62 }

// kernel: wave_attention_forward.5
= control target key start
LH: loop header
LB: loop body
LE: loop exit
PB: predicated region body
PF: predicated region fallthrough
CT: control target
= control target key end

     0   :  { %s1427_s15 = smov 0   ;;  %s1854_s0 = inlined_call_operand.vmem [shape: f32[128,128], index: 0, kind: input, shape index: {}]   ;;  %s1855_s1 = inlined_call_operand.vmem [shape: f32[32,8], index: 1, kind: input, shape index: {}]   ;;  %s1856_s2 = inlined_call_operand.vmem [shape: f32[1,8], index: 2, kind: input, shape index: {}]   ;;  %s1857_s3 = inlined_call_operand.vmem [shape: f32[128,32], index: 3, kind: output, shape index: {0}]   ;;  %s1858_s4 = inlined_call_operand.vmem [shape: f32[2,2,8], index: 4, kind: output, shape index: {1}]  }
   0x1 LB: > { %s1433_s16 = sadd.s32 4294967295, %s1393_s15   ;;  %p1194_p0 = scmp.ge.s32.totalorder %s1393_s15, 1  ;;  %s1393_s15 = sphi %s1427_s15, %s15_s15  }
   0x2   : > { %p166_p1 = scmp.lt.s32.totalorder %s1393_s15, 3 }
   0x4   : > { %p167_p2 = pnand %p1194_p0, %p166_p1 }
   0x5   : > { %s1195_s17 = sshll.u32 (!%p167_p2), %s1433_s16, 3  ;;  %s1395_s30 = smov (!%p167_p2), 96  }
   0x6   : > { %170 = sbr.rel (%p167_p2) target bundleno = 505 (0x1f9), region = 32  ;;  %p197_p3 = scmp.lt.s32.totalorder (!%p167_p2), %s1195_s17, 15 }
   0x7   : > { %s1396_s5 = smov (!%p167_p2), 64   ;;  %s1397_s6 = smov (!%p167_p2), 32  }
   0x8   : > { %s1233_s7 = sshll.u32 (!%p167_p2), %s1433_s16, 6  ;;  %s1398_s10 = smov (!%p167_p2), 8  }
   0x9   : > { %s1400_s11 = smov (!%p167_p2), 16   ;;  %s1401_s12 = smov (!%p167_p2), 24  }
   0xa   : > { %p208_p4 = scmp.lt.s32.totalorder (!%p167_p2), %s1433_s16, 1 }
   0xb   : > { %v1441_v0 = vld [vmem:[%s1855_s1 + $0x18] sm:$0xff]  ;;  %v1446_v1 = vld [vmem:[%s1855_s1 + $0x10] sm:$0xff]  ;;  %v1454_v2 = vld [vmem:[%s1855_s1 + $0x8] sm:$0xff]  ;;  %s1860_s17 = smov (!%p197_p3, %s1195_s17), 15  ;;  %vm231_vm0 = vcmask 261120   ;;  %v904_v38 = vlaneseq  ;;  %v913_v42 = vstv %s1233_s7  ;;  %vm868_vm9 = vcmask 64512  }
   0xc   : > { %1292 = vmatprep.subr.mxu0 %v1441_v0  ;;  %1312 = vmatprep.subr.mxu1 %v1441_v0  ;;  %v1465_v3 = vld [vmem:[%s1855_s1] sm:$0xff]  ;;  %s1196_s26 = sshll.u32 %s1860_s17, 3  ;;  %s1862_s16 = smov (!%p208_p4, %s1433_s16), 1  ;;  %vm1100_vm10 = vcmask 57344   ;;  %vm877_vm11 = vcmask 130048   ;;  %vm886_vm12 = vcmask 195584  }
   0xd   : > { %1293 = vmatpush3.msra.mxu0 %v1441_v0  ;;  %1313 = vmatpush3.msra.mxu1 %v1441_v0  ;;  %s1476_s29 = scalar_lea.vmem %s1854_s0, %s1196_s26  ;;  %v905_v40 = vshrl.u32 %v904_v38, 7  ;;  %v1544_v51 = vld [vmem:[%s1856_s2] ss:$0 sm:$0xff]  ;;  %s1199_s13 = sshll.u32 %s1862_s16, 1 }
   0xe   : > { %1294 = vmatprep.subr.mxu0 %v1446_v1  ;;  %1314 = vmatprep.subr.mxu1 %v1446_v1  ;;  %v212_v4 = vld [vmem:[%s1476_s29] sm:$0xff]  ;;  %v214_v5 = vld [vmem:[%s1476_s29 + $0x10] sm:$0xff]  ;;  %v213_v6 = vld [vmem:[%s1476_s29 + $0x8] sm:$0xff]  ;;  %s211_s19 = scalar_lea.vmem %s1858_s4, %s1199_s13  ;;  %s1803_s21 = scalar_lea.vmem %s1857_s3, %s1196_s26 }
   0xf   : > { %1295 = vmatpush3.msra.mxu0 %v1446_v1  ;;  %1315 = vmatpush3.msra.mxu1 %v1446_v1  ;;  %v215_v7 = vld [vmem:[%s1476_s29 + $0x18] sm:$0xff]  ;;  %v216_v8 = vld [vmem:[%s1476_s29 + $0x20] sm:$0xff]  ;;  %v217_v9 = vld [vmem:[%s1476_s29 + $0x28] sm:$0xff]  ;;  %v906_v43 = vadd.s32 8, %v905_v40  ;;  %v914_v45 = vadd.s32 %v913_v42, %v905_v40  ;;  %v908_v46 = vadd.s32 24, %v905_v40  ;;  %v907_v47 = vadd.s32 16, %v905_v40 }
  0x10   : > { %1296 = vmatprep.subr.mxu0 %v1454_v2  ;;  %1316 = vmatprep.subr.mxu1 %v1454_v2  ;;  %v218_v10 = vld [vmem:[%s1476_s29 + $0x30] sm:$0xff]  ;;  %v219_v11 = vld [vmem:[%s1476_s29 + $0x38] sm:$0xff]  ;;  %v910_v48 = vadd.s32 40, %v905_v40  ;;  %v909_v49 = vadd.s32 32, %v905_v40  ;;  %v912_v50 = vadd.s32 56, %v905_v40  ;;  %v911_v55 = vadd.s32 48, %v905_v40 }
  0x11   : > { %1297 = vmatpush3.msra.mxu0 %v1454_v2  ;;  %1317 = vmatpush3.msra.mxu1 %v1454_v2  ;;  %v915_v52 = vadd.s32 %v913_v42, %v906_v43  ;;  %vm922_vm1 = vcmp.lt.s32.totalorder %v914_v45, 128  ;;  %v917_v57 = vadd.s32 %v913_v42, %v908_v46  ;;  %v916_v58 = vadd.s32 %v913_v42, %v907_v47 }
  0x12   : > { %1298 = vmatprep.subr.mxu0 %v1465_v3  ;;  %1318 = vmatprep.subr.mxu1 %v1465_v3  ;;  %v919_v60 = vadd.s32 %v913_v42, %v910_v48  ;;  %v918_v62 = vadd.s32 %v913_v42, %v909_v49  ;;  %v921_v63 = vadd.s32 %v913_v42, %v912_v50 }
  0x13   : > { %361 = vrot.lane.b32.xlu0 %v212_v4, %s1395_s30  ;;  %365 = vrot.lane.b32.xlu1 %v214_v5, %s1395_s30  ;;  %vm923_vm2 = vcmp.lt.s32.totalorder %v915_v52, 128  ;;  %vm925_vm3 = vcmp.lt.s32.totalorder %v917_v57, 128  ;;  %vm924_vm4 = vcmp.lt.s32.totalorder %v916_v58, 128 }
  0x14   : > { %1299 = vmatpush3.msra.mxu0 %v1465_v3  ;;  %1300 = vmatprep.mubr.msk.f32.mxu0 %vm231_vm0, %v212_v4  ;;  %vm927_vm5 = vcmp.lt.s32.totalorder %v919_v60, 128  ;;  %vm926_vm6 = vcmp.lt.s32.totalorder %v918_v62, 128  ;;  %vm929_vm7 = vcmp.lt.s32.totalorder %v921_v63, 128 }
  0x15   : > { %1301 = vmatmul.mubr.msk.f32.vlgmr.msra.gmra.mxu0 %vm231_vm0, %v213_v6  ;;  %1332 = vmatprep.subr.mxu0 %v1441_v0 }
  0x16   : > { %1303 = vmatprep.mubr.msk.f32.mxu0 %vm231_vm0, %v214_v5  ;;  %1333 = vmatpush3.msra.mxu0 %v1441_v0 }
  0x17   : > { %363 = vrot.lane.b32.xlu0 %v213_v6, %s1395_s30  ;;  %367 = vrot.lane.b32.xlu1 %v215_v7, %s1395_s30 }
  0x18   : > { %1319 = vmatpush3.msra.mxu1 %v1465_v3  ;;  %1334 = vmatprep.subr.mxu0 %v1446_v1 }
  0x19   : > { %1304 = vmatmul.mubr.msk.f32.gmra.mxu0 %vm231_vm0, %v215_v7  ;;  %1352 = vmatprep.subr.mxu1 %v1441_v0 }
  0x1a   : > { %1306 = vmatprep.mubr.msk.f32.mxu0 %vm231_vm0, %v216_v8  ;;  %1335 = vmatpush3.msra.mxu0 %v1446_v1 }
  0x1b   : > { %369 = vrot.lane.b32.xlu0 %v216_v8, %s1395_s30  ;;  %371 = vrot.lane.b32.xlu1 %v217_v9, %s1395_s30 }
  0x1c   : > { %1336 = vmatprep.subr.mxu0 %v1454_v2 }
  0x1d   : > { %1307 = vmatmul.mubr.msk.f32.gmra.mxu0 %vm231_vm0, %v217_v9 }
  0x1e   : > { %1309 = vmatprep.mubr.msk.f32.mxu0 %vm231_vm0, %v218_v10  ;;  %1337 = vmatpush3.msra.mxu0 %v1454_v2 }
  0x1f   : > { %373 = vrot.lane.b32.xlu0 %v218_v10, %s1395_s30  ;;  %375 = vrot.lane.b32.xlu1 %v219_v11, %s1395_s30 }
  0x20   : > { %1338 = vmatprep.subr.mxu0 %v1465_v3 }
  0x21   : > { %1310 = vmatmul.mubr.msk.f32.gmra.mxu0 %vm231_vm0, %v219_v11 }
  0x22   : > { %1339 = vmatpush3.msra.mxu0 %v1465_v3 }
  0x23   : > { %498 = vrot.lane.b32.xlu0 %v212_v4, %s1396_s5  ;;  %500 = vrot.lane.b32.xlu1 %v213_v6, %s1396_s5 }
  0x27   : > { %635 = vrot.lane.b32.xlu0 %v212_v4, %s1397_s6  ;;  %637 = vrot.lane.b32.xlu1 %v213_v6, %s1397_s6 }
  0x2b   : > { %502 = vrot.lane.b32.xlu0 %v214_v5, %s1396_s5  ;;  %504 = vrot.lane.b32.xlu1 %v215_v7, %s1396_s5 }
  0x2f   : > { %639 = vrot.lane.b32.xlu0 %v214_v5, %s1397_s6  ;;  %641 = vrot.lane.b32.xlu1 %v215_v7, %s1397_s6 }
  0x33   : > { %506 = vrot.lane.b32.xlu0 %v216_v8, %s1396_s5  ;;  %508 = vrot.lane.b32.xlu1 %v217_v9, %s1396_s5 }
  0x37   : > { %643 = vrot.lane.b32.xlu0 %v216_v8, %s1397_s6  ;;  %645 = vrot.lane.b32.xlu1 %v217_v9, %s1397_s6 }
  0x3b   : > { %510 = vrot.lane.b32.xlu0 %v218_v10, %s1396_s5  ;;  %512 = vrot.lane.b32.xlu1 %v219_v11, %s1396_s5 }
  0x3f   : > { %647 = vrot.lane.b32.xlu0 %v218_v10, %s1397_s6  ;;  %649 = vrot.lane.b32.xlu1 %v219_v11, %s1397_s6 }
  0x85   : > { %v362_v12 = vpop.permute.xlu0 %361  ;;  %v366_v13 = vpop.permute.xlu1 %365 }
  0x86   : > { %1320 = vmatprep.mubr.msk.f32.mxu1 %vm231_vm0, %v362_v12 }
  0x89   : > { %v364_v14 = vpop.permute.xlu0 %363  ;;  %v368_v15 = vpop.permute.xlu1 %367 }
  0x8a   : > { %1321 = vmatmul.mubr.msk.f32.vlgmr.msra.gmra.mxu1 %vm231_vm0, %v364_v14 }
  0x8b   : > { %1323 = vmatprep.mubr.msk.f32.mxu1 %vm231_vm0, %v366_v13  ;;  %1353 = vmatpush3.msra.mxu1 %v1441_v0 }
  0x8c   : > { %1354 = vmatprep.subr.mxu1 %v1446_v1 }
  0x8d   : > { %v370_v16 = vpop.permute.xlu0 %369  ;;  %v372_v17 = vpop.permute.xlu1 %371  ;;  %1355 = vmatpush3.msra.mxu1 %v1446_v1 }
  0x8e   : > { %1324 = vmatmul.mubr.msk.f32.gmra.mxu1 %vm231_vm0, %v368_v15  ;;  %1356 = vmatprep.subr.mxu1 %v1454_v2 }
  0x8f   : > { %1326 = vmatprep.mubr.msk.f32.mxu1 %vm231_vm0, %v370_v16  ;;  %1357 = vmatpush3.msra.mxu1 %v1454_v2  ;;  %v920_v2 = vadd.s32 %v913_v42, %v911_v55 }
  0x90   : > { %1358 = vmatprep.subr.mxu1 %v1465_v3 }
  0x91   : > { %v374_v18 = vpop.permute.xlu0 %373  ;;  %v376_v19 = vpop.permute.xlu1 %375  ;;  %1359 = vmatpush3.msra.mxu1 %v1465_v3  ;;  %v1399_v3 = vmov 0.0   ;;  %vm928_vm8 = vcmp.lt.s32.totalorder %v920_v2, 128 }
  0x92   : > { %1327 = vmatmul.mubr.msk.f32.gmra.mxu1 %vm231_vm0, %v372_v17  ;;  %v1557_v4 = vsel %vm922_vm1, 1.0, %v1399_v3  ;;  %v1559_v6 = vsel %vm923_vm2, 1.0, %v1399_v3  ;;  %v1570_v12 = vsel %vm925_vm3, 1.0, %v1399_v3  ;;  %v1575_v14 = vsel %vm924_vm4, 1.0, %v1399_v3 }
  0x93   : > { %1329 = vmatprep.mubr.msk.f32.mxu1 %vm231_vm0, %v374_v18  ;;  %v1580_v16 = vsel %vm927_vm5, 1.0, %v1399_v3  ;;  %v1585_v18 = vsel %vm926_vm6, 1.0, %v1399_v3 }
  0x95   : > { %v499_v20 = vpop.permute.xlu0 %498  ;;  %v501_v21 = vpop.permute.xlu1 %500 }
  0x96   : > { %1330 = vmatmul.mubr.msk.f32.gmra.mxu1 %vm231_vm0, %v376_v19  ;;  %1340 = vmatprep.mubr.msk.f32.mxu0 %vm231_vm0, %v499_v20  ;;  %v1587_v19 = vsel %vm929_vm7, 1.0, %v1399_v3 }
  0x97   : > { %1341 = vmatmul.mubr.msk.f32.vlgmr.msra.gmra.mxu0 %vm231_vm0, %v501_v21 }
  0x99   : > { %v636_v22 = vpop.permute.xlu0 %635  ;;  %v638_v23 = vpop.permute.xlu1 %637 }
  0x9a   : > { %1360 = vmatprep.mubr.msk.f32.mxu1 %vm231_vm0, %v636_v22 }
  0x9b   : > { %1361 = vmatmul.mubr.msk.f32.vlgmr.msra.gmra.mxu1 %vm231_vm0, %v638_v23 }
  0x9d   : > { %v503_v24 = vpop.permute.xlu0 %502  ;;  %v505_v25 = vpop.permute.xlu1 %504 }
  0x9e   : > { %1343 = vmatprep.mubr.msk.f32.mxu0 %vm231_vm0, %v503_v24  ;;  %v1596_v24 = vsel %vm928_vm8, 1.0, %v1399_v3 }
  0x9f   : > { %1344 = vmatmul.mubr.msk.f32.gmra.mxu0 %vm231_vm0, %v505_v25 }
  0xa1   : > { %v640_v26 = vpop.permute.xlu0 %639  ;;  %v642_v27 = vpop.permute.xlu1 %641 }
  0xa2   : > { %1363 = vmatprep.mubr.msk.f32.mxu1 %vm231_vm0, %v640_v26 }
  0xa3   : > { %1364 = vmatmul.mubr.msk.f32.gmra.mxu1 %vm231_vm0, %v642_v27 }
  0xa5   : > { %v507_v28 = vpop.permute.xlu0 %506  ;;  %v509_v29 = vpop.permute.xlu1 %508 }
  0xa6   : > { %1346 = vmatprep.mubr.msk.f32.mxu0 %vm231_vm0, %v507_v28 }
  0xa7   : > { %1347 = vmatmul.mubr.msk.f32.gmra.mxu0 %vm231_vm0, %v509_v29 }
  0xa9   : > { %v644_v30 = vpop.permute.xlu0 %643  ;;  %v646_v31 = vpop.permute.xlu1 %645 }
  0xaa   : > { %1366 = vmatprep.mubr.msk.f32.mxu1 %vm231_vm0, %v644_v30 }
  0xab   : > { %1367 = vmatmul.mubr.msk.f32.gmra.mxu1 %vm231_vm0, %v646_v31 }
  0xad   : > { %v511_v32 = vpop.permute.xlu0 %510  ;;  %v513_v33 = vpop.permute.xlu1 %512 }
  0xae   : > { %1349 = vmatprep.mubr.msk.f32.mxu0 %vm231_vm0, %v511_v32 }
  0xaf   : > { %1350 = vmatmul.mubr.msk.f32.gmra.mxu0 %vm231_vm0, %v513_v33 }
  0xb1   : > { %v648_v34 = vpop.permute.xlu0 %647  ;;  %v650_v35 = vpop.permute.xlu1 %649 }
  0xb2   : > { %1369 = vmatprep.mubr.msk.f32.mxu1 %vm231_vm0, %v648_v34 }
  0xb3   : > { %1370 = vmatmul.mubr.msk.f32.gmra.mxu1 %vm231_vm0, %v650_v35 }
  0xd5   : > { %v1302_v36 = vpop.f32.mrf.mxu0 }
  0xd6   : > { %v1562_v7 = vadd.f32 %v1302_v36, %v1544_v51 }
  0xd7   : > { %v322_v37 = vpop.f32.mrf.mxu0 }
  0xd8   : > { %v1565_v8 = vadd.f32 %v1544_v51, %v322_v37  ;;  %v947_v25 = vmul.f32 %v1559_v6, %v1562_v7 }
  0xd9   : > { %v1305_v39 = vpop.f32.mrf.mxu0 }
  0xda   : > { %v1568_v9 = vadd.f32 %v1305_v39, %v1544_v51  ;;  %v946_v26 = vmul.f32 %v1557_v4, %v1565_v8 }
  0xdb   : > { %v332_v41 = vpop.f32.mrf.mxu0 }
  0xdc   : > { %v1573_v13 = vadd.f32 %v1544_v51, %v332_v41  ;;  %v949_v27 = vmul.f32 %v1570_v12, %v1568_v9  ;;  %v1023_v45 = vmul.f32 %v946_v26, %v1565_v8 }
  0xdd   : > { %v1308_v44 = vpop.f32.mrf.mxu0 }
  0xde   : > { %v1578_v15 = vadd.f32 %v1308_v44, %v1544_v51  ;;  %v948_v30 = vmul.f32 %v1575_v14, %v1573_v13  ;;  %v1024_v44 = vmul.f32 %v947_v25, %v1562_v7  ;;  %v1026_v48 = vmul.f32 %v949_v27, %v1568_v9 }
  0xdf   : > { %v342_v54 = vpop.f32.mrf.mxu0 }
  0xe0   : > { %v1583_v17 = vadd.f32 %v1544_v51, %v342_v54  ;;  %v951_v31 = vmul.f32 %v1580_v16, %v1578_v15  ;;  %v1025_v49 = vmul.f32 %v948_v30, %v1573_v13 }
  0xe1   : > { %v1311_v1 = vpop.f32.mrf.mxu0 }
  0xe2   : > { %v1591_v22 = vadd.f32 %v1311_v1, %v1544_v51  ;;  %v950_v36 = vmul.f32 %v1585_v18, %v1583_v17  ;;  %v1028_v54 = vmul.f32 %v951_v31, %v1578_v15 }
  0xe3   : > { %v352_v10 = vpop.f32.mrf.mxu0 }
  0xe4   : > { %v1594_v23 = vadd.f32 %v1544_v51, %v352_v10  ;;  %v953_v41 = vmul.f32 %v1587_v19, %v1591_v22 }
  0xe6   : > { %v1627_v42 = vmul.f32 %v1596_v24, %v1594_v23 }
  0xe8   : > { %v1650_v60 = vmul.f32 %v1627_v42, %v1594_v23 }
 0x14a   : > { %v1322_v53 = vpop.f32.mrf.mxu1 }
 0x14b   : > { %v1547_v56 = vadd.f32 %v1322_v53, %v1544_v51 }
 0x14c   : > { %v459_v59 = vpop.f32.mrf.mxu1 }
 0x14d   : > { %v1550_v61 = vadd.f32 %v1544_v51, %v459_v59  ;;  %782 = vrot.lane.b32.xlu1 %v1547_v56, %s1398_s10  ;;  %v955_v28 = vmul.f32 %v1559_v6, %v1547_v56  ;;  %v1646_v59 = vmul.f32 %v953_v41, %v1591_v22 }
 0x14e   : > { %v1325_v0 = vpop.f32.mrf.mxu1 }
 0x14f   : > { %780 = vrot.lane.b32.xlu0 %v1550_v61, %s1398_s10  ;;  %v475_v21 = vadd.f32 %v1325_v0, %v1544_v51  ;;  %v954_v35 = vmul.f32 %v1557_v4, %v1550_v61  ;;  %v1032_v46 = vmul.f32 %v955_v28, %v1547_v56  ;;  %v1027_v56 = vmul.f32 %v950_v36, %v1583_v17 }
 0x150   : > { %v469_v5 = vpop.f32.mrf.mxu1 }
 0x151   : > { %v470_v32 = vadd.f32 %v1544_v51, %v469_v5  ;;  %v957_v40 = vmul.f32 %v1570_v12, %v475_v21  ;;  %v1031_v55 = vmul.f32 %v954_v35, %v1550_v61  ;;  %v979_v61 = vadd.f32 %v955_v28, %v947_v25 }
 0x152   : > { %v1328_v11 = vpop.f32.mrf.mxu1  ;;  %v1040_v0 = vadd.f32 %v1032_v46, %v1024_v44  ;;  %v978_v1 = vadd.f32 %v954_v35, %v946_v26 }
 0x153   : > { %v1612_v33 = vadd.f32 %v1328_v11, %v1544_v51  ;;  %v956_v50 = vmul.f32 %v1575_v14, %v470_v32  ;;  %v1034_v58 = vmul.f32 %v957_v40, %v475_v21  ;;  %v1668_v28 = vadd.f32 %v957_v40, %v949_v27 }
 0x154   : > { %v479_v20 = vpop.f32.mrf.mxu1 }
 0x155   : > { %v1619_v37 = vadd.f32 %v1544_v51, %v479_v20  ;;  %v959_v52 = vmul.f32 %v1580_v16, %v1612_v33  ;;  %v1033_v3 = vmul.f32 %v956_v50, %v470_v32 }
 0x156   : > { %v1331_v29 = vpop.f32.mrf.mxu1 }
 0x157   : > { %v1342_v34 = vpop.f32.mrf.mxu0  ;;  %v958_v57 = vmul.f32 %v1585_v18, %v1619_v37  ;;  %v1653_v62 = vadd.f32 %v1331_v29, %v1544_v51  ;;  %v1036_v5 = vmul.f32 %v959_v52, %v1612_v33  ;;  %v1039_v29 = vadd.f32 %v1031_v55, %v1023_v45 }
 0x158   : > { %v602_v38 = vadd.f32 %v1342_v34, %v1544_v51  ;;  %v489_v39 = vpop.f32.mrf.mxu1  ;;  %v980_v45 = vadd.f32 %v956_v50, %v948_v30  ;;  %v1676_v46 = vadd.f32 %v959_v52, %v951_v31  ;;  %v1041_v27 = vadd.f32 %v1033_v3, %v1025_v49 }
 0x159   : > { %v596_v43 = vpop.f32.mrf.mxu0  ;;  %v1035_v34 = vmul.f32 %v958_v57, %v1619_v37  ;;  %v961_v35 = vmul.f32 %v1587_v19, %v1653_v62  ;;  %v1682_v40 = vadd.f32 %v1036_v5, %v1028_v54  ;;  %v490_v31 = vadd.f32 %v1544_v51, %v489_v39 }
 0x15a   : > { %v597_v47 = vadd.f32 %v1544_v51, %v596_v43  ;;  %814 = vrot.lane.b32.xlu1 %v602_v38, %s1400_s11  ;;  %v963_v25 = vmul.f32 %v1559_v6, %v602_v38 }
 0x15b   : > { %v1362_v53 = vpop.f32.mrf.mxu1 }
 0x15c   : > { %812 = vrot.lane.b32.xlu0 %v597_v47, %s1400_s11  ;;  %v1656_v2 = vadd.f32 %v1362_v53, %v1544_v51  ;;  %v962_v10 = vmul.f32 %v1557_v4, %v597_v47  ;;  %v1048_v30 = vmul.f32 %v963_v25, %v602_v38 }
 0x15d   : > { %v733_v63 = vpop.f32.mrf.mxu1 }
 0x15e   : > { %786 = vrot.lane.b32.xlu1 %v475_v21, %s1398_s10  ;;  %v1662_v11 = vadd.f32 %v1544_v51, %v733_v63  ;;  %v1670_v21 = vadd.f32 %v1034_v58, %v1026_v48  ;;  %v971_v53 = vmul.f32 %v1559_v6, %v1656_v2  ;;  %v1684_v48 = vadd.f32 %v958_v57, %v950_v36 }
 0x15f   : > { %v1345_v20 = vpop.f32.mrf.mxu0  ;;  %v1047_v55 = vmul.f32 %v962_v10, %v597_v47  ;;  %v1691_v6 = vadd.f32 %v961_v35, %v953_v41  ;;  %v986_v52 = vadd.f32 %v978_v1, %v962_v10  ;;  %v1038_v47 = vmul.f32 %v961_v35, %v1653_v62 }
 0x160   : > { %v612_v26 = vadd.f32 %v1345_v20, %v1544_v51  ;;  %784 = vrot.lane.b32.xlu0 %v470_v32, %s1398_s10  ;;  %v970_v43 = vmul.f32 %v1557_v4, %v1662_v11  ;;  %v1686_v4 = vadd.f32 %v1035_v34, %v1027_v56  ;;  %v987_v56 = vadd.f32 %v979_v61, %v963_v25 }
 0x161   : > { %v606_v44 = vpop.f32.mrf.mxu0  ;;  %v1064_v38 = vmul.f32 %v971_v53, %v1656_v2  ;;  %v1055_v57 = vadd.f32 %v1047_v55, %v1039_v29  ;;  %v1056_v5 = vadd.f32 %v1048_v30, %v1040_v0  ;;  %v960_v10 = vmul.f32 %v1596_v24, %v490_v31 }
 0x162   : > { %v607_v32 = vadd.f32 %v1544_v51, %v606_v44  ;;  %818 = vrot.lane.b32.xlu1 %v612_v26, %s1400_s11  ;;  %v1063_v49 = vmul.f32 %v970_v43, %v1662_v11  ;;  %v965_v39 = vmul.f32 %v1570_v12, %v612_v26  ;;  %v994_v41 = vadd.f32 %v986_v52, %v970_v43 }
 0x163   : > { %v1365_v58 = vpop.f32.mrf.mxu1  ;;  %v995_v20 = vadd.f32 %v987_v56, %v971_v53  ;;  %v1714_v43 = vadd.f32 %v1038_v47, %v1646_v59  ;;  %v1072_v0 = vadd.f32 %v1064_v38, %v1056_v5 }
 0x164   : > { %v964_v50 = vmul.f32 %v1575_v14, %v607_v32  ;;  %816 = vrot.lane.b32.xlu0 %v607_v32, %s1400_s11  ;;  %v1695_v54 = vadd.f32 %v1365_v58, %v1544_v51  ;;  %v1071_v34 = vadd.f32 %v1063_v49, %v1055_v57  ;;  %v1050_v44 = vmul.f32 %v965_v39, %v612_v26 }
 0x165   : > { %v743_v36 = vpop.f32.mrf.mxu1  ;;  %v1721_v58 = vadd.f32 %v960_v10, %v1627_v42  ;;  %v1003_v26 = vsel %vm868_vm9, %v995_v20, 0.0  ;;  %v989_v47 = vadd.f32 %v1668_v28, %v965_v39 }
 0x166   : > { %790 = vrot.lane.b32.xlu1 %v1612_v33, %s1398_s10  ;;  %v1049_v63 = vmul.f32 %v964_v50, %v607_v32  ;;  %v1703_v1 = vadd.f32 %v1544_v51, %v743_v36  ;;  %v988_v25 = vadd.f32 %v980_v45, %v964_v50  ;;  %v973_v33 = vmul.f32 %v1570_v12, %v1695_v54 }
 0x167   : > { %v1348_v3 = vpop.f32.mrf.mxu0  ;;  %v1079_v50 = vsel %vm868_vm9, %v1071_v34, 0.0  ;;  %v1080_v36 = vsel %vm868_vm9, %v1072_v0, 0.0  ;;  %v1058_v38 = vadd.f32 %v1050_v44, %v1670_v21 }
 0x168   : > { %v622_v61 = vadd.f32 %v1348_v3, %v1544_v51  ;;  %788 = vrot.lane.b32.xlu0 %v1619_v37, %s1398_s10  ;;  %v972_v29 = vmul.f32 %v1575_v14, %v1703_v1  ;;  %v1002_v37 = vsel %vm868_vm9, %v994_v41, 0.0  ;;  %v1057_v32 = vadd.f32 %v1049_v63, %v1041_v27 }
 0x169   : > { %v616_v35 = vpop.f32.mrf.mxu0  ;;  %v1037_v14 = vmul.f32 %v960_v10, %v490_v31  ;;  %v1066_v27 = vmul.f32 %v973_v33, %v1695_v54  ;;  %v1004_v42 = vadd.f32 %v1003_v26, %v1002_v37  ;;  %v1081_v5 = vadd.f32 %v1080_v36, %v1079_v50 }
 0x16a   : > { %v617_v53 = vadd.f32 %v1544_v51, %v616_v35  ;;  %822 = vrot.lane.b32.xlu1 %v622_v61, %s1400_s11  ;;  %v996_v45 = vadd.f32 %v988_v25, %v972_v29  ;;  %v1065_v55 = vmul.f32 %v972_v29, %v1703_v1  ;;  %v967_v56 = vmul.f32 %v1580_v16, %v622_v61 }
 0x16b   : > { %v1368_v12 = vpop.f32.mrf.mxu1  ;;  %v997_v10 = vadd.f32 %v989_v47, %v973_v33  ;;  %v1074_v39 = vadd.f32 %v1066_v27, %v1058_v38  ;;  %v1045_v47 = vadd.f32 %v1037_v14, %v1650_v60 }
 0x16c   : > { %v966_v59 = vmul.f32 %v1585_v18, %v617_v53  ;;  %v1725_v30 = vadd.f32 %v1368_v12, %v1544_v51  ;;  %820 = vrot.lane.b32.xlu0 %v617_v53, %s1400_s11  ;;  %v1073_v52 = vadd.f32 %v1065_v55, %v1057_v32  ;;  %v1005_v57 = vsel %vm868_vm9, %v996_v45, 0.0 }
 0x16d   : > { %v753_v49 = vpop.f32.mrf.mxu1  ;;  %v1006_v29 = vadd.f32 %v1005_v57, %v1004_v42  ;;  %v1052_v35 = vmul.f32 %v967_v56, %v622_v61  ;;  %v1007_v45 = vsel %vm868_vm9, %v997_v10, 0.0  ;;  %v1084_v55 = vsel %vm868_vm9, %v1074_v39, 0.0 }
 0x16e   : > { %794 = vrot.lane.b32.xlu1 %v1653_v62, %s1398_s10  ;;  %v1051_v41 = vmul.f32 %v966_v59, %v617_v53  ;;  %v1739_v63 = vadd.f32 %v1544_v51, %v753_v49  ;;  %v975_v20 = vmul.f32 %v1580_v16, %v1725_v30  ;;  %v1082_v62 = vsel %vm868_vm9, %v1073_v52, 0.0 }
 0x16f   : > { %v1351_v3 = vpop.f32.mrf.mxu0  ;;  %v990_v21 = vadd.f32 %v1684_v48, %v966_v59  ;;  %v991_v16 = vadd.f32 %v1676_v46, %v967_v56  ;;  %v1083_v37 = vadd.f32 %v1082_v62, %v1081_v5  ;;  %v1060_v59 = vadd.f32 %v1052_v35, %v1682_v40 }
 0x170   : > { %v632_v28 = vadd.f32 %v1351_v3, %v1544_v51  ;;  %792 = vrot.lane.b32.xlu0 %v490_v31, %s1398_s10  ;;  %v974_v34 = vmul.f32 %v1585_v18, %v1739_v63  ;;  %v1059_v31 = vadd.f32 %v1051_v41, %v1686_v4  ;;  %v1068_v18 = vmul.f32 %v975_v20, %v1725_v30 }
 0x171   : > { %v626_v25 = vpop.f32.mrf.mxu0  ;;  %v999_v26 = vadd.f32 %v991_v16, %v975_v20  ;;  %v1008_v50 = vadd.f32 %v1007_v45, %v1006_v29  ;;  %v1085_v57 = vadd.f32 %v1084_v55, %v1083_v37 }
 0x172   : > { %v969_v33 = vmul.f32 %v1587_v19, %v632_v28  ;;  %v627_v0 = vadd.f32 %v1544_v51, %v626_v25  ;;  %826 = vrot.lane.b32.xlu1 %v632_v28, %s1400_s11  ;;  %v998_v44 = vadd.f32 %v990_v21, %v974_v34  ;;  %v1067_v53 = vmul.f32 %v974_v34, %v1739_v63 }
 0x173   : > { %v1371_v48 = vpop.f32.mrf.mxu1  ;;  %v1076_v56 = vadd.f32 %v1068_v18, %v1060_v59  ;;  %v1011_v5 = vsel %vm868_vm9, %v999_v26, 0.0 }
 0x174   : > { %v968_v32 = vmul.f32 %v1596_v24, %v627_v0  ;;  %v769_v61 = vadd.f32 %v1371_v48, %v1544_v51  ;;  %824 = vrot.lane.b32.xlu0 %v627_v0, %s1400_s11  ;;  %v1009_v46 = vsel %vm868_vm9, %v998_v44, 0.0  ;;  %v1075_v4 = vadd.f32 %v1067_v53, %v1059_v31 }
 0x175   : > { %v763_v12 = vpop.f32.mrf.mxu1  ;;  %v1054_v27 = vmul.f32 %v969_v33, %v632_v28  ;;  %v1010_v38 = vadd.f32 %v1009_v46, %v1008_v50  ;;  %v993_v40 = vadd.f32 %v1691_v6, %v969_v33  ;;  %v1088_v6 = vsel %vm868_vm9, %v1076_v56, 0.0 }
 0x176   : > { %846 = vrot.lane.b32.xlu1 %v1656_v2, %s1401_s12  ;;  %v1086_v52 = vsel %vm868_vm9, %v1075_v4, 0.0  ;;  %v1053_v49 = vmul.f32 %v968_v32, %v627_v0  ;;  %v977_v36 = vmul.f32 %v1587_v19, %v769_v61  ;;  %v764_v42 = vadd.f32 %v1544_v51, %v763_v12 }
 0x177   : > { %v992_v41 = vadd.f32 %v1721_v58, %v968_v32  ;;  %v1087_v19 = vadd.f32 %v1086_v52, %v1085_v57  ;;  %v1062_v51 = vadd.f32 %v1054_v27, %v1714_v43  ;;  %v1012_v20 = vadd.f32 %v1011_v5, %v1010_v38 }
 0x178   : > { %844 = vrot.lane.b32.xlu0 %v1662_v11, %s1401_s12  ;;  %v1070_v2 = vmul.f32 %v977_v36, %v769_v61  ;;  %v976_v3 = vmul.f32 %v1596_v24, %v764_v42  ;;  %v1061_v60 = vadd.f32 %v1053_v49, %v1045_v47  ;;  %v1001_v14 = vadd.f32 %v993_v40, %v977_v36 }
 0x179   : > { %v1089_v39 = vadd.f32 %v1088_v6, %v1087_v19 }
 0x17a   : > { %850 = vrot.lane.b32.xlu1 %v1695_v54, %s1401_s12  ;;  %v1000_v10 = vadd.f32 %v992_v41, %v976_v3  ;;  %v1069_v11 = vmul.f32 %v976_v3, %v764_v42  ;;  %v1078_v24 = vadd.f32 %v1070_v2, %v1062_v51  ;;  %v1015_v54 = vsel %vm868_vm9, %v1001_v14, 0.0 }
 0x17c   : > { %848 = vrot.lane.b32.xlu0 %v1703_v1, %s1401_s12  ;;  %v1013_v58 = vsel %vm868_vm9, %v1000_v10, 0.0  ;;  %v1077_v28 = vadd.f32 %v1069_v11, %v1061_v60  ;;  %v1092_v1 = vsel %vm868_vm9, %v1078_v24, 0.0 }
 0x17d   : > { %v1014_v43 = vadd.f32 %v1013_v58, %v1012_v20 }
 0x17e   : > { %854 = vrot.lane.b32.xlu1 %v1725_v30, %s1401_s12  ;;  %v1090_v62 = vsel %vm868_vm9, %v1077_v28, 0.0 }
 0x17f   : > { %v1016_v21 = vadd.f32 %v1015_v54, %v1014_v43  ;;  %v1091_v34 = vadd.f32 %v1090_v62, %v1089_v39 }
 0x180   : > { %852 = vrot.lane.b32.xlu0 %v1739_v63, %s1401_s12 }
 0x181   : > { %v1017_v25 = vrot.slane %v1016_v21, 4  ;;  %v1093_v29 = vadd.f32 %v1092_v1, %v1091_v34 }
 0x182   : > { %858 = vrot.lane.b32.xlu1 %v769_v61, %s1401_s12 }
 0x183   : > { %v1018_v35 = vadd.f32 %v1017_v25, %v1016_v21  ;;  %v1094_v33 = vrot.slane %v1093_v29, 4 }
 0x184   : > { %856 = vrot.lane.b32.xlu0 %v764_v42, %s1401_s12 }
 0x185   : > { %v1019_v30 = vrot.slane %v1018_v35, 2  ;;  %v1095_v0 = vadd.f32 %v1094_v33, %v1093_v29 }
 0x187   : > { %v1020_v16 = vadd.f32 %v1019_v30, %v1018_v35  ;;  %v1096_v31 = vrot.slane %v1095_v0, 2 }
 0x189   : > { %v1021_v44 = vrot.slane %v1020_v16, 1  ;;  %v1097_v53 = vadd.f32 %v1096_v31, %v1095_v0 }
 0x18b   : > { %v1022_v63 = vadd.f32 %v1021_v44, %v1020_v16  ;;  %v1098_v48 = vrot.slane %v1097_v53, 1 }
 0x18d   : > { %v1099_v37 = vadd.f32 %v1098_v48, %v1097_v53  ;;  %1101 = vst.msk [vmem:[%s211_s19] sm:$0x1] %vm1100_vm10, %v1022_v63 }
 0x18f   : > { %1102 = vst.msk [vmem:[%s211_s19 + $0x1] sm:$0x1] %vm1100_vm10, %v1099_v37 }
 0x1bf   : > { %v783_v18 = vpop.permute.xlu1 %782 }
 0x1c0   : > { %v870_v47 = vsel %vm868_vm9, %v1562_v7, %v783_v18 }
 0x1c1   : > { %v781_v32 = vpop.permute.xlu0 %780 }
 0x1c2   : > { %v869_v57 = vsel %vm868_vm9, %v1565_v8, %v781_v32 }
 0x1cc   : > { %v815_v61 = vpop.permute.xlu1 %814 }
 0x1cd   : > { %v879_v56 = vsel %vm877_vm11, %v870_v47, %v815_v61 }
 0x1ce   : > { %v813_v45 = vpop.permute.xlu0 %812 }
 0x1cf   : > { %v878_v41 = vsel %vm877_vm11, %v869_v57, %v813_v45 }
 0x1d0   : > { %v787_v55 = vpop.permute.xlu1 %786 }
 0x1d1   : > { %v872_v2 = vsel %vm868_vm9, %v1568_v9, %v787_v55 }
 0x1d2   : > { %v785_v46 = vpop.permute.xlu0 %784 }
 0x1d3   : > { %v871_v8 = vsel %vm868_vm9, %v1573_v13, %v785_v46 }
 0x1d4   : > { %v819_v4 = vpop.permute.xlu1 %818 }
 0x1d5   : > { %v881_v5 = vsel %vm877_vm11, %v872_v2, %v819_v4 }
 0x1d6   : > { %v817_v12 = vpop.permute.xlu0 %816 }
 0x1d7   : > { %v880_v60 = vsel %vm877_vm11, %v871_v8, %v817_v12 }
 0x1d8   : > { %v791_v59 = vpop.permute.xlu1 %790 }
 0x1d9   : > { %v874_v9 = vsel %vm868_vm9, %v1578_v15, %v791_v59 }
 0x1da   : > { %v789_v26 = vpop.permute.xlu0 %788 }
 0x1db   : > { %v873_v13 = vsel %vm868_vm9, %v1583_v17, %v789_v26 }
 0x1dc   : > { %v823_v50 = vpop.permute.xlu1 %822 }
 0x1dd   : > { %v883_v11 = vsel %vm877_vm11, %v874_v9, %v823_v50 }
 0x1de   : > { %v821_v27 = vpop.permute.xlu0 %820 }
 0x1df   : > { %v882_v24 = vsel %vm877_vm11, %v873_v13, %v821_v27 }
 0x1e0   : > { %v795_v52 = vpop.permute.xlu1 %794 }
 0x1e1   : > { %v876_v15 = vsel %vm868_vm9, %v1591_v22, %v795_v52 }
 0x1e2   : > { %v793_v49 = vpop.permute.xlu0 %792 }
 0x1e3   : > { %v875_v17 = vsel %vm868_vm9, %v1594_v23, %v793_v49 }
 0x1e4   : > { %v827_v36 = vpop.permute.xlu1 %826 }
 0x1e5   : > { %v885_v43 = vsel %vm877_vm11, %v876_v15, %v827_v36 }
 0x1e6   : > { %v825_v42 = vpop.permute.xlu0 %824 }
 0x1e7   : > { %v884_v62 = vsel %vm877_vm11, %v875_v17, %v825_v42 }
 0x1e8   : > { %v847_v38 = vpop.permute.xlu1 %846 }
 0x1e9   : > { %v888_v40 = vsel %vm886_vm12, %v879_v56, %v847_v38 }
 0x1ea   : > { %896 = vst.msk [vmem:[%s1803_s21 + $0x8] sm:$0xff] %vm231_vm0, %v888_v40  ;;  %v845_v7 = vpop.permute.xlu0 %844 }
 0x1eb   : > { %v887_v3 = vsel %vm886_vm12, %v878_v41, %v845_v7 }
 0x1ec   : > { %895 = vst.msk [vmem:[%s1803_s21] sm:$0xff] %vm231_vm0, %v887_v3  ;;  %v851_v19 = vpop.permute.xlu1 %850 }
 0x1ed   : > { %v890_v51 = vsel %vm886_vm12, %v881_v5, %v851_v19 }
 0x1ee   : > { %898 = vst.msk [vmem:[%s1803_s21 + $0x18] sm:$0xff] %vm231_vm0, %v890_v51  ;;  %v849_v14 = vpop.permute.xlu0 %848 }
 0x1ef   : > { %v889_v10 = vsel %vm886_vm12, %v880_v60, %v849_v14 }
 0x1f0   : > { %897 = vst.msk [vmem:[%s1803_s21 + $0x10] sm:$0xff] %vm231_vm0, %v889_v10  ;;  %v855_v20 = vpop.permute.xlu1 %854 }
 0x1f1   : > { %v892_v6 = vsel %vm886_vm12, %v883_v11, %v855_v20 }
 0x1f2   : > { %900 = vst.msk [vmem:[%s1803_s21 + $0x28] sm:$0xff] %vm231_vm0, %v892_v6  ;;  %v853_v58 = vpop.permute.xlu0 %852 }
 0x1f3   : > { %v891_v28 = vsel %vm886_vm12, %v882_v24, %v853_v58 }
 0x1f4   : > { %899 = vst.msk [vmem:[%s1803_s21 + $0x20] sm:$0xff] %vm231_vm0, %v891_v28  ;;  %v859_v39 = vpop.permute.xlu1 %858 }
 0x1f5   : > { %v894_v54 = vsel %vm886_vm12, %v885_v43, %v859_v39 }
 0x1f6   : > { %902 = vst.msk [vmem:[%s1803_s21 + $0x38] sm:$0xff] %vm231_vm0, %v894_v54  ;;  %v857_v21 = vpop.permute.xlu0 %856 }
 0x1f7   : > { %v893_v34 = vsel %vm886_vm12, %v884_v62, %v857_v21 }
 0x1f8   : > { %901 = vst.msk [vmem:[%s1803_s21 + $0x30] sm:$0xff] %vm231_vm0, %v893_v34 }
 0x1f9 PF: > { %s15_s15 = sadd.s32 1, %s1393_s15  }
 0x1fa   : > { %p12_p5 = scmp.ge.s32.totalorder %s15_s15, 4  }
 0x1fc   :  { %14 = sbr.rel (!%p12_p5) target bundleno = 1 (0x1), region = 74 }

// kernel: wave_attention_forward.7
= control target key start
LH: loop header
LB: loop body
LE: loop exit
PB: predicated region body
PF: predicated region fallthrough
CT: control target
= control target key end

     0   :  { %s2463_s18 = smov 0   ;;  %s3130_s0 = inlined_call_operand.vmem [shape: f32[2,100,32], index: 0, kind: input, shape index: {}]   ;;  %s3131_s1 = inlined_call_operand.vmem [shape: f32[9,32,32], index: 1, kind: input, shape index: {}]   ;;  %s3132_s2 = inlined_call_operand.vmem [shape: f32[1,32], index: 2, kind: input, shape index: {}]   ;;  %s3133_s3 = inlined_call_operand.vmem [shape: f32[78,1], index: 3, kind: input, shape index: {}]   ;;  %s3134_s4 = inlined_call_operand.vmem [shape: f32[2,78,32], index: 4, kind: output, shape index: {0}]   ;;  %s3135_s5 = inlined_call_operand.vmem [shape: f32[2,2,32], index: 5, kind: output, shape index: {1}]  }
   0x1 LB: > { %s1937_s19 = sadd.s32 4294967295, %s2430_s18   ;;  %p1941_p0 = scmp.ge.s32.totalorder %s2430_s18, 1  ;;  %s2430_s18 = sphi %s2463_s18, %s16_s18  }
   0x2   : > { %p190_p1 = scmp.lt.s32.totalorder %s2430_s18, 3 }
   0x4   : > { %p191_p2 = pnand %p1941_p0, %p190_p1 }
   0x6   : > { %194 = sbr.rel (%p191_p2) target bundleno = 335 (0x14f), region = 36 }
   0xb   : > { %v1948_v0 = vld [vmem:[%s3131_s1 + $0x38] sm:$0xff]  ;;  %v1947_v1 = vld [vmem:[%s3131_s1 + $0x30] sm:$0xff]  ;;  %p222_p3 = scmp.lt.s32.totalorder %s1937_s19, 1  ;;  %v1946_v2 = vld [vmem:[%s3131_s1 + $0x28] sm:$0xff]  ;;  %vm268_vm0 = vcmask 1046528   ;;  %vm288_vm1 = vcmask 261120  }
   0xc   : > { %2403 = vmatprep.subr.mxu1 %v1948_v0  ;;  %2196 = vmatprep.subr.mxu0 %v1948_v0  ;;  %v1945_v3 = vld [vmem:[%s3131_s1 + $0x20] sm:$0xff]  ;;  %v252_v4 = vld [vmem:[%s3131_s1 + $0x18] sm:$0xff]  ;;  %v2432_v26 = vmov 0   ;;  %v251_v27 = vld [vmem:[%s3131_s1 + $0x10] sm:$0xff]  ;;  %vm564_vm2 = vcmask 1045504   ;;  %vm1351_vm3 = vcmask 1042432  }
   0xd   : > { %2407 = vmatpush3.msra.mxu1 %v1948_v0  ;;  %2197 = vmatpush3.msra.mxu0 %v1948_v0  ;;  %s3149_s19 = smov (!%p222_p3, %s1937_s19), 1  ;;  %v1972_v5 = vld [vmem:[%s3131_s1 + $0x58] sm:$0xff]  ;;  %v250_v34 = vld [vmem:[%s3131_s1 + $0x8] sm:$0xff]  ;;  %v1971_v35 = vld [vmem:[%s3131_s1 + $0x50] sm:$0xff]  ;;  %vm1523_vm4 = vcmask 1041408   ;;  %vm872_vm5 = vcmask 1044480  }
   0xe   : > { %2404 = vmatprep.subr.mxu1 %v1947_v1  ;;  %2198 = vmatprep.subr.mxu0 %v1947_v1  ;;  %s2411_s28 = smul.u32 104, %s3149_s19  ;;  %v249_v38 = vld [vmem:[%s3131_s1] sm:$0xff]  ;;  %v1970_v42 = vld [vmem:[%s3131_s1 + $0x48] sm:$0xff]  ;;  %v1986_v46 = vld [vmem:[%s3131_s1 + $0x78] sm:$0xff]  ;;  %vm1044_vm6 = vcmask 1043456   ;;  %vm1716_vm7 = vcmask 259072  }
   0xf   : > { %2408 = vmatpush3.msra.mxu1 %v1947_v1  ;;  %2199 = vmatpush3.msra.mxu0 %v1947_v1  ;;  %v1969_v44 = vld [vmem:[%s3131_s1 + $0x40] sm:$0xff]  ;;  %v2000_v50 = vld [vmem:[%s3131_s1 + $0x98] sm:$0xff]  ;;  %v1985_v55 = vld [vmem:[%s3131_s1 + $0x70] sm:$0xff]  ;;  %s2412_s26 = smul.u32 80, %s3149_s19  ;;  %s1944_s8 = sshll.u32 %s3149_s19, 1  ;;  %vm1813_vm8 = vcmask 253952  }
  0x10   : > { %2405 = vmatprep.subr.mxu1 %v1946_v2  ;;  %2200 = vmatprep.subr.mxu0 %v1946_v2  ;;  %s2489_s6 = scalar_lea.vmem %s3130_s0, %s2411_s28  ;;  %v1999_v59 = vld [vmem:[%s3131_s1 + $0x90] sm:$0xff]  ;;  %v1984_v0 = vld [vmem:[%s3131_s1 + $0x68] sm:$0xff]  ;;  %s235_s11 = scalar_lea.vmem %s3135_s5, %s1944_s8 }
  0x11   : > { %2409 = vmatpush3.msra.mxu1 %v1946_v2  ;;  %2201 = vmatpush3.msra.mxu0 %v1946_v2  ;;  %v2498_v6 = vld [vmem:[%s2489_s6 + $0x20] sm:$0xff]  ;;  %v2501_v7 = vld [vmem:[%s2489_s6 + $0x28] sm:$0xff]  ;;  %v2504_v8 = vld [vmem:[%s2489_s6 + $0x30] sm:$0xff]  ;;  %s3059_s7 = scalar_lea.vmem %s3134_s4, %s2412_s26 }
  0x12   : > { %2406 = vmatprep.subr.mxu1 %v1945_v3  ;;  %2202 = vmatprep.subr.mxu0 %v1945_v3  ;;  %v276_v9 = vrot.slane %v2498_v6, 1  ;;  %v278_v10 = vrot.slane %v2501_v7, 1  ;;  %v280_v11 = vrot.slane %v2504_v8, 1  ;;  %v2510_v12 = vld [vmem:[%s2489_s6] sm:$0xff]  ;;  %v2513_v13 = vld [vmem:[%s2489_s6 + $0x8] sm:$0xff]  ;;  %v2516_v14 = vld [vmem:[%s2489_s6 + $0x38] sm:$0xff] }
  0x13   : > { %2410 = vmatpush3.msra.mxu1 %v1945_v3  ;;  %2203 = vmatpush3.msra.mxu0 %v1945_v3  ;;  %v269_v15 = vrot.slane %v2510_v12, 1  ;;  %v270_v16 = vrot.slane %v2513_v13, 1  ;;  %v282_v17 = vrot.slane %v2516_v14, 1  ;;  %v2522_v18 = vld [vmem:[%s2489_s6 + $0x10] sm:$0xff]  ;;  %v2525_v19 = vld [vmem:[%s2489_s6 + $0x40] sm:$0xff]  ;;  %v2528_v20 = vld [vmem:[%s2489_s6 + $0x18] sm:$0xff] }
  0x14   : > { %2219 = vmatprep.subr.mxu1 %v252_v4  ;;  %2242 = vmatprep.subr.mxu0 %v1972_v5  ;;  %v279_v21 = vsel %vm268_vm0, %v276_v9, %v278_v10  ;;  %v281_v22 = vsel %vm268_vm0, %v278_v10, %v280_v11  ;;  %v272_v23 = vrot.slane %v2522_v18, 1  ;;  %v284_v24 = vrot.slane %v2525_v19, 1  ;;  %v2535_v25 = vld [vmem:[%s2489_s6 + $0x48] sm:$0xff] }
  0x15   : > { %2422 = vset.pattern.permute.xlu0 %v2432_v26  ;;  %2423 = vset.pattern.permute.xlu1 %v2432_v26  ;;  %v271_v28 = vsel %vm268_vm0, %v269_v15, %v270_v16  ;;  %v283_v29 = vsel %vm268_vm0, %v280_v11, %v282_v17  ;;  %v274_v30 = vrot.slane %v2528_v20, 1  ;;  %v286_v31 = vrot.slane %v2535_v25, 1 }
  0x16   : > { %2210 = vmatprep.mubr.msk.f32.mxu1 %vm288_vm1, %v279_v21  ;;  %2204 = vmatprep.mubr.msk.f32.mxu0 %vm288_vm1, %v271_v28  ;;  %v273_v32 = vsel %vm268_vm0, %v270_v16, %v272_v23  ;;  %v285_v33 = vsel %vm268_vm0, %v282_v17, %v284_v24  ;;  %v565_v39 = vrot.slane %v2510_v12, 2  ;;  %v566_v40 = vrot.slane %v2513_v13, 2  ;;  %v1998_v21 = vld [vmem:[%s3131_s1 + $0x88] sm:$0xff] }
  0x17   : > { %2211 = vmatmul.mubr.msk.f32.vlgmr.msra.gmra.mxu1 %vm288_vm1, %v281_v22  ;;  %2205 = vmatmul.mubr.msk.f32.vlgmr.msra.gmra.mxu0 %vm288_vm1, %v273_v32  ;;  %v275_v36 = vsel %vm268_vm0, %v272_v23, %v274_v30  ;;  %v287_v37 = vsel %vm268_vm0, %v284_v24, %v286_v31  ;;  %v277_v41 = vsel %vm268_vm0, %v274_v30, %v276_v9  ;;  %v568_v43 = vrot.slane %v2522_v18, 2 }
  0x18   : > { %2220 = vmatpush3.msra.mxu1 %v252_v4  ;;  %2213 = vmatprep.mubr.msk.f32.mxu1 %vm288_vm1, %v283_v29  ;;  %v567_v45 = vsel %vm564_vm2, %v565_v39, %v566_v40  ;;  %v570_v47 = vrot.slane %v2528_v20, 2  ;;  %v572_v49 = vrot.slane %v2498_v6, 2  ;;  %v574_v51 = vrot.slane %v2501_v7, 2 }
  0x19   : > { %2221 = vmatprep.subr.mxu1 %v251_v27  ;;  %2243 = vmatpush3.msra.mxu0 %v1972_v5  ;;  %v2585_v48 = vsel %vm564_vm2, %v566_v40, %v568_v43  ;;  %v576_v52 = vrot.slane %v2504_v8, 2  ;;  %v578_v53 = vrot.slane %v2516_v14, 2  ;;  %v580_v56 = vrot.slane %v2525_v19, 2  ;;  %v1997_v40 = vld [vmem:[%s3131_s1 + $0x80] sm:$0xff] }
  0x1a   : > { %2222 = vmatpush3.msra.mxu1 %v251_v27  ;;  %2244 = vmatprep.subr.mxu0 %v1971_v35  ;;  %v2600_v54 = vsel %vm564_vm2, %v568_v43, %v570_v47  ;;  %v2607_v57 = vsel %vm564_vm2, %v570_v47, %v572_v49  ;;  %v2610_v58 = vrot.slane %v2535_v25, 2  ;;  %v2620_v60 = vsel %vm564_vm2, %v572_v49, %v574_v51  ;;  %v1983_v27 = vld [vmem:[%s3131_s1 + $0x60] sm:$0xff] }
  0x1b   : > { %2214 = vmatmul.mubr.msk.f32.gmra.mxu1 %vm288_vm1, %v285_v33  ;;  %2223 = vmatprep.subr.mxu1 %v250_v34  ;;  %v2623_v61 = vsel %vm564_vm2, %v574_v51, %v576_v52  ;;  %v2626_v62 = vsel %vm564_vm2, %v576_v52, %v578_v53  ;;  %v1352_v63 = vrot.slane %v2522_v18, 5  ;;  %v2637_v1 = vsel %vm564_vm2, %v578_v53, %v580_v56  ;;  %v1718_v52 = vld [vmem:[%s3133_s3] sm:$0xff]  ;;  %v1720_v53 = vld [vmem:[%s3133_s3 + $0x10] sm:$0xff] }
  0x1c   : > { %2224 = vmatpush3.msra.mxu1 %v250_v34  ;;  %2207 = vmatprep.mubr.msk.f32.mxu0 %vm288_vm1, %v275_v36  ;;  %v873_v2 = vrot.slane %v2513_v13, 3  ;;  %v1353_v3 = vrot.slane %v2528_v20, 5  ;;  %v1524_v4 = vrot.slane %v2522_v18, 6  ;;  %v2644_v5 = vsel %vm564_vm2, %v580_v56, %v2610_v58 }
  0x1d   : > { %2216 = vmatprep.mubr.msk.f32.mxu1 %vm288_vm1, %v287_v37  ;;  %2245 = vmatpush3.msra.mxu0 %v1971_v35  ;;  %v1525_v9 = vrot.slane %v2528_v20, 6  ;;  %v1355_v10 = vrot.slane %v2498_v6, 5  ;;  %v1527_v11 = vrot.slane %v2498_v6, 6  ;;  %v1357_v15 = vrot.slane %v2501_v7, 5 }
  0x1e   : > { %2225 = vmatprep.subr.mxu1 %v249_v38  ;;  %2208 = vmatmul.mubr.msk.f32.gmra.mxu0 %vm288_vm1, %v277_v41  ;;  %v1529_v16 = vrot.slane %v2501_v7, 6  ;;  %v1359_v17 = vrot.slane %v2504_v8, 5  ;;  %v1531_v26 = vrot.slane %v2504_v8, 6  ;;  %v1533_v33 = vrot.slane %v2516_v14, 6 }
  0x1f   : > { %2217 = vmatmul.mubr.msk.f32.gmra.mxu1 %vm288_vm1, %v286_v31  ;;  %2246 = vmatprep.subr.mxu0 %v1970_v42  ;;  %v2663_v22 = vsel %vm1523_vm4, %v1524_v4, %v1525_v9  ;;  %v2666_v23 = vsel %vm1351_vm3, %v1353_v3, %v1355_v10  ;;  %v2669_v24 = vsel %vm1523_vm4, %v1525_v9, %v1527_v11  ;;  %v1361_v31 = vrot.slane %v2516_v14, 5 }
  0x20   : > { %2226 = vmatpush3.msra.mxu1 %v249_v38  ;;  %2247 = vmatpush3.msra.mxu0 %v1970_v42  ;;  %v2680_v28 = vsel %vm1351_vm3, %v1355_v10, %v1357_v15  ;;  %v2683_v29 = vsel %vm1523_vm4, %v1527_v11, %v1529_v16  ;;  %v2686_v30 = vsel %vm1351_vm3, %v1357_v15, %v1359_v17  ;;  %v1363_v34 = vrot.slane %v2525_v19, 5  ;;  %v2026_v10 = vld [vmem:[%s3131_s1 + $0xc8] sm:$0xff] }
  0x21   : > { %2227 = vmatprep.mubr.msk.f32.mxu1 %vm288_vm1, %v2510_v12  ;;  %2248 = vmatprep.subr.mxu0 %v1969_v44  ;;  %v2654_v12 = vsel %vm1351_vm3, %v1352_v63, %v1353_v3  ;;  %v2692_v32 = vsel %vm1523_vm4, %v1529_v16, %v1531_v26  ;;  %v1535_v35 = vrot.slane %v2525_v19, 6  ;;  %v874_v36 = vrot.slane %v2522_v18, 3 }
  0x22   : > { %2250 = vmatprep.mubr.msk.f32.mxu0 %vm288_vm1, %v567_v45  ;;  %2249 = vmatpush3.msra.mxu0 %v1969_v44  ;;  %v2701_v37 = vsel %vm1351_vm3, %v1359_v17, %v1361_v31  ;;  %v1365_v38 = vrot.slane %v2535_v25, 5  ;;  %v1537_v39 = vrot.slane %v2535_v25, 6  ;;  %v2709_v41 = vsel %vm1523_vm4, %v1531_v26, %v1533_v33  ;;  %v2014_v44 = vld [vmem:[%s3131_s1 + $0xb8] sm:$0xff]  ;;  %v2025_v26 = vld [vmem:[%s3131_s1 + $0xc0] sm:$0xff] }
  0x23   : > { %2265 = vmatprep.subr.mxu1 %v1986_v46  ;;  %2228 = vmatmul.mubr.msk.f32.vlgmr.msra.gmra.mxu1 %vm288_vm1, %v2513_v13  ;;  %v2712_v42 = vsel %vm1351_vm3, %v1361_v31, %v1363_v34  ;;  %v2715_v43 = vsel %vm1523_vm4, %v1533_v33, %v1535_v35  ;;  %v876_v47 = vrot.slane %v2528_v20, 3  ;;  %v875_v49 = vsel %vm872_vm5, %v873_v2, %v874_v36  ;;  %v2797_v17 = vld [vmem:[%s2489_s6 + $0x58] sm:$0xff] }
  0x24   : > { %2251 = vmatmul.mubr.msk.f32.vlgmr.msra.gmra.mxu0 %vm288_vm1, %v2585_v48  ;;  %2266 = vmatpush3.msra.mxu1 %v1986_v46  ;;  %v2727_v45 = vsel %vm1351_vm3, %v1363_v34, %v1365_v38  ;;  %v2732_v46 = vsel %vm1523_vm4, %v1535_v35, %v1537_v39  ;;  %v878_v51 = vrot.slane %v2498_v6, 3  ;;  %v880_v56 = vrot.slane %v2501_v7, 3 }
  0x25   : > { %2288 = vmatprep.subr.mxu0 %v2000_v50  ;;  %2230 = vmatprep.mubr.msk.f32.mxu1 %vm288_vm1, %v2522_v18  ;;  %v882_v63 = vrot.slane %v2504_v8, 3  ;;  %v884_v3 = vrot.slane %v2516_v14, 3  ;;  %v886_v9 = vrot.slane %v2525_v19, 3  ;;  %v888_v15 = vrot.slane %v2535_v25, 3 }
  0x26   : > { %2289 = vmatpush3.msra.mxu0 %v2000_v50  ;;  %2253 = vmatprep.mubr.msk.f32.mxu0 %vm288_vm1, %v2600_v54  ;;  %v2028_v50 = vld [vmem:[%s3131_s1 + $0xd8] sm:$0xff]  ;;  %v881_v2 = vsel %vm872_vm5, %v878_v51, %v880_v56  ;;  %v1045_v34 = vrot.slane %v2513_v13, 4  ;;  %v1046_v35 = vrot.slane %v2522_v18, 4 }
  0x27   : > { %2267 = vmatprep.subr.mxu1 %v1985_v55  ;;  %2231 = vmatmul.mubr.msk.f32.gmra.mxu1 %vm288_vm1, %v2528_v20  ;;  %v883_v4 = vsel %vm872_vm5, %v880_v56, %v882_v63  ;;  %v885_v11 = vsel %vm872_vm5, %v882_v63, %v884_v3  ;;  %v2056_v13 = vld [vmem:[%s3131_s1 + $0x118] sm:$0xff]  ;;  %v2040_v56 = vld [vmem:[%s3131_s1 + $0xe8] sm:$0xff] }
  0x28   : > { %2254 = vmatmul.mubr.msk.f32.gmra.mxu0 %vm288_vm1, %v2607_v57  ;;  %2268 = vmatpush3.msra.mxu1 %v1985_v55  ;;  %v877_v55 = vsel %vm872_vm5, %v874_v36, %v876_v47  ;;  %v1048_v36 = vrot.slane %v2528_v20, 4  ;;  %v1050_v20 = vrot.slane %v2498_v6, 4 }
  0x29   : > { %2290 = vmatprep.subr.mxu0 %v1999_v59  ;;  %2233 = vmatprep.mubr.msk.f32.mxu1 %vm288_vm1, %v2498_v6 }
  0x2a   : > { %2256 = vmatprep.mubr.msk.f32.mxu0 %vm288_vm1, %v2620_v60  ;;  %2291 = vmatpush3.msra.mxu0 %v1999_v59  ;;  %v879_v59 = vsel %vm872_vm5, %v876_v47, %v878_v51  ;;  %v1721_v47 = vld [vmem:[%s3133_s3 + $0x18] sm:$0xff]  ;;  %v1051_v6 = vsel %vm1044_vm6, %v1048_v36, %v1050_v20  ;;  %v2041_v51 = vld [vmem:[%s3131_s1 + $0xf0] sm:$0xff] }
  0x2b   : > { %2269 = vmatprep.subr.mxu1 %v1984_v0  ;;  %2234 = vmatmul.mubr.msk.f32.gmra.mxu1 %vm288_vm1, %v2501_v7 }
  0x2c   : > { %2257 = vmatmul.mubr.msk.f32.gmra.mxu0 %vm288_vm1, %v2623_v61  ;;  %2270 = vmatpush3.msra.mxu1 %v1984_v0  ;;  %v2027_v0 = vld [vmem:[%s3131_s1 + $0xd0] sm:$0xff] }
  0x2d   : > { %2236 = vmatprep.mubr.msk.f32.mxu1 %vm288_vm1, %v2504_v8  ;;  %2259 = vmatprep.mubr.msk.f32.mxu0 %vm288_vm1, %v2626_v62 }
  0x2e   : > { %2292 = vmatprep.subr.mxu0 %v1998_v21  ;;  %2271 = vmatprep.subr.mxu1 %v1983_v27 }
  0x2f   : > { %2293 = vmatpush3.msra.mxu0 %v1998_v21  ;;  %2237 = vmatmul.mubr.msk.f32.gmra.mxu1 %vm288_vm1, %v2516_v14  ;;  %v887_v21 = vsel %vm872_vm5, %v884_v3, %v886_v9  ;;  %v2039_v3 = vld [vmem:[%s3131_s1 + $0xe0] sm:$0xff] }
  0x30   : > { %2260 = vmatmul.mubr.msk.f32.gmra.mxu0 %vm288_vm1, %v2637_v1  ;;  %2239 = vmatprep.mubr.msk.f32.mxu1 %vm288_vm1, %v2525_v19 }
  0x31   : > { %2262 = vmatprep.mubr.msk.f32.mxu0 %vm288_vm1, %v2644_v5  ;;  %2272 = vmatpush3.msra.mxu1 %v1983_v27  ;;  %v889_v27 = vsel %vm872_vm5, %v886_v9, %v888_v15 }
  0x32   : > { %2294 = vmatprep.subr.mxu0 %v1997_v40  ;;  %2311 = vmatprep.subr.mxu1 %v2014_v44 }
  0x33   : > { %2295 = vmatpush3.msra.mxu0 %v1997_v40  ;;  %2240 = vmatmul.mubr.msk.f32.gmra.mxu1 %vm288_vm1, %v2535_v25  ;;  %v1052_v40 = vrot.slane %v2501_v7, 4  ;;  %v1054_v7 = vrot.slane %v2504_v8, 4 }
  0x34   : > { %2263 = vmatmul.mubr.msk.f32.gmra.mxu0 %vm288_vm1, %v2610_v58  ;;  %2273 = vmatprep.mubr.msk.f32.mxu1 %vm288_vm1, %v2585_v48  ;;  %v2013_v48 = vld [vmem:[%s3131_s1 + $0xb0] sm:$0xff] }
  0x35   : > { %2296 = vmatprep.mubr.msk.f32.mxu0 %vm288_vm1, %v875_v49  ;;  %2334 = vmatprep.subr.mxu0 %v2028_v50  ;;  %v1053_v49 = vsel %vm1044_vm6, %v1050_v20, %v1052_v40  ;;  %v1055_v8 = vsel %vm1044_vm6, %v1052_v40, %v1054_v7 }
  0x36   : > { %1730 = vperm.xlu0 %2422, %v1718_v52   ;;  %1740 = vperm.xlu1 %2423, %v1720_v53   ;;  %v2055_v52 = vld [vmem:[%s3131_s1 + $0x110] sm:$0xff]  ;;  %v1058_v53 = vrot.slane %v2525_v19, 4  ;;  %v2054_v19 = vld [vmem:[%s3131_s1 + $0x108] sm:$0xff] }
  0x37   : > { %2274 = vmatmul.mubr.msk.f32.vlgmr.msra.gmra.mxu1 %vm288_vm1, %v2600_v54  ;;  %v2776_v54 = vld [vmem:[%s2489_s6 + $0x50] sm:$0xff] }
  0x38   : > { %2297 = vmatmul.mubr.msk.f32.vlgmr.msra.gmra.mxu0 %vm288_vm1, %v877_v55  ;;  %2312 = vmatpush3.msra.mxu1 %v2014_v44  ;;  %v890_v16 = vrot.slane %v2776_v54, 3  ;;  %v1719_v44 = vld [vmem:[%s3133_s3 + $0x8] sm:$0xff]  ;;  %v1060_v55 = vrot.slane %v2535_v25, 4  ;;  %v1062_v63 = vrot.slane %v2776_v54, 4 }
  0x39   : > { %2335 = vmatpush3.msra.mxu0 %v2028_v50  ;;  %2276 = vmatprep.mubr.msk.f32.mxu1 %vm288_vm1, %v2607_v57  ;;  %v2012_v57 = vld [vmem:[%s3131_s1 + $0xa8] sm:$0xff]  ;;  %v1056_v50 = vrot.slane %v2516_v14, 4 }
  0x3a   : > { %2299 = vmatprep.mubr.msk.f32.mxu0 %vm288_vm1, %v879_v59  ;;  %2313 = vmatprep.subr.mxu1 %v2013_v48  ;;  %v891_v33 = vsel %vm872_vm5, %v888_v15, %v890_v16  ;;  %v1063_v9 = vsel %vm1044_vm6, %v1060_v55, %v1062_v63  ;;  %v1723_v15 = vld [vmem:[%s3133_s3 + $0x28] sm:$0xff] }
  0x3b   : > { %2336 = vmatprep.subr.mxu0 %v2027_v0  ;;  %2277 = vmatmul.mubr.msk.f32.gmra.mxu1 %vm288_vm1, %v2620_v60  ;;  %v735_v60 = vrot.slane %v2776_v54, 2  ;;  %v1057_v14 = vsel %vm1044_vm6, %v1054_v7, %v1056_v50  ;;  %v1059_v59 = vsel %vm1044_vm6, %v1056_v50, %v1058_v53 }
  0x3c   : > { %2300 = vmatmul.mubr.msk.f32.gmra.mxu0 %vm288_vm1, %v881_v2  ;;  %2314 = vmatpush3.msra.mxu1 %v2013_v48  ;;  %v1064_v48 = vrot.slane %v2797_v17, 4  ;;  %v1061_v2 = vsel %vm1044_vm6, %v1058_v53, %v1060_v55 }
  0x3d   : > { %2279 = vmatprep.mubr.msk.f32.mxu1 %vm288_vm1, %v2623_v61  ;;  %2302 = vmatprep.mubr.msk.f32.mxu0 %vm288_vm1, %v883_v4  ;;  %v2011_v61 = vld [vmem:[%s3131_s1 + $0xa0] sm:$0xff]  ;;  %v736_v31 = vsel %vm564_vm2, %v2610_v58, %v735_v60  ;;  %v2042_v58 = vld [vmem:[%s3131_s1 + $0xf8] sm:$0xff] }
  0x3e   : > { %2337 = vmatpush3.msra.mxu0 %v2027_v0  ;;  %2315 = vmatprep.subr.mxu1 %v2012_v57  ;;  %v2878_v0 = vld [vmem:[%s2489_s6 + $0x60] sm:$0xf] }
  0x3f   : > { %2338 = vmatprep.subr.mxu0 %v2026_v10  ;;  %2280 = vmatmul.mubr.msk.f32.gmra.mxu1 %vm288_vm1, %v2626_v62  ;;  %v892_v62 = vrot.slane %v2797_v17, 3  ;;  %v2053_v4 = vld [vmem:[%s3131_s1 + $0x100] sm:$0xff] }
  0x40   : > { %2303 = vmatmul.mubr.msk.f32.gmra.mxu0 %vm288_vm1, %v885_v11  ;;  %2316 = vmatpush3.msra.mxu1 %v2012_v57  ;;  %v1217_v57 = vrot.slane %v2878_v0, 4  ;;  %v1722_v11 = vld [vmem:[%s3133_s3 + $0x20] sm:$0xff] }
  0x41   : > { %2282 = vmatprep.mubr.msk.f32.mxu1 %vm288_vm1, %v2637_v1  ;;  %2305 = vmatprep.mubr.msk.f32.mxu0 %vm288_vm1, %v887_v21  ;;  %v893_v18 = vsel %vm872_vm5, %v890_v16, %v892_v62  ;;  %v1047_v1 = vsel %vm1044_vm6, %v1045_v34, %v1046_v35  ;;  %v1724_v16 = vld [vmem:[%s3133_s3 + $0x30] sm:$0xff]  ;;  %v1725_v21 = vld [vmem:[%s3133_s3 + $0x38] sm:$0xff] }
  0x42   : > { %2339 = vmatpush3.msra.mxu0 %v2026_v10  ;;  %2317 = vmatprep.subr.mxu1 %v2011_v61  ;;  %v1065_v10 = vsel %vm1044_vm6, %v1062_v63, %v1064_v48 }
  0x43   : > { %2340 = vmatprep.subr.mxu0 %v2025_v26  ;;  %2283 = vmatmul.mubr.msk.f32.gmra.mxu1 %vm288_vm1, %v2644_v5  ;;  %v1049_v5 = vsel %vm1044_vm6, %v1046_v35, %v1048_v36 }
  0x44   : > { %2306 = vmatmul.mubr.msk.f32.gmra.mxu0 %vm288_vm1, %v889_v27  ;;  %2285 = vmatprep.mubr.msk.f32.mxu1 %vm288_vm1, %v736_v31 }
  0x45   : > { %2308 = vmatprep.mubr.msk.f32.mxu0 %vm288_vm1, %v891_v33  ;;  %2318 = vmatpush3.msra.mxu1 %v2011_v61  ;;  %v1726_v61 = vld [vmem:[%s3133_s3 + $0x40] sm:$0xff] }
  0x46   : > { %2341 = vmatpush3.msra.mxu0 %v2025_v26  ;;  %2357 = vmatprep.subr.mxu1 %v2042_v58  ;;  %v1727_v26 = vld [vmem:[%s3133_s3 + $0x48] sm:$0x3f] }
  0x47   : > { %2380 = vmatprep.subr.mxu0 %v2056_v13  ;;  %2286 = vmatmul.mubr.msk.f32.gmra.mxu1 %vm288_vm1, %v735_v60  ;;  %v1218_v60 = vsel %vm1044_vm6, %v1064_v48, %v1217_v57 }
  0x48   : > { %2309 = vmatmul.mubr.msk.f32.gmra.mxu0 %vm288_vm1, %v893_v18  ;;  %2319 = vmatprep.mubr.msk.f32.mxu1 %vm288_vm1, %v1047_v1 }
  0x49   : > { %2342 = vmatprep.mubr.msk.f32.mxu0 %vm288_vm1, %v1049_v5  ;;  %1735 = vperm.xlu0 %2422, %v1719_v44  }
  0x4a   : > { %1745 = vperm.xlu1 %2423, %v1721_v47  }
  0x4b   : > { %2320 = vmatmul.mubr.msk.f32.vlgmr.msra.gmra.mxu1 %vm288_vm1, %v1049_v5 }
  0x4c   : > { %2343 = vmatmul.mubr.msk.f32.vlgmr.msra.gmra.mxu0 %vm288_vm1, %v1051_v6  ;;  %2358 = vmatpush3.msra.mxu1 %v2042_v58 }
  0x4d   : > { %2381 = vmatpush3.msra.mxu0 %v2056_v13  ;;  %2322 = vmatprep.mubr.msk.f32.mxu1 %vm288_vm1, %v1051_v6 }
  0x4e   : > { %2345 = vmatprep.mubr.msk.f32.mxu0 %vm288_vm1, %v1053_v49  ;;  %2359 = vmatprep.subr.mxu1 %v2041_v51 }
  0x4f   : > { %2382 = vmatprep.subr.mxu0 %v2055_v52  ;;  %2323 = vmatmul.mubr.msk.f32.gmra.mxu1 %vm288_vm1, %v1053_v49 }
  0x50   : > { %2346 = vmatmul.mubr.msk.f32.gmra.mxu0 %vm288_vm1, %v1055_v8  ;;  %2360 = vmatpush3.msra.mxu1 %v2041_v51 }
  0x51   : > { %2325 = vmatprep.mubr.msk.f32.mxu1 %vm288_vm1, %v1055_v8  ;;  %2348 = vmatprep.mubr.msk.f32.mxu0 %vm288_vm1, %v1057_v14 }
  0x52   : > { %2383 = vmatpush3.msra.mxu0 %v2055_v52  ;;  %2361 = vmatprep.subr.mxu1 %v2040_v56 }
  0x53   : > { %2384 = vmatprep.subr.mxu0 %v2054_v19  ;;  %2326 = vmatmul.mubr.msk.f32.gmra.mxu1 %vm288_vm1, %v1057_v14 }
  0x54   : > { %2349 = vmatmul.mubr.msk.f32.gmra.mxu0 %vm288_vm1, %v1059_v59  ;;  %2362 = vmatpush3.msra.mxu1 %v2040_v56 }
  0x55   : > { %2328 = vmatprep.mubr.msk.f32.mxu1 %vm288_vm1, %v1059_v59  ;;  %2351 = vmatprep.mubr.msk.f32.mxu0 %vm288_vm1, %v1061_v2 }
  0x56   : > { %2385 = vmatpush3.msra.mxu0 %v2054_v19  ;;  %2363 = vmatprep.subr.mxu1 %v2039_v3 }
  0x57   : > { %2386 = vmatprep.subr.mxu0 %v2053_v4  ;;  %2329 = vmatmul.mubr.msk.f32.gmra.mxu1 %vm288_vm1, %v1061_v2 }
  0x58   : > { %2352 = vmatmul.mubr.msk.f32.gmra.mxu0 %vm288_vm1, %v1063_v9  ;;  %2331 = vmatprep.mubr.msk.f32.mxu1 %vm288_vm1, %v1063_v9 }
  0x59   : > { %2354 = vmatprep.mubr.msk.f32.mxu0 %vm288_vm1, %v1065_v10  ;;  %2364 = vmatpush3.msra.mxu1 %v2039_v3 }
  0x5a   : > { %2387 = vmatpush3.msra.mxu0 %v2053_v4  ;;  %1750 = vperm.xlu0 %2422, %v1722_v11  }
  0x5b   : > { %1755 = vperm.xlu1 %2423, %v1723_v15   ;;  %2332 = vmatmul.mubr.msk.f32.gmra.mxu1 %vm288_vm1, %v1065_v10 }
  0x5c   : > { %2355 = vmatmul.mubr.msk.f32.gmra.mxu0 %vm288_vm1, %v1218_v60  ;;  %2365 = vmatprep.mubr.msk.f32.mxu1 %vm288_vm1, %v2654_v12  ;;  %v1367_v12 = vrot.slane %v2776_v54, 5 }
  0x5d   : > { %2388 = vmatprep.mubr.msk.f32.mxu0 %vm288_vm1, %v2663_v22  ;;  %v1539_v22 = vrot.slane %v2776_v54, 6 }
  0x5e   : > { %1760 = vperm.xlu0 %2422, %v1724_v16  }
  0x5f   : > { %1765 = vperm.xlu1 %2423, %v1725_v21   ;;  %2366 = vmatmul.mubr.msk.f32.vlgmr.msra.gmra.mxu1 %vm288_vm1, %v2666_v23  ;;  %v1369_v23 = vrot.slane %v2797_v17, 5 }
  0x60   : > { %2389 = vmatmul.mubr.msk.f32.vlgmr.msra.gmra.mxu0 %vm288_vm1, %v2669_v24  ;;  %2368 = vmatprep.mubr.msk.f32.mxu1 %vm288_vm1, %v2680_v28  ;;  %v1541_v24 = vrot.slane %v2797_v17, 6  ;;  %v1368_v28 = vsel %vm1351_vm3, %v1365_v38, %v1367_v12 }
  0x61   : > { %2391 = vmatprep.mubr.msk.f32.mxu0 %vm288_vm1, %v2683_v29  ;;  %v1540_v29 = vsel %vm1523_vm4, %v1537_v39, %v1539_v22 }
  0x62   : > { %1770 = vperm.xlu0 %2422, %v1726_v61  }
  0x63   : > { %1775 = vperm.xlu1 %2423, %v1727_v26   ;;  %2369 = vmatmul.mubr.msk.f32.gmra.mxu1 %vm288_vm1, %v2686_v30  ;;  %v1371_v30 = vrot.slane %v2878_v0, 5 }
  0x64   : > { %2392 = vmatmul.mubr.msk.f32.gmra.mxu0 %vm288_vm1, %v2692_v32  ;;  %2371 = vmatprep.mubr.msk.f32.mxu1 %vm288_vm1, %v2701_v37  ;;  %v1543_v32 = vrot.slane %v2878_v0, 6  ;;  %v1370_v37 = vsel %vm1351_vm3, %v1367_v12, %v1369_v23 }
  0x65   : > { %2394 = vmatprep.mubr.msk.f32.mxu0 %vm288_vm1, %v2709_v41  ;;  %v1542_v41 = vsel %vm1523_vm4, %v1539_v22, %v1541_v24  ;;  %v1372_v25 = vsel %vm1351_vm3, %v1369_v23, %v1371_v30 }
  0x66   : > { %v1544_v38 = vsel %vm1523_vm4, %v1541_v24, %v1543_v32 }
  0x67   : > { %2372 = vmatmul.mubr.msk.f32.gmra.mxu1 %vm288_vm1, %v2712_v42 }
  0x68   : > { %2395 = vmatmul.mubr.msk.f32.gmra.mxu0 %vm288_vm1, %v2715_v43  ;;  %2374 = vmatprep.mubr.msk.f32.mxu1 %vm288_vm1, %v2727_v45 }
  0x69   : > { %2397 = vmatprep.mubr.msk.f32.mxu0 %vm288_vm1, %v2732_v46 }
  0x6b   : > { %2375 = vmatmul.mubr.msk.f32.gmra.mxu1 %vm288_vm1, %v1368_v28 }
  0x6c   : > { %2398 = vmatmul.mubr.msk.f32.gmra.mxu0 %vm288_vm1, %v1540_v29  ;;  %2377 = vmatprep.mubr.msk.f32.mxu1 %vm288_vm1, %v1370_v37 }
  0x6d   : > { %2400 = vmatprep.mubr.msk.f32.mxu0 %vm288_vm1, %v1542_v41 }
  0x6f   : > { %2378 = vmatmul.mubr.msk.f32.gmra.mxu1 %vm288_vm1, %v1372_v25 }
  0x70   : > { %2401 = vmatmul.mubr.msk.f32.gmra.mxu0 %vm288_vm1, %v1544_v38 }
  0xd7   : > { %v2969_v39 = vpop.f32.mrf.mxu1  ;;  %v2206_v43 = vpop.f32.mrf.mxu0 }
  0xd9   : > { %v2971_v42 = vpop.f32.mrf.mxu1  ;;  %v375_v46 = vpop.f32.mrf.mxu0 }
  0xdb   : > { %v2973_v45 = vpop.f32.mrf.mxu1 }
  0xdd   : > { %v2975_v54 = vpop.f32.mrf.mxu1 }
  0xde   : > { %v2209_v17 = vpop.f32.mrf.mxu0 }
  0xdf   : > { %v2977_v27 = vpop.f32.mrf.mxu1 }
  0xe0   : > { %v385_v31 = vpop.f32.mrf.mxu0 }
  0xe1   : > { %v2979_v62 = vpop.f32.mrf.mxu1 }
  0xe3   : > { %v2229_v33 = vpop.f32.mrf.mxu1 }
  0xe4   : > { %v2252_v34 = vpop.f32.mrf.mxu0  ;;  %v516_v23 = vadd.f32 %v2229_v33, %v2206_v43 }
  0xe5   : > { %v510_v35 = vpop.f32.mrf.mxu1 }
  0xe6   : > { %v670_v36 = vpop.f32.mrf.mxu0  ;;  %v511_v29 = vadd.f32 %v510_v35, %v375_v46  ;;  %v720_v37 = vadd.f32 %v2252_v34, %v516_v23  ;;  %v3039_v23 = vpop.permute.xlu1 %1740 }
  0xe7   : > { %v2232_v58 = vpop.f32.mrf.mxu1 }
  0xe8   : > { %v2255_v13 = vpop.f32.mrf.mxu0  ;;  %v526_v41 = vadd.f32 %v2232_v58, %v2209_v17 }
  0xe9   : > { %v520_v18 = vpop.f32.mrf.mxu1 }
  0xea   : > { %v680_v20 = vpop.f32.mrf.mxu0  ;;  %v521_v25 = vadd.f32 %v520_v18, %v385_v31  ;;  %v722_v43 = vadd.f32 %v2255_v13, %v526_v41 }
  0xeb   : > { %v2235_v1 = vpop.f32.mrf.mxu1 }
  0xec   : > { %v2981_v5 = vpop.f32.mrf.mxu0  ;;  %v721_v33 = vadd.f32 %v680_v20, %v521_v25  ;;  %v536_v46 = vadd.f32 %v2235_v1, %v2969_v39 }
  0xed   : > { %v530_v40 = vpop.f32.mrf.mxu1 }
  0xee   : > { %v2983_v44 = vpop.f32.mrf.mxu0  ;;  %v531_v35 = vadd.f32 %v530_v40, %v2971_v42 }
  0xef   : > { %v2238_v47 = vpop.f32.mrf.mxu1 }
  0xf0   : > { %v2985_v6 = vpop.f32.mrf.mxu0  ;;  %v546_v17 = vadd.f32 %v2238_v47, %v2973_v45  ;;  %v724_v45 = vadd.f32 %v2981_v5, %v536_v46 }
  0xf1   : > { %v540_v7 = vpop.f32.mrf.mxu1 }
  0xf2   : > { %v2987_v49 = vpop.f32.mrf.mxu0  ;;  %v541_v31 = vadd.f32 %v540_v7, %v2975_v54  ;;  %v723_v54 = vadd.f32 %v2983_v44, %v531_v35  ;;  %v726_v1 = vadd.f32 %v2985_v6, %v546_v17 }
  0xf3   : > { %v2241_v50 = vpop.f32.mrf.mxu1 }
  0xf4   : > { %v2989_v51 = vpop.f32.mrf.mxu0  ;;  %v725_v40 = vadd.f32 %v2987_v49, %v541_v31 }
  0xf5   : > { %v550_v52 = vpop.f32.mrf.mxu1 }
  0xf6   : > { %v2991_v8 = vpop.f32.mrf.mxu0  ;;  %v551_v18 = vadd.f32 %v550_v52, %v2979_v62 }
  0xf7   : > { %v2275_v53 = vpop.f32.mrf.mxu1 }
  0xf8   : > { %v2298_v14 = vpop.f32.mrf.mxu0  ;;  %v727_v7 = vadd.f32 %v2991_v8, %v551_v18 }
  0xf9   : > { %v807_v55 = vpop.f32.mrf.mxu1 }
  0xfa   : > { %v980_v56 = vpop.f32.mrf.mxu0 }
  0xfb   : > { %v2278_v19 = vpop.f32.mrf.mxu1 }
  0xfc   : > { %v2301_v59 = vpop.f32.mrf.mxu0  ;;  %v859_v13 = vadd.f32 %v2278_v19, %v722_v43 }
  0xfd   : > { %v817_v63 = vpop.f32.mrf.mxu1 }
  0xfe   : > { %v990_v48 = vpop.f32.mrf.mxu0  ;;  %v858_v20 = vadd.f32 %v817_v63, %v721_v33 }
  0xff   : > { %v2281_v0 = vpop.f32.mrf.mxu1 }
 0x100   : > { %v2993_v2 = vpop.f32.mrf.mxu0 }
 0x101   : > { %v827_v3 = vpop.f32.mrf.mxu1 }
 0x102   : > { %v2995_v4 = vpop.f32.mrf.mxu0  ;;  %v860_v19 = vadd.f32 %v827_v3, %v723_v54 }
 0x103   : > { %3136 = vst [vmem:[#allocation2_spill] sm:$0xff] %v2995_v4  ;;  %v2284_v9 = vpop.f32.mrf.mxu1 }
 0x104   : > { %v2997_v57 = vpop.f32.mrf.mxu0  ;;  %v863_v5 = vadd.f32 %v2284_v9, %v726_v1 }
 0x105   : > { %3137 = vst [vmem:[#allocation3_spill] sm:$0xff] %v2997_v57  ;;  %v837_v10 = vpop.f32.mrf.mxu1 }
 0x106   : > { %v2999_v11 = vpop.f32.mrf.mxu0  ;;  %v862_v6 = vadd.f32 %v837_v10, %v725_v40  ;;  %v3048_v10 = vld [vmem:[%s3132_s2] ss:$0 sm:$0xff] }
 0x107   : > { %3138 = vst [vmem:[#allocation4_spill] sm:$0xff] %v2999_v11  ;;  %v2287_v15 = vpop.f32.mrf.mxu1  ;;  %v857_v11 = vadd.f32 %v2275_v53, %v720_v37 }
 0x108   : > { %v3001_v60 = vpop.f32.mrf.mxu0 }
 0x109   : > { %3139 = vst [vmem:[#allocation5_spill] sm:$0xff] %v3001_v60  ;;  %v847_v16 = vpop.f32.mrf.mxu1  ;;  %v1030_v53 = vadd.f32 %v2298_v14, %v857_v11  ;;  %v1031_v14 = vadd.f32 %v990_v48, %v858_v20  ;;  %v1746_v20 = vpop.permute.xlu1 %1745 }
 0x10a   : > { %v3003_v21 = vpop.f32.mrf.mxu0  ;;  %v3142_v3 = vld [vmem:[#allocation2_spill] sm:$0xff] }
 0x10b   : > { %3140 = vst [vmem:[#allocation6_spill] sm:$0xff] %v3003_v21  ;;  %v2321_v61 = vpop.f32.mrf.mxu1  ;;  %v719_v21 = vadd.f32 %v670_v36, %v511_v29  ;;  %v556_v36 = vadd.f32 %v2241_v50, %v2977_v27  ;;  %v1032_v50 = vadd.f32 %v2301_v59, %v859_v13  ;;  %v1033_v9 = vadd.f32 %v3142_v3, %v860_v19 }
 0x10c   : > { %v2344_v26 = vpop.f32.mrf.mxu0  ;;  %v1202_v42 = vadd.f32 %v2321_v61, %v1030_v53  ;;  %v1731_v61 = vpop.permute.xlu0 %1730  ;;  %v3143_v37 = vld [vmem:[#allocation3_spill] sm:$0xff] }
 0x10d   : > { %v1152_v12 = vpop.f32.mrf.mxu1  ;;  %v728_v62 = vadd.f32 %v2989_v51, %v556_v36  ;;  %v864_v51 = vadd.f32 %v847_v16, %v727_v7  ;;  %v1036_v41 = vadd.f32 %v3143_v37, %v863_v5 }
 0x10e   : > { %v1287_v22 = vpop.f32.mrf.mxu0  ;;  %v1337_v11 = vadd.f32 %v2344_v26, %v1202_v42  ;;  %v3144_v16 = vld [vmem:[#allocation4_spill] sm:$0xff] }
 0x10f   : > { %v2324_v24 = vpop.f32.mrf.mxu1 }
 0x110   : > { %v3005_v28 = vpop.f32.mrf.mxu0  ;;  %v1204_v49 = vadd.f32 %v2324_v24, %v1032_v50  ;;  %v1035_v24 = vadd.f32 %v3144_v16, %v862_v6  ;;  %v3146_v33 = vld [vmem:[#allocation5_spill] sm:$0xff]  ;;  %v1736_v13 = vpop.permute.xlu0 %1735 }
 0x111   : > { %3141 = vst [vmem:[#allocation7_spill] sm:$0xff] %v3005_v28  ;;  %v1162_v30 = vpop.f32.mrf.mxu1  ;;  %v856_v28 = vadd.f32 %v807_v55, %v719_v21 }
 0x112   : > { %v3007_v32 = vpop.f32.mrf.mxu0  ;;  %v1203_v29 = vadd.f32 %v1162_v30, %v1031_v14 }
 0x113   : > { %v3009_v38 = vpop.f32.mrf.mxu1  ;;  %v1029_v39 = vadd.f32 %v980_v56, %v856_v28  ;;  %v861_v56 = vadd.f32 %v2281_v0, %v724_v45  ;;  %v865_v28 = vadd.f32 %v2287_v15, %v728_v62 }
 0x114   : > { %v3011_v60 = vpop.f32.mrf.mxu0  ;;  %v1338_v17 = vadd.f32 %v3007_v32, %v1203_v29 }
 0x115   : > { %v3013_v57 = vpop.f32.mrf.mxu1  ;;  %v1201_v52 = vadd.f32 %v1152_v12, %v1029_v39  ;;  %v1034_v0 = vadd.f32 %v2993_v2, %v861_v56  ;;  %v1038_v46 = vadd.f32 %v3146_v33, %v865_v28  ;;  %v3147_v2 = vld [vmem:[#allocation6_spill] sm:$0xff] }
 0x116   : > { %v3015_v4 = vpop.f32.mrf.mxu0  ;;  %v1037_v35 = vadd.f32 %v3147_v2, %v864_v51  ;;  %v1205_v53 = vadd.f32 %v3013_v57, %v1033_v9 }
 0x117   : > { %v3021_v34 = vpop.f32.mrf.mxu1  ;;  %v1336_v12 = vadd.f32 %v1287_v22, %v1201_v52  ;;  %v1206_v31 = vadd.f32 %v3009_v38, %v1034_v0 }
 0x118   : > { %v3023_v58 = vpop.f32.mrf.mxu0  ;;  %v3145_v30 = vld [vmem:[#allocation7_spill] sm:$0xff]  ;;  %v1208_v32 = vadd.f32 %v3021_v34, %v1036_v41  ;;  %v1340_v34 = vadd.f32 %v3015_v4, %v1205_v53  ;;  %v1756_v4 = vpop.permute.xlu1 %1755 }
 0x119   : > { %v1182_v55 = vpop.f32.mrf.mxu1  ;;  %v1339_v25 = vadd.f32 %v3145_v30, %v1204_v49  ;;  %v1341_v14 = vadd.f32 %v3011_v60, %v1206_v31 }
 0x11a   : > { %v3027_v21 = vpop.f32.mrf.mxu0  ;;  %v1207_v38 = vadd.f32 %v1182_v55, %v1035_v24  ;;  %v1751_v24 = vpop.permute.xlu0 %1750 }
 0x11b   : > { %v2333_v47 = vpop.f32.mrf.mxu1 }
 0x11c   : > { %v3033_v27 = vpop.f32.mrf.mxu0  ;;  %v1210_v54 = vadd.f32 %v2333_v47, %v1038_v46  ;;  %v1342_v6 = vadd.f32 %v3027_v21, %v1207_v38 }
 0x11d   : > { %v1192_v63 = vpop.f32.mrf.mxu1 }
 0x11e   : > { %v3037_v44 = vpop.f32.mrf.mxu0  ;;  %v1209_v1 = vadd.f32 %v1192_v63, %v1037_v35  ;;  %v1343_v63 = vadd.f32 %v3023_v58, %v1208_v32  ;;  %v1345_v60 = vadd.f32 %v3033_v27, %v1210_v54 }
 0x11f   : > { %v2367_v8 = vpop.f32.mrf.mxu1 }
 0x120   : > { %v2390_v59 = vpop.f32.mrf.mxu0  ;;  %v1509_v48 = vadd.f32 %v2367_v8, %v1337_v11  ;;  %v3076_v29 = vadd.f32 %v3037_v44, %v1209_v1 }
 0x121   : > { %v1459_v26 = vpop.f32.mrf.mxu1 }
 0x122   : > { %v1631_v15 = vpop.f32.mrf.mxu0  ;;  %v1681_v43 = vadd.f32 %v2390_v59, %v1509_v48  ;;  %v1508_v22 = vadd.f32 %v1459_v26, %v1336_v12 }
 0x123   : > { %v2370_v36 = vpop.f32.mrf.mxu1 }
 0x124   : > { %v2393_v18 = vpop.f32.mrf.mxu0  ;;  %v1698_v39 = vadd.f32 %v3048_v10, %v1681_v43  ;;  %v1680_v42 = vadd.f32 %v1631_v15, %v1508_v22  ;;  %v1511_v45 = vadd.f32 %v2370_v36, %v1339_v25 }
 0x125   : > { %v1469_v40 = vpop.f32.mrf.mxu1 }
 0x126   : > { %v1641_v62 = vpop.f32.mrf.mxu0  ;;  %1708 = vst.msk [vmem:[%s3059_s7 + $0x8] sm:$0xff] %vm288_vm1, %v1698_v39  ;;  %v1779_v7 = vmul.f32 %v1736_v13, %v1698_v39  ;;  %v1697_v50 = vadd.f32 %v3048_v10, %v1680_v42  ;;  %v1683_v57 = vadd.f32 %v2393_v18, %v1511_v45  ;;  %v1510_v52 = vadd.f32 %v1469_v40, %v1338_v17 }
 0x127   : > { %v2373_v56 = vpop.f32.mrf.mxu1 }
 0x128   : > { %v2396_v19 = vpop.f32.mrf.mxu0  ;;  %v1816_v5 = vmul.f32 %v1779_v7, %v1698_v39  ;;  %1707 = vst.msk [vmem:[%s3059_s7] sm:$0xff] %vm288_vm1, %v1697_v50  ;;  %v1778_v55 = vmul.f32 %v1731_v61, %v1697_v50  ;;  %v1700_v47 = vadd.f32 %v3048_v10, %v1683_v57  ;;  %v1682_v11 = vadd.f32 %v1641_v62, %v1510_v52  ;;  %v1766_v39 = vpop.permute.xlu1 %1765 }
 0x129   : > { %v1513_v49 = vadd.f32 %v2373_v56, %v1341_v14  ;;  %v1479_v28 = vpop.f32.mrf.mxu1  ;;  %v1789_v3 = vsel %vm288_vm1, %v1779_v7, 0.0  ;;  %v1761_v14 = vpop.permute.xlu0 %1760 }
 0x12a   : > { %v1651_v51 = vpop.f32.mrf.mxu0  ;;  %v1815_v8 = vmul.f32 %v1778_v55, %v1697_v50  ;;  %1710 = vst.msk [vmem:[%s3059_s7 + $0x18] sm:$0xff] %vm288_vm1, %v1700_v47  ;;  %v1781_v61 = vmul.f32 %v1746_v20, %v1700_v47  ;;  %v1788_v59 = vsel %vm288_vm1, %v1778_v55, 0.0  ;;  %v1699_v58 = vadd.f32 %v3048_v10, %v1682_v11 }
 0x12b   : > { %v1685_v21 = vadd.f32 %v2396_v19, %v1513_v49  ;;  %v1512_v12 = vadd.f32 %v1479_v28, %v1340_v34  ;;  %v2376_v48 = vpop.f32.mrf.mxu1  ;;  %v1826_v27 = vsel %vm288_vm1, %v1816_v5, 0.0  ;;  %v1790_v30 = vadd.f32 %v1789_v3, %v1788_v59 }
 0x12c   : > { %v2399_v0 = vpop.f32.mrf.mxu0  ;;  %v1825_v44 = vsel %vm288_vm1, %v1815_v8, 0.0  ;;  %v1515_v9 = vadd.f32 %v2376_v48, %v1343_v63  ;;  %v1818_v37 = vmul.f32 %v1781_v61, %v1700_v47  ;;  %1709 = vst.msk [vmem:[%s3059_s7 + $0x10] sm:$0xff] %vm288_vm1, %v1699_v58  ;;  %v1780_v41 = vmul.f32 %v3039_v23, %v1699_v58 }
 0x12d   : > { %v1702_v26 = vadd.f32 %v3048_v10, %v1685_v21  ;;  %v1684_v15 = vadd.f32 %v1651_v51, %v1512_v12  ;;  %v1489_v16 = vpop.f32.mrf.mxu1  ;;  %v1827_v25 = vadd.f32 %v1826_v27, %v1825_v44  ;;  %v1793_v13 = vsel %vm288_vm1, %v1781_v61, 0.0  ;;  %v1776_v61 = vpop.permute.xlu1 %1775 }
 0x12e   : > { %v1687_v43 = vadd.f32 %v2399_v0, %v1515_v9  ;;  %v1514_v22 = vadd.f32 %v1489_v16, %v1342_v6  ;;  %v1661_v33 = vpop.f32.mrf.mxu0  ;;  %v1791_v46 = vsel %vm288_vm1, %v1780_v41, 0.0  ;;  %v1817_v2 = vmul.f32 %v1780_v41, %v1699_v58  ;;  %v1771_v0 = vpop.permute.xlu0 %1770 }
 0x12f   : > { %1712 = vst.msk [vmem:[%s3059_s7 + $0x28] sm:$0xff] %vm288_vm1, %v1702_v26  ;;  %v1783_v35 = vmul.f32 %v1756_v4, %v1702_v26  ;;  %v1701_v23 = vadd.f32 %v3048_v10, %v1684_v15  ;;  %v2379_v17 = vpop.f32.mrf.mxu1  ;;  %v1792_v31 = vadd.f32 %v1791_v46, %v1790_v30  ;;  %v1830_v20 = vsel %vm288_vm1, %v1818_v37, 0.0 }
 0x130   : > { %v1704_v36 = vadd.f32 %v3048_v10, %v1687_v43  ;;  %v1686_v18 = vadd.f32 %v1661_v33, %v1514_v22  ;;  %v1517_v53 = vadd.f32 %v2379_v17, %v1345_v60  ;;  %v1828_v42 = vsel %vm288_vm1, %v1817_v2, 0.0  ;;  %v2402_v40 = vpop.f32.mrf.mxu0 }
 0x131   : > { %1711 = vst.msk [vmem:[%s3059_s7 + $0x20] sm:$0xff] %vm288_vm1, %v1701_v23  ;;  %v1782_v45 = vmul.f32 %v1751_v24, %v1701_v23  ;;  %v1829_v32 = vadd.f32 %v1828_v42, %v1827_v25  ;;  %v1820_v38 = vmul.f32 %v1783_v35, %v1702_v26  ;;  %v1794_v54 = vadd.f32 %v1793_v13, %v1792_v31  ;;  %v1499_v62 = vpop.f32.mrf.mxu1 }
 0x132   : > { %1714 = vst.msk [vmem:[%s3059_s7 + $0x38] sm:$0xff] %vm288_vm1, %v1704_v36  ;;  %v1703_v1 = vadd.f32 %v3048_v10, %v1686_v18  ;;  %v1785_v57 = vmul.f32 %v1766_v39, %v1704_v36  ;;  %v1689_v52 = vadd.f32 %v2402_v40, %v1517_v53  ;;  %v1797_v56 = vsel %vm288_vm1, %v1783_v35, 0.0  ;;  %v1671_v28 = vpop.f32.mrf.mxu0 }
 0x133   : > { %v1795_v7 = vsel %vm288_vm1, %v1782_v45, 0.0  ;;  %v1819_v50 = vmul.f32 %v1782_v45, %v1701_v23  ;;  %v1831_v34 = vadd.f32 %v1830_v20, %v1829_v32  ;;  %v1516_v63 = vadd.f32 %v1499_v62, %v3076_v29 }
 0x134   : > { %v1796_v19 = vadd.f32 %v1795_v7, %v1794_v54  ;;  %1713 = vst.msk [vmem:[%s3059_s7 + $0x30] sm:$0xff] %vm288_vm1, %v1703_v1  ;;  %v1784_v55 = vmul.f32 %v1761_v14, %v1703_v1  ;;  %v1706_v47 = vadd.f32 %v3048_v10, %v1689_v52  ;;  %v1834_v6 = vsel %vm288_vm1, %v1820_v38, 0.0 }
 0x135   : > { %v1832_v5 = vsel %vm288_vm1, %v1819_v50, 0.0  ;;  %v1822_v51 = vmul.f32 %v1785_v57, %v1704_v36  ;;  %v1688_v8 = vadd.f32 %v1671_v28, %v1516_v63  ;;  %v1801_v21 = vsel %vm288_vm1, %v1785_v57, 0.0 }
 0x136   : > { %v1833_v11 = vadd.f32 %v1832_v5, %v1831_v34  ;;  %v1798_v49 = vadd.f32 %v1797_v56, %v1796_v19  ;;  %v1799_v60 = vsel %vm288_vm1, %v1784_v55, 0.0  ;;  %v1821_v4 = vmul.f32 %v1784_v55, %v1703_v1  ;;  %1717 = vst.msk [vmem:[%s3059_s7 + $0x48] sm:$0x3f] %vm1716_vm7, %v1706_v47 }
 0x137   : > { %v1787_v12 = vmul.f32 %v1776_v61, %v1706_v47  ;;  %v1705_v48 = vadd.f32 %v3048_v10, %v1688_v8  ;;  %v1838_v44 = vsel %vm288_vm1, %v1822_v51, 0.0 }
 0x138   : > { %v1800_v59 = vadd.f32 %v1799_v60, %v1798_v49  ;;  %v1835_v58 = vadd.f32 %v1834_v6, %v1833_v11  ;;  %v1836_v29 = vsel %vm288_vm1, %v1821_v4, 0.0 }
 0x139   : > { %1715 = vst.msk [vmem:[%s3059_s7 + $0x40] sm:$0xff] %vm288_vm1, %v1705_v48  ;;  %v1786_v9 = vmul.f32 %v1771_v0, %v1705_v48  ;;  %v1824_v41 = vmul.f32 %v1787_v12, %v1706_v47  ;;  %v1805_v24 = vsel %vm1716_vm7, %v1787_v12, 0.0 }
 0x13a   : > { %v1837_v3 = vadd.f32 %v1836_v29, %v1835_v58  ;;  %v1802_v27 = vadd.f32 %v1801_v21, %v1800_v59 }
 0x13b   : > { %v1803_v26 = vsel %vm288_vm1, %v1786_v9, 0.0  ;;  %v1823_v15 = vmul.f32 %v1786_v9, %v1705_v48  ;;  %v1842_v43 = vsel %vm1716_vm7, %v1824_v41, 0.0 }
 0x13c   : > { %v1839_v37 = vadd.f32 %v1838_v44, %v1837_v3  ;;  %v1804_v16 = vadd.f32 %v1803_v26, %v1802_v27 }
 0x13d   : > { %v1840_v30 = vsel %vm288_vm1, %v1823_v15, 0.0 }
 0x13e   : > { %v1806_v10 = vadd.f32 %v1805_v24, %v1804_v16  ;;  %v1841_v25 = vadd.f32 %v1840_v30, %v1839_v37 }
 0x140   : > { %v1807_v22 = vrot.slane %v1806_v10, 4  ;;  %v1843_v33 = vadd.f32 %v1842_v43, %v1841_v25 }
 0x142   : > { %v1808_v46 = vadd.f32 %v1807_v22, %v1806_v10  ;;  %v1844_v2 = vrot.slane %v1843_v33, 4 }
 0x144   : > { %v1809_v35 = vrot.slane %v1808_v46, 2  ;;  %v1845_v23 = vadd.f32 %v1844_v2, %v1843_v33 }
 0x146   : > { %v1810_v17 = vadd.f32 %v1809_v35, %v1808_v46  ;;  %v1846_v31 = vrot.slane %v1845_v23, 2 }
 0x148   : > { %v1811_v36 = vrot.slane %v1810_v17, 1  ;;  %v1847_v18 = vadd.f32 %v1846_v31, %v1845_v23 }
 0x14a   : > { %v1812_v53 = vadd.f32 %v1811_v36, %v1810_v17  ;;  %v1848_v13 = vrot.slane %v1847_v18, 1 }
 0x14c   : > { %1814 = vst.msk [vmem:[%s235_s11] sm:$0x1] %vm1813_vm8, %v1812_v53  ;;  %v1849_v20 = vadd.f32 %v1848_v13, %v1847_v18 }
 0x14e   : > { %1850 = vst.msk [vmem:[%s235_s11 + $0x1] sm:$0x1] %vm1813_vm8, %v1849_v20 }
 0x14f PF: > { %s16_s18 = sadd.s32 1, %s2430_s18  }
 0x150   : > { %p13_p4 = scmp.ge.s32.totalorder %s16_s18, 4  }
 0x152   :  { %15 = sbr.rel (!%p13_p4) target bundleno = 1 (0x1), region = 86 }

// kernel: wave_attention_forward.8
= control target key start
LH: loop header
LB: loop body
LE: loop exit
PB: predicated region body
PF: predicated region fallthrough
CT: control target
= control target key end

     0   :  { %s1222_s27 = smov 0   ;;  %s1644_s0 = inlined_call_operand.vmem [shape: f32[128,32], index: 0, kind: input, shape index: {}]   ;;  %s1645_s1 = inlined_call_operand.vmem [shape: f32[1,32], index: 1, kind: input, shape index: {}]   ;;  %s1646_s2 = inlined_call_operand.vmem [shape: f32[1,32], index: 2, kind: input, shape index: {}]   ;;  %s1647_s3 = inlined_call_operand.vmem [shape: f32[1,32], index: 3, kind: input, shape index: {}]   ;;  %s1648_s4 = inlined_call_operand.vmem [shape: f32[1,32], index: 4, kind: input, shape index: {}]   ;;  %s1649_s5 = inlined_call_operand.vmem [shape: f32[32,64], index: 5, kind: input, shape index: {}]   ;;  %s1650_s6 = inlined_call_operand.vmem [shape: f32[1,64], index: 6, kind: input, shape index: {}]   ;;  %s1651_s7 = inlined_call_operand.vmem [shape: f32[128,64], index: 7, kind: output, shape index: {0}]   ;;  %s1652_s8 = inlined_call_operand.vmem [shape: f32[128,32], index: 8, kind: output, shape index: {1}]  }
   0x1 LB: > { %s1067_s28 = sadd.s32 4294967295, %s1169_s27   ;;  %p1071_p0 = scmp.ge.s32.totalorder %s1169_s27, 1  ;;  %s1169_s27 = sphi %s1222_s27, %s19_s27  }
   0x2   : > { %p266_p1 = scmp.lt.s32.totalorder %s1169_s27, 3 }
   0x4   : > { %p267_p2 = pnand %p1071_p0, %p266_p1 }
   0x5   : > { %s1072_s29 = sshll.u32 (!%p267_p2), %s1067_s28, 3  ;;  %s1171_s20 = smov (!%p267_p2), 120  }
   0x6   : > { %270 = sbr.rel (%p267_p2) target bundleno = 543 (0x21f), region = 48  ;;  %p306_p3 = scmp.lt.s32.totalorder (!%p267_p2), %s1072_s29, 15 }
   0x7   : > { %s1172_s25 = smov (!%p267_p2), 112   ;;  %s1173_s26 = smov (!%p267_p2), 104  }
   0x8   : > { %s1174_s11 = smov (!%p267_p2), 8   ;;  %s1175_s12 = smov (!%p267_p2), 16  }
   0xb   : > { %s1654_s29 = smov (!%p306_p3, %s1072_s29), 15  ;;  %v1078_v0 = vld [vmem:[%s1645_s1] ss:$0 sm:$0xff]  ;;  %vm684_vm0 = vcmask 261120   ;;  %vm657_vm1 = vcmask 64512   ;;  %vm666_vm2 = vcmask 130048  }
   0xc   : > { %s1230_s30 = sshll.u32 %s1654_s29, 3  ;;  %v1079_v1 = vld [vmem:[%s1646_s2] ss:$0 sm:$0xff]  ;;  %vm675_vm3 = vcmask 195584   ;;  %vm968_vm4 = vcmask 523264  }
   0xd   : > { %s309_s13 = scalar_lea.vmem %s1644_s0, %s1230_s30  ;;  %s1576_s16 = scalar_lea.vmem %s1652_s8, %s1230_s30 }
   0xe   : > { %v323_v2 = vld [vmem:[%s309_s13] sm:$0xff]  ;;  %v324_v3 = vld [vmem:[%s309_s13 + $0x8] sm:$0xff]  ;;  %v325_v9 = vld [vmem:[%s309_s13 + $0x10] sm:$0xff]  ;;  %s315_s21 = scalar_lea.vmem %s1651_s7, %s1230_s30 }
   0xf   : > { %v327_v4 = vld [vmem:[%s309_s13 + $0x20] sm:$0xff]  ;;  %v338_v5 = vmul.f32 %v1078_v0, %v323_v2  ;;  %v339_v6 = vmul.f32 %v1078_v0, %v324_v3  ;;  %v328_v8 = vld [vmem:[%s309_s13 + $0x28] sm:$0xff]  ;;  %v329_v10 = vld [vmem:[%s309_s13 + $0x30] sm:$0xff]  ;;  %v340_v12 = vmul.f32 %v1078_v0, %v325_v9 }
  0x10   : > { %v342_v7 = vmul.f32 %v1078_v0, %v327_v4  ;;  %v343_v11 = vmul.f32 %v1078_v0, %v328_v8  ;;  %v344_v13 = vmul.f32 %v1078_v0, %v329_v10  ;;  %v326_v14 = vld [vmem:[%s309_s13 + $0x18] sm:$0xff] }
  0x11   : > { %v330_v15 = vld [vmem:[%s309_s13 + $0x38] sm:$0xff]  ;;  %v353_v16 = vadd.f32 %v1079_v1, %v338_v5  ;;  %v354_v17 = vadd.f32 %v1079_v1, %v339_v6  ;;  %v355_v20 = vadd.f32 %v1079_v1, %v340_v12  ;;  %v341_v22 = vmul.f32 %v1078_v0, %v326_v14  ;;  %s1176_s13 = smov 24  }
  0x12   : > { %v357_v18 = vadd.f32 %v1079_v1, %v342_v7  ;;  %v358_v19 = vadd.f32 %v1079_v1, %v343_v11  ;;  %v359_v21 = vadd.f32 %v1079_v1, %v344_v13  ;;  %v345_v26 = vmul.f32 %v1078_v0, %v330_v15 }
  0x13   : > { %v1242_v23 = vmax.f32 %v353_v16, 0.0  ;;  %v1244_v24 = vmax.f32 %v354_v17, 0.0  ;;  %v1254_v30 = vmax.f32 %v355_v20, 0.0  ;;  %v356_v31 = vadd.f32 %v1079_v1, %v341_v22  ;;  %v829_v20 = vld [vmem:[%s1649_s5 + $0x8] sm:$0xff] }
  0x14   : > { %v1246_v25 = vmax.f32 %v357_v18, 0.0  ;;  %v1248_v27 = vmax.f32 %v358_v19, 0.0  ;;  %v1260_v34 = vmax.f32 %v359_v21, 0.0  ;;  %v360_v35 = vadd.f32 %v1079_v1, %v345_v26  ;;  %v831_v18 = vld [vmem:[%s1649_s5 + $0x18] sm:$0xff]  ;;  %v830_v19 = vld [vmem:[%s1649_s5 + $0x10] sm:$0xff]  ;;  %v828_v21 = vld [vmem:[%s1649_s5] sm:$0xff] }
  0x15   : > { %v693_v28 = vsel %vm684_vm0, %v1242_v23, 0.0  ;;  %v696_v29 = vsel %vm684_vm0, %v1244_v24, 0.0  ;;  %v699_v36 = vsel %vm684_vm0, %v1254_v30, 0.0  ;;  %v1266_v38 = vmax.f32 %v356_v31, 0.0  ;;  %1105 = vmatprep.subr.mxu0 %v831_v18  ;;  %1125 = vmatprep.subr.mxu1 %v831_v18 }
  0x16   : > { %694 = vadd.xlane.f32.xlu0 %v693_v28  ;;  %697 = vadd.xlane.f32.xlu1 %v696_v29  ;;  %v705_v32 = vsel %vm684_vm0, %v1246_v25, 0.0  ;;  %v708_v33 = vsel %vm684_vm0, %v1248_v27, 0.0  ;;  %v711_v37 = vsel %vm684_vm0, %v1260_v34, 0.0  ;;  %v1268_v39 = vmax.f32 %v360_v35, 0.0 }
  0x17   : > { %v702_v40 = vsel %vm684_vm0, %v1266_v38, 0.0  ;;  %1106 = vmatpush3.msra.mxu0 %v831_v18  ;;  %1129 = vmatpush3.msra.mxu1 %v831_v18 }
  0x18   : > { %v714_v41 = vsel %vm684_vm0, %v1268_v39, 0.0  ;;  %1107 = vmatprep.subr.mxu0 %v830_v19  ;;  %1126 = vmatprep.subr.mxu1 %v830_v19 }
  0x19   : > { %1108 = vmatpush3.msra.mxu0 %v830_v19  ;;  %1130 = vmatpush3.msra.mxu1 %v830_v19 }
  0x1a   : > { %706 = vadd.xlane.f32.xlu0 %v705_v32  ;;  %709 = vadd.xlane.f32.xlu1 %v708_v33 }
  0x1b   : > { %1109 = vmatprep.subr.mxu0 %v829_v20  ;;  %1127 = vmatprep.subr.mxu1 %v829_v20 }
  0x1c   : > { %1110 = vmatpush3.msra.mxu0 %v829_v20  ;;  %1131 = vmatpush3.msra.mxu1 %v829_v20 }
  0x1d   : > { %1111 = vmatprep.subr.mxu0 %v828_v21  ;;  %1128 = vmatprep.subr.mxu1 %v828_v21 }
  0x1e   : > { %700 = vadd.xlane.f32.xlu0 %v699_v36  ;;  %712 = vadd.xlane.f32.xlu1 %v711_v37 }
  0x1f   : > { %1112 = vmatpush3.msra.mxu0 %v828_v21  ;;  %1132 = vmatpush3.msra.mxu1 %v828_v21 }
  0x22   : > { %703 = vadd.xlane.f32.xlu0 %v702_v40  ;;  %715 = vadd.xlane.f32.xlu1 %v714_v41 }
  0x9f   : > { %v695_v42 = vpop.xlane.xlu0 %694  ;;  %v698_v43 = vpop.xlane.xlu1 %697 }
  0xa0   : > { %v718_v44 = vmul.f32 0.03125, %v695_v42  ;;  %v719_v45 = vmul.f32 0.03125, %v698_v43 }
  0xa2   : > { %v1275_v46 = vsub.f32 %v1242_v23, %v718_v44  ;;  %v1278_v47 = vsub.f32 %v1244_v24, %v719_v45 }
  0xa3   : > { %v707_v48 = vpop.xlane.xlu0 %706  ;;  %v710_v49 = vpop.xlane.xlu1 %709 }
  0xa4   : > { %v722_v50 = vmul.f32 0.03125, %v707_v48  ;;  %v723_v51 = vmul.f32 0.03125, %v710_v49  ;;  %v734_v52 = vmul.f32 %v1275_v46, %v1275_v46  ;;  %v735_v53 = vmul.f32 %v1278_v47, %v1278_v47 }
  0xa6   : > { %v1285_v54 = vsub.f32 %v1246_v25, %v722_v50  ;;  %v1288_v55 = vsub.f32 %v1248_v27, %v723_v51  ;;  %v742_v56 = vsel %vm684_vm0, %v734_v52, 0.0  ;;  %v745_v59 = vsel %vm684_vm0, %v735_v53, 0.0 }
  0xa7   : > { %743 = vadd.xlane.f32.xlu0 %v742_v56  ;;  %v701_v57 = vpop.xlane.xlu0 %700  ;;  %v713_v58 = vpop.xlane.xlu1 %712 }
  0xa8   : > { %v720_v60 = vmul.f32 0.03125, %v701_v57  ;;  %v724_v61 = vmul.f32 0.03125, %v713_v58  ;;  %v738_v62 = vmul.f32 %v1285_v54, %v1285_v54  ;;  %v739_v63 = vmul.f32 %v1288_v55, %v1288_v55 }
  0xaa   : > { %v1297_v0 = vsub.f32 %v1254_v30, %v720_v60  ;;  %v1300_v1 = vsub.f32 %v1260_v34, %v724_v61  ;;  %v754_v2 = vsel %vm684_vm0, %v738_v62, 0.0  ;;  %v757_v5 = vsel %vm684_vm0, %v739_v63, 0.0  ;;  %v1080_v61 = vld [vmem:[%s1647_s3] ss:$0 sm:$0xff] }
  0xab   : > { %746 = vadd.xlane.f32.xlu0 %v745_v59  ;;  %755 = vadd.xlane.f32.xlu1 %v754_v2  ;;  %v704_v3 = vpop.xlane.xlu0 %703  ;;  %v716_v4 = vpop.xlane.xlu1 %715  ;;  %v1081_v2 = vld [vmem:[%s1648_s4] ss:$0 sm:$0xff] }
  0xac   : > { %v721_v6 = vmul.f32 0.03125, %v704_v3  ;;  %v725_v7 = vmul.f32 0.03125, %v716_v4  ;;  %v736_v8 = vmul.f32 %v1297_v0, %v1297_v0  ;;  %v740_v9 = vmul.f32 %v1300_v1, %v1300_v1 }
  0xae   : > { %v1309_v10 = vsub.f32 %v1266_v38, %v721_v6  ;;  %v1312_v11 = vsub.f32 %v1268_v39, %v725_v7  ;;  %v748_v12 = vsel %vm684_vm0, %v736_v8, 0.0  ;;  %v760_v13 = vsel %vm684_vm0, %v740_v9, 0.0 }
  0xaf   : > { %758 = vadd.xlane.f32.xlu1 %v757_v5  ;;  %749 = vadd.xlane.f32.xlu0 %v748_v12 }
  0xb0   : > { %v737_v14 = vmul.f32 %v1309_v10, %v1309_v10  ;;  %v741_v15 = vmul.f32 %v1312_v11, %v1312_v11 }
  0xb2   : > { %v751_v16 = vsel %vm684_vm0, %v737_v14, 0.0  ;;  %v763_v17 = vsel %vm684_vm0, %v741_v15, 0.0 }
  0xb3   : > { %761 = vadd.xlane.f32.xlu1 %v760_v13  ;;  %752 = vadd.xlane.f32.xlu0 %v751_v16 }
  0xb7   : > { %764 = vadd.xlane.f32.xlu1 %v763_v17 }
  0xc8   : > { %379 = vrot.lane.b32.xlu1 %v1244_v24, %s1171_s20 }
  0xc9   : > { %377 = vrot.lane.b32.xlu0 %v1242_v23, %s1171_s20 }
  0xcc   : > { %381 = vrot.lane.b32.xlu1 %v1254_v30, %s1171_s20 }
  0xcd   : > { %385 = vrot.lane.b32.xlu0 %v1246_v25, %s1171_s20 }
  0xd0   : > { %383 = vrot.lane.b32.xlu1 %v1266_v38, %s1171_s20 }
  0xd1   : > { %389 = vrot.lane.b32.xlu0 %v1260_v34, %s1171_s20 }
  0xd4   : > { %387 = vrot.lane.b32.xlu1 %v1248_v27, %s1171_s20 }
  0xd5   : > { %409 = vrot.lane.b32.xlu0 %v1242_v23, %s1172_s25 }
  0xd8   : > { %391 = vrot.lane.b32.xlu1 %v1268_v39, %s1171_s20 }
  0xd9   : > { %413 = vrot.lane.b32.xlu0 %v1254_v30, %s1172_s25 }
  0xdc   : > { %411 = vrot.lane.b32.xlu1 %v1244_v24, %s1172_s25 }
  0xdd   : > { %417 = vrot.lane.b32.xlu0 %v1246_v25, %s1172_s25 }
  0xe0   : > { %415 = vrot.lane.b32.xlu1 %v1266_v38, %s1172_s25 }
  0xe1   : > { %421 = vrot.lane.b32.xlu0 %v1260_v34, %s1172_s25 }
  0xe4   : > { %419 = vrot.lane.b32.xlu1 %v1248_v27, %s1172_s25 }
  0xe5   : > { %441 = vrot.lane.b32.xlu0 %v1242_v23, %s1173_s26 }
  0xe8   : > { %423 = vrot.lane.b32.xlu1 %v1268_v39, %s1172_s25 }
  0xe9   : > { %445 = vrot.lane.b32.xlu0 %v1254_v30, %s1173_s26 }
  0xec   : > { %443 = vrot.lane.b32.xlu1 %v1244_v24, %s1173_s26 }
  0xed   : > { %449 = vrot.lane.b32.xlu0 %v1246_v25, %s1173_s26 }
  0xf0   : > { %447 = vrot.lane.b32.xlu1 %v1266_v38, %s1173_s26 }
  0xf1   : > { %453 = vrot.lane.b32.xlu0 %v1260_v34, %s1173_s26 }
  0xf4   : > { %451 = vrot.lane.b32.xlu1 %v1248_v27, %s1173_s26 }
  0xf8   : > { %455 = vrot.lane.b32.xlu1 %v1268_v39, %s1173_s26 }
 0x130   : > { %v744_v22 = vpop.xlane.xlu0 %743 }
 0x131   : > { %v766_v26 = vmul.f32 0.03125, %v744_v22 }
 0x133   : > { %v774_v28 = vadd.f32 1e-05, %v766_v26 }
 0x134   : > { %v756_v29 = vpop.xlane.xlu1 %755  ;;  %v747_v31 = vpop.xlane.xlu0 %746 }
 0x135   : > { %1147 = vrsqrt.f32 %v774_v28  ;;  %v770_v32 = vmul.f32 0.03125, %v756_v29  ;;  %v767_v33 = vmul.f32 0.03125, %v747_v31 }
 0x137   : > { %v778_v35 = vadd.f32 1e-05, %v770_v32  ;;  %v775_v36 = vadd.f32 1e-05, %v767_v33 }
 0x138   : > { %v759_v37 = vpop.xlane.xlu1 %758  ;;  %v750_v40 = vpop.xlane.xlu0 %749 }
 0x139   : > { %1149 = vrsqrt.f32 %v778_v35  ;;  %v771_v41 = vmul.f32 0.03125, %v759_v37  ;;  %v768_v42 = vmul.f32 0.03125, %v750_v40 }
 0x13a   : > { %1151 = vrsqrt.f32 %v775_v36 }
 0x13b   : > { %v779_v43 = vadd.f32 1e-05, %v771_v41  ;;  %v776_v44 = vadd.f32 1e-05, %v768_v42 }
 0x13c   : > { %v762_v45 = vpop.xlane.xlu1 %761  ;;  %v753_v48 = vpop.xlane.xlu0 %752 }
 0x13d   : > { %1153 = vrsqrt.f32 %v779_v43  ;;  %v772_v49 = vmul.f32 0.03125, %v762_v45  ;;  %v769_v50 = vmul.f32 0.03125, %v753_v48 }
 0x13e   : > { %1155 = vrsqrt.f32 %v776_v44 }
 0x13f   : > { %v780_v51 = vadd.f32 1e-05, %v772_v49  ;;  %v777_v52 = vadd.f32 1e-05, %v769_v50 }
 0x140   : > { %v765_v53 = vpop.xlane.xlu1 %764  ;;  %v1358_v56 = vpop.permute.xlu0 %377 }
 0x141   : > { %1157 = vrsqrt.f32 %v780_v51  ;;  %v773_v57 = vmul.f32 0.03125, %v765_v53  ;;  %v401_v16 = vadd.f32 %v1358_v56, %v1242_v23 }
 0x142   : > { %v1148_v58 = vpop.eup %1147  ;;  %1159 = vrsqrt.f32 %v777_v52 }
 0x143   : > { %v781_v59 = vadd.f32 1e-05, %v773_v57  ;;  %v790_v60 = vmul.f32 %v1148_v58, %v1275_v46 }
 0x144   : > { %v1364_v62 = vpop.permute.xlu1 %379  ;;  %v1366_v63 = vpop.permute.xlu0 %385 }
 0x145   : > { %1161 = vrsqrt.f32 %v781_v59  ;;  %v805_v4 = vmul.f32 %v1080_v61, %v790_v60  ;;  %v405_v36 = vadd.f32 %v1366_v63, %v1246_v25  ;;  %v402_v48 = vadd.f32 %v1364_v62, %v1244_v24 }
 0x146   : > { %v1150_v3 = vpop.eup %1149 }
 0x147   : > { %v1152_v5 = vpop.eup %1151  ;;  %v794_v6 = vmul.f32 %v1150_v3, %v1285_v54  ;;  %v820_v8 = vadd.f32 %v1081_v2, %v805_v4 }
 0x148   : > { %v1372_v7 = vpop.permute.xlu1 %381  ;;  %v1374_v46 = vpop.permute.xlu0 %389  ;;  %v791_v9 = vmul.f32 %v1152_v5, %v1278_v47 }
 0x149   : > { %1113 = vmatprep.mubr.msk.f32.mxu0 %vm684_vm0, %v820_v8  ;;  %v809_v14 = vmul.f32 %v1080_v61, %v794_v6  ;;  %v403_v47 = vadd.f32 %v1372_v7, %v1254_v30  ;;  %v407_v50 = vadd.f32 %v1374_v46, %v1260_v34 }
 0x14a   : > { %v1154_v12 = vpop.eup %1153  ;;  %v806_v13 = vmul.f32 %v1080_v61, %v791_v9 }
 0x14b   : > { %v1156_v15 = vpop.eup %1155  ;;  %v795_v17 = vmul.f32 %v1154_v12, %v1288_v55  ;;  %v824_v20 = vadd.f32 %v1081_v2, %v809_v14 }
 0x14c   : > { %v1381_v18 = vpop.permute.xlu1 %383  ;;  %v1383_v54 = vpop.permute.xlu0 %409  ;;  %v821_v19 = vadd.f32 %v1081_v2, %v806_v13  ;;  %v792_v21 = vmul.f32 %v1156_v15, %v1297_v0 }
 0x14d   : > { %v433_v22 = vadd.f32 %v1383_v54, %v401_v16  ;;  %1119 = vmatprep.mubr.msk.f32.mxu1 %vm684_vm0, %v824_v20  ;;  %v810_v29 = vmul.f32 %v1080_v61, %v795_v17  ;;  %v404_v58 = vadd.f32 %v1381_v18, %v1266_v38  ;;  %v481_v60 = vsub.f32 %v401_v16, %v1383_v54 }
 0x14e   : > { %v1158_v26 = vpop.eup %1157  ;;  %1114 = vmatmul.mubr.msk.f32.vlgmr.msra.gmra.mxu0 %vm684_vm0, %v821_v19  ;;  %v807_v28 = vmul.f32 %v1080_v61, %v792_v21  ;;  %v1453_v21 = vsub.f32 %v1242_v23, %v1358_v56 }
 0x14f   : > { %v1160_v55 = vpop.eup %1159  ;;  %v796_v31 = vmul.f32 %v1158_v26, %v1300_v1  ;;  %v825_v41 = vadd.f32 %v1081_v2, %v810_v29 }
 0x150   : > { %v1392_v32 = vpop.permute.xlu1 %387  ;;  %v1394_v33 = vpop.permute.xlu0 %413  ;;  %v822_v0 = vadd.f32 %v1081_v2, %v807_v28  ;;  %v793_v35 = vmul.f32 %v1160_v55, %v1309_v10  ;;  %v513_v56 = vadd.f32 %v1453_v21, %v1383_v54 }
 0x151   : > { %v435_v37 = vadd.f32 %v1394_v33, %v403_v47  ;;  %v811_v43 = vmul.f32 %v1080_v61, %v796_v31  ;;  %1120 = vmatmul.mubr.msk.f32.vlgmr.msra.gmra.mxu1 %vm684_vm0, %v825_v41  ;;  %v406_v5 = vadd.f32 %v1392_v32, %v1248_v27  ;;  %v483_v9 = vsub.f32 %v403_v47, %v1394_v33 }
 0x152   : > { %v1162_v40 = vpop.eup %1161  ;;  %1116 = vmatprep.mubr.msk.f32.mxu0 %vm684_vm0, %v822_v0  ;;  %v808_v42 = vmul.f32 %v1080_v61, %v793_v35 }
 0x153   : > { %v797_v1 = vmul.f32 %v1162_v40, %v1312_v11  ;;  %v826_v51 = vadd.f32 %v1081_v2, %v811_v43 }
 0x154   : > { %v1403_v44 = vpop.permute.xlu1 %391  ;;  %v1405_v45 = vpop.permute.xlu0 %417  ;;  %v823_v10 = vadd.f32 %v1081_v2, %v808_v42  ;;  %v507_v42 = vsub.f32 %v1254_v30, %v1372_v7 }
 0x155   : > { %v437_v49 = vadd.f32 %v1405_v45, %v405_v36  ;;  %v812_v52 = vmul.f32 %v1080_v61, %v797_v1  ;;  %1122 = vmatprep.mubr.msk.f32.mxu1 %vm684_vm0, %v826_v51  ;;  %v408_v15 = vadd.f32 %v1403_v44, %v1268_v39  ;;  %v485_v17 = vsub.f32 %v405_v36, %v1405_v45 }
 0x156   : > { %1117 = vmatmul.mubr.msk.f32.gmra.mxu0 %vm684_vm0, %v823_v10  ;;  %v515_v7 = vadd.f32 %v507_v42, %v1394_v33 }
 0x157   : > { %v827_v57 = vadd.f32 %v1081_v2, %v812_v52 }
 0x158   : > { %v1414_v11 = vpop.permute.xlu1 %411  ;;  %v1416_v53 = vpop.permute.xlu0 %421 }
 0x159   : > { %v434_v59 = vadd.f32 %v1414_v11, %v402_v48  ;;  %v1423_v3 = vadd.f32 %v1416_v53, %v407_v50  ;;  %1123 = vmatmul.mubr.msk.f32.gmra.mxu1 %vm684_vm0, %v827_v57  ;;  %v487_v28 = vsub.f32 %v407_v50, %v1416_v53  ;;  %v482_v23 = vsub.f32 %v402_v48, %v1414_v11 }
 0x15a   : > { %v1486_v48 = vsub.f32 %v1246_v25, %v1366_v63  ;;  %v511_v25 = vsub.f32 %v1260_v34, %v1374_v46 }
 0x15c   : > { %v1426_v61 = vpop.permute.xlu1 %415  ;;  %v1428_v4 = vpop.permute.xlu0 %441  ;;  %v517_v63 = vadd.f32 %v1486_v48, %v1405_v45 }
 0x15d   : > { %v436_v2 = vadd.f32 %v1426_v61, %v404_v58  ;;  %v1434_v6 = vadd.f32 %v1428_v4, %v433_v22  ;;  %v489_v8 = vsub.f32 %v481_v60, %v1428_v4  ;;  %v484_v43 = vsub.f32 %v404_v58, %v1426_v61 }
 0x15e   : > { %v521_v50 = vsub.f32 %v513_v56, %v1428_v4 }
 0x15f   : > { %v497_v14 = vmul.f32 0.5, %v489_v8 }
 0x160   : > { %v1438_v12 = vpop.permute.xlu1 %419  ;;  %v1440_v13 = vpop.permute.xlu0 %445 }
 0x161   : > { %v438_v16 = vadd.f32 %v1438_v12, %v406_v5  ;;  %v1447_v19 = vadd.f32 %v1440_v13, %v435_v37  ;;  %569 = vrot.lane.b32.xlu0 %v497_v14, %s1174_s11  ;;  %v491_v20 = vsub.f32 %v483_v9, %v1440_v13  ;;  %v486_v52 = vsub.f32 %v406_v5, %v1438_v12 }
 0x162   : > { %v523_v60 = vsub.f32 %v515_v7, %v1440_v13  ;;  %v519_v9 = vadd.f32 %v511_v25, %v1416_v53 }
 0x163   : > { %v499_v26 = vmul.f32 0.5, %v491_v20 }
 0x164   : > { %v1455_v47 = vpop.permute.xlu1 %423  ;;  %v1457_v22 = vpop.permute.xlu0 %449 }
 0x165   : > { %v1461_v55 = vadd.f32 %v1455_v47, %v408_v15  ;;  %v1464_v29 = vadd.f32 %v1457_v22, %v437_v49  ;;  %573 = vrot.lane.b32.xlu0 %v499_v26, %s1174_s11  ;;  %v493_v31 = vsub.f32 %v485_v17, %v1457_v22  ;;  %v488_v34 = vsub.f32 %v408_v15, %v1455_v47 }
 0x166   : > { %v531_v17 = vmul.f32 0.5, %v523_v60 }
 0x167   : > { %v501_v36 = vmul.f32 0.5, %v493_v31 }
 0x168   : > { %v1471_v0 = vpop.permute.xlu1 %443  ;;  %v1473_v35 = vpop.permute.xlu0 %453 }
 0x169   : > { %v1476_v37 = vadd.f32 %v1471_v0, %v434_v59  ;;  %v490_v40 = vsub.f32 %v482_v23, %v1471_v0  ;;  %v495_v41 = vsub.f32 %v487_v28, %v1473_v35  ;;  %577 = vrot.lane.b32.xlu0 %v501_v36, %s1174_s11  ;;  %v529_v59 = vmul.f32 0.5, %v521_v50 }
 0x16a   : > { %v537_v28 = vsub.f32 %v1453_v21, %v1383_v54  ;;  %v527_v23 = vsub.f32 %v519_v9, %v1473_v35  ;;  %v512_v54 = vsub.f32 %v1268_v39, %v1403_v44  ;;  %v543_v44 = vsub.f32 %v511_v25, %v1416_v53 }
 0x16b   : > { %v498_v1 = vmul.f32 0.5, %v490_v40  ;;  %v503_v10 = vmul.f32 0.5, %v495_v41 }
 0x16c   : > { %v1488_v49 = vpop.permute.xlu1 %447  ;;  %v535_v40 = vmul.f32 0.5, %v527_v23  ;;  %v545_v41 = vadd.f32 %v537_v28, %v1428_v4  ;;  %v520_v50 = vadd.f32 %v512_v54, %v1455_v47 }
 0x16d   : > { %v1492_v51 = vadd.f32 %v1488_v49, %v436_v2  ;;  %571 = vrot.lane.b32.xlu1 %v498_v1, %s1174_s11  ;;  %v492_v30 = vsub.f32 %v484_v43, %v1488_v49  ;;  %581 = vrot.lane.b32.xlu0 %v503_v10, %s1174_s11  ;;  %v506_v2 = vsub.f32 %v1244_v24, %v1364_v62 }
 0x16e   : > { %v525_v24 = vsub.f32 %v517_v63, %v1457_v22  ;;  %v508_v62 = vsub.f32 %v1266_v38, %v1381_v18  ;;  %v510_v38 = vsub.f32 %v1248_v27, %v1392_v32  ;;  %v539_v27 = vsub.f32 %v507_v42, %v1394_v33 }
 0x16f   : > { %v500_v57 = vmul.f32 0.5, %v492_v30  ;;  %v541_v1 = vsub.f32 %v1486_v48, %v1405_v45  ;;  %v553_v10 = vmul.f32 0.5, %v545_v41  ;;  %v538_v45 = vsub.f32 %v506_v2, %v1414_v11 }
 0x170   : > { %v1503_v58 = vpop.permute.xlu1 %451  ;;  %v533_v31 = vmul.f32 0.5, %v525_v24  ;;  %v516_v18 = vadd.f32 %v508_v62, %v1426_v61  ;;  %v518_v21 = vadd.f32 %v510_v38, %v1438_v12  ;;  %v547_v4 = vadd.f32 %v539_v27, %v1440_v13 }
 0x171   : > { %v1509_v8 = vadd.f32 %v1503_v58, %v438_v16  ;;  %575 = vrot.lane.b32.xlu1 %v500_v57, %s1174_s11  ;;  %v494_v5 = vsub.f32 %v486_v52, %v1503_v58  ;;  %601 = vrot.lane.b32.xlu0 %v529_v59, %s1175_s12  ;;  %v514_v16 = vadd.f32 %v506_v2, %v1414_v11 }
 0x172   : > { %v524_v36 = vsub.f32 %v516_v18, %v1488_v49  ;;  %v526_v43 = vsub.f32 %v518_v21, %v1503_v58  ;;  %v555_v42 = vmul.f32 0.5, %v547_v4  ;;  %v549_v30 = vadd.f32 %v541_v1, %v1457_v22 }
 0x173   : > { %v502_v46 = vmul.f32 0.5, %v494_v5  ;;  %v522_v26 = vsub.f32 %v514_v16, %v1471_v0  ;;  %v546_v48 = vadd.f32 %v538_v45, %v1471_v0  ;;  %v551_v52 = vadd.f32 %v543_v44, %v1473_v35 }
 0x174   : > { %v1516_v14 = vpop.permute.xlu1 %455  ;;  %v532_v32 = vmul.f32 0.5, %v524_v36  ;;  %v534_v39 = vmul.f32 0.5, %v526_v43  ;;  %v557_v7 = vmul.f32 0.5, %v549_v30  ;;  %v540_v57 = vsub.f32 %v508_v62, %v1426_v61 }
 0x175   : > { %579 = vrot.lane.b32.xlu1 %v502_v46, %s1174_s11  ;;  %v496_v20 = vsub.f32 %v488_v34, %v1516_v14  ;;  %605 = vrot.lane.b32.xlu0 %v531_v17, %s1175_s12  ;;  %v530_v56 = vmul.f32 0.5, %v522_v26  ;;  %v528_v33 = vsub.f32 %v520_v50, %v1516_v14  ;;  %v554_v53 = vmul.f32 0.5, %v546_v48 }
 0x176   : > { %v548_v22 = vadd.f32 %v540_v57, %v1488_v49  ;;  %v559_v11 = vmul.f32 0.5, %v551_v52  ;;  %v542_v25 = vsub.f32 %v510_v38, %v1438_v12  ;;  %v544_v59 = vsub.f32 %v512_v54, %v1455_v47 }
 0x177   : > { %v504_v15 = vmul.f32 0.5, %v496_v20  ;;  %v536_v13 = vmul.f32 0.5, %v528_v33  ;;  %v475_v38 = vmul.f32 0.5, %v1447_v19  ;;  %v471_v41 = vadd.f32 %v1473_v35, %v1423_v3 }
 0x178   : > { %v556_v0 = vmul.f32 0.5, %v548_v22  ;;  %v550_v63 = vadd.f32 %v542_v25, %v1503_v58  ;;  %v552_v60 = vadd.f32 %v544_v59, %v1516_v14  ;;  %v477_v54 = vmul.f32 0.5, %v1464_v29 }
 0x179   : > { %583 = vrot.lane.b32.xlu1 %v504_v15, %s1174_s11  ;;  %609 = vrot.lane.b32.xlu0 %v533_v31, %s1175_s12  ;;  %v473_v15 = vmul.f32 0.5, %v1434_v6  ;;  %v478_v48 = vmul.f32 0.5, %v1509_v8 }
 0x17a   : > { %v558_v61 = vmul.f32 0.5, %v550_v63  ;;  %v560_v49 = vmul.f32 0.5, %v552_v60 }
 0x17d   : > { %603 = vrot.lane.b32.xlu1 %v530_v56, %s1175_s12  ;;  %613 = vrot.lane.b32.xlu0 %v535_v40, %s1175_s12 }
 0x181   : > { %607 = vrot.lane.b32.xlu1 %v532_v32, %s1175_s12  ;;  %633 = vrot.lane.b32.xlu0 %v553_v10, %s1176_s13  ;;  %v474_v32 = vmul.f32 0.5, %v1476_v37  ;;  %v479_v10 = vmul.f32 0.5, %v471_v41 }
 0x185   : > { %611 = vrot.lane.b32.xlu1 %v534_v39, %s1175_s12  ;;  %637 = vrot.lane.b32.xlu0 %v555_v42, %s1176_s13  ;;  %v476_v39 = vmul.f32 0.5, %v1492_v51  ;;  %v472_v51 = vadd.f32 %v1516_v14, %v1461_v55 }
 0x187   : > { %v480_v22 = vmul.f32 0.5, %v472_v51 }
 0x189   : > { %615 = vrot.lane.b32.xlu1 %v536_v13, %s1175_s12  ;;  %641 = vrot.lane.b32.xlu0 %v557_v7, %s1176_s13 }
 0x18d   : > { %635 = vrot.lane.b32.xlu1 %v554_v53, %s1176_s13  ;;  %645 = vrot.lane.b32.xlu0 %v559_v11, %s1176_s13 }
 0x191   : > { %639 = vrot.lane.b32.xlu1 %v556_v0, %s1176_s13  ;;  %v1082_v0 = vld [vmem:[%s1650_s6] ss:$0 sm:$0xff] }
 0x195   : > { %643 = vrot.lane.b32.xlu1 %v558_v61, %s1176_s13 }
 0x199   : > { %647 = vrot.lane.b32.xlu1 %v560_v49, %s1176_s13 }
 0x1d3   : > { %v570_v12 = vpop.permute.xlu0 %569 }
 0x1d4   : > { %v658_v26 = vsel %vm657_vm1, %v473_v15, %v570_v12 }
 0x1d7   : > { %v574_v2 = vpop.permute.xlu0 %573 }
 0x1d8   : > { %v660_v6 = vsel %vm657_vm1, %v475_v38, %v574_v2 }
 0x1db   : > { %v578_v5 = vpop.permute.xlu0 %577 }
 0x1dc   : > { %v662_v19 = vsel %vm657_vm1, %v477_v54, %v578_v5 }
 0x1df   : > { %v572_v34 = vpop.permute.xlu1 %571  ;;  %v582_v46 = vpop.permute.xlu0 %581 }
 0x1e0   : > { %v659_v3 = vsel %vm657_vm1, %v474_v32, %v572_v34  ;;  %v664_v29 = vsel %vm657_vm1, %v479_v10, %v582_v46 }
 0x1e3   : > { %v576_v9 = vpop.permute.xlu1 %575  ;;  %v602_v58 = vpop.permute.xlu0 %601 }
 0x1e4   : > { %v667_v31 = vsel %vm666_vm2, %v658_v26, %v602_v58  ;;  %v661_v30 = vsel %vm657_vm1, %v476_v39, %v576_v9 }
 0x1e7   : > { %v580_v17 = vpop.permute.xlu1 %579  ;;  %v606_v47 = vpop.permute.xlu0 %605 }
 0x1e8   : > { %v669_v36 = vsel %vm666_vm2, %v660_v6, %v606_v47  ;;  %v663_v52 = vsel %vm657_vm1, %v478_v48, %v580_v17 }
 0x1eb   : > { %v584_v24 = vpop.permute.xlu1 %583  ;;  %v610_v62 = vpop.permute.xlu0 %609 }
 0x1ec   : > { %v671_v43 = vsel %vm666_vm2, %v662_v19, %v610_v62  ;;  %v665_v25 = vsel %vm657_vm1, %v480_v22, %v584_v24 }
 0x1ef   : > { %v604_v16 = vpop.permute.xlu1 %603  ;;  %v614_v20 = vpop.permute.xlu0 %613 }
 0x1f0   : > { %v668_v35 = vsel %vm666_vm2, %v659_v3, %v604_v16  ;;  %v673_v37 = vsel %vm666_vm2, %v664_v29, %v614_v20 }
 0x1f3   : > { %v608_v28 = vpop.permute.xlu1 %607  ;;  %v634_v23 = vpop.permute.xlu0 %633 }
 0x1f4   : > { %v676_v18 = vsel %vm675_vm3, %v667_v31, %v634_v23  ;;  %v670_v45 = vsel %vm666_vm2, %v661_v30, %v608_v28 }
 0x1f5   : > { %685 = vst.msk [vmem:[%s1576_s16] sm:$0xff] %vm684_vm0, %v676_v18 }
 0x1f7   : > { %v612_v56 = vpop.permute.xlu1 %611  ;;  %v638_v40 = vpop.permute.xlu0 %637 }
 0x1f8   : > { %v678_v21 = vsel %vm675_vm3, %v669_v36, %v638_v40  ;;  %v672_v57 = vsel %vm666_vm2, %v663_v52, %v612_v56 }
 0x1f9   : > { %687 = vst.msk [vmem:[%s1576_s16 + $0x10] sm:$0xff] %vm684_vm0, %v678_v21 }
 0x1fb   : > { %v616_v27 = vpop.permute.xlu1 %615  ;;  %v642_v1 = vpop.permute.xlu0 %641 }
 0x1fc   : > { %v680_v4 = vsel %vm675_vm3, %v671_v43, %v642_v1  ;;  %v674_v55 = vsel %vm666_vm2, %v665_v25, %v616_v27 }
 0x1fd   : > { %689 = vst.msk [vmem:[%s1576_s16 + $0x20] sm:$0xff] %vm684_vm0, %v680_v4 }
 0x1ff   : > { %v636_v50 = vpop.permute.xlu1 %635  ;;  %v646_v44 = vpop.permute.xlu0 %645 }
 0x200   : > { %v677_v33 = vsel %vm675_vm3, %v668_v35, %v636_v50  ;;  %v682_v42 = vsel %vm675_vm3, %v673_v37, %v646_v44 }
 0x201   : > { %686 = vst.msk [vmem:[%s1576_s16 + $0x8] sm:$0xff] %vm684_vm0, %v677_v33  ;;  %691 = vst.msk [vmem:[%s1576_s16 + $0x30] sm:$0xff] %vm684_vm0, %v682_v42 }
 0x203   : > { %v640_v13 = vpop.permute.xlu1 %639 }
 0x204   : > { %v679_v7 = vsel %vm675_vm3, %v670_v45, %v640_v13 }
 0x205   : > { %688 = vst.msk [vmem:[%s1576_s16 + $0x18] sm:$0xff] %vm684_vm0, %v679_v7 }
 0x207   : > { %v644_v53 = vpop.permute.xlu1 %643 }
 0x208   : > { %v681_v11 = vsel %vm675_vm3, %v672_v57, %v644_v53 }
 0x209   : > { %690 = vst.msk [vmem:[%s1576_s16 + $0x28] sm:$0xff] %vm684_vm0, %v681_v11 }
 0x20b   : > { %v648_v14 = vpop.permute.xlu1 %647 }
 0x20c   : > { %v683_v8 = vsel %vm675_vm3, %v674_v55, %v648_v14 }
 0x20d   : > { %692 = vst.msk [vmem:[%s1576_s16 + $0x38] sm:$0xff] %vm684_vm0, %v683_v8 }
 0x20e   : > { %v1115_v63 = vpop.f32.mrf.mxu0 }
 0x20f   : > { %v935_v59 = vadd.f32 %v1115_v63, %v1082_v0 }
 0x210   : > { %v929_v61 = vpop.f32.mrf.mxu0 }
 0x211   : > { %970 = vst.msk [vmem:[%s315_s21 + $0x8] sm:$0xff] %vm968_vm4, %v935_v59  ;;  %v930_v60 = vadd.f32 %v1082_v0, %v929_v61  ;;  %v1121_v49 = vpop.f32.mrf.mxu1 }
 0x212   : > { %v955_v12 = vadd.f32 %v1121_v49, %v1082_v0 }
 0x213   : > { %969 = vst.msk [vmem:[%s315_s21] sm:$0xff] %vm968_vm4, %v930_v60  ;;  %v949_v2 = vpop.f32.mrf.mxu1 }
 0x214   : > { %974 = vst.msk [vmem:[%s315_s21 + $0x28] sm:$0xff] %vm968_vm4, %v955_v12  ;;  %v950_v34 = vadd.f32 %v1082_v0, %v949_v2 }
 0x216   : > { %v1118_v5 = vpop.f32.mrf.mxu0  ;;  %973 = vst.msk [vmem:[%s315_s21 + $0x20] sm:$0xff] %vm968_vm4, %v950_v34 }
 0x217   : > { %v945_v46 = vadd.f32 %v1118_v5, %v1082_v0 }
 0x218   : > { %v939_v9 = vpop.f32.mrf.mxu0 }
 0x219   : > { %972 = vst.msk [vmem:[%s315_s21 + $0x18] sm:$0xff] %vm968_vm4, %v945_v46  ;;  %v940_v58 = vadd.f32 %v1082_v0, %v939_v9  ;;  %v1124_v17 = vpop.f32.mrf.mxu1 }
 0x21a   : > { %v965_v47 = vadd.f32 %v1124_v17, %v1082_v0 }
 0x21b   : > { %971 = vst.msk [vmem:[%s315_s21 + $0x10] sm:$0xff] %vm968_vm4, %v940_v58  ;;  %v959_v24 = vpop.f32.mrf.mxu1 }
 0x21c   : > { %976 = vst.msk [vmem:[%s315_s21 + $0x38] sm:$0xff] %vm968_vm4, %v965_v47  ;;  %v960_v62 = vadd.f32 %v1082_v0, %v959_v24 }
 0x21e   : > { %975 = vst.msk [vmem:[%s315_s21 + $0x30] sm:$0xff] %vm968_vm4, %v960_v62 }
 0x21f PF: > { %s19_s27 = sadd.s32 1, %s1169_s27  }
 0x220   : > { %p16_p4 = scmp.ge.s32.totalorder %s19_s27, 4  }
 0x222   :  { %18 = sbr.rel (!%p16_p4) target bundleno = 1 (0x1), region = 90 }

// kernel: wave_attention_forward.9
= control target key start
LH: loop header
LB: loop body
LE: loop exit
PB: predicated region body
PF: predicated region fallthrough
CT: control target
= control target key end

     0   :  { %13 = vsyncpa [#allocation3], 0  ;;  %s12736_s0 = inlined_call_operand.vmem [shape: f32[2,256,32], index: 0, kind: input, shape index: {}]   ;;  %s12737_s1 = inlined_call_operand.vmem [shape: f32[2,64,64], index: 1, kind: input, shape index: {}]   ;;  %s12738_s2 = inlined_call_operand.vmem [shape: f32[2,256,8], index: 2, kind: input, shape index: {}]   ;;  %s12739_s3 = inlined_call_operand.vmem [shape: f32[32,32], index: 3, kind: input, shape index: {}]   ;;  %s12740_s4 = inlined_call_operand.vmem [shape: f32[1,32], index: 4, kind: input, shape index: {}]   ;;  %s12741_s5 = inlined_call_operand.vmem [shape: f32[32,32], index: 5, kind: input, shape index: {}]   ;;  %s12742_s6 = inlined_call_operand.vmem [shape: f32[8,32], index: 6, kind: input, shape index: {}]   ;;  %s12743_s7 = inlined_call_operand.vmem [shape: f32[1,32], index: 7, kind: input, shape index: {}]   ;;  %s12744_s8 = inlined_call_operand.hbm [shape: f32[2,256,32], index: 8, kind: output, shape index: {}]  }
   0x1   :  { %15 = vsyncpa [#allocation3 + $0x1], 0  ;;  %s9591_s27 = smov 0   ;;  %s9593_s28 = smov 0  }
   0x2   :  { %s9595_s29 = smov 0   ;;  %s9597_s30 = smov 0  }
   0x3 LB: > { %s9612_s9 = sadd.s32 4294967295, %s9534_s30   ;;  %s7044_s10 = sadd.s32 4294967294, %s9534_s30   ;;  %s9534_s30 = sphi %s9597_s30, %s13059_s30   ;;  %s9530_s29 = sphi %s9595_s29, %s13058_s29   ;;  %s9526_s28 = sphi %s9593_s28, %s13057_s28   ;;  %s9522_s27 = sphi %s9591_s27, %s13056_s27  }
   0x4   : > { %s9616_s11 = sadd.s32 1, %s9534_s30   ;;  %s211_s12 = sadd.s32 1, %s9530_s29 }
   0x5   : > { %s208_s13 = ssub.s32 %s9534_s30, %s9616_s11  ;;  %p221_p0 = scmp.ne.s32.totalorder %s9530_s29, %s9526_s28 }
   0x6   : > { %p209_p1 = scmp.eq.s32.totalorder %s208_s13, 0  ;;  %p222_p2 = scmp.eq.s32.totalorder %s9612_s9, 1 }
   0x7   : > { %p227_p3 = scmp.ne.s32.totalorder %s9526_s28, %s9522_s27  ;;  %p228_p4 = scmp.eq.s32.totalorder %s7044_s10, 1 }
   0x8   : > { %s9627_s14 = scalar_select %p209_p1, %s9530_s29, %s211_s12  }
   0x9   : > { %p9629_p5 = por %p222_p2, %p221_p0  ;;  %p9633_p6 = por %p228_p4, %p227_p3 }
   0xa   : > { %p7047_p7 = scmp.ge.s32.totalorder %s9534_s30, 1  ;;  %p285_p8 = scmp.lt.s32.totalorder %s9534_s30, 3 }
   0xc   : > { %p286_p9 = pnand %p7047_p7, %p285_p8 }
   0xe   : > { %289 = sbr.rel (%p286_p9) target bundleno = 2577 (0xa11), region = 52 }
  0x13   : > { %v379_v0 = vld [vmem:[%s12739_s3 + $0x18] sm:$0xff]  ;;  %v378_v1 = vld [vmem:[%s12739_s3 + $0x10] sm:$0xff]  ;;  %p329_p10 = scmp.lt.s32.totalorder %s9612_s9, 1  ;;  %v749_v2 = vld [vmem:[%s12742_s6] sm:$0xff]  ;;  %vm387_vm0 = vcmask 261120   ;;  %vm757_vm1 = vcmask 64512  }
  0x14   : > { %8067 = vmatprep.subr.mxu0 %v379_v0  ;;  %v377_v3 = vld [vmem:[%s12739_s3 + $0x8] sm:$0xff]  ;;  %8123 = vmatprep.subr.mxu1 %v749_v2  ;;  %v376_v4 = vld [vmem:[%s12739_s3] sm:$0xff]  ;;  %s9536_s26 = smov 96   ;;  %s9537_s10 = smov 120   ;;  %vm1456_vm2 = vcmask 523264  }
  0x15   : > { %8068 = vmatpush3.msra.mxu0 %v379_v0  ;;  %s330_s25 = scalar_select %p329_p10, %s9612_s9, 1  ;;  %8124 = vmatpush3.msra.mxu1 %v749_v2 }
  0x16   : > { %8069 = vmatprep.subr.mxu0 %v378_v1  ;;  %s9539_s20 = smov 112   ;;  %s9543_s23 = smov [#allocation2]  }
  0x17   : > { %8070 = vmatpush3.msra.mxu0 %v378_v1  ;;  %s7542_s12 = sshll.u32 %s330_s25, 8  ;;  %s7543_s19 = sshll.u32 %s330_s25, 6 }
  0x18   : > { %8071 = vmatprep.subr.mxu0 %v377_v3  ;;  %s9659_s18 = scalar_lea.vmem %s12736_s0, %s7542_s12  ;;  %s9673_s22 = scalar_lea.vmem %s12738_s2, %s7542_s12 }
  0x19   : > { %8072 = vmatpush3.msra.mxu0 %v377_v3  ;;  %v344_v5 = vld [vmem:[%s9659_s18] sm:$0xff]  ;;  %v345_v6 = vld [vmem:[%s9659_s18 + $0x8] sm:$0xff]  ;;  %v346_v7 = vld [vmem:[%s9659_s18 + $0x10] sm:$0xff]  ;;  %s9680_s25 = scalar_lea.vmem %s12737_s1, %s7543_s19  ;;  %s9538_s19 = smov 88  }
  0x1a   : > { %8073 = vmatprep.subr.mxu0 %v376_v4  ;;  %8075 = vmatprep.mubr.msk.f32.mxu0 %vm387_vm0, %v344_v5  ;;  %v347_v8 = vld [vmem:[%s9659_s18 + $0x18] sm:$0xff]  ;;  %v348_v9 = vld [vmem:[%s9659_s18 + $0x20] sm:$0xff]  ;;  %v349_v10 = vld [vmem:[%s9659_s18 + $0x28] sm:$0xff]  ;;  %s9478_s24 = sshll.u32 %s9543_s23, 4  ;;  %s9479_s24 = int_to_ptr.vmem [resolvable:$false] %s9478_s24 }
  0x1b   : > { %8074 = vmatpush3.msra.mxu0 %v376_v4  ;;  %v350_v11 = vld [vmem:[%s9659_s18 + $0x30] sm:$0xff]  ;;  %v717_v12 = vld [vmem:[%s9673_s22] sm:$0xff]  ;;  %v718_v13 = vld [vmem:[%s9673_s22 + $0x8] sm:$0xff] }
  0x1c   : > { %8076 = vmatmul.mubr.msk.f32.vlgmr.msra.gmra.mxu0 %vm387_vm0, %v345_v6  ;;  %8125 = vmatprep.mubr.msk.f32.mxu1 %vm757_vm1, %v717_v12  ;;  %v9688_v14 = vld [vmem:[%s9680_s25 + $0x38] sm:$0xff]  ;;  %v719_v15 = vld [vmem:[%s9673_s22 + $0x10] sm:$0xff]  ;;  %v352_v17 = vld [vmem:[%s9659_s18 + $0x40] sm:$0xff] }
  0x1d   : > { %8078 = vmatprep.mubr.msk.f32.mxu0 %vm387_vm0, %v346_v7  ;;  %v351_v16 = vld [vmem:[%s9659_s18 + $0x38] sm:$0xff]  ;;  %8126 = vmatmul.mubr.msk.f32.vlgmr.msra.gmra.mxu1 %vm757_vm1, %v718_v13  ;;  %v9700_v19 = vld [vmem:[%s9680_s25 + $0x30] sm:$0xff]  ;;  %v721_v20 = vld [vmem:[%s9673_s22 + $0x20] sm:$0xff] }
  0x1e   : > { %8173 = vmatprep.subr.msk.mxu1 %vm757_vm1, %v9688_v14  ;;  %8128 = vmatprep.mubr.msk.f32.mxu1 %vm757_vm1, %v719_v15  ;;  %v720_v18 = vld [vmem:[%s9673_s22 + $0x18] sm:$0xff]  ;;  %v353_v21 = vld [vmem:[%s9659_s18 + $0x48] sm:$0xff]  ;;  %v354_v23 = vld [vmem:[%s9659_s18 + $0x50] sm:$0xff] }
  0x1f   : > { %8174 = vmatpush3.xpose.msk.msra.mxu1 %vm757_vm1, %v9688_v14  ;;  %v9712_v22 = vld [vmem:[%s9680_s25 + $0x28] sm:$0xff]  ;;  %v723_v25 = vld [vmem:[%s9673_s22 + $0x30] sm:$0xff]  ;;  %v355_v26 = vld [vmem:[%s9659_s18 + $0x58] sm:$0xff]  ;;  %1791 = vrot.lane.b32.xlu0 %v9688_v14, %s9536_s26 }
  0x20   : > { %8079 = vmatmul.mubr.msk.f32.gmra.mxu0 %vm387_vm0, %v347_v8  ;;  %8175 = vmatprep.subr.msk.mxu1 %vm757_vm1, %v9700_v19  ;;  %v722_v24 = vld [vmem:[%s9673_s22 + $0x28] sm:$0xff]  ;;  %v9727_v27 = vld [vmem:[%s9680_s25 + $0x20] sm:$0xff]  ;;  %v724_v29 = vld [vmem:[%s9673_s22 + $0x38] sm:$0xff] }
  0x21   : > { %8081 = vmatprep.mubr.msk.f32.mxu0 %vm387_vm0, %v348_v9  ;;  %8129 = vmatmul.mubr.msk.f32.gmra.mxu1 %vm757_vm1, %v720_v18  ;;  %v356_v28 = vld [vmem:[%s9659_s18 + $0x60] sm:$0xff]  ;;  %v357_v31 = vld [vmem:[%s9659_s18 + $0x68] sm:$0xff]  ;;  %v9742_v32 = vld [vmem:[%s9680_s25 + $0x18] sm:$0xff] }
  0x22   : > { %8131 = vmatprep.mubr.msk.f32.mxu1 %vm757_vm1, %v721_v20  ;;  %v725_v30 = vld [vmem:[%s9673_s22 + $0x40] sm:$0xff]  ;;  %v358_v33 = vld [vmem:[%s9659_s18 + $0x70] sm:$0xff]  ;;  %v726_v34 = vld [vmem:[%s9673_s22 + $0x48] sm:$0xff]  ;;  %1789 = vrot.lane.b32.xlu1 %v9700_v19, %s9536_s26 }
  0x23   : > { %8176 = vmatpush3.xpose.msk.msra.mxu1 %vm757_vm1, %v9700_v19  ;;  %v727_v35 = vld [vmem:[%s9673_s22 + $0x50] sm:$0xff]  ;;  %v359_v36 = vld [vmem:[%s9659_s18 + $0x78] sm:$0xff]  ;;  %v360_v38 = vld [vmem:[%s9659_s18 + $0x80] sm:$0xff]  ;;  %1787 = vrot.lane.b32.xlu0 %v9712_v22, %s9536_s26 }
  0x24   : > { %8082 = vmatmul.mubr.msk.f32.gmra.mxu0 %vm387_vm0, %v349_v10  ;;  %8177 = vmatprep.subr.msk.mxu1 %vm757_vm1, %v9712_v22  ;;  %v9757_v37 = vld [vmem:[%s9680_s25 + $0x10] sm:$0xff]  ;;  %v728_v39 = vld [vmem:[%s9673_s22 + $0x58] sm:$0xff]  ;;  %v729_v40 = vld [vmem:[%s9673_s22 + $0x60] sm:$0xff] }
  0x25   : > { %8084 = vmatprep.mubr.msk.f32.mxu0 %vm387_vm0, %v350_v11  ;;  %8132 = vmatmul.mubr.msk.f32.gmra.mxu1 %vm757_vm1, %v722_v24  ;;  %v361_v41 = vld [vmem:[%s9659_s18 + $0x88] sm:$0xff]  ;;  %v362_v43 = vld [vmem:[%s9659_s18 + $0x90] sm:$0xff]  ;;  %v363_v46 = vld [vmem:[%s9659_s18 + $0x98] sm:$0xff] }
  0x26   : > { %8134 = vmatprep.mubr.msk.f32.mxu1 %vm757_vm1, %v723_v25  ;;  %v9772_v42 = vld [vmem:[%s9680_s25 + $0x8] sm:$0xff]  ;;  %v731_v45 = vld [vmem:[%s9673_s22 + $0x70] sm:$0xff]  ;;  %v9787_v47 = vld [vmem:[%s9680_s25] sm:$0xff]  ;;  %1783 = vrot.lane.b32.xlu1 %v9742_v32, %s9536_s26 }
  0x27   : > { %8178 = vmatpush3.xpose.msk.msra.mxu1 %vm757_vm1, %v9712_v22  ;;  %v730_v44 = vld [vmem:[%s9673_s22 + $0x68] sm:$0xff]  ;;  %v364_v48 = vld [vmem:[%s9659_s18 + $0xa0] sm:$0xff]  ;;  %v732_v49 = vld [vmem:[%s9673_s22 + $0x78] sm:$0xff]  ;;  %1785 = vrot.lane.b32.xlu0 %v9727_v27, %s9536_s26 }
  0x28   : > { %8085 = vmatmul.mubr.msk.f32.gmra.mxu0 %vm387_vm0, %v351_v16  ;;  %8179 = vmatprep.subr.msk.mxu1 %vm757_vm1, %v9727_v27  ;;  %v733_v50 = vld [vmem:[%s9673_s22 + $0x80] sm:$0xff]  ;;  %v365_v51 = vld [vmem:[%s9659_s18 + $0xa8] sm:$0xff]  ;;  %v366_v52 = vld [vmem:[%s9659_s18 + $0xb0] sm:$0xff] }
  0x29   : > { %8087 = vmatprep.mubr.msk.f32.mxu0 %vm387_vm0, %v352_v17  ;;  %8135 = vmatmul.mubr.msk.f32.gmra.mxu1 %vm757_vm1, %v724_v29  ;;  %v734_v53 = vld [vmem:[%s9673_s22 + $0x88] sm:$0xff]  ;;  %v735_v54 = vld [vmem:[%s9673_s22 + $0x90] sm:$0xff]  ;;  %v367_v55 = vld [vmem:[%s9659_s18 + $0xb8] sm:$0xff] }
  0x2a   : > { %8137 = vmatprep.mubr.msk.f32.mxu1 %vm757_vm1, %v725_v30  ;;  %v368_v56 = vld [vmem:[%s9659_s18 + $0xc0] sm:$0xff]  ;;  %v736_v57 = vld [vmem:[%s9673_s22 + $0x98] sm:$0xff]  ;;  %v369_v59 = vld [vmem:[%s9659_s18 + $0xc8] sm:$0xff]  ;;  %1779 = vrot.lane.b32.xlu1 %v9772_v42, %s9536_s26 }
  0x2b   : > { %8180 = vmatpush3.xpose.msk.msra.mxu1 %vm757_vm1, %v9727_v27  ;;  %v737_v58 = vld [vmem:[%s9673_s22 + $0xa0] sm:$0xff]  ;;  %v370_v60 = vld [vmem:[%s9659_s18 + $0xd0] sm:$0xff]  ;;  %v738_v61 = vld [vmem:[%s9673_s22 + $0xa8] sm:$0xff]  ;;  %1781 = vrot.lane.b32.xlu0 %v9757_v37, %s9536_s26 }
  0x2c   : > { %8088 = vmatmul.mubr.msk.f32.gmra.mxu0 %vm387_vm0, %v353_v21  ;;  %8181 = vmatprep.subr.msk.mxu1 %vm757_vm1, %v9742_v32  ;;  %v739_v62 = vld [vmem:[%s9673_s22 + $0xb0] sm:$0xff]  ;;  %v371_v63 = vld [vmem:[%s9659_s18 + $0xd8] sm:$0xff]  ;;  %v372_v0 = vld [vmem:[%s9659_s18 + $0xe0] sm:$0xff] }
  0x2d   : > { %8090 = vmatprep.mubr.msk.f32.mxu0 %vm387_vm0, %v354_v23  ;;  %8138 = vmatmul.mubr.msk.f32.gmra.mxu1 %vm757_vm1, %v726_v34  ;;  %v740_v1 = vld [vmem:[%s9673_s22 + $0xb8] sm:$0xff]  ;;  %v741_v2 = vld [vmem:[%s9673_s22 + $0xc0] sm:$0xff]  ;;  %v373_v3 = vld [vmem:[%s9659_s18 + $0xe8] sm:$0xff] }
  0x2e   : > { %8140 = vmatprep.mubr.msk.f32.mxu1 %vm757_vm1, %v727_v35  ;;  %v374_v4 = vld [vmem:[%s9659_s18 + $0xf0] sm:$0xff]  ;;  %v742_v5 = vld [vmem:[%s9673_s22 + $0xc8] sm:$0xff]  ;;  %v375_v7 = vld [vmem:[%s9659_s18 + $0xf8] sm:$0xff]  ;;  %2584 = vrot.lane.b32.xlu1 %v9700_v19, %s9537_s10  ;;  %s7545_s18 = sshll.u32 %s9612_s9, 12 }
  0x2f   : > { %8182 = vmatpush3.xpose.msk.msra.mxu1 %vm757_vm1, %v9742_v32  ;;  %v743_v6 = vld [vmem:[%s9673_s22 + $0xd0] sm:$0xff]  ;;  %v744_v8 = vld [vmem:[%s9673_s22 + $0xd8] sm:$0xff]  ;;  %v745_v9 = vld [vmem:[%s9673_s22 + $0xe0] sm:$0xff]  ;;  %1777 = vrot.lane.b32.xlu0 %v9787_v47, %s9536_s26  ;;  %s9540_s26 = smov 80  }
  0x30   : > { %8091 = vmatmul.mubr.msk.f32.gmra.mxu0 %vm387_vm0, %v355_v26  ;;  %8183 = vmatprep.subr.msk.mxu1 %vm757_vm1, %v9757_v37  ;;  %v746_v10 = vld [vmem:[%s9673_s22 + $0xe8] sm:$0xff]  ;;  %v747_v11 = vld [vmem:[%s9673_s22 + $0xf0] sm:$0xff]  ;;  %v748_v12 = vld [vmem:[%s9673_s22 + $0xf8] sm:$0xff] }
  0x31   : > { %8093 = vmatprep.mubr.msk.f32.mxu0 %vm387_vm0, %v356_v28  ;;  %8141 = vmatmul.mubr.msk.f32.gmra.mxu1 %vm757_vm1, %v728_v39  ;;  %v9876_v15 = vld [vmem:[%s12740_s4] ss:$0 sm:$0xff] }
  0x32   : > { %8143 = vmatprep.mubr.msk.f32.mxu1 %vm757_vm1, %v729_v40  ;;  %2582 = vrot.lane.b32.xlu1 %v9712_v22, %s9537_s10 }
  0x33   : > { %8184 = vmatpush3.xpose.msk.msra.mxu1 %vm757_vm1, %v9757_v37  ;;  %2586 = vrot.lane.b32.xlu0 %v9688_v14, %s9537_s10 }
  0x34   : > { %8094 = vmatmul.mubr.msk.f32.gmra.mxu0 %vm387_vm0, %v357_v31  ;;  %8185 = vmatprep.subr.msk.mxu1 %vm757_vm1, %v9772_v42 }
  0x35   : > { %8096 = vmatprep.mubr.msk.f32.mxu0 %vm387_vm0, %v358_v33  ;;  %8144 = vmatmul.mubr.msk.f32.gmra.mxu1 %vm757_vm1, %v730_v44 }
  0x36   : > { %8146 = vmatprep.mubr.msk.f32.mxu1 %vm757_vm1, %v731_v45  ;;  %2578 = vrot.lane.b32.xlu1 %v9742_v32, %s9537_s10 }
  0x37   : > { %8186 = vmatpush3.xpose.msk.msra.mxu1 %vm757_vm1, %v9772_v42  ;;  %2580 = vrot.lane.b32.xlu0 %v9727_v27, %s9537_s10 }
  0x38   : > { %8097 = vmatmul.mubr.msk.f32.gmra.mxu0 %vm387_vm0, %v359_v36  ;;  %8187 = vmatprep.subr.msk.mxu1 %vm757_vm1, %v9787_v47 }
  0x39   : > { %8099 = vmatprep.mubr.msk.f32.mxu0 %vm387_vm0, %v360_v38  ;;  %8147 = vmatmul.mubr.msk.f32.gmra.mxu1 %vm757_vm1, %v732_v49 }
  0x3a   : > { %8149 = vmatprep.mubr.msk.f32.mxu1 %vm757_vm1, %v733_v50 }
  0x3b   : > { %8188 = vmatpush3.xpose.msk.msra.mxu1 %vm757_vm1, %v9787_v47 }
  0x3c   : > { %8100 = vmatmul.mubr.msk.f32.gmra.mxu0 %vm387_vm0, %v361_v41 }
  0x3d   : > { %8102 = vmatprep.mubr.msk.f32.mxu0 %vm387_vm0, %v362_v43  ;;  %8150 = vmatmul.mubr.msk.f32.gmra.mxu1 %vm757_vm1, %v734_v53 }
  0x3e   : > { %8152 = vmatprep.mubr.msk.f32.mxu1 %vm757_vm1, %v735_v54 }
  0x40   : > { %8103 = vmatmul.mubr.msk.f32.gmra.mxu0 %vm387_vm0, %v363_v46 }
  0x41   : > { %8105 = vmatprep.mubr.msk.f32.mxu0 %vm387_vm0, %v364_v48  ;;  %8153 = vmatmul.mubr.msk.f32.gmra.mxu1 %vm757_vm1, %v736_v57 }
  0x42   : > { %8155 = vmatprep.mubr.msk.f32.mxu1 %vm757_vm1, %v737_v58 }
  0x44   : > { %8106 = vmatmul.mubr.msk.f32.gmra.mxu0 %vm387_vm0, %v365_v51 }
  0x45   : > { %8108 = vmatprep.mubr.msk.f32.mxu0 %vm387_vm0, %v366_v52  ;;  %8156 = vmatmul.mubr.msk.f32.gmra.mxu1 %vm757_vm1, %v738_v61 }
  0x46   : > { %8158 = vmatprep.mubr.msk.f32.mxu1 %vm757_vm1, %v739_v62 }
  0x48   : > { %8109 = vmatmul.mubr.msk.f32.gmra.mxu0 %vm387_vm0, %v367_v55 }
  0x49   : > { %8111 = vmatprep.mubr.msk.f32.mxu0 %vm387_vm0, %v368_v56  ;;  %8159 = vmatmul.mubr.msk.f32.gmra.mxu1 %vm757_vm1, %v740_v1 }
  0x4a   : > { %8161 = vmatprep.mubr.msk.f32.mxu1 %vm757_vm1, %v741_v2 }
  0x4c   : > { %8112 = vmatmul.mubr.msk.f32.gmra.mxu0 %vm387_vm0, %v369_v59 }
  0x4d   : > { %8114 = vmatprep.mubr.msk.f32.mxu0 %vm387_vm0, %v370_v60  ;;  %8162 = vmatmul.mubr.msk.f32.gmra.mxu1 %vm757_vm1, %v742_v5 }
  0x4e   : > { %8164 = vmatprep.mubr.msk.f32.mxu1 %vm757_vm1, %v743_v6 }
  0x50   : > { %8115 = vmatmul.mubr.msk.f32.gmra.mxu0 %vm387_vm0, %v371_v63 }
  0x51   : > { %8117 = vmatprep.mubr.msk.f32.mxu0 %vm387_vm0, %v372_v0  ;;  %8165 = vmatmul.mubr.msk.f32.gmra.mxu1 %vm757_vm1, %v744_v8 }
  0x52   : > { %8167 = vmatprep.mubr.msk.f32.mxu1 %vm757_vm1, %v745_v9 }
  0x54   : > { %8118 = vmatmul.mubr.msk.f32.gmra.mxu0 %vm387_vm0, %v373_v3 }
  0x55   : > { %8120 = vmatprep.mubr.msk.f32.mxu0 %vm387_vm0, %v374_v4  ;;  %8168 = vmatmul.mubr.msk.f32.gmra.mxu1 %vm757_vm1, %v746_v10 }
  0x56   : > { %8170 = vmatprep.mubr.msk.f32.mxu1 %vm757_vm1, %v747_v11 }
  0x58   : > { %8121 = vmatmul.mubr.msk.f32.gmra.mxu0 %vm387_vm0, %v375_v7 }
  0x59   : > { %8171 = vmatmul.mubr.msk.f32.gmra.mxu1 %vm757_vm1, %v748_v12 }
  0xdc   : > { %v8077_v13 = vpop.f32.mrf.mxu0 }
  0xdd   : > { %v9882_v18 = vadd.f32 %v8077_v13, %v9876_v15  ;;  %v9896_v23 = vpop.f32.mrf.mxu1 }
  0xde   : > { %v550_v16 = vpop.f32.mrf.mxu0  ;;  %12814 = vst [vmem:[#allocation9_spill] sm:$0xff] %v9896_v23 }
  0xdf   : > { %v9879_v17 = vadd.f32 %v9876_v15, %v550_v16  ;;  %12811 = vst [vmem:[#allocation6_spill] sm:$0xff] %v9882_v18  ;;  %v9906_v27 = vpop.f32.mrf.mxu1 }
  0xe0   : > { %v8080_v14 = vpop.f32.mrf.mxu0  ;;  %12817 = vst [vmem:[#allocation12_spill] sm:$0xff] %v9906_v27 }
  0xe1   : > { %12810 = vst [vmem:[#allocation5_spill] sm:$0xff] %v9879_v17  ;;  %8189 = vmatprep.mubr.msk.f32.mxu1 %vm757_vm1, %v9879_v17  ;;  %v9892_v21 = vadd.f32 %v8080_v14, %v9876_v15  ;;  %v9910_v29 = vpop.f32.mrf.mxu1 }
  0xe2   : > { %v560_v19 = vpop.f32.mrf.mxu0  ;;  %8190 = vmatmul.mubr.msk.f32.vlgmr.msra.gmra.mxu1 %vm757_vm1, %v9882_v18  ;;  %12818 = vst [vmem:[#allocation13_spill] sm:$0xff] %v9910_v29 }
  0xe3   : > { %v9889_v20 = vadd.f32 %v9876_v15, %v560_v19  ;;  %12813 = vst [vmem:[#allocation8_spill] sm:$0xff] %v9892_v21  ;;  %v9920_v33 = vpop.f32.mrf.mxu1 }
  0xe4   : > { %v8083_v22 = vpop.f32.mrf.mxu0  ;;  %12821 = vst [vmem:[#allocation16_spill] sm:$0xff] %v9920_v33 }
  0xe5   : > { %12812 = vst [vmem:[#allocation7_spill] sm:$0xff] %v9889_v20  ;;  %8192 = vmatprep.mubr.msk.f32.mxu1 %vm757_vm1, %v9889_v20  ;;  %v9899_v24 = vadd.f32 %v8083_v22, %v9876_v15  ;;  %v9924_v35 = vpop.f32.mrf.mxu1 }
  0xe6   : > { %v570_v25 = vpop.f32.mrf.mxu0  ;;  %8193 = vmatmul.mubr.msk.f32.gmra.mxu1 %vm757_vm1, %v9892_v21  ;;  %12822 = vst [vmem:[#allocation17_spill] sm:$0xff] %v9924_v35 }
  0xe7   : > { %12815 = vst [vmem:[#allocation10_spill] sm:$0xff] %v9899_v24  ;;  %v9904_v26 = vadd.f32 %v9876_v15, %v570_v25  ;;  %v9934_v40 = vpop.f32.mrf.mxu1 }
  0xe8   : > { %v8086_v28 = vpop.f32.mrf.mxu0  ;;  %12824 = vst [vmem:[#allocation19_spill] sm:$0xff] %v9934_v40 }
  0xe9   : > { %12816 = vst [vmem:[#allocation11_spill] sm:$0xff] %v9904_v26  ;;  %8195 = vmatprep.mubr.msk.f32.mxu1 %vm757_vm1, %v9904_v26  ;;  %v9913_v30 = vadd.f32 %v8086_v28, %v9876_v15  ;;  %v9938_v43 = vpop.f32.mrf.mxu1 }
  0xea   : > { %v580_v31 = vpop.f32.mrf.mxu0  ;;  %8196 = vmatmul.mubr.msk.f32.gmra.mxu1 %vm757_vm1, %v9899_v24  ;;  %12825 = vst [vmem:[#allocation20_spill] sm:$0xff] %v9938_v43 }
  0xeb   : > { %12819 = vst [vmem:[#allocation14_spill] sm:$0xff] %v9913_v30  ;;  %v9918_v32 = vadd.f32 %v9876_v15, %v580_v31  ;;  %v9948_v48 = vpop.f32.mrf.mxu1 }
  0xec   : > { %v8089_v34 = vpop.f32.mrf.mxu0  ;;  %12827 = vst [vmem:[#allocation22_spill] sm:$0xff] %v9948_v48 }
  0xed   : > { %12820 = vst [vmem:[#allocation15_spill] sm:$0xff] %v9918_v32  ;;  %8198 = vmatprep.mubr.msk.f32.mxu1 %vm757_vm1, %v9918_v32  ;;  %v9927_v36 = vadd.f32 %v8089_v34, %v9876_v15  ;;  %v9952_v50 = vpop.f32.mrf.mxu1 }
  0xee   : > { %v590_v38 = vpop.f32.mrf.mxu0  ;;  %8199 = vmatmul.mubr.msk.f32.gmra.mxu1 %vm757_vm1, %v9913_v30  ;;  %12828 = vst [vmem:[#allocation23_spill] sm:$0xff] %v9952_v50 }
  0xef   : > { %12823 = vst [vmem:[#allocation18_spill] sm:$0xff] %v9927_v36  ;;  %v9932_v39 = vadd.f32 %v9876_v15, %v590_v38  ;;  %v9962_v54 = vpop.f32.mrf.mxu1  ;;  %v7088_v38 = vld [vmem:[%s12743_s7] ss:$0 sm:$0xff] }
  0xf0   : > { %v8092_v41 = vpop.f32.mrf.mxu0  ;;  %12829 = vst [vmem:[#allocation24_spill] sm:$0xff] %v9962_v54 }
  0xf1   : > { %8201 = vmatprep.mubr.msk.f32.mxu1 %vm757_vm1, %v9932_v39  ;;  %v9941_v44 = vadd.f32 %v8092_v41, %v9876_v15  ;;  %v9966_v56 = vpop.f32.mrf.mxu1 }
  0xf2   : > { %v600_v45 = vpop.f32.mrf.mxu0  ;;  %8202 = vmatmul.mubr.msk.f32.gmra.mxu1 %vm757_vm1, %v9927_v36  ;;  %12830 = vst [vmem:[#allocation25_spill] sm:$0xff] %v9966_v56 }
  0xf3   : > { %12826 = vst [vmem:[#allocation21_spill] sm:$0xff] %v9941_v44  ;;  %v9946_v46 = vadd.f32 %v9876_v15, %v600_v45  ;;  %v9976_v60 = vpop.f32.mrf.mxu1 }
  0xf4   : > { %v8095_v49 = vpop.f32.mrf.mxu0  ;;  %12831 = vst [vmem:[#allocation26_spill] sm:$0xff] %v9976_v60 }
  0xf5   : > { %8204 = vmatprep.mubr.msk.f32.mxu1 %vm757_vm1, %v9946_v46  ;;  %v9955_v51 = vadd.f32 %v8095_v49, %v9876_v15  ;;  %v9980_v62 = vpop.f32.mrf.mxu1 }
  0xf6   : > { %v610_v52 = vpop.f32.mrf.mxu0  ;;  %8205 = vmatmul.mubr.msk.f32.gmra.mxu1 %vm757_vm1, %v9941_v44  ;;  %12832 = vst [vmem:[#allocation27_spill] sm:$0xff] %v9980_v62 }
  0xf7   : > { %v9960_v53 = vadd.f32 %v9876_v15, %v610_v52  ;;  %v9990_v2 = vpop.f32.mrf.mxu1 }
  0xf8   : > { %v8098_v55 = vpop.f32.mrf.mxu0  ;;  %12834 = vst [vmem:[#allocation29_spill] sm:$0xff] %v9990_v2 }
  0xf9   : > { %8207 = vmatprep.mubr.msk.f32.mxu1 %vm757_vm1, %v9960_v53  ;;  %v9969_v57 = vadd.f32 %v8098_v55, %v9876_v15  ;;  %v9994_v4 = vpop.f32.mrf.mxu1 }
  0xfa   : > { %v620_v58 = vpop.f32.mrf.mxu0  ;;  %8208 = vmatmul.mubr.msk.f32.gmra.mxu1 %vm757_vm1, %v9955_v51  ;;  %12835 = vst [vmem:[#allocation30_spill] sm:$0xff] %v9994_v4 }
  0xfb   : > { %v9974_v59 = vadd.f32 %v9876_v15, %v620_v58  ;;  %v10004_v8 = vpop.f32.mrf.mxu1 }
  0xfc   : > { %v8101_v61 = vpop.f32.mrf.mxu0  ;;  %12837 = vst [vmem:[#allocation32_spill] sm:$0xff] %v10004_v8 }
  0xfd   : > { %8210 = vmatprep.mubr.msk.f32.mxu1 %vm757_vm1, %v9974_v59  ;;  %v9983_v63 = vadd.f32 %v8101_v61, %v9876_v15  ;;  %v10008_v10 = vpop.f32.mrf.mxu1 }
  0xfe   : > { %v630_v0 = vpop.f32.mrf.mxu0  ;;  %8211 = vmatmul.mubr.msk.f32.gmra.mxu1 %vm757_vm1, %v9969_v57  ;;  %12838 = vst [vmem:[#allocation33_spill] sm:$0xff] %v10008_v10 }
  0xff   : > { %v9988_v1 = vadd.f32 %v9876_v15, %v630_v0  ;;  %v10018_v16 = vpop.f32.mrf.mxu1 }
 0x100   : > { %v8104_v3 = vpop.f32.mrf.mxu0  ;;  %12841 = vst [vmem:[#allocation36_spill] sm:$0xff] %v10018_v16 }
 0x101   : > { %12833 = vst [vmem:[#allocation28_spill] sm:$0xff] %v9988_v1  ;;  %8213 = vmatprep.mubr.msk.f32.mxu1 %vm757_vm1, %v9988_v1  ;;  %v9997_v5 = vadd.f32 %v8104_v3, %v9876_v15  ;;  %v10022_v19 = vpop.f32.mrf.mxu1 }
 0x102   : > { %v640_v6 = vpop.f32.mrf.mxu0  ;;  %8214 = vmatmul.mubr.msk.f32.gmra.mxu1 %vm757_vm1, %v9983_v63  ;;  %12842 = vst [vmem:[#allocation37_spill] sm:$0xff] %v10022_v19 }
 0x103   : > { %v10002_v7 = vadd.f32 %v9876_v15, %v640_v6  ;;  %v10032_v31 = vpop.f32.mrf.mxu1 }
 0x104   : > { %v8107_v9 = vpop.f32.mrf.mxu0  ;;  %12845 = vst [vmem:[#allocation40_spill] sm:$0xff] %v10032_v31  ;;  %v1790_v31 = vpop.permute.xlu1 %1789 }
 0x105   : > { %12836 = vst [vmem:[#allocation31_spill] sm:$0xff] %v10002_v7  ;;  %8216 = vmatprep.mubr.msk.f32.mxu1 %vm757_vm1, %v10002_v7  ;;  %v10011_v11 = vadd.f32 %v8107_v9, %v9876_v15  ;;  %v8157_v41 = vpop.f32.mrf.mxu1 }
 0x106   : > { %v650_v12 = vpop.f32.mrf.mxu0  ;;  %8217 = vmatmul.mubr.msk.f32.gmra.mxu1 %vm757_vm1, %v9997_v5  ;;  %v10044_v52 = vadd.f32 %v8157_v41, %v7088_v38 }
 0x107   : > { %12839 = vst [vmem:[#allocation34_spill] sm:$0xff] %v10011_v11  ;;  %v10016_v13 = vadd.f32 %v9876_v15, %v650_v12  ;;  %v10049_v58 = vpop.f32.mrf.mxu1 }
 0x108   : > { %v8110_v14 = vpop.f32.mrf.mxu0  ;;  %12847 = vst [vmem:[#allocation42_spill] sm:$0xff] %v10044_v52  ;;  %12849 = vst [vmem:[#allocation44_spill] sm:$0xff] %v10049_v58  ;;  %v1784_v16 = vpop.permute.xlu1 %1783 }
 0x109   : > { %12840 = vst [vmem:[#allocation35_spill] sm:$0xff] %v10016_v13  ;;  %8219 = vmatprep.mubr.msk.f32.mxu1 %vm757_vm1, %v10016_v13  ;;  %v10027_v22 = vadd.f32 %v8110_v14, %v9876_v15  ;;  %v8160_v0 = vpop.f32.mrf.mxu1 }
 0x10a   : > { %8220 = vmatmul.mubr.msk.f32.gmra.mxu1 %vm757_vm1, %v10011_v11  ;;  %v660_v25 = vpop.f32.mrf.mxu0  ;;  %v10058_v9 = vadd.f32 %v8160_v0, %v7088_v38 }
 0x10b   : > { %12843 = vst [vmem:[#allocation38_spill] sm:$0xff] %v10027_v22  ;;  %v10030_v28 = vadd.f32 %v9876_v15, %v660_v25  ;;  %v10063_v14 = vpop.f32.mrf.mxu1 }
 0x10c   : > { %v8113_v34 = vpop.f32.mrf.mxu0  ;;  %12851 = vst [vmem:[#allocation46_spill] sm:$0xff] %v10058_v9  ;;  %12853 = vst [vmem:[#allocation48_spill] sm:$0xff] %v10063_v14 }
 0x10d   : > { %12844 = vst [vmem:[#allocation39_spill] sm:$0xff] %v10030_v28  ;;  %8222 = vmatprep.mubr.msk.f32.mxu1 %vm757_vm1, %v10030_v28  ;;  %v10040_v45 = vadd.f32 %v8113_v34, %v9876_v15  ;;  %v8163_v34 = vpop.f32.mrf.mxu1 }
 0x10e   : > { %v670_v49 = vpop.f32.mrf.mxu0  ;;  %8223 = vmatmul.mubr.msk.f32.gmra.mxu1 %vm757_vm1, %v10027_v22 }
 0x10f   : > { %12846 = vst [vmem:[#allocation41_spill] sm:$0xff] %v10040_v45  ;;  %v10047_v55 = vadd.f32 %v9876_v15, %v670_v49 }
 0x110   : > { %v8116_v61 = vpop.f32.mrf.mxu0 }
 0x111   : > { %12848 = vst [vmem:[#allocation43_spill] sm:$0xff] %v10047_v55  ;;  %8225 = vmatprep.mubr.msk.f32.mxu1 %vm757_vm1, %v10047_v55  ;;  %v10054_v3 = vadd.f32 %v8116_v61, %v9876_v15  ;;  %v10072_v61 = vadd.f32 %v8163_v34, %v7088_v38 }
 0x112   : > { %v680_v6 = vpop.f32.mrf.mxu0  ;;  %8226 = vmatmul.mubr.msk.f32.gmra.mxu1 %vm757_vm1, %v10040_v45 }
 0x113   : > { %12850 = vst [vmem:[#allocation45_spill] sm:$0xff] %v10054_v3  ;;  %v10061_v12 = vadd.f32 %v9876_v15, %v680_v6  ;;  %12855 = vst [vmem:[#allocation50_spill] sm:$0xff] %v10072_v61  ;;  %v10077_v6 = vpop.f32.mrf.mxu1 }
 0x114   : > { %v8119_v25 = vpop.f32.mrf.mxu0  ;;  %12857 = vst [vmem:[#allocation52_spill] sm:$0xff] %v10077_v6 }
 0x115   : > { %12852 = vst [vmem:[#allocation47_spill] sm:$0xff] %v10061_v12  ;;  %8228 = vmatprep.mubr.msk.f32.mxu1 %vm757_vm1, %v10061_v12  ;;  %v10068_v41 = vadd.f32 %v8119_v25, %v9876_v15  ;;  %v8166_v2 = vpop.f32.mrf.mxu1 }
 0x116   : > { %v690_v49 = vpop.f32.mrf.mxu0  ;;  %8229 = vmatmul.mubr.msk.f32.gmra.mxu1 %vm757_vm1, %v10054_v3  ;;  %v10086_v54 = vadd.f32 %v8166_v2, %v7088_v38  ;;  %v1792_v2 = vpop.permute.xlu0 %1791 }
 0x117   : > { %12854 = vst [vmem:[#allocation49_spill] sm:$0xff] %v10068_v41  ;;  %v10075_v0 = vadd.f32 %v9876_v15, %v690_v49  ;;  %v10091_v49 = vpop.f32.mrf.mxu1  ;;  %8237 = vmatprep.subr.mxu0 %v1792_v2 }
 0x118   : > { %v8122_v8 = vpop.f32.mrf.mxu0  ;;  %12859 = vst [vmem:[#allocation54_spill] sm:$0xff] %v10086_v54  ;;  %12861 = vst [vmem:[#allocation56_spill] sm:$0xff] %v10091_v49  ;;  %8238 = vmatpush3.msra.mxu0 %v1792_v2 }
 0x119   : > { %12856 = vst [vmem:[#allocation51_spill] sm:$0xff] %v10075_v0  ;;  %8231 = vmatprep.mubr.msk.f32.mxu1 %vm757_vm1, %v10075_v0  ;;  %v10082_v60 = vadd.f32 %v8122_v8, %v9876_v15  ;;  %v8169_v48 = vpop.f32.mrf.mxu1  ;;  %8239 = vmatprep.subr.mxu0 %v1790_v31 }
 0x11a   : > { %v700_v25 = vpop.f32.mrf.mxu0  ;;  %8232 = vmatmul.mubr.msk.f32.gmra.mxu1 %vm757_vm1, %v10068_v41  ;;  %v10097_v8 = vadd.f32 %v8169_v48, %v7088_v38  ;;  %8240 = vmatpush3.msra.mxu0 %v1790_v31 }
 0x11b   : > { %12858 = vst [vmem:[#allocation53_spill] sm:$0xff] %v10082_v60  ;;  %v10089_v34 = vadd.f32 %v9876_v15, %v700_v25  ;;  %v10099_v40 = vpop.f32.mrf.mxu1  ;;  %v1788_v15 = vpop.permute.xlu0 %1787 }
 0x11c   : > { %12862 = vst [vmem:[#allocation57_spill] sm:$0xff] %v10097_v8  ;;  %12863 = vst [vmem:[#allocation58_spill] sm:$0xff] %v10099_v40  ;;  %8241 = vmatprep.subr.mxu0 %v1788_v15  ;;  %v1780_v40 = vpop.permute.xlu1 %1779 }
 0x11d   : > { %12860 = vst [vmem:[#allocation55_spill] sm:$0xff] %v10089_v34  ;;  %8234 = vmatprep.mubr.msk.f32.mxu1 %vm757_vm1, %v10089_v34  ;;  %v8172_v33 = vpop.f32.mrf.mxu1  ;;  %8242 = vmatpush3.msra.mxu0 %v1788_v15 }
 0x11e   : > { %8235 = vmatmul.mubr.msk.f32.gmra.mxu1 %vm757_vm1, %v10082_v60  ;;  %v10101_v27 = vadd.f32 %v8172_v33, %v7088_v38 }
 0x11f   : > { %v1786_v25 = vpop.permute.xlu0 %1785  ;;  %v10103_v33 = vpop.f32.mrf.mxu1 }
 0x120   : > { %12864 = vst [vmem:[#allocation59_spill] sm:$0xff] %v10101_v27  ;;  %8243 = vmatprep.subr.mxu0 %v1786_v25  ;;  %12865 = vst [vmem:[#allocation60_spill] sm:$0xff] %v10103_v33 }
 0x121   : > { %8244 = vmatpush3.msra.mxu0 %v1786_v25 }
 0x122   : > { %8245 = vmatprep.subr.mxu0 %v1784_v16 }
 0x123   : > { %v1782_v48 = vpop.permute.xlu0 %1781  ;;  %8246 = vmatpush3.msra.mxu0 %v1784_v16 }
 0x124   : > { %8247 = vmatprep.subr.mxu0 %v1782_v48 }
 0x125   : > { %8248 = vmatpush3.msra.mxu0 %v1782_v48 }
 0x126   : > { %8249 = vmatprep.subr.mxu0 %v1780_v40 }
 0x127   : > { %8250 = vmatpush3.msra.mxu0 %v1780_v40  ;;  %v1778_v38 = vpop.permute.xlu0 %1777 }
 0x128   : > { %8251 = vmatprep.subr.mxu0 %v1778_v38 }
 0x129   : > { %8252 = vmatpush3.msra.mxu0 %v1778_v38 }
 0x12b   : > { %v10111_v25 = vpop.permute.xlu0 %2586 }
 0x12c   : > { %8351 = vmatprep.subr.msk.mxu0 %vm757_vm1, %v10111_v25 }
 0x1a2   : > { %v8191_v2 = vpop.f32.mrf.mxu1 }
 0x1a3   : > { %v10105_v31 = vmul.f32 0.35355338, %v8191_v2 }
 0x1a4   : > { %v1265_v15 = vpop.f32.mrf.mxu1 }
 0x1a5   : > { %v10107_v49 = vmul.f32 0.35355338, %v1265_v15  ;;  %v1460_v16 = vsel %vm1456_vm2, %v10105_v31, -inf }
 0x1a6   : > { %1461 = vmax.xlane.f32.xlu0 %v1460_v16  ;;  %v8194_v48 = vpop.f32.mrf.mxu1 }
 0x1a7   : > { %v10115_v40 = vmul.f32 0.35355338, %v8194_v48  ;;  %v1457_v38 = vsel %vm1456_vm2, %v10107_v49, -inf }
 0x1a8   : > { %v1275_v33 = vpop.f32.mrf.mxu1 }
 0x1a9   : > { %v10117_v6 = vmul.f32 0.35355338, %v1275_v33  ;;  %v1466_v2 = vsel %vm1456_vm2, %v10115_v40, -inf }
 0x1aa   : > { %1458 = vmax.xlane.f32.xlu0 %v1457_v38  ;;  %1467 = vmax.xlane.f32.xlu1 %v1466_v2  ;;  %v8197_v15 = vpop.f32.mrf.mxu1 }
 0x1ab   : > { %v10123_v16 = vmul.f32 0.35355338, %v8197_v15  ;;  %v1463_v48 = vsel %vm1456_vm2, %v10117_v6, -inf }
 0x1ac   : > { %v1285_v14 = vpop.f32.mrf.mxu1 }
 0x1ad   : > { %v10125_v58 = vmul.f32 0.35355338, %v1285_v14  ;;  %v1472_v2 = vsel %vm1456_vm2, %v10123_v16, -inf }
 0x1ae   : > { %1464 = vmax.xlane.f32.xlu1 %v1463_v48  ;;  %v8200_v33 = vpop.f32.mrf.mxu1 }
 0x1af   : > { %v1469_v27 = vsel %vm1456_vm2, %v10125_v58, -inf  ;;  %v10131_v54 = vmul.f32 0.35355338, %v8200_v33 }
 0x1b0   : > { %1470 = vmax.xlane.f32.xlu0 %v1469_v27  ;;  %v1295_v8 = vpop.f32.mrf.mxu1 }
 0x1b1   : > { %v10133_v38 = vmul.f32 0.35355338, %v1295_v8  ;;  %v1478_v27 = vsel %vm1456_vm2, %v10131_v54, -inf }
 0x1b2   : > { %1473 = vmax.xlane.f32.xlu1 %v1472_v2  ;;  %v8203_v14 = vpop.f32.mrf.mxu1 }
 0x1b3   : > { %v1475_v15 = vsel %vm1456_vm2, %v10133_v38, -inf  ;;  %v10139_v61 = vmul.f32 0.35355338, %v8203_v14 }
 0x1b4   : > { %1476 = vmax.xlane.f32.xlu0 %v1475_v15  ;;  %v1305_v48 = vpop.f32.mrf.mxu1 }
 0x1b5   : > { %v10145_v52 = vmul.f32 0.35355338, %v1305_v48  ;;  %v1484_v2 = vsel %vm1456_vm2, %v10139_v61, -inf }
 0x1b6   : > { %1479 = vmax.xlane.f32.xlu1 %v1478_v27  ;;  %v8206_v33 = vpop.f32.mrf.mxu1 }
 0x1b7   : > { %v10143_v9 = vmul.f32 0.35355338, %v8206_v33  ;;  %v1481_v27 = vsel %vm1456_vm2, %v10145_v52, -inf }
 0x1b8   : > { %v1315_v8 = vpop.f32.mrf.mxu1 }
 0x1b9   : > { %v1490_v19 = vsel %vm1456_vm2, %v10143_v9, -inf  ;;  %v10153_v4 = vmul.f32 0.35355338, %v1315_v8 }
 0x1ba   : > { %1485 = vmax.xlane.f32.xlu1 %v1484_v2  ;;  %1491 = vmax.xlane.f32.xlu0 %v1490_v19  ;;  %v8209_v14 = vpop.f32.mrf.mxu1 }
 0x1bb   : > { %v10151_v15 = vmul.f32 0.35355338, %v8209_v14  ;;  %v1487_v19 = vsel %vm1456_vm2, %v10153_v4, -inf }
 0x1bc   : > { %v1325_v10 = vpop.f32.mrf.mxu1 }
 0x1bd   : > { %v1496_v48 = vsel %vm1456_vm2, %v10151_v15, -inf  ;;  %v10161_v2 = vmul.f32 0.35355338, %v1325_v10 }
 0x1be   : > { %1482 = vmax.xlane.f32.xlu1 %v1481_v27  ;;  %1497 = vmax.xlane.f32.xlu0 %v1496_v48  ;;  %v8212_v33 = vpop.f32.mrf.mxu1 }
 0x1bf   : > { %v10159_v62 = vmul.f32 0.35355338, %v8212_v33  ;;  %v1493_v27 = vsel %vm1456_vm2, %v10161_v2, -inf }
 0x1c0   : > { %v1335_v56 = vpop.f32.mrf.mxu1 }
 0x1c1   : > { %v1502_v8 = vsel %vm1456_vm2, %v10159_v62, -inf  ;;  %v10167_v43 = vmul.f32 0.35355338, %v1335_v56 }
 0x1c2   : > { %1488 = vmax.xlane.f32.xlu1 %v1487_v19  ;;  %1503 = vmax.xlane.f32.xlu0 %v1502_v8  ;;  %v8215_v14 = vpop.f32.mrf.mxu1 }
 0x1c3   : > { %v10171_v10 = vmul.f32 0.35355338, %v8215_v14  ;;  %v1499_v35 = vsel %vm1456_vm2, %v10167_v43, -inf }
 0x1c4   : > { %v1345_v50 = vpop.f32.mrf.mxu1 }
 0x1c5   : > { %v10177_v19 = vmul.f32 0.35355338, %v1345_v50  ;;  %v1508_v56 = vsel %vm1456_vm2, %v10171_v10, -inf }
 0x1c6   : > { %1494 = vmax.xlane.f32.xlu1 %v1493_v27  ;;  %v8218_v48 = vpop.f32.mrf.mxu1 }
 0x1c7   : > { %v10183_v27 = vmul.f32 0.35355338, %v8218_v48  ;;  %v1505_v14 = vsel %vm1456_vm2, %v10177_v19, -inf }
 0x1c8   : > { %v1355_v33 = vpop.f32.mrf.mxu1 }
 0x1ca   : > { %1500 = vmax.xlane.f32.xlu1 %v1499_v35  ;;  %v8221_v29 = vpop.f32.mrf.mxu1  ;;  %v10187_v35 = vmul.f32 0.35355338, %v1355_v33 }
 0x1cb   : > { %v10175_v23 = vmul.f32 0.35355338, %v8221_v29  ;;  %v1514_v29 = vsel %vm1456_vm2, %v10183_v27, -inf }
 0x1cc   : > { %v1365_v34 = vpop.f32.mrf.mxu1  ;;  %v1511_v0 = vsel %vm1456_vm2, %v10187_v35, -inf }
 0x1cd   : > { %12866 = vst [vmem:[#allocation61_spill] sm:$0xff] %v10175_v23  ;;  %v1520_v8 = vsel %vm1456_vm2, %v10175_v23, -inf }
 0x1ce   : > { %1509 = vmax.xlane.f32.xlu1 %v1508_v56  ;;  %1521 = vmax.xlane.f32.xlu0 %v1520_v8  ;;  %v8224_v50 = vpop.f32.mrf.mxu1 }
 0x1cf   : > { %v10203_v7 = vmul.f32 0.35355338, %v8224_v50 }
 0x1d0   : > { %v1375_v23 = vpop.f32.mrf.mxu1 }
 0x1d1   : > { %v10207_v1 = vmul.f32 0.35355338, %v1375_v23 }
 0x1d2   : > { %1506 = vmax.xlane.f32.xlu1 %v1505_v14  ;;  %v8227_v56 = vpop.f32.mrf.mxu1 }
 0x1d4   : > { %v1385_v48 = vpop.f32.mrf.mxu1 }
 0x1d6   : > { %1515 = vmax.xlane.f32.xlu1 %v1514_v29  ;;  %v8230_v8 = vpop.f32.mrf.mxu1 }
 0x1d7   : > { %v10223_v23 = vmul.f32 0.35355338, %v8230_v8 }
 0x1d8   : > { %v1395_v12 = vpop.f32.mrf.mxu1 }
 0x1da   : > { %1512 = vmax.xlane.f32.xlu1 %v1511_v0  ;;  %v8233_v33 = vpop.f32.mrf.mxu1  ;;  %v10201_v0 = vmul.f32 0.35355338, %v1365_v34 }
 0x1db   : > { %v10237_v8 = vmul.f32 0.35355338, %v8233_v33 }
 0x1dc   : > { %v1405_v14 = vpop.f32.mrf.mxu1 }
 0x1de   : > { %v8236_v55 = vpop.f32.mrf.mxu1 }
 0x1df   : > { %v10253_v33 = vmul.f32 0.35355338, %v8236_v55 }
 0x1e0   : > { %v1415_v28 = vpop.f32.mrf.mxu1 }
 0x1e1   : > { %v10197_v29 = vmul.f32 0.35355338, %v1415_v28  ;;  %v10211_v28 = vmul.f32 0.35355338, %v8227_v56  ;;  %v10229_v56 = vmul.f32 0.35355338, %v1395_v12  ;;  %v10245_v12 = vpop.permute.xlu0 %2580 }
 0x1e3   : > { %12867 = vst [vmem:[#allocation62_spill] sm:$0xff] %v10197_v29  ;;  %v1547_v13 = vsel %vm1456_vm2, %v10197_v29, -inf  ;;  %v1523_v29 = vsel %vm1456_vm2, %v10207_v1, -inf  ;;  %v1532_v34 = vsel %vm1456_vm2, %v10211_v28, -inf }
 0x1e4   : > { %2576 = vrot.lane.b32.xlu0 %v9757_v37, %s9537_s10  ;;  %v1517_v37 = vsel %vm1456_vm2, %v10201_v0, -inf }
 0x1eb   : > { %2574 = vrot.lane.b32.xlu1 %v9772_v42, %s9537_s10  ;;  %v1526_v42 = vsel %vm1456_vm2, %v10203_v7, -inf }
 0x203   : > { %1548 = vmax.xlane.f32.xlu0 %v1547_v13  ;;  %v10217_v13 = vmul.f32 0.35355338, %v1385_v48  ;;  %v10233_v48 = vpop.permute.xlu1 %2584 }
 0x205   : > { %v1529_v50 = vsel %vm1456_vm2, %v10217_v13, -inf }
 0x20f   : > { %1518 = vmax.xlane.f32.xlu1 %v1517_v37  ;;  %v10241_v37 = vpop.permute.xlu1 %2582 }
 0x213   : > { %1527 = vmax.xlane.f32.xlu1 %v1526_v42  ;;  %v10247_v42 = vmul.f32 0.35355338, %v1405_v14  ;;  %v1550_v14 = vsel %vm1456_vm2, %v10253_v33, -inf }
 0x217   : > { %1524 = vmax.xlane.f32.xlu1 %v1523_v29  ;;  %v1535_v29 = vsel %vm1456_vm2, %v10229_v56, -inf }
 0x219   : > { %2572 = vrot.lane.b32.xlu0 %v9787_v47, %s9537_s10  ;;  %v1538_v47 = vsel %vm1456_vm2, %v10223_v23, -inf }
 0x21b   : > { %1533 = vmax.xlane.f32.xlu1 %v1532_v34  ;;  %v1544_v34 = vsel %vm1456_vm2, %v10237_v8, -inf }
 0x21d   : > { %2510 = vrot.lane.b32.xlu0 %v9882_v18, %s9537_s10 }
 0x21f   : > { %1530 = vmax.xlane.f32.xlu1 %v1529_v50  ;;  %v1541_v50 = vsel %vm1456_vm2, %v10247_v42, -inf }
 0x221   : > { %2514 = vrot.lane.b32.xlu0 %v9892_v21, %s9537_s10 }
 0x223   : > { %1539 = vmax.xlane.f32.xlu1 %v1538_v47  ;;  %v10257_v47 = vpop.permute.xlu1 %2578 }
 0x225   : > { %2518 = vrot.lane.b32.xlu0 %v9899_v24, %s9537_s10 }
 0x227   : > { %1536 = vmax.xlane.f32.xlu1 %v1535_v29 }
 0x229   : > { %2522 = vrot.lane.b32.xlu0 %v9913_v30, %s9537_s10 }
 0x22b   : > { %1545 = vmax.xlane.f32.xlu1 %v1544_v34 }
 0x22d   : > { %2526 = vrot.lane.b32.xlu0 %v9927_v36, %s9537_s10 }
 0x22f   : > { %v1462_v29 = vpop.xlane.xlu0 %1461  ;;  %1542 = vmax.xlane.f32.xlu1 %v1541_v50 }
 0x230   : > { %v1554_v30 = vsub.f32 %v10105_v31, %v1462_v29 }
 0x231   : > { %2530 = vrot.lane.b32.xlu0 %v9941_v44, %s9537_s10 }
 0x232   : > { %v1587_v36 = vmul.f32 1.442695, %v1554_v30 }
 0x233   : > { %v1459_v34 = vpop.xlane.xlu0 %1458  ;;  %v1468_v24 = vpop.xlane.xlu1 %1467  ;;  %1551 = vmax.xlane.f32.xlu1 %v1550_v14 }
 0x234   : > { %v1553_v55 = vsub.f32 %v10107_v49, %v1459_v34  ;;  %v1556_v21 = vsub.f32 %v10115_v40, %v1468_v24 }
 0x235   : > { %2534 = vrot.lane.b32.xlu0 %v9955_v51, %s9537_s10 }
 0x236   : > { %v1585_v50 = vmul.f32 1.442695, %v1553_v55  ;;  %v1591_v29 = vmul.f32 1.442695, %v1556_v21 }
 0x237   : > { %v1465_v18 = vpop.xlane.xlu1 %1464 }
 0x238   : > { %8933 = vpow2.f32 %v1585_v50  ;;  %v1555_v31 = vsub.f32 %v10117_v6, %v1465_v18 }
 0x239   : > { %8935 = vpow2.f32 %v1587_v36  ;;  %v1471_v44 = vpop.xlane.xlu0 %1470  ;;  %2538 = vrot.lane.b32.xlu0 %v9969_v57, %s9537_s10 }
 0x23a   : > { %v1589_v14 = vmul.f32 1.442695, %v1555_v31  ;;  %v1557_v49 = vsub.f32 %v10125_v58, %v1471_v44 }
 0x23b   : > { %v1474_v30 = vpop.xlane.xlu1 %1473 }
 0x23c   : > { %8937 = vpow2.f32 %v1589_v14  ;;  %v1593_v24 = vmul.f32 1.442695, %v1557_v49  ;;  %v1558_v40 = vsub.f32 %v10123_v16, %v1474_v30 }
 0x23d   : > { %8939 = vpow2.f32 %v1591_v29  ;;  %v1477_v34 = vpop.xlane.xlu0 %1476  ;;  %2542 = vrot.lane.b32.xlu0 %v9983_v63, %s9537_s10 }
 0x23e   : > { %8941 = vpow2.f32 %v1593_v24  ;;  %v1595_v18 = vmul.f32 1.442695, %v1558_v40  ;;  %v1559_v21 = vsub.f32 %v10133_v38, %v1477_v34 }
 0x23f   : > { %v1480_v36 = vpop.xlane.xlu1 %1479 }
 0x240   : > { %8943 = vpow2.f32 %v1595_v18  ;;  %v1597_v6 = vmul.f32 1.442695, %v1559_v21  ;;  %v1560_v55 = vsub.f32 %v10131_v54, %v1480_v36 }
 0x241   : > { %2546 = vrot.lane.b32.xlu0 %v9997_v5, %s9537_s10 }
 0x242   : > { %8945 = vpow2.f32 %v1597_v6  ;;  %v1599_v44 = vmul.f32 1.442695, %v1560_v55 }
 0x243   : > { %v1486_v58 = vpop.xlane.xlu1 %1485  ;;  %v1492_v16 = vpop.xlane.xlu0 %1491 }
 0x244   : > { %8947 = vpow2.f32 %v1599_v44  ;;  %2508 = vrot.lane.b32.xlu1 %v9879_v17, %s9537_s10  ;;  %v1562_v38 = vsub.f32 %v10139_v61, %v1486_v58  ;;  %v1564_v30 = vsub.f32 %v10143_v9, %v1492_v16 }
 0x245   : > { %v10281_v50 = vpop.eup %8933  ;;  %2550 = vrot.lane.b32.xlu0 %v10011_v11, %s9537_s10 }
 0x246   : > { %v10286_v31 = vpop.eup %8935  ;;  %8253 = vmatprep.mubr.msk.f32.mxu0 %vm1456_vm2, %v10281_v50  ;;  %v1603_v49 = vmul.f32 1.442695, %v1562_v38  ;;  %v1607_v18 = vmul.f32 1.442695, %v1564_v30 }
 0x247   : > { %8254 = vmatmul.mubr.msk.f32.vlgmr.msra.gmra.mxu0 %vm1456_vm2, %v10286_v31  ;;  %v1483_v54 = vpop.xlane.xlu1 %1482  ;;  %v1498_v14 = vpop.xlane.xlu0 %1497 }
 0x248   : > { %8352 = vmatpush3.xpose.msk.msra.mxu0 %vm757_vm1, %v10111_v25  ;;  %v1561_v29 = vsub.f32 %v10145_v52, %v1483_v54  ;;  %2512 = vrot.lane.b32.xlu1 %v9889_v20, %s9537_s10  ;;  %v1566_v21 = vsub.f32 %v10151_v15, %v1498_v14 }
 0x249   : > { %v10297_v61 = vpop.eup %8937  ;;  %8353 = vmatprep.subr.msk.mxu0 %vm757_vm1, %v10233_v48  ;;  %2554 = vrot.lane.b32.xlu0 %v10027_v22, %s9537_s10 }
 0x24a   : > { %v10304_v24 = vpop.eup %8939  ;;  %v1601_v25 = vmul.f32 1.442695, %v1561_v29  ;;  %8256 = vmatprep.mubr.msk.f32.mxu0 %vm1456_vm2, %v10297_v61  ;;  %v1611_v44 = vmul.f32 1.442695, %v1566_v21 }
 0x24b   : > { %v10308_v52 = vpop.eup %8941  ;;  %8257 = vmatmul.mubr.msk.f32.gmra.mxu0 %vm1456_vm2, %v10304_v24  ;;  %v1489_v40 = vpop.xlane.xlu1 %1488 }
 0x24c   : > { %8949 = vpow2.f32 %v1601_v25  ;;  %8354 = vmatpush3.xpose.msk.msra.mxu0 %vm757_vm1, %v10233_v48  ;;  %v1563_v9 = vsub.f32 %v10153_v4, %v1489_v40  ;;  %8259 = vmatprep.mubr.msk.f32.mxu0 %vm1456_vm2, %v10308_v52  ;;  %v1504_v6 = vpop.xlane.xlu0 %1503 }
 0x24d   : > { %v10317_v34 = vpop.eup %8943  ;;  %8951 = vpow2.f32 %v1603_v49  ;;  %8355 = vmatprep.subr.msk.mxu0 %vm757_vm1, %v10241_v37  ;;  %2516 = vrot.lane.b32.xlu1 %v9904_v26, %s9537_s10  ;;  %v1568_v58 = vsub.f32 %v10159_v62, %v1504_v6 }
 0x24e   : > { %v1605_v36 = vmul.f32 1.442695, %v1563_v9  ;;  %2558 = vrot.lane.b32.xlu0 %v10040_v45, %s9537_s10 }
 0x24f   : > { %v10326_v4 = vpop.eup %8945  ;;  %8260 = vmatmul.mubr.msk.f32.gmra.mxu0 %vm1456_vm2, %v10317_v34  ;;  %v1495_v48 = vpop.xlane.xlu1 %1494 }
 0x250   : > { %8953 = vpow2.f32 %v1605_v36  ;;  %8356 = vmatpush3.xpose.msk.msra.mxu0 %vm757_vm1, %v10241_v37  ;;  %v1565_v15 = vsub.f32 %v10161_v2, %v1495_v48  ;;  %8262 = vmatprep.mubr.msk.f32.mxu0 %vm1456_vm2, %v10326_v4  ;;  %v1615_v37 = vmul.f32 1.442695, %v1568_v58  ;;  %v9446_v48 = vld [vmem:[%s9680_s25 + $0x28] sm:$0xff] }
 0x251   : > { %v10335_v55 = vpop.eup %8947  ;;  %8955 = vpow2.f32 %v1607_v18  ;;  %8357 = vmatprep.subr.msk.mxu0 %vm757_vm1, %v10245_v12  ;;  %2520 = vrot.lane.b32.xlu1 %v9918_v32, %s9537_s10  ;;  %v9445_v18 = vld [vmem:[%s9680_s25 + $0x38] sm:$0xff] }
 0x252   : > { %v1609_v16 = vmul.f32 1.442695, %v1565_v15  ;;  %2562 = vrot.lane.b32.xlu0 %v10054_v3, %s9537_s10 }
 0x253   : > { %8263 = vmatmul.mubr.msk.f32.gmra.mxu0 %vm1456_vm2, %v10335_v55  ;;  %v1501_v2 = vpop.xlane.xlu1 %1500 }
 0x254   : > { %8957 = vpow2.f32 %v1609_v16  ;;  %8358 = vmatpush3.xpose.msk.msra.mxu0 %vm757_vm1, %v10245_v12  ;;  %v1567_v62 = vsub.f32 %v10167_v43, %v1501_v2  ;;  %v12868_v16 = vld [vmem:[#allocation28_spill] sm:$0xff] }
 0x255   : > { %8959 = vpow2.f32 %v1611_v44  ;;  %8359 = vmatprep.subr.msk.mxu0 %vm757_vm1, %v10257_v47  ;;  %2524 = vrot.lane.b32.xlu1 %v9932_v39, %s9537_s10 }
 0x256   : > { %v1613_v38 = vmul.f32 1.442695, %v1567_v62  ;;  %2566 = vrot.lane.b32.xlu0 %v10068_v41, %s9537_s10 }
 0x257   : > { %v1510_v54 = vpop.xlane.xlu1 %1509  ;;  %v10355_v29 = vpop.xlane.xlu0 %1521 }
 0x258   : > { %8961 = vpow2.f32 %v1613_v38  ;;  %8360 = vmatpush3.xpose.msk.msra.mxu0 %vm757_vm1, %v10257_v47  ;;  %v1570_v12 = vsub.f32 %v10171_v10, %v1510_v54  ;;  %v12869_v38 = vld [vmem:[#allocation31_spill] sm:$0xff] }
 0x259   : > { %v10359_v43 = vpop.eup %8949  ;;  %8963 = vpow2.f32 %v1615_v37  ;;  %2528 = vrot.lane.b32.xlu1 %v9946_v46, %s9537_s10  ;;  %v9447_v37 = vld [vmem:[%s9680_s25 + $0x20] sm:$0xff]  ;;  %v9448_v54 = vld [vmem:[%s9680_s25 + $0x10] sm:$0xff] }
 0x25a   : > { %v10364_v14 = vpop.eup %8951  ;;  %2570 = vrot.lane.b32.xlu0 %v10082_v60, %s9537_s10  ;;  %8265 = vmatprep.mubr.msk.f32.mxu0 %vm1456_vm2, %v10359_v43  ;;  %v1619_v25 = vmul.f32 1.442695, %v1570_v12  ;;  %v1652_v60 = vsel %vm1456_vm2, %v10286_v31, 0.0 }
 0x25b   : > { %8266 = vmatmul.mubr.msk.f32.gmra.mxu0 %vm1456_vm2, %v10364_v14  ;;  %v1507_v47 = vpop.xlane.xlu1 %1506  ;;  %v2577_v49 = vpop.permute.xlu0 %2576 }
 0x25c   : > { %v1569_v30 = vsub.f32 %v10177_v19, %v1507_v47  ;;  %8361 = vmatprep.subr.msk.mxu0 %vm757_vm1, %v2577_v49  ;;  %v12870_v47 = vld [vmem:[#allocation35_spill] sm:$0xff] }
 0x25d   : > { %v10374_v10 = vpop.eup %8953  ;;  %2532 = vrot.lane.b32.xlu1 %v9960_v53, %s9537_s10  ;;  %8362 = vmatpush3.xpose.msk.msra.mxu0 %vm757_vm1, %v2577_v49 }
 0x25e   : > { %v10379_v40 = vpop.eup %8955  ;;  %v1617_v9 = vmul.f32 1.442695, %v1569_v30  ;;  %3259 = vrot.lane.b32.xlu0 %v9445_v18, %s9538_s19  ;;  %8268 = vmatprep.mubr.msk.f32.mxu0 %vm1456_vm2, %v10374_v10  ;;  %v9449_v30 = vld [vmem:[%s9680_s25] sm:$0xff] }
 0x25f   : > { %8269 = vmatmul.mubr.msk.f32.gmra.mxu0 %vm1456_vm2, %v10379_v40  ;;  %v1516_v19 = vpop.xlane.xlu1 %1515 }
 0x260   : > { %8965 = vpow2.f32 %v1617_v9  ;;  %v1572_v36 = vsub.f32 %v10183_v27, %v1516_v19  ;;  %v9450_v9 = vld [vmem:[%s9680_s25 + $0x30] sm:$0xff] }
 0x261   : > { %v10387_v21 = vpop.eup %8957  ;;  %8967 = vpow2.f32 %v1619_v25  ;;  %2536 = vrot.lane.b32.xlu1 %v9974_v59, %s9537_s10  ;;  %v12871_v25 = vld [vmem:[#allocation39_spill] sm:$0xff] }
 0x262   : > { %v10392_v6 = vpop.eup %8959  ;;  %3255 = vrot.lane.b32.xlu0 %v9446_v48, %s9538_s19  ;;  %8271 = vmatprep.mubr.msk.f32.mxu0 %vm1456_vm2, %v10387_v21  ;;  %v1623_v27 = vmul.f32 1.442695, %v1572_v36  ;;  %v12872_v36 = vld [vmem:[#allocation43_spill] sm:$0xff] }
 0x263   : > { %8272 = vmatmul.mubr.msk.f32.gmra.mxu0 %vm1456_vm2, %v10392_v6  ;;  %v1513_v15 = vpop.xlane.xlu1 %1512 }
 0x264   : > { %v1571_v44 = vsub.f32 %v10187_v35, %v1513_v15 }
 0x265   : > { %v10401_v58 = vpop.eup %8961  ;;  %2540 = vrot.lane.b32.xlu1 %v12868_v16, %s9537_s10 }
 0x266   : > { %v10405_v2 = vpop.eup %8963  ;;  %v1621_v62 = vmul.f32 1.442695, %v1571_v44  ;;  %3253 = vrot.lane.b32.xlu0 %v9447_v37, %s9538_s19  ;;  %8274 = vmatprep.mubr.msk.f32.mxu0 %vm1456_vm2, %v10401_v58  ;;  %v12873_v44 = vld [vmem:[#allocation47_spill] sm:$0xff] }
 0x267   : > { %8275 = vmatmul.mubr.msk.f32.gmra.mxu0 %vm1456_vm2, %v10405_v2  ;;  %v2575_v35 = vpop.permute.xlu1 %2574 }
 0x268   : > { %8969 = vpow2.f32 %v1621_v62  ;;  %8363 = vmatprep.subr.msk.mxu0 %vm757_vm1, %v2575_v35  ;;  %v12875_v62 = vld [vmem:[#allocation55_spill] sm:$0xff] }
 0x269   : > { %8971 = vpow2.f32 %v1623_v27  ;;  %2544 = vrot.lane.b32.xlu1 %v12869_v38, %s9537_s10  ;;  %8364 = vmatpush3.xpose.msk.msra.mxu0 %vm757_vm1, %v2575_v35  ;;  %v12874_v27 = vld [vmem:[#allocation51_spill] sm:$0xff]  ;;  %v9451_v35 = vld [vmem:[%s9680_s25 + $0x18] sm:$0xff] }
 0x26a   : > { %3249 = vrot.lane.b32.xlu0 %v9448_v54, %s9538_s19 }
 0x26d   : > { %v10419_v12 = vpop.eup %8965  ;;  %2548 = vrot.lane.b32.xlu1 %v12870_v47, %s9537_s10 }
 0x26e   : > { %v10423_v49 = vpop.eup %8967  ;;  %3245 = vrot.lane.b32.xlu0 %v9449_v30, %s9538_s19  ;;  %8277 = vmatprep.mubr.msk.f32.mxu0 %vm1456_vm2, %v10419_v12  ;;  %v9452_v30 = vld [vmem:[%s9680_s25 + $0x8] sm:$0xff] }
 0x26f   : > { %8278 = vmatmul.mubr.msk.f32.gmra.mxu0 %vm1456_vm2, %v10423_v49 }
 0x271   : > { %2552 = vrot.lane.b32.xlu1 %v12871_v25, %s9537_s10 }
 0x272   : > { %4052 = vrot.lane.b32.xlu0 %v9450_v9, %s9539_s20 }
 0x275   : > { %v10435_v19 = vpop.eup %8969  ;;  %2556 = vrot.lane.b32.xlu1 %v12872_v36, %s9537_s10 }
 0x276   : > { %v10439_v15 = vpop.eup %8971  ;;  %8280 = vmatprep.mubr.msk.f32.mxu0 %vm1456_vm2, %v10435_v19 }
 0x277   : > { %8281 = vmatmul.mubr.msk.f32.gmra.mxu0 %vm1456_vm2, %v10439_v15 }
 0x279   : > { %2560 = vrot.lane.b32.xlu1 %v12873_v44, %s9537_s10 }
 0x27d   : > { %2564 = vrot.lane.b32.xlu1 %v12874_v27, %s9537_s10 }
 0x281   : > { %2568 = vrot.lane.b32.xlu1 %v12875_v62, %s9537_s10  ;;  %s9541_s10 = smov 104  }
 0x285   : > { %3257 = vrot.lane.b32.xlu1 %v9450_v9, %s9538_s19  ;;  %v1655_v9 = vsel %vm1456_vm2, %v10297_v61, 0.0 }
 0x289   : > { %3251 = vrot.lane.b32.xlu1 %v9451_v35, %s9538_s19 }
 0x28c   : > { %v10454_v54 = vpop.xlane.xlu0 %1548 }
 0x28d   : > { %3247 = vrot.lane.b32.xlu1 %v9452_v30, %s9538_s19  ;;  %v12876_v30 = vld [vmem:[#allocation61_spill] sm:$0xff]  ;;  %s9542_s19 = smov 72  }
 0x28e   : > { %v1574_v3 = vsub.f32 %v12876_v30, %v10355_v29 }
 0x290   : > { %v2573_v41 = vpop.permute.xlu0 %2572 }
 0x291   : > { %4054 = vrot.lane.b32.xlu1 %v9445_v18, %s9539_s20  ;;  %1653 = vadd.xlane.f32.xlu0 %v1652_v60  ;;  %v1661_v18 = vsel %vm1456_vm2, %v10308_v52, 0.0 }
 0x292   : > { %8365 = vmatprep.subr.msk.mxu0 %vm757_vm1, %v2573_v41 }
 0x293   : > { %8366 = vmatpush3.xpose.msk.msra.mxu0 %vm757_vm1, %v2573_v41  ;;  %v1627_v41 = vmul.f32 1.442695, %v1574_v3 }
 0x294   : > { %v10465_v35 = vpop.permute.xlu0 %2510 }
 0x295   : > { %4050 = vrot.lane.b32.xlu1 %v9446_v48, %s9539_s20  ;;  %1656 = vadd.xlane.f32.xlu0 %v1655_v9  ;;  %v1667_v48 = vsel %vm1456_vm2, %v10326_v4, 0.0  ;;  %v1679_v4 = vsel %vm1456_vm2, %v10374_v10, 0.0 }
 0x298   : > { %v1519_v31 = vpop.xlane.xlu1 %1518  ;;  %v10472_v60 = vpop.permute.xlu0 %2514 }
 0x299   : > { %v1573_v45 = vsub.f32 %v10201_v0, %v1519_v31  ;;  %4048 = vrot.lane.b32.xlu1 %v9447_v37, %s9539_s20  ;;  %1662 = vadd.xlane.f32.xlu0 %v1661_v18  ;;  %v1673_v0 = vsel %vm1456_vm2, %v10359_v43, 0.0  ;;  %v1685_v43 = vsel %vm1456_vm2, %v10387_v21, 0.0 }
 0x29b   : > { %v1625_v61 = vmul.f32 1.442695, %v1573_v45 }
 0x29c   : > { %v1528_v22 = vpop.xlane.xlu1 %1527  ;;  %v10478_v9 = vpop.permute.xlu0 %2518 }
 0x29d   : > { %8973 = vpow2.f32 %v1625_v61  ;;  %1668 = vadd.xlane.f32.xlu0 %v1667_v48  ;;  %v1576_v52 = vsub.f32 %v10203_v7, %v1528_v22 }
 0x29e   : > { %8975 = vpow2.f32 %v1627_v41 }
 0x29f   : > { %v1631_v45 = vmul.f32 1.442695, %v1576_v52 }
 0x2a0   : > { %v1525_v29 = vpop.xlane.xlu1 %1524  ;;  %v10483_v30 = vpop.permute.xlu0 %2522 }
 0x2a1   : > { %v1575_v3 = vsub.f32 %v10207_v1, %v1525_v29  ;;  %1674 = vadd.xlane.f32.xlu0 %v1673_v0  ;;  %v1691_v29 = vsel %vm1456_vm2, %v10401_v58, 0.0 }
 0x2a3   : > { %v1629_v37 = vmul.f32 1.442695, %v1575_v3  ;;  %v1697_v3 = vsel %vm1456_vm2, %v10419_v12, 0.0 }
 0x2a4   : > { %v1534_v31 = vpop.xlane.xlu1 %1533  ;;  %v10488_v18 = vpop.permute.xlu0 %2526 }
 0x2a5   : > { %8977 = vpow2.f32 %v1629_v37  ;;  %1680 = vadd.xlane.f32.xlu0 %v1679_v4  ;;  %v1578_v7 = vsub.f32 %v10211_v28, %v1534_v31 }
 0x2a6   : > { %8979 = vpow2.f32 %v1631_v45 }
 0x2a7   : > { %v1635_v48 = vmul.f32 1.442695, %v1578_v7 }
 0x2a8   : > { %v1531_v22 = vpop.xlane.xlu1 %1530  ;;  %v10493_v41 = vpop.permute.xlu0 %2530 }
 0x2a9   : > { %v1577_v1 = vsub.f32 %v10217_v13, %v1531_v22  ;;  %1686 = vadd.xlane.f32.xlu0 %v1685_v43  ;;  %v1703_v22 = vsel %vm1456_vm2, %v10435_v19, 0.0  ;;  %v12877_v43 = vld [vmem:[#allocation62_spill] sm:$0xff] }
 0x2aa   : > { %v8974_v61 = vpop.eup %8973 }
 0x2ab   : > { %v10496_v52 = vpop.eup %8975  ;;  %v1633_v10 = vmul.f32 1.442695, %v1577_v1  ;;  %8283 = vmatprep.mubr.msk.f32.mxu0 %vm1456_vm2, %v8974_v61  ;;  %v1583_v1 = vsub.f32 %v12877_v43, %v10454_v54 }
 0x2ac   : > { %8284 = vmatmul.mubr.msk.f32.gmra.mxu0 %vm1456_vm2, %v10496_v52  ;;  %v1540_v28 = vpop.xlane.xlu1 %1539  ;;  %v10503_v21 = vpop.permute.xlu0 %2534 }
 0x2ad   : > { %8981 = vpow2.f32 %v1633_v10  ;;  %1692 = vadd.xlane.f32.xlu0 %v1691_v29  ;;  %v1580_v13 = vsub.f32 %v10223_v23, %v1540_v28  ;;  %v1709_v10 = vsel %vm1456_vm2, %v8974_v61, 0.0 }
 0x2ae   : > { %8983 = vpow2.f32 %v1635_v48 }
 0x2af   : > { %v1639_v4 = vmul.f32 1.442695, %v1580_v13 }
 0x2b0   : > { %v1537_v0 = vpop.xlane.xlu1 %1536  ;;  %v10508_v45 = vpop.permute.xlu0 %2538 }
 0x2b1   : > { %v1579_v37 = vsub.f32 %v10229_v56, %v1537_v0  ;;  %1698 = vadd.xlane.f32.xlu0 %v1697_v3  ;;  %v1645_v3 = vmul.f32 1.442695, %v1583_v1 }
 0x2b2   : > { %v8978_v31 = vpop.eup %8977 }
 0x2b3   : > { %v10511_v7 = vpop.eup %8979  ;;  %v1637_v58 = vmul.f32 1.442695, %v1579_v37  ;;  %8286 = vmatprep.mubr.msk.f32.mxu0 %vm1456_vm2, %v8978_v31  ;;  %v1715_v61 = vsel %vm1456_vm2, %v8978_v31, 0.0 }
 0x2b4   : > { %8287 = vmatmul.mubr.msk.f32.gmra.mxu0 %vm1456_vm2, %v10511_v7  ;;  %v1546_v23 = vpop.xlane.xlu1 %1545  ;;  %v10518_v12 = vpop.permute.xlu0 %2542 }
 0x2b5   : > { %8985 = vpow2.f32 %v1637_v58  ;;  %1704 = vadd.xlane.f32.xlu0 %v1703_v22  ;;  %v1582_v56 = vsub.f32 %v10237_v8, %v1546_v23  ;;  %v1649_v8 = vsel %vm1456_vm2, %v10281_v50, 0.0  ;;  %v1658_v23 = vsel %vm1456_vm2, %v10304_v24, 0.0 }
 0x2b6   : > { %8987 = vpow2.f32 %v1639_v4  ;;  %v1664_v24 = vsel %vm1456_vm2, %v10317_v34, 0.0 }
 0x2b7   : > { %v1643_v19 = vmul.f32 1.442695, %v1582_v56 }
 0x2b8   : > { %v1543_v48 = vpop.xlane.xlu1 %1542  ;;  %v10524_v28 = vpop.permute.xlu0 %2546 }
 0x2b9   : > { %v1581_v29 = vsub.f32 %v10247_v42, %v1543_v48  ;;  %1710 = vadd.xlane.f32.xlu0 %v1709_v10  ;;  %v1670_v10 = vsel %vm1456_vm2, %v10335_v55, 0.0 }
 0x2ba   : > { %v8982_v13 = vpop.eup %8981 }
 0x2bb   : > { %v10527_v0 = vpop.eup %8983  ;;  %v1641_v37 = vmul.f32 1.442695, %v1581_v29  ;;  %8289 = vmatprep.mubr.msk.f32.mxu0 %vm1456_vm2, %v8982_v13  ;;  %v1721_v56 = vsel %vm1456_vm2, %v8982_v13, 0.0 }
 0x2bc   : > { %8290 = vmatmul.mubr.msk.f32.gmra.mxu0 %vm1456_vm2, %v10527_v0  ;;  %v1552_v54 = vpop.xlane.xlu1 %1551  ;;  %v10535_v4 = vpop.permute.xlu0 %2550 }
 0x2bd   : > { %8989 = vpow2.f32 %v1641_v37  ;;  %1650 = vadd.xlane.f32.xlu1 %v1649_v8  ;;  %v1584_v42 = vsub.f32 %v10253_v33, %v1552_v54  ;;  %1716 = vadd.xlane.f32.xlu0 %v1715_v61  ;;  %v1676_v8 = vsel %vm1456_vm2, %v10364_v14, 0.0 }
 0x2be   : > { %8991 = vpow2.f32 %v1643_v19 }
 0x2bf   : > { %8993 = vpow2.f32 %v1645_v3  ;;  %v1647_v58 = vmul.f32 1.442695, %v1584_v42 }
 0x2c0   : > { %v2509_v22 = vpop.permute.xlu1 %2508  ;;  %v10541_v50 = vpop.permute.xlu0 %2554 }
 0x2c1   : > { %8995 = vpow2.f32 %v1647_v58  ;;  %1659 = vadd.xlane.f32.xlu1 %v1658_v23  ;;  %1722 = vadd.xlane.f32.xlu0 %v1721_v56  ;;  %v1682_v58 = vsel %vm1456_vm2, %v10379_v40, 0.0  ;;  %v2154_v56 = vld [vmem:[%s12741_s5] sm:$0xff] }
 0x2c2   : > { %v8986_v31 = vpop.eup %8985  ;;  %8301 = vmatprep.subr.mxu1 %v2154_v56 }
 0x2c3   : > { %v10543_v43 = vpop.eup %8987  ;;  %8292 = vmatprep.mubr.msk.f32.mxu0 %vm1456_vm2, %v8986_v31  ;;  %v1727_v33 = vsel %vm1456_vm2, %v8986_v31, 0.0  ;;  %v1688_v31 = vsel %vm1456_vm2, %v10392_v6, 0.0  ;;  %8302 = vmatpush3.msra.mxu1 %v2154_v56  ;;  %v1700_v6 = vsel %vm1456_vm2, %v10423_v49, 0.0  ;;  %v1712_v49 = vsel %vm1456_vm2, %v10496_v52, 0.0 }
 0x2c4   : > { %8293 = vmatmul.mubr.msk.f32.gmra.mxu0 %vm1456_vm2, %v10543_v43  ;;  %v2513_v1 = vpop.permute.xlu1 %2512  ;;  %v10551_v48 = vpop.permute.xlu0 %2558  ;;  %v1730_v52 = vsel %vm1456_vm2, %v10543_v43, 0.0 }
 0x2c5   : > { %1665 = vadd.xlane.f32.xlu1 %v1664_v24  ;;  %1728 = vadd.xlane.f32.xlu0 %v1727_v33 }
 0x2c8   : > { %v2517_v29 = vpop.permute.xlu1 %2516  ;;  %v10555_v13 = vpop.permute.xlu0 %2562 }
 0x2c9   : > { %1671 = vadd.xlane.f32.xlu1 %v1670_v10 }
 0x2ca   : > { %v8990_v19 = vpop.eup %8989 }
 0x2cb   : > { %v10557_v3 = vpop.eup %8991  ;;  %8295 = vmatprep.mubr.msk.f32.mxu0 %vm1456_vm2, %v8990_v19  ;;  %v1733_v37 = vsel %vm1456_vm2, %v8990_v19, 0.0 }
 0x2cc   : > { %v8994_v34 = vpop.eup %8993  ;;  %8296 = vmatmul.mubr.msk.f32.gmra.mxu0 %vm1456_vm2, %v10557_v3  ;;  %v2521_v54 = vpop.permute.xlu1 %2520  ;;  %1734 = vadd.xlane.f32.xlu0 %v1733_v37 }
 0x2cd   : > { %v10565_v55 = vpop.permute.xlu0 %2566  ;;  %1677 = vadd.xlane.f32.xlu1 %v1676_v8  ;;  %8298 = vmatprep.mubr.msk.f32.mxu0 %vm1456_vm2, %v8994_v34  ;;  %v1739_v42 = vsel %vm1456_vm2, %v8994_v34, 0.0 }
 0x2ce   : > { %v8996_v61 = vpop.eup %8995 }
 0x2d0   : > { %v2525_v23 = vpop.permute.xlu1 %2524  ;;  %8299 = vmatmul.mubr.msk.f32.gmra.mxu0 %vm1456_vm2, %v8996_v61  ;;  %1740 = vadd.xlane.f32.xlu0 %v1739_v42 }
 0x2d1   : > { %1683 = vadd.xlane.f32.xlu1 %v1682_v58  ;;  %8367 = vmatprep.mubr.msk.f32.mxu0 %vm757_vm1, %v2509_v22  ;;  %v10573_v14 = vpop.permute.xlu0 %2570  ;;  %v1694_v22 = vsel %vm1456_vm2, %v10405_v2, 0.0  ;;  %v1706_v2 = vsel %vm1456_vm2, %v10439_v15, 0.0  ;;  %v1718_v15 = vsel %vm1456_vm2, %v10511_v7, 0.0  ;;  %v1736_v7 = vsel %vm1456_vm2, %v10557_v3, 0.0 }
 0x2d4   : > { %v2529_v33 = vpop.permute.xlu1 %2528  ;;  %8368 = vmatmul.mubr.msk.f32.vlgmr.msra.gmra.mxu0 %vm757_vm1, %v10465_v35 }
 0x2d5   : > { %1689 = vadd.xlane.f32.xlu1 %v1688_v31  ;;  %8370 = vmatprep.mubr.msk.f32.mxu0 %vm757_vm1, %v2513_v1  ;;  %v10583_v40 = vpop.permute.xlu0 %3259 }
 0x2d6   : > { %8415 = vmatprep.subr.mxu1 %v10583_v40 }
 0x2d8   : > { %v2533_v24 = vpop.permute.xlu1 %2532  ;;  %8371 = vmatmul.mubr.msk.f32.gmra.mxu0 %vm757_vm1, %v10472_v60 }
 0x2d9   : > { %1695 = vadd.xlane.f32.xlu1 %v1694_v22  ;;  %8373 = vmatprep.mubr.msk.f32.mxu0 %vm757_vm1, %v2517_v29 }
 0x2dc   : > { %v2537_v35 = vpop.permute.xlu1 %2536  ;;  %8374 = vmatmul.mubr.msk.f32.gmra.mxu0 %vm757_vm1, %v10478_v9 }
 0x2dd   : > { %1701 = vadd.xlane.f32.xlu1 %v1700_v6  ;;  %8376 = vmatprep.mubr.msk.f32.mxu0 %vm757_vm1, %v2521_v54 }
 0x2e0   : > { %8377 = vmatmul.mubr.msk.f32.gmra.mxu0 %vm757_vm1, %v10483_v30  ;;  %v2541_v60 = vpop.permute.xlu1 %2540  ;;  %v1724_v30 = vsel %vm1456_vm2, %v10527_v0, 0.0 }
 0x2e1   : > { %1707 = vadd.xlane.f32.xlu1 %v1706_v2  ;;  %8379 = vmatprep.mubr.msk.f32.mxu0 %vm757_vm1, %v2525_v23 }
 0x2e4   : > { %8380 = vmatmul.mubr.msk.f32.gmra.mxu0 %vm757_vm1, %v10488_v18  ;;  %v2545_v9 = vpop.permute.xlu1 %2544 }
 0x2e5   : > { %1713 = vadd.xlane.f32.xlu1 %v1712_v49  ;;  %8382 = vmatprep.mubr.msk.f32.mxu0 %vm757_vm1, %v2529_v33 }
 0x2e8   : > { %8383 = vmatmul.mubr.msk.f32.gmra.mxu0 %vm757_vm1, %v10493_v41  ;;  %v2549_v18 = vpop.permute.xlu1 %2548 }
 0x2e9   : > { %1719 = vadd.xlane.f32.xlu1 %v1718_v15  ;;  %8385 = vmatprep.mubr.msk.f32.mxu0 %vm757_vm1, %v2533_v24 }
 0x2ec   : > { %8386 = vmatmul.mubr.msk.f32.gmra.mxu0 %vm757_vm1, %v10503_v21  ;;  %v2553_v41 = vpop.permute.xlu1 %2552  ;;  %v1742_v21 = vsel %vm1456_vm2, %v8996_v61, 0.0 }
 0x2ed   : > { %1725 = vadd.xlane.f32.xlu1 %v1724_v30  ;;  %8388 = vmatprep.mubr.msk.f32.mxu0 %vm757_vm1, %v2537_v35 }
 0x2f0   : > { %8389 = vmatmul.mubr.msk.f32.gmra.mxu0 %vm757_vm1, %v10508_v45  ;;  %v2557_v45 = vpop.permute.xlu1 %2556 }
 0x2f1   : > { %1731 = vadd.xlane.f32.xlu1 %v1730_v52  ;;  %8391 = vmatprep.mubr.msk.f32.mxu0 %vm757_vm1, %v2541_v60 }
 0x2f4   : > { %8392 = vmatmul.mubr.msk.f32.gmra.mxu0 %vm757_vm1, %v10518_v12  ;;  %v2561_v0 = vpop.permute.xlu1 %2560 }
 0x2f5   : > { %1737 = vadd.xlane.f32.xlu1 %v1736_v7  ;;  %8394 = vmatprep.mubr.msk.f32.mxu0 %vm757_vm1, %v2545_v9 }
 0x2f8   : > { %8395 = vmatmul.mubr.msk.f32.gmra.mxu0 %vm757_vm1, %v10524_v28  ;;  %v2565_v12 = vpop.permute.xlu1 %2564  ;;  %v10641_v28 = vpop.permute.xlu0 %3255 }
 0x2f9   : > { %1743 = vadd.xlane.f32.xlu1 %v1742_v21  ;;  %8397 = vmatprep.mubr.msk.f32.mxu0 %vm757_vm1, %v2549_v18 }
 0x2fc   : > { %8398 = vmatmul.mubr.msk.f32.gmra.mxu0 %vm757_vm1, %v10535_v4  ;;  %v2569_v4 = vpop.permute.xlu1 %2568 }
 0x2fd   : > { %8400 = vmatprep.mubr.msk.f32.mxu0 %vm757_vm1, %v2553_v41 }
 0x300   : > { %8401 = vmatmul.mubr.msk.f32.gmra.mxu0 %vm757_vm1, %v10541_v50  ;;  %v10647_v50 = vpop.permute.xlu0 %3253  ;;  %v10657_v10 = vpop.permute.xlu1 %3257 }
 0x301   : > { %8403 = vmatprep.mubr.msk.f32.mxu0 %vm757_vm1, %v2557_v45 }
 0x304   : > { %8404 = vmatmul.mubr.msk.f32.gmra.mxu0 %vm757_vm1, %v10551_v48  ;;  %v10651_v43 = vpop.permute.xlu0 %3249  ;;  %v10659_v19 = vpop.permute.xlu1 %3251 }
 0x305   : > { %8406 = vmatprep.mubr.msk.f32.mxu0 %vm757_vm1, %v2561_v0 }
 0x308   : > { %8407 = vmatmul.mubr.msk.f32.gmra.mxu0 %vm757_vm1, %v10555_v13  ;;  %v10653_v1 = vpop.permute.xlu0 %3245  ;;  %v8255_v13 = vpop.f32.mrf.mxu0 }
 0x309   : > { %8409 = vmatprep.mubr.msk.f32.mxu0 %vm757_vm1, %v2565_v12  ;;  %v10661_v34 = vpop.permute.xlu1 %3247 }
 0x30a   : > { %v1963_v3 = vpop.f32.mrf.mxu0 }
 0x30c   : > { %8410 = vmatmul.mubr.msk.f32.gmra.mxu0 %vm757_vm1, %v10565_v55  ;;  %v10655_v48 = vpop.permute.xlu0 %4052  ;;  %v8258_v8 = vpop.f32.mrf.mxu0 }
 0x30d   : > { %8412 = vmatprep.mubr.msk.f32.mxu0 %vm757_vm1, %v2569_v4  ;;  %v10663_v61 = vpop.permute.xlu1 %4054 }
 0x30e   : > { %v1973_v55 = vpop.f32.mrf.mxu0 }
 0x310   : > { %8413 = vmatmul.mubr.msk.f32.gmra.mxu0 %vm757_vm1, %v10573_v14  ;;  %v8261_v42 = vpop.f32.mrf.mxu0 }
 0x311   : > { %v10665_v23 = vpop.permute.xlu1 %4050 }
 0x312   : > { %v1983_v14 = vpop.f32.mrf.mxu0 }
 0x314   : > { %v10667_v31 = vpop.f32.mrf.mxu0 }
 0x315   : > { %v10669_v33 = vpop.permute.xlu1 %4048 }
 0x316   : > { %v1993_v22 = vpop.f32.mrf.mxu0 }
 0x31a   : > { %v1654_v29 = vpop.xlane.xlu0 %1653 }
 0x31b   : > { %8997 = vrcp.f32 %v1654_v29  ;;  %v10671_v6 = vpop.f32.mrf.mxu0 }
 0x31d   : > { %v10673_v2 = vpop.f32.mrf.mxu0 }
 0x31e   : > { %v1657_v37 = vpop.xlane.xlu0 %1656 }
 0x31f   : > { %8999 = vrcp.f32 %v1657_v37  ;;  %v10675_v9 = vpop.f32.mrf.mxu0 }
 0x321   : > { %v10677_v52 = vpop.f32.mrf.mxu0 }
 0x322   : > { %v1663_v54 = vpop.xlane.xlu0 %1662 }
 0x323   : > { %v10679_v12 = vpop.f32.mrf.mxu0 }
 0x326   : > { %v1669_v58 = vpop.xlane.xlu0 %1668 }
 0x328   : > { %v8998_v18 = vpop.eup %8997 }
 0x329   : > { %v2123_v0 = vmul.f32 %v8998_v18, %v8255_v13 }
 0x32a   : > { %v1675_v56 = vpop.xlane.xlu0 %1674 }
 0x32c   : > { %v9000_v7 = vpop.eup %8999 }
 0x32e   : > { %v1681_v24 = vpop.xlane.xlu0 %1680 }
 0x332   : > { %v1687_v49 = vpop.xlane.xlu0 %1686 }
 0x336   : > { %v1693_v30 = vpop.xlane.xlu0 %1692 }
 0x33a   : > { %v1699_v37 = vpop.xlane.xlu0 %1698 }
 0x346   : > { %v1651_v35 = vpop.xlane.xlu1 %1650 }
 0x347   : > { %9001 = vrcp.f32 %v1651_v35 }
 0x348   : > { %9003 = vrcp.f32 %v1663_v54  ;;  %v2124_v54 = vmul.f32 %v9000_v7, %v1973_v55 }
 0x34a   : > { %v1660_v60 = vpop.xlane.xlu1 %1659 }
 0x34b   : > { %9005 = vrcp.f32 %v1660_v60  ;;  %v1705_v60 = vpop.xlane.xlu0 %1704 }
 0x34c   : > { %9007 = vrcp.f32 %v1669_v58 }
 0x34e   : > { %v1666_v15 = vpop.xlane.xlu1 %1665 }
 0x34f   : > { %9009 = vrcp.f32 %v1666_v15 }
 0x350   : > { %9011 = vrcp.f32 %v1675_v56 }
 0x352   : > { %v1672_v41 = vpop.xlane.xlu1 %1671 }
 0x353   : > { %9013 = vrcp.f32 %v1672_v41 }
 0x354   : > { %v9002_v21 = vpop.eup %9001  ;;  %9015 = vrcp.f32 %v1681_v24 }
 0x355   : > { %v2122_v45 = vmul.f32 %v9002_v21, %v1963_v3  ;;  %v9004_v29 = vpop.eup %9003  ;;  %v10685_v3 = vpop.f32.mrf.mxu0 }
 0x356   : > { %v1678_v4 = vpop.xlane.xlu1 %1677  ;;  %v2126_v35 = vmul.f32 %v9004_v29, %v1983_v14 }
 0x357   : > { %9017 = vrcp.f32 %v1678_v4  ;;  %8303 = vmatprep.mubr.msk.f32.mxu1 %vm757_vm1, %v2122_v45 }
 0x358   : > { %v9006_v58 = vpop.eup %9005  ;;  %8304 = vmatmul.mubr.msk.f32.vlgmr.msra.gmra.mxu1 %vm757_vm1, %v2123_v0  ;;  %9019 = vrcp.f32 %v1687_v49 }
 0x359   : > { %8306 = vmatprep.mubr.msk.f32.mxu1 %vm757_vm1, %v2124_v54  ;;  %v2125_v56 = vmul.f32 %v9006_v58, %v8258_v8  ;;  %8416 = vmatpush3.msra.mxu1 %v10583_v40  ;;  %v9008_v24 = vpop.eup %9007  ;;  %v10693_v8 = vpop.f32.mrf.mxu0 }
 0x35a   : > { %v1684_v13 = vpop.xlane.xlu1 %1683  ;;  %8417 = vmatprep.subr.mxu1 %v10657_v10 }
 0x35b   : > { %9021 = vrcp.f32 %v1684_v13  ;;  %8418 = vmatpush3.msra.mxu1 %v10657_v10  ;;  %v2128_v10 = vmul.f32 %v9008_v24, %v1993_v22  ;;  %v1711_v22 = vpop.xlane.xlu0 %1710 }
 0x35c   : > { %v9010_v55 = vpop.eup %9009  ;;  %8307 = vmatmul.mubr.msk.f32.gmra.mxu1 %vm757_vm1, %v2125_v56  ;;  %8419 = vmatprep.subr.mxu1 %v10641_v28  ;;  %9023 = vrcp.f32 %v1693_v30 }
 0x35d   : > { %8309 = vmatprep.mubr.msk.f32.mxu1 %vm757_vm1, %v2126_v35  ;;  %v2127_v40 = vmul.f32 %v9010_v55, %v8261_v42  ;;  %8420 = vmatpush3.msra.mxu1 %v10641_v28  ;;  %v9012_v14 = vpop.eup %9011  ;;  %v2033_v42 = vpop.f32.mrf.mxu0 }
 0x35e   : > { %v1690_v49 = vpop.xlane.xlu1 %1689  ;;  %8421 = vmatprep.subr.mxu1 %v10647_v50 }
 0x35f   : > { %9025 = vrcp.f32 %v1690_v49  ;;  %8422 = vmatpush3.msra.mxu1 %v10647_v50  ;;  %v2130_v50 = vmul.f32 %v9012_v14, %v10673_v2  ;;  %v8279_v7 = vpop.f32.mrf.mxu0 }
 0x360   : > { %v9014_v15 = vpop.eup %9013  ;;  %8310 = vmatmul.mubr.msk.f32.gmra.mxu1 %vm757_vm1, %v2127_v40  ;;  %8423 = vmatprep.subr.mxu1 %v10659_v19  ;;  %9027 = vrcp.f32 %v1699_v37 }
 0x361   : > { %8312 = vmatprep.mubr.msk.f32.mxu1 %vm757_vm1, %v2128_v10  ;;  %v2129_v28 = vmul.f32 %v9014_v15, %v10667_v31  ;;  %8424 = vmatpush3.msra.mxu1 %v10659_v19  ;;  %v9016_v18 = vpop.eup %9015  ;;  %v2043_v45 = vpop.f32.mrf.mxu0 }
 0x362   : > { %v1696_v30 = vpop.xlane.xlu1 %1695  ;;  %8425 = vmatprep.subr.mxu1 %v10651_v43 }
 0x363   : > { %9029 = vrcp.f32 %v1696_v30  ;;  %8426 = vmatpush3.msra.mxu1 %v10651_v43  ;;  %v2132_v43 = vmul.f32 %v9016_v18, %v10677_v52  ;;  %v8282_v0 = vpop.f32.mrf.mxu0 }
 0x364   : > { %v9018_v41 = vpop.eup %9017  ;;  %8313 = vmatmul.mubr.msk.f32.gmra.mxu1 %vm757_vm1, %v2129_v28  ;;  %8427 = vmatprep.subr.mxu1 %v10661_v34  ;;  %9031 = vrcp.f32 %v1705_v60 }
 0x365   : > { %8315 = vmatprep.mubr.msk.f32.mxu1 %vm757_vm1, %v2130_v50  ;;  %v2131_v19 = vmul.f32 %v9018_v41, %v10671_v6  ;;  %8428 = vmatpush3.msra.mxu1 %v10661_v34  ;;  %v9020_v21 = vpop.eup %9019  ;;  %v1717_v6 = vpop.xlane.xlu0 %1716 }
 0x366   : > { %v1702_v31 = vpop.xlane.xlu1 %1701  ;;  %8429 = vmatprep.subr.mxu1 %v10653_v1  ;;  %v2134_v52 = vmul.f32 %v9020_v21, %v10685_v3  ;;  %v2053_v54 = vpop.f32.mrf.mxu0 }
 0x367   : > { %9033 = vrcp.f32 %v1702_v31  ;;  %8430 = vmatpush3.msra.mxu1 %v10653_v1 }
 0x368   : > { %v9022_v2 = vpop.eup %9021  ;;  %8316 = vmatmul.mubr.msk.f32.gmra.mxu1 %vm757_vm1, %v2131_v19  ;;  %8529 = vmatprep.subr.msk.mxu1 %vm757_vm1, %v10663_v61 }
 0x369   : > { %8318 = vmatprep.mubr.msk.f32.mxu1 %vm757_vm1, %v2132_v43  ;;  %v2133_v34 = vmul.f32 %v9022_v2, %v10675_v9  ;;  %v9024_v29 = vpop.eup %9023  ;;  %v1723_v13 = vpop.xlane.xlu0 %1722 }
 0x36a   : > { %v1708_v4 = vpop.xlane.xlu1 %1707  ;;  %v2136_v9 = vmul.f32 %v9024_v29, %v2033_v42 }
 0x36b   : > { %9035 = vrcp.f32 %v1708_v4 }
 0x36c   : > { %v9026_v37 = vpop.eup %9025  ;;  %8319 = vmatmul.mubr.msk.f32.gmra.mxu1 %vm757_vm1, %v2133_v34  ;;  %9037 = vrcp.f32 %v1711_v22  ;;  %v8285_v35 = vpop.f32.mrf.mxu0 }
 0x36d   : > { %8321 = vmatprep.mubr.msk.f32.mxu1 %vm757_vm1, %v2134_v52  ;;  %v2135_v1 = vmul.f32 %v9026_v37, %v10679_v12  ;;  %v9028_v56 = vpop.eup %9027  ;;  %v1729_v14 = vpop.xlane.xlu0 %1728 }
 0x36e   : > { %v1714_v58 = vpop.xlane.xlu1 %1713  ;;  %v2138_v40 = vmul.f32 %v9028_v56, %v2043_v45  ;;  %v2063_v49 = vpop.f32.mrf.mxu0 }
 0x36f   : > { %9039 = vrcp.f32 %v1714_v58 }
 0x370   : > { %v9030_v24 = vpop.eup %9029  ;;  %8322 = vmatmul.mubr.msk.f32.gmra.mxu1 %vm757_vm1, %v2135_v1  ;;  %9041 = vrcp.f32 %v1717_v6 }
 0x371   : > { %8324 = vmatprep.mubr.msk.f32.mxu1 %vm757_vm1, %v2136_v9  ;;  %v2137_v3 = vmul.f32 %v9030_v24, %v10693_v8  ;;  %v9032_v60 = vpop.eup %9031  ;;  %v1735_v31 = vpop.xlane.xlu0 %1734 }
 0x372   : > { %v1720_v55 = vpop.xlane.xlu1 %1719  ;;  %v2140_v42 = vmul.f32 %v9032_v60, %v2053_v54 }
 0x373   : > { %9043 = vrcp.f32 %v1720_v55 }
 0x374   : > { %v9034_v12 = vpop.eup %9033  ;;  %8325 = vmatmul.mubr.msk.f32.gmra.mxu1 %vm757_vm1, %v2137_v3  ;;  %9045 = vrcp.f32 %v1723_v13  ;;  %v8288_v15 = vpop.f32.mrf.mxu0 }
 0x375   : > { %8327 = vmatprep.mubr.msk.f32.mxu1 %vm757_vm1, %v2138_v40  ;;  %v2139_v10 = vmul.f32 %v9034_v12, %v8279_v7  ;;  %v1741_v29 = vpop.xlane.xlu0 %1740 }
 0x376   : > { %v1726_v28 = vpop.xlane.xlu1 %1725  ;;  %v2073_v22 = vpop.f32.mrf.mxu0 }
 0x377   : > { %9047 = vrcp.f32 %v1726_v28 }
 0x378   : > { %v9036_v30 = vpop.eup %9035  ;;  %8328 = vmatmul.mubr.msk.f32.gmra.mxu1 %vm757_vm1, %v2139_v10  ;;  %9049 = vrcp.f32 %v1729_v14 }
 0x379   : > { %8330 = vmatprep.mubr.msk.f32.mxu1 %vm757_vm1, %v2140_v42  ;;  %v2141_v8 = vmul.f32 %v9036_v30, %v8282_v0  ;;  %v9038_v18 = vpop.eup %9037 }
 0x37a   : > { %v1732_v50 = vpop.xlane.xlu1 %1731  ;;  %v2142_v41 = vmul.f32 %v9038_v18, %v2063_v49 }
 0x37b   : > { %9051 = vrcp.f32 %v1732_v50 }
 0x37c   : > { %v9040_v19 = vpop.eup %9039  ;;  %8331 = vmatmul.mubr.msk.f32.gmra.mxu1 %vm757_vm1, %v2141_v8  ;;  %v8291_v7 = vpop.f32.mrf.mxu0 }
 0x37d   : > { %8333 = vmatprep.mubr.msk.f32.mxu1 %vm757_vm1, %v2142_v41  ;;  %v2143_v21 = vmul.f32 %v9040_v19, %v8285_v35  ;;  %v9042_v43 = vpop.eup %9041 }
 0x37e   : > { %v1738_v2 = vpop.xlane.xlu1 %1737  ;;  %v2144_v45 = vmul.f32 %v9042_v43, %v2073_v22  ;;  %v2083_v34 = vpop.f32.mrf.mxu0 }
 0x37f   : > { %9053 = vrcp.f32 %v1738_v2 }
 0x380   : > { %v9044_v6 = vpop.eup %9043  ;;  %8334 = vmatmul.mubr.msk.f32.gmra.mxu1 %vm757_vm1, %v2143_v21  ;;  %9055 = vrcp.f32 %v1735_v31 }
 0x381   : > { %v2145_v0 = vmul.f32 %v9044_v6, %v8288_v15  ;;  %8336 = vmatprep.mubr.msk.f32.mxu1 %vm757_vm1, %v2144_v45  ;;  %v9046_v4 = vpop.eup %9045 }
 0x382   : > { %v1744_v52 = vpop.xlane.xlu1 %1743  ;;  %v2146_v37 = vmul.f32 %v9046_v4, %v2083_v34 }
 0x383   : > { %9057 = vrcp.f32 %v1744_v52 }
 0x384   : > { %v9048_v1 = vpop.eup %9047  ;;  %8337 = vmatmul.mubr.msk.f32.gmra.mxu1 %vm757_vm1, %v2145_v0  ;;  %v8294_v54 = vpop.f32.mrf.mxu0  ;;  %9059 = vrcp.f32 %v1741_v29 }
 0x385   : > { %v2147_v58 = vmul.f32 %v9048_v1, %v8291_v7  ;;  %8339 = vmatprep.mubr.msk.f32.mxu1 %vm757_vm1, %v2146_v37  ;;  %v9050_v56 = vpop.eup %9049 }
 0x386   : > { %v2093_v13 = vpop.f32.mrf.mxu0 }
 0x387   : > { %v2148_v9 = vmul.f32 %v9050_v56, %v2093_v13 }
 0x388   : > { %v9052_v24 = vpop.eup %9051  ;;  %8340 = vmatmul.mubr.msk.f32.gmra.mxu1 %vm757_vm1, %v2147_v58 }
 0x389   : > { %v2149_v35 = vmul.f32 %v9052_v24, %v8294_v54  ;;  %8342 = vmatprep.mubr.msk.f32.mxu1 %vm757_vm1, %v2148_v9 }
 0x38c   : > { %8343 = vmatmul.mubr.msk.f32.gmra.mxu1 %vm757_vm1, %v2149_v35  ;;  %v8297_v3 = vpop.f32.mrf.mxu0  ;;  %v9054_v55 = vpop.eup %9053 }
 0x38d   : > { %v9056_v60 = vpop.eup %9055  ;;  %v2151_v49 = vmul.f32 %v9054_v55, %v8297_v3 }
 0x38e   : > { %v2103_v40 = vpop.f32.mrf.mxu0 }
 0x38f   : > { %v2150_v12 = vmul.f32 %v9056_v60, %v2103_v40 }
 0x390   : > { %v8300_v14 = vpop.f32.mrf.mxu0  ;;  %v9058_v10 = vpop.eup %9057 }
 0x391   : > { %8345 = vmatprep.mubr.msk.f32.mxu1 %vm757_vm1, %v2150_v12  ;;  %v9060_v15 = vpop.eup %9059  ;;  %v2153_v30 = vmul.f32 %v9058_v10, %v8300_v14 }
 0x392   : > { %v2113_v28 = vpop.f32.mrf.mxu0  ;;  %8346 = vmatmul.mubr.msk.f32.gmra.mxu1 %vm757_vm1, %v2151_v49 }
 0x393   : > { %v2152_v42 = vmul.f32 %v9060_v15, %v2113_v28 }
 0x394   : > { %v8369_v8 = vpop.f32.mrf.mxu0 }
 0x395   : > { %v10740_v18 = vmul.f32 0.35355338, %v8369_v8  ;;  %8348 = vmatprep.mubr.msk.f32.mxu1 %vm757_vm1, %v2152_v42 }
 0x396   : > { %8349 = vmatmul.mubr.msk.f32.gmra.mxu1 %vm757_vm1, %v2153_v30  ;;  %v2734_v22 = vpop.f32.mrf.mxu0 }
 0x397   : > { %v10744_v50 = vmul.f32 0.35355338, %v2734_v22  ;;  %v2928_v41 = vsel %vm1456_vm2, %v10740_v18, -inf }
 0x398   : > { %2929 = vmax.xlane.f32.xlu1 %v2928_v41  ;;  %v8372_v19 = vpop.f32.mrf.mxu0 }
 0x399   : > { %v10748_v31 = vmul.f32 0.35355338, %v8372_v19  ;;  %v2925_v7 = vsel %vm1456_vm2, %v10744_v50, -inf }
 0x39a   : > { %2926 = vmax.xlane.f32.xlu0 %v2925_v7  ;;  %v2744_v21 = vpop.f32.mrf.mxu0 }
 0x39b   : > { %v10752_v43 = vmul.f32 0.35355338, %v2744_v21  ;;  %v2934_v2 = vsel %vm1456_vm2, %v10748_v31, -inf }
 0x39c   : > { %2935 = vmax.xlane.f32.xlu1 %v2934_v2  ;;  %v8375_v45 = vpop.f32.mrf.mxu0 }
 0x39d   : > { %v10756_v6 = vmul.f32 0.35355338, %v8375_v45  ;;  %v2931_v34 = vsel %vm1456_vm2, %v10752_v43, -inf }
 0x39e   : > { %2932 = vmax.xlane.f32.xlu0 %v2931_v34  ;;  %v2754_v0 = vpop.f32.mrf.mxu0 }
 0x39f   : > { %v10760_v4 = vmul.f32 0.35355338, %v2754_v0  ;;  %v2940_v29 = vsel %vm1456_vm2, %v10756_v6, -inf }
 0x3a0   : > { %2941 = vmax.xlane.f32.xlu1 %v2940_v29  ;;  %v8378_v52 = vpop.f32.mrf.mxu0 }
 0x3a1   : > { %v10764_v37 = vmul.f32 0.35355338, %v8378_v52  ;;  %v2937_v1 = vsel %vm1456_vm2, %v10760_v4, -inf }
 0x3a2   : > { %2938 = vmax.xlane.f32.xlu0 %v2937_v1  ;;  %v2764_v54 = vpop.f32.mrf.mxu0 }
 0x3a3   : > { %v10768_v58 = vmul.f32 0.35355338, %v2764_v54  ;;  %v2946_v56 = vsel %vm1456_vm2, %v10764_v37, -inf }
 0x3a4   : > { %2947 = vmax.xlane.f32.xlu1 %v2946_v56  ;;  %v8381_v13 = vpop.f32.mrf.mxu0 }
 0x3a5   : > { %v10772_v9 = vmul.f32 0.35355338, %v8381_v13  ;;  %v2943_v24 = vsel %vm1456_vm2, %v10768_v58, -inf }
 0x3a6   : > { %2944 = vmax.xlane.f32.xlu0 %v2943_v24  ;;  %v2774_v35 = vpop.f32.mrf.mxu0 }
 0x3a7   : > { %v10776_v3 = vmul.f32 0.35355338, %v2774_v35  ;;  %v2952_v55 = vsel %vm1456_vm2, %v10772_v9, -inf }
 0x3a8   : > { %2953 = vmax.xlane.f32.xlu1 %v2952_v55  ;;  %v8384_v60 = vpop.f32.mrf.mxu0 }
 0x3a9   : > { %v10780_v12 = vmul.f32 0.35355338, %v8384_v60  ;;  %v2949_v14 = vsel %vm1456_vm2, %v10776_v3, -inf }
 0x3aa   : > { %v2784_v40 = vpop.f32.mrf.mxu0 }
 0x3ab   : > { %v10782_v49 = vmul.f32 0.35355338, %v2784_v40  ;;  %v2958_v8 = vsel %vm1456_vm2, %v10780_v12, -inf }
 0x3ac   : > { %2950 = vmax.xlane.f32.xlu1 %v2949_v14  ;;  %v8387_v10 = vpop.f32.mrf.mxu0 }
 0x3ad   : > { %v2955_v15 = vsel %vm1456_vm2, %v10782_v49, -inf  ;;  %v10788_v42 = vmul.f32 0.35355338, %v8387_v10 }
 0x3ae   : > { %2956 = vmax.xlane.f32.xlu0 %v2955_v15  ;;  %v2794_v28 = vpop.f32.mrf.mxu0 }
 0x3af   : > { %v10790_v30 = vmul.f32 0.35355338, %v2794_v28  ;;  %v2964_v2 = vsel %vm1456_vm2, %v10788_v42, -inf }
 0x3b0   : > { %2959 = vmax.xlane.f32.xlu1 %v2958_v8  ;;  %v8390_v22 = vpop.f32.mrf.mxu0 }
 0x3b1   : > { %v2961_v41 = vsel %vm1456_vm2, %v10790_v30, -inf  ;;  %v10796_v7 = vmul.f32 0.35355338, %v8390_v22 }
 0x3b2   : > { %2962 = vmax.xlane.f32.xlu0 %v2961_v41  ;;  %v2804_v19 = vpop.f32.mrf.mxu0 }
 0x3b3   : > { %v10798_v21 = vmul.f32 0.35355338, %v2804_v19  ;;  %v2970_v52 = vsel %vm1456_vm2, %v10796_v7, -inf }
 0x3b4   : > { %2965 = vmax.xlane.f32.xlu1 %v2964_v2  ;;  %v8393_v45 = vpop.f32.mrf.mxu0  ;;  %v10831_v2 = vld [vmem:[%s9680_s25 + $0x18] sm:$0xff] }
 0x3b5   : > { %v2967_v34 = vsel %vm1456_vm2, %v10798_v21, -inf  ;;  %v10804_v29 = vmul.f32 0.35355338, %v8393_v45 }
 0x3b6   : > { %2968 = vmax.xlane.f32.xlu0 %v2967_v34  ;;  %v2814_v0 = vpop.f32.mrf.mxu0  ;;  %v10836_v34 = vld [vmem:[%s9680_s25 + $0x10] sm:$0xff] }
 0x3b7   : > { %v10808_v56 = vmul.f32 0.35355338, %v2814_v0  ;;  %v2976_v13 = vsel %vm1456_vm2, %v10804_v29, -inf }
 0x3b8   : > { %2971 = vmax.xlane.f32.xlu1 %v2970_v52  ;;  %v8396_v1 = vpop.f32.mrf.mxu0 }
 0x3b9   : > { %v10812_v55 = vmul.f32 0.35355338, %v8396_v1  ;;  %v2973_v40 = vsel %vm1456_vm2, %v10808_v56, -inf }
 0x3ba   : > { %v2824_v54 = vpop.f32.mrf.mxu0 }
 0x3bb   : > { %v10820_v10 = vmul.f32 0.35355338, %v2824_v54  ;;  %v2982_v15 = vsel %vm1456_vm2, %v10812_v55, -inf }
 0x3bc   : > { %2977 = vmax.xlane.f32.xlu1 %v2976_v13  ;;  %v8399_v24 = vpop.f32.mrf.mxu0 }
 0x3bd   : > { %v10824_v28 = vmul.f32 0.35355338, %v8399_v24  ;;  %v2979_v8 = vsel %vm1456_vm2, %v10820_v10, -inf }
 0x3be   : > { %v2834_v35 = vpop.f32.mrf.mxu0 }
 0x3bf   : > { %v10814_v60 = vmul.f32 0.35355338, %v2834_v35  ;;  %v2988_v22 = vsel %vm1456_vm2, %v10824_v28, -inf }
 0x3c0   : > { %2974 = vmax.xlane.f32.xlu1 %v2973_v40  ;;  %v8402_v41 = vpop.f32.mrf.mxu0 }
 0x3c1   : > { %v2985_v14 = vsel %vm1456_vm2, %v10814_v60, -inf }
 0x3c2   : > { %2986 = vmax.xlane.f32.xlu0 %v2985_v14  ;;  %v2844_v19 = vpop.f32.mrf.mxu0 }
 0x3c4   : > { %2983 = vmax.xlane.f32.xlu1 %v2982_v15  ;;  %v8405_v45 = vpop.f32.mrf.mxu0 }
 0x3c5   : > { %v10854_v11 = vmul.f32 0.35355338, %v8405_v45 }
 0x3c6   : > { %v2854_v0 = vpop.f32.mrf.mxu0 }
 0x3c8   : > { %2980 = vmax.xlane.f32.xlu1 %v2979_v8  ;;  %v8408_v52 = vpop.f32.mrf.mxu0  ;;  %v10848_v8 = vmul.f32 0.35355338, %v8402_v41 }
 0x3c9   : > { %v10862_v41 = vmul.f32 0.35355338, %v8408_v52 }
 0x3ca   : > { %v2864_v1 = vpop.f32.mrf.mxu0 }
 0x3cb   : > { %12880 = vst [vmem:[#allocation35_spill] sm:$0xff] %v10862_v41  ;;  %v3006_v45 = vsel %vm1456_vm2, %v10862_v41, -inf }
 0x3cc   : > { %2989 = vmax.xlane.f32.xlu1 %v2988_v22  ;;  %v8411_v54 = vpop.f32.mrf.mxu0  ;;  %v10850_v22 = vmul.f32 0.35355338, %v2844_v19 }
 0x3cd   : > { %v10840_v24 = vmul.f32 0.35355338, %v8411_v54  ;;  %v2994_v54 = vsel %vm1456_vm2, %v10848_v8, -inf }
 0x3ce   : > { %v2874_v13 = vpop.f32.mrf.mxu0 }
 0x3cf   : > { %12878 = vst [vmem:[#allocation28_spill] sm:$0xff] %v10840_v24  ;;  %v3012_v14 = vsel %vm1456_vm2, %v10840_v24, -inf }
 0x3d0   : > { %v8414_v35 = vpop.f32.mrf.mxu0 }
 0x3d1   : > { %v10842_v40 = vmul.f32 0.35355338, %v8414_v35  ;;  %v2991_v35 = vsel %vm1456_vm2, %v10850_v22, -inf }
 0x3d3   : > { %12879 = vst [vmem:[#allocation31_spill] sm:$0xff] %v10842_v40  ;;  %v3018_v15 = vsel %vm1456_vm2, %v10842_v40, -inf  ;;  %v10866_v40 = vmul.f32 0.35355338, %v2864_v1  ;;  %v10884_v1 = vld [vmem:[%s12743_s7] ss:$0 sm:$0xff] }
 0x3d5   : > { %12881 = vst [vmem:[#allocation61_spill] sm:$0xff] %v10866_v40  ;;  %v3003_v52 = vsel %vm1456_vm2, %v10866_v40, -inf }
 0x3d8   : > { %4046 = vrot.lane.b32.xlu0 %v10831_v2, %s9539_s20 }
 0x3dd   : > { %4044 = vrot.lane.b32.xlu1 %v10836_v34, %s9539_s20 }
 0x3f7   : > { %3013 = vmax.xlane.f32.xlu0 %v3012_v14  ;;  %v10858_v14 = vmul.f32 0.35355338, %v2854_v0  ;;  %v10875_v0 = vmul.f32 0.35355338, %v2874_v13 }
 0x3f9   : > { %v2997_v19 = vsel %vm1456_vm2, %v10858_v14, -inf  ;;  %12882 = vst [vmem:[#allocation62_spill] sm:$0xff] %v10875_v0  ;;  %v3009_v13 = vsel %vm1456_vm2, %v10875_v0, -inf  ;;  %v12889_v0 = vld [vmem:[#allocation17_spill] sm:$0xff] }
 0x3fb   : > { %3019 = vmax.xlane.f32.xlu0 %v3018_v15  ;;  %v3000_v15 = vsel %vm1456_vm2, %v10854_v11, -inf }
 0x401   : > { %2995 = vmax.xlane.f32.xlu1 %v2994_v54  ;;  %v10871_v54 = vld [vmem:[%s9680_s25 + $0x8] sm:$0xff] }
 0x405   : > { %2992 = vmax.xlane.f32.xlu1 %v2991_v35  ;;  %v12883_v35 = vld [vmem:[#allocation9_spill] sm:$0xff] }
 0x409   : > { %3001 = vmax.xlane.f32.xlu1 %v3000_v15  ;;  %v926_v15 = vadd.f32 %v10884_v1, %v12883_v35 }
 0x40d   : > { %2998 = vmax.xlane.f32.xlu1 %v2997_v19 }
 0x411   : > { %3007 = vmax.xlane.f32.xlu1 %v3006_v45  ;;  %4042 = vrot.lane.b32.xlu0 %v10871_v54, %s9539_s20 }
 0x415   : > { %3004 = vmax.xlane.f32.xlu1 %v3003_v52  ;;  %3976 = vrot.lane.b32.xlu0 %v9879_v17, %s9539_s20  ;;  %v12886_v17 = vld [vmem:[#allocation13_spill] sm:$0xff] }
 0x416   : > { %v936_v24 = vadd.f32 %v10884_v1, %v12886_v17 }
 0x418   : > { %v8305_v19 = vpop.f32.mrf.mxu1 }
 0x419   : > { %v10890_v45 = vadd.f32 %v8305_v19, %v926_v15  ;;  %3010 = vmax.xlane.f32.xlu1 %v3009_v13  ;;  %3980 = vrot.lane.b32.xlu0 %v9889_v20, %s9539_s20  ;;  %v946_v15 = vadd.f32 %v10884_v1, %v12889_v0 }
 0x41a   : > { %v10894_v52 = vpop.f32.mrf.mxu1 }
 0x41b   : > { %12884 = vst [vmem:[#allocation9_spill] sm:$0xff] %v10890_v45  ;;  %12885 = vst [vmem:[#allocation63_spill] sm:$0xff] %v10894_v52 }
 0x41c   : > { %v8308_v40 = vpop.f32.mrf.mxu1 }
 0x41d   : > { %v10898_v41 = vadd.f32 %v8308_v40, %v936_v24  ;;  %3984 = vrot.lane.b32.xlu0 %v9904_v26, %s9539_s20  ;;  %v12892_v24 = vld [vmem:[#allocation20_spill] sm:$0xff] }
 0x41e   : > { %v10902_v35 = vpop.f32.mrf.mxu1  ;;  %v956_v40 = vadd.f32 %v10884_v1, %v12892_v24 }
 0x41f   : > { %12887 = vst [vmem:[#allocation13_spill] sm:$0xff] %v10898_v41  ;;  %12888 = vst [vmem:[#allocation64_spill] sm:$0xff] %v10902_v35 }
 0x420   : > { %v8311_v19 = vpop.f32.mrf.mxu1 }
 0x421   : > { %v10906_v13 = vadd.f32 %v8311_v19, %v946_v15  ;;  %v2930_v45 = vpop.xlane.xlu1 %2929  ;;  %3988 = vrot.lane.b32.xlu0 %v9918_v32, %s9539_s20 }
 0x422   : > { %v3022_v17 = vsub.f32 %v10740_v18, %v2930_v45  ;;  %v10911_v52 = vpop.f32.mrf.mxu1 }
 0x423   : > { %12890 = vst [vmem:[#allocation17_spill] sm:$0xff] %v10906_v13  ;;  %12891 = vst [vmem:[#allocation65_spill] sm:$0xff] %v10911_v52  ;;  %v2927_v41 = vpop.xlane.xlu0 %2926  ;;  %v12894_v52 = vld [vmem:[#allocation23_spill] sm:$0xff] }
 0x424   : > { %v8314_v26 = vpop.f32.mrf.mxu1  ;;  %v3021_v35 = vsub.f32 %v10744_v50, %v2927_v41  ;;  %v3055_v20 = vmul.f32 1.442695, %v3022_v17  ;;  %v966_v24 = vadd.f32 %v10884_v1, %v12894_v52  ;;  %v12897_v52 = vld [vmem:[#allocation25_spill] sm:$0xff] }
 0x425   : > { %v10916_v0 = vadd.f32 %v8314_v26, %v956_v40  ;;  %v2936_v15 = vpop.xlane.xlu1 %2935  ;;  %3992 = vrot.lane.b32.xlu0 %v9932_v39, %s9539_s20 }
 0x426   : > { %v3053_v19 = vmul.f32 1.442695, %v3021_v35  ;;  %v3024_v18 = vsub.f32 %v10748_v31, %v2936_v15  ;;  %v10921_v45 = vpop.f32.mrf.mxu1  ;;  %v10934_v15 = vld [vmem:[%s9680_s25] sm:$0xff] }
 0x427   : > { %12893 = vst [vmem:[#allocation20_spill] sm:$0xff] %v10921_v45  ;;  %v2933_v13 = vpop.xlane.xlu0 %2932 }
 0x428   : > { %9061 = vpow2.f32 %v3053_v19  ;;  %v8317_v32 = vpop.f32.mrf.mxu1  ;;  %v3023_v50 = vsub.f32 %v10752_v43, %v2933_v13  ;;  %v3059_v26 = vmul.f32 1.442695, %v3024_v18 }
 0x429   : > { %9063 = vpow2.f32 %v3055_v20  ;;  %v10926_v41 = vadd.f32 %v8317_v32, %v966_v24  ;;  %v2942_v17 = vpop.xlane.xlu1 %2941  ;;  %3996 = vrot.lane.b32.xlu0 %v9946_v46, %s9539_s20  ;;  %v976_v20 = vadd.f32 %v10884_v1, %v12897_v52 }
 0x42a   : > { %v3057_v35 = vmul.f32 1.442695, %v3023_v50  ;;  %v3026_v31 = vsub.f32 %v10756_v6, %v2942_v17  ;;  %v10931_v40 = vpop.f32.mrf.mxu1  ;;  %4040 = vrot.lane.b32.xlu1 %v10934_v15, %s9539_s20 }
 0x42b   : > { %12895 = vst [vmem:[#allocation23_spill] sm:$0xff] %v10926_v41  ;;  %12896 = vst [vmem:[#allocation66_spill] sm:$0xff] %v10931_v40  ;;  %v2939_v43 = vpop.xlane.xlu0 %2938  ;;  %v12900_v40 = vld [vmem:[#allocation27_spill] sm:$0xff] }
 0x42c   : > { %9065 = vpow2.f32 %v3057_v35  ;;  %v8320_v32 = vpop.f32.mrf.mxu1  ;;  %v3025_v13 = vsub.f32 %v10760_v4, %v2939_v43  ;;  %v3063_v19 = vmul.f32 1.442695, %v3026_v31  ;;  %v986_v52 = vadd.f32 %v10884_v1, %v12900_v40 }
 0x42d   : > { %9067 = vpow2.f32 %v3059_v26  ;;  %v10941_v18 = vadd.f32 %v8320_v32, %v976_v20  ;;  %v2948_v6 = vpop.xlane.xlu1 %2947  ;;  %4000 = vrot.lane.b32.xlu0 %v9960_v53, %s9539_s20  ;;  %v12903_v32 = vld [vmem:[#allocation30_spill] sm:$0xff] }
 0x42e   : > { %v3061_v24 = vmul.f32 1.442695, %v3025_v13  ;;  %v3028_v50 = vsub.f32 %v10764_v37, %v2948_v6  ;;  %v10946_v17 = vpop.f32.mrf.mxu1  ;;  %v996_v13 = vadd.f32 %v10884_v1, %v12903_v32 }
 0x42f   : > { %12898 = vst [vmem:[#allocation25_spill] sm:$0xff] %v10941_v18  ;;  %12899 = vst [vmem:[#allocation67_spill] sm:$0xff] %v10946_v17  ;;  %v2945_v35 = vpop.xlane.xlu0 %2944 }
 0x430   : > { %9069 = vpow2.f32 %v3061_v24  ;;  %v8323_v45 = vpop.f32.mrf.mxu1  ;;  %v3027_v4 = vsub.f32 %v10768_v58, %v2945_v35  ;;  %v3067_v26 = vmul.f32 1.442695, %v3028_v50 }
 0x431   : > { %9071 = vpow2.f32 %v3063_v19  ;;  %v10951_v31 = vadd.f32 %v8323_v45, %v986_v52  ;;  %v2954_v20 = vpop.xlane.xlu1 %2953  ;;  %4004 = vrot.lane.b32.xlu0 %v9974_v59, %s9539_s20 }
 0x432   : > { %v3065_v43 = vmul.f32 1.442695, %v3027_v4  ;;  %v10955_v37 = vpop.f32.mrf.mxu1  ;;  %v3030_v40 = vsub.f32 %v10772_v9, %v2954_v20  ;;  %v12906_v9 = vld [vmem:[#allocation33_spill] sm:$0xff] }
 0x433   : > { %12901 = vst [vmem:[#allocation27_spill] sm:$0xff] %v10951_v31  ;;  %12902 = vst [vmem:[#allocation68_spill] sm:$0xff] %v10955_v37  ;;  %v1006_v35 = vadd.f32 %v10884_v1, %v12906_v9 }
 0x434   : > { %9073 = vpow2.f32 %v3065_v43  ;;  %v8326_v6 = vpop.f32.mrf.mxu1  ;;  %v3071_v4 = vmul.f32 1.442695, %v3030_v40 }
 0x435   : > { %v10960_v24 = vpop.eup %9061  ;;  %9075 = vpow2.f32 %v3067_v26  ;;  %v10962_v58 = vadd.f32 %v8326_v6, %v996_v13  ;;  %v2951_v45 = vpop.xlane.xlu1 %2950  ;;  %4008 = vrot.lane.b32.xlu0 %v12868_v16, %s9539_s20 }
 0x436   : > { %v10966_v19 = vpop.eup %9063  ;;  %v3029_v50 = vsub.f32 %v10776_v3, %v2951_v45  ;;  %v10969_v52 = vpop.f32.mrf.mxu1  ;;  %8431 = vmatprep.mubr.msk.f32.mxu1 %vm1456_vm2, %v10960_v24 }
 0x437   : > { %12904 = vst [vmem:[#allocation30_spill] sm:$0xff] %v10962_v58  ;;  %12905 = vst [vmem:[#allocation69_spill] sm:$0xff] %v10969_v52  ;;  %8432 = vmatmul.mubr.msk.f32.vlgmr.msra.gmra.mxu1 %vm1456_vm2, %v10966_v19  ;;  %v2957_v26 = vpop.xlane.xlu0 %2956  ;;  %v12936_v58 = vld [vmem:[#allocation38_spill] sm:$0xff] }
 0x438   : > { %v3069_v20 = vmul.f32 1.442695, %v3029_v50  ;;  %v8329_v43 = vpop.f32.mrf.mxu1  ;;  %8530 = vmatpush3.xpose.msk.msra.mxu1 %vm757_vm1, %v10663_v61  ;;  %v3031_v3 = vsub.f32 %v10782_v49, %v2957_v26  ;;  %v12909_v49 = vld [vmem:[#allocation37_spill] sm:$0xff] }
 0x439   : > { %v10980_v32 = vpop.eup %9065  ;;  %v10982_v13 = vadd.f32 %v8329_v43, %v1006_v35  ;;  %8531 = vmatprep.subr.msk.mxu1 %vm757_vm1, %v10655_v48  ;;  %v2960_v6 = vpop.xlane.xlu1 %2959  ;;  %4012 = vrot.lane.b32.xlu0 %v12869_v38, %s9539_s20  ;;  %v1016_v9 = vadd.f32 %v10884_v1, %v12909_v49 }
 0x43a   : > { %v10988_v40 = vpop.eup %9067  ;;  %9077 = vpow2.f32 %v3069_v20  ;;  %v3073_v45 = vmul.f32 1.442695, %v3031_v3  ;;  %v3032_v50 = vsub.f32 %v10780_v12, %v2960_v6  ;;  %v10991_v61 = vpop.f32.mrf.mxu1  ;;  %8434 = vmatprep.mubr.msk.f32.mxu1 %vm1456_vm2, %v10980_v32 }
 0x43b   : > { %12907 = vst [vmem:[#allocation33_spill] sm:$0xff] %v10982_v13  ;;  %12908 = vst [vmem:[#allocation70_spill] sm:$0xff] %v10991_v61  ;;  %9079 = vpow2.f32 %v3071_v4  ;;  %8435 = vmatmul.mubr.msk.f32.gmra.mxu1 %vm1456_vm2, %v10988_v40  ;;  %v2963_v35 = vpop.xlane.xlu0 %2962  ;;  %v12921_v61 = vld [vmem:[#allocation54_spill] sm:$0xff] }
 0x43c   : > { %9081 = vpow2.f32 %v3073_v45  ;;  %v3075_v26 = vmul.f32 1.442695, %v3032_v50  ;;  %v8332_v43 = vpop.f32.mrf.mxu1  ;;  %8532 = vmatpush3.xpose.msk.msra.mxu1 %vm757_vm1, %v10655_v48  ;;  %v3033_v12 = vsub.f32 %v10790_v30, %v2963_v35 }
 0x43d   : > { %v11002_v20 = vpop.eup %9069  ;;  %v11004_v3 = vadd.f32 %v8332_v43, %v1016_v9  ;;  %8533 = vmatprep.subr.msk.mxu1 %vm757_vm1, %v10665_v23  ;;  %v2966_v1 = vpop.xlane.xlu1 %2965  ;;  %4016 = vrot.lane.b32.xlu0 %v12870_v47, %s9539_s20 }
 0x43e   : > { %v11010_v4 = vpop.eup %9071  ;;  %9083 = vpow2.f32 %v3075_v26  ;;  %v3077_v6 = vmul.f32 1.442695, %v3033_v12  ;;  %v3034_v45 = vsub.f32 %v10788_v42, %v2966_v1  ;;  %v11013_v48 = vpop.f32.mrf.mxu1  ;;  %8437 = vmatprep.mubr.msk.f32.mxu1 %vm1456_vm2, %v11002_v20  ;;  %v12912_v42 = vld [vmem:[#allocation42_spill] sm:$0xff] }
 0x43f   : > { %12910 = vst [vmem:[#allocation37_spill] sm:$0xff] %v11004_v3  ;;  %12911 = vst [vmem:[#allocation71_spill] sm:$0xff] %v11013_v48  ;;  %8438 = vmatmul.mubr.msk.f32.gmra.mxu1 %vm1456_vm2, %v11010_v4  ;;  %v2969_v30 = vpop.xlane.xlu0 %2968  ;;  %v12935_v3 = vld [vmem:[#allocation34_spill] sm:$0xff] }
 0x440   : > { %9085 = vpow2.f32 %v3077_v6  ;;  %v3079_v50 = vmul.f32 1.442695, %v3034_v45  ;;  %v8335_v49 = vpop.f32.mrf.mxu1  ;;  %8534 = vmatpush3.xpose.msk.msra.mxu1 %vm757_vm1, %v10665_v23  ;;  %v3035_v9 = vsub.f32 %v10798_v21, %v2969_v30  ;;  %v12915_v30 = vld [vmem:[#allocation46_spill] sm:$0xff] }
 0x441   : > { %v11022_v35 = vpop.eup %9073  ;;  %v11025_v26 = vadd.f32 %v8335_v49, %v12912_v42  ;;  %8535 = vmatprep.subr.msk.mxu1 %vm757_vm1, %v10669_v33  ;;  %v2972_v43 = vpop.xlane.xlu1 %2971  ;;  %4020 = vrot.lane.b32.xlu0 %v12871_v25, %s9539_s20 }
 0x442   : > { %v11031_v12 = vpop.eup %9075  ;;  %9087 = vpow2.f32 %v3079_v50  ;;  %v3081_v1 = vmul.f32 1.442695, %v3035_v9  ;;  %v3036_v23 = vsub.f32 %v10796_v7, %v2972_v43  ;;  %v11034_v6 = vpop.f32.mrf.mxu1  ;;  %8440 = vmatprep.mubr.msk.f32.mxu1 %vm1456_vm2, %v11022_v35 }
 0x443   : > { %12913 = vst [vmem:[#allocation42_spill] sm:$0xff] %v11025_v26  ;;  %12914 = vst [vmem:[#allocation72_spill] sm:$0xff] %v11034_v6  ;;  %8441 = vmatmul.mubr.msk.f32.gmra.mxu1 %vm1456_vm2, %v11031_v12  ;;  %v2884_v7 = vpop.f32.mrf.mxu0  ;;  %v11112_v6 = vld [vmem:[%s9680_s25 + $0x30] sm:$0xff] }
 0x444   : > { %9089 = vpow2.f32 %v3081_v1  ;;  %v3083_v21 = vmul.f32 1.442695, %v3036_v23  ;;  %v8338_v45 = vpop.f32.mrf.mxu1  ;;  %8536 = vmatpush3.xpose.msk.msra.mxu1 %vm757_vm1, %v10669_v33 }
 0x445   : > { %v11043_v49 = vadd.f32 %v8338_v45, %v12915_v30  ;;  %v2978_v50 = vpop.xlane.xlu1 %2977  ;;  %4024 = vrot.lane.b32.xlu0 %v12872_v36, %s9539_s20  ;;  %v11058_v45 = vmul.f32 0.35355338, %v2884_v7  ;;  %v12918_v30 = vld [vmem:[#allocation50_spill] sm:$0xff] }
 0x446   : > { %9091 = vpow2.f32 %v3083_v21  ;;  %v11047_v9 = vpop.f32.mrf.mxu1  ;;  %v3038_v43 = vsub.f32 %v10804_v29, %v2978_v50 }
 0x447   : > { %12916 = vst [vmem:[#allocation46_spill] sm:$0xff] %v11043_v49  ;;  %12917 = vst [vmem:[#allocation73_spill] sm:$0xff] %v11047_v9  ;;  %v11049_v42 = vpop.eup %9077 }
 0x448   : > { %v11052_v1 = vpop.eup %9079  ;;  %v8341_v23 = vpop.f32.mrf.mxu1  ;;  %8443 = vmatprep.mubr.msk.f32.mxu1 %vm1456_vm2, %v11049_v42  ;;  %v3087_v7 = vmul.f32 1.442695, %v3038_v43 }
 0x449   : > { %v11056_v33 = vpop.eup %9081  ;;  %v11061_v52 = vadd.f32 %v8341_v23, %v12918_v30  ;;  %v2975_v21 = vpop.xlane.xlu1 %2974  ;;  %4028 = vrot.lane.b32.xlu0 %v12873_v44, %s9539_s20  ;;  %8444 = vmatmul.mubr.msk.f32.gmra.mxu1 %vm1456_vm2, %v11052_v1  ;;  %v3126_v44 = vsel %vm1456_vm2, %v10988_v40, 0.0  ;;  %v12938_v40 = vld [vmem:[#allocation45_spill] sm:$0xff] }
 0x44a   : > { %v3037_v29 = vsub.f32 %v10808_v56, %v2975_v21  ;;  %v11068_v50 = vpop.f32.mrf.mxu1  ;;  %8446 = vmatprep.mubr.msk.f32.mxu1 %vm1456_vm2, %v11056_v33  ;;  %v3015_v56 = vsel %vm1456_vm2, %v11058_v45, -inf }
 0x44b   : > { %12919 = vst [vmem:[#allocation50_spill] sm:$0xff] %v11061_v52  ;;  %12920 = vst [vmem:[#allocation74_spill] sm:$0xff] %v11068_v50  ;;  %v11072_v37 = vpop.eup %9083  ;;  %v2987_v17 = vpop.xlane.xlu0 %2986 }
 0x44c   : > { %v3085_v23 = vmul.f32 1.442695, %v3037_v29  ;;  %v8344_v30 = vpop.f32.mrf.mxu1  ;;  %v3041_v29 = vsub.f32 %v10814_v60, %v2987_v17 }
 0x44d   : > { %v11074_v48 = vpop.eup %9085  ;;  %v11077_v52 = vadd.f32 %v8344_v30, %v12921_v61  ;;  %v2984_v49 = vpop.xlane.xlu1 %2983  ;;  %4032 = vrot.lane.b32.xlu0 %v12874_v27, %s9539_s20  ;;  %8447 = vmatmul.mubr.msk.f32.gmra.mxu1 %vm1456_vm2, %v11072_v37 }
 0x44e   : > { %9093 = vpow2.f32 %v3085_v23  ;;  %3016 = vmax.xlane.f32.xlu1 %v3015_v56  ;;  %8449 = vmatprep.mubr.msk.f32.mxu1 %vm1456_vm2, %v11074_v48  ;;  %v3040_v61 = vsub.f32 %v10812_v55, %v2984_v49  ;;  %v11091_v30 = vpop.f32.mrf.mxu1  ;;  %v12924_v49 = vld [vmem:[#allocation57_spill] sm:$0xff] }
 0x44f   : > { %12922 = vst [vmem:[#allocation54_spill] sm:$0xff] %v11077_v52  ;;  %v11087_v43 = vpop.eup %9087  ;;  %9095 = vpow2.f32 %v3087_v7  ;;  %v4047_v21 = vpop.permute.xlu0 %4046  ;;  %12923 = vst [vmem:[#allocation75_spill] sm:$0xff] %v11091_v30  ;;  %v3093_v30 = vmul.f32 1.442695, %v3041_v29 }
 0x450   : > { %8537 = vmatprep.subr.msk.mxu1 %vm757_vm1, %v4047_v21  ;;  %v3091_v17 = vmul.f32 1.442695, %v3040_v61 }
 0x451   : > { %v11094_v52 = vpop.eup %9089  ;;  %v2981_v23 = vpop.xlane.xlu1 %2980  ;;  %4036 = vrot.lane.b32.xlu0 %v12875_v62, %s9539_s20  ;;  %8450 = vmatmul.mubr.msk.f32.gmra.mxu1 %vm1456_vm2, %v11087_v43  ;;  %v3117_v62 = vsel %vm1456_vm2, %v10960_v24, 0.0  ;;  %v12937_v24 = vld [vmem:[#allocation41_spill] sm:$0xff] }
 0x452   : > { %v3039_v7 = vsub.f32 %v10820_v10, %v2981_v23  ;;  %v8347_v55 = vpop.f32.mrf.mxu1  ;;  %8452 = vmatprep.mubr.msk.f32.mxu1 %vm1456_vm2, %v11094_v52  ;;  %8538 = vmatpush3.xpose.msk.msra.mxu1 %vm757_vm1, %v4047_v21  ;;  %v12927_v21 = vld [vmem:[#allocation59_spill] sm:$0xff] }
 0x453   : > { %v11104_v60 = vpop.eup %9091  ;;  %v11107_v56 = vadd.f32 %v8347_v55, %v12924_v49 }
 0x454   : > { %v3089_v50 = vmul.f32 1.442695, %v3039_v7  ;;  %v11109_v9 = vpop.f32.mrf.mxu1 }
 0x455   : > { %12925 = vst [vmem:[#allocation57_spill] sm:$0xff] %v11107_v56  ;;  %12926 = vst [vmem:[#allocation76_spill] sm:$0xff] %v11109_v9  ;;  %v2990_v26 = vpop.xlane.xlu1 %2989  ;;  %4725 = vrot.lane.b32.xlu0 %v11112_v6, %s9540_s26  ;;  %8453 = vmatmul.mubr.msk.f32.gmra.mxu1 %vm1456_vm2, %v11104_v60 }
 0x456   : > { %9097 = vpow2.f32 %v3089_v50  ;;  %v3042_v10 = vsub.f32 %v10824_v28, %v2990_v26  ;;  %v8350_v61 = vpop.f32.mrf.mxu1  ;;  %v12929_v26 = vld [vmem:[#allocation6_spill] sm:$0xff]  ;;  %v11139_v50 = vld [vmem:[%s9680_s25 + $0x38] sm:$0xff] }
 0x457   : > { %9099 = vpow2.f32 %v3091_v17  ;;  %v11120_v29 = vadd.f32 %v8350_v61, %v12927_v21  ;;  %v12930_v17 = vld [vmem:[#allocation8_spill] sm:$0xff]  ;;  %v12931_v21 = vld [vmem:[#allocation10_spill] sm:$0xff] }
 0x458   : > { %9101 = vpow2.f32 %v3093_v30  ;;  %v3095_v23 = vmul.f32 1.442695, %v3042_v10  ;;  %v11154_v10 = vld [vmem:[%s9680_s25 + $0x20] sm:$0xff] }
 0x459   : > { %12928 = vst [vmem:[#allocation59_spill] sm:$0xff] %v11120_v29  ;;  %v4045_v7 = vpop.permute.xlu1 %4044  ;;  %4719 = vrot.lane.b32.xlu0 %v10831_v2, %s9540_s26  ;;  %v12934_v29 = vld [vmem:[#allocation21_spill] sm:$0xff] }
 0x45a   : > { %9103 = vpow2.f32 %v3095_v23  ;;  %8539 = vmatprep.subr.msk.mxu1 %vm757_vm1, %v4045_v7  ;;  %v12932_v23 = vld [vmem:[#allocation14_spill] sm:$0xff] }
 0x45b   : > { %v11125_v55 = vpop.eup %9093  ;;  %8540 = vmatpush3.xpose.msk.msra.mxu1 %vm757_vm1, %v4045_v7  ;;  %v12933_v7 = vld [vmem:[#allocation18_spill] sm:$0xff] }
 0x45c   : > { %v11128_v28 = vpop.eup %9095  ;;  %8455 = vmatprep.mubr.msk.f32.mxu1 %vm1456_vm2, %v11125_v55 }
 0x45d   : > { %4715 = vrot.lane.b32.xlu0 %v10871_v54, %s9540_s26  ;;  %8456 = vmatmul.mubr.msk.f32.gmra.mxu1 %vm1456_vm2, %v11128_v28 }
 0x45f   : > { %3978 = vrot.lane.b32.xlu1 %v12929_v26, %s9539_s20 }
 0x461   : > { %5522 = vrot.lane.b32.xlu0 %v11139_v50, %s9541_s10 }
 0x463   : > { %v11143_v30 = vpop.eup %9097  ;;  %3982 = vrot.lane.b32.xlu1 %v12930_v17, %s9539_s20 }
 0x464   : > { %v11147_v49 = vpop.eup %9099  ;;  %8458 = vmatprep.mubr.msk.f32.mxu1 %vm1456_vm2, %v11143_v30 }
 0x465   : > { %v11151_v54 = vpop.eup %9101  ;;  %5516 = vrot.lane.b32.xlu0 %v11154_v10, %s9541_s10  ;;  %8459 = vmatmul.mubr.msk.f32.gmra.mxu1 %vm1456_vm2, %v11147_v49 }
 0x466   : > { %8461 = vmatprep.mubr.msk.f32.mxu1 %vm1456_vm2, %v11151_v54 }
 0x467   : > { %v11162_v61 = vpop.eup %9103  ;;  %3986 = vrot.lane.b32.xlu1 %v12931_v21, %s9539_s20 }
 0x469   : > { %5512 = vrot.lane.b32.xlu0 %v10836_v34, %s9541_s10  ;;  %8462 = vmatmul.mubr.msk.f32.gmra.mxu1 %vm1456_vm2, %v11162_v61 }
 0x46b   : > { %3990 = vrot.lane.b32.xlu1 %v12932_v23, %s9539_s20 }
 0x46f   : > { %3994 = vrot.lane.b32.xlu1 %v12933_v7, %s9539_s20 }
 0x473   : > { %3998 = vrot.lane.b32.xlu1 %v12934_v29, %s9539_s20 }
 0x477   : > { %4002 = vrot.lane.b32.xlu1 %v9955_v51, %s9539_s20 }
 0x47b   : > { %4006 = vrot.lane.b32.xlu1 %v9969_v57, %s9539_s20 }
 0x47f   : > { %4010 = vrot.lane.b32.xlu1 %v9983_v63, %s9539_s20 }
 0x480   : > { %v11182_v56 = vpop.xlane.xlu0 %3013 }
 0x483   : > { %4014 = vrot.lane.b32.xlu1 %v9997_v5, %s9539_s20 }
 0x484   : > { %v11186_v9 = vpop.xlane.xlu0 %3019 }
 0x487   : > { %4018 = vrot.lane.b32.xlu1 %v12935_v3, %s9539_s20 }
 0x488   : > { %3118 = vadd.xlane.f32.xlu0 %v3117_v62  ;;  %v4043_v13 = vpop.permute.xlu0 %4042 }
 0x489   : > { %8541 = vmatprep.subr.msk.mxu1 %vm757_vm1, %v4043_v13 }
 0x48a   : > { %v2996_v27 = vpop.xlane.xlu1 %2995  ;;  %8542 = vmatpush3.xpose.msk.msra.mxu1 %vm757_vm1, %v4043_v13  ;;  %v3123_v13 = vsel %vm1456_vm2, %v10980_v32, 0.0 }
 0x48b   : > { %4022 = vrot.lane.b32.xlu1 %v12936_v58, %s9539_s20  ;;  %v3044_v31 = vsub.f32 %v10848_v8, %v2996_v27 }
 0x48c   : > { %3127 = vadd.xlane.f32.xlu0 %v3126_v44  ;;  %v11199_v18 = vpop.permute.xlu0 %3976  ;;  %v3132_v44 = vsel %vm1456_vm2, %v11010_v4, 0.0 }
 0x48d   : > { %v3099_v25 = vmul.f32 1.442695, %v3044_v31  ;;  %v12939_v31 = vld [vmem:[#allocation49_spill] sm:$0xff] }
 0x48e   : > { %v2993_v36 = vpop.xlane.xlu1 %2992 }
 0x48f   : > { %v3043_v62 = vsub.f32 %v10850_v22, %v2993_v36  ;;  %4026 = vrot.lane.b32.xlu1 %v12937_v24, %s9539_s20 }
 0x490   : > { %3124 = vadd.xlane.f32.xlu0 %v3123_v13  ;;  %v11211_v27 = vpop.permute.xlu0 %3980 }
 0x491   : > { %v3097_v58 = vmul.f32 1.442695, %v3043_v62 }
 0x492   : > { %v3002_v41 = vpop.xlane.xlu1 %3001 }
 0x493   : > { %9105 = vpow2.f32 %v3097_v58  ;;  %4030 = vrot.lane.b32.xlu1 %v12938_v40, %s9539_s20  ;;  %v3046_v36 = vsub.f32 %v10854_v11, %v3002_v41  ;;  %v3138_v58 = vsel %vm1456_vm2, %v11031_v12, 0.0  ;;  %v12940_v11 = vld [vmem:[#allocation53_spill] sm:$0xff] }
 0x494   : > { %9107 = vpow2.f32 %v3099_v25  ;;  %3133 = vadd.xlane.f32.xlu0 %v3132_v44  ;;  %v11218_v4 = vpop.permute.xlu0 %3984  ;;  %v3144_v25 = vsel %vm1456_vm2, %v11052_v1, 0.0 }
 0x495   : > { %v3103_v32 = vmul.f32 1.442695, %v3046_v36  ;;  %v3150_v36 = vsel %vm1456_vm2, %v11072_v37, 0.0 }
 0x496   : > { %v2999_v8 = vpop.xlane.xlu1 %2998 }
 0x497   : > { %v3045_v22 = vsub.f32 %v10858_v14, %v2999_v8  ;;  %4034 = vrot.lane.b32.xlu1 %v12939_v31, %s9539_s20  ;;  %v12941_v14 = vld [vmem:[#allocation35_spill] sm:$0xff]  ;;  %v12942_v8 = vld [vmem:[#allocation61_spill] sm:$0xff] }
 0x498   : > { %3139 = vadd.xlane.f32.xlu0 %v3138_v58  ;;  %v12943_v58 = vld [vmem:[#allocation28_spill] sm:$0xff] }
 0x499   : > { %v3101_v62 = vmul.f32 1.442695, %v3045_v22 }
 0x49a   : > { %v3008_v13 = vpop.xlane.xlu1 %3007 }
 0x49b   : > { %9109 = vpow2.f32 %v3101_v62  ;;  %4038 = vrot.lane.b32.xlu1 %v12940_v11, %s9539_s20  ;;  %v3048_v41 = vsub.f32 %v12941_v14, %v3008_v13  ;;  %v3050_v62 = vsub.f32 %v12943_v58, %v11182_v56  ;;  %v11234_v13 = vpop.permute.xlu0 %3988  ;;  %v3156_v56 = vsel %vm1456_vm2, %v11087_v43, 0.0 }
 0x49c   : > { %9111 = vpow2.f32 %v3103_v32  ;;  %3145 = vadd.xlane.f32.xlu0 %v3144_v25  ;;  %v3162_v58 = vsel %vm1456_vm2, %v11104_v60, 0.0 }
 0x49d   : > { %v3107_v1 = vmul.f32 1.442695, %v3048_v41  ;;  %v3111_v41 = vmul.f32 1.442695, %v3050_v62  ;;  %v12945_v62 = vld [vmem:[#allocation31_spill] sm:$0xff] }
 0x49e   : > { %v3005_v44 = vpop.xlane.xlu1 %3004 }
 0x49f   : > { %v3047_v12 = vsub.f32 %v12942_v8, %v3005_v44  ;;  %4727 = vrot.lane.b32.xlu1 %v11139_v50, %s9540_s26  ;;  %v12944_v50 = vld [vmem:[#allocation62_spill] sm:$0xff] }
 0x4a0   : > { %v11230_v22 = vpop.eup %9105  ;;  %3151 = vadd.xlane.f32.xlu0 %v3150_v36  ;;  %v9461_v44 = vld [vmem:[%s9680_s25 + $0x28] sm:$0xff]  ;;  %v11244_v36 = vpop.permute.xlu0 %3992 }
 0x4a1   : > { %v9108_v32 = vpop.eup %9107  ;;  %v3105_v25 = vmul.f32 1.442695, %v3047_v12  ;;  %8464 = vmatprep.mubr.msk.f32.mxu1 %vm1456_vm2, %v11230_v22 }
 0x4a2   : > { %v3011_v14 = vpop.xlane.xlu1 %3010  ;;  %8465 = vmatmul.mubr.msk.f32.gmra.mxu1 %vm1456_vm2, %v9108_v32 }
 0x4a3   : > { %9113 = vpow2.f32 %v3105_v25  ;;  %v3049_v37 = vsub.f32 %v12944_v50, %v3011_v14  ;;  %4723 = vrot.lane.b32.xlu1 %v9461_v44, %s9540_s26  ;;  %v3174_v14 = vsel %vm1456_vm2, %v11147_v49, 0.0 }
 0x4a4   : > { %9115 = vpow2.f32 %v3107_v1  ;;  %3157 = vadd.xlane.f32.xlu0 %v3156_v56  ;;  %v11261_v60 = vpop.permute.xlu0 %3996  ;;  %v3052_v1 = vsub.f32 %v12945_v62, %v11186_v9  ;;  %v3186_v56 = vsel %vm1456_vm2, %v9108_v32, 0.0 }
 0x4a5   : > { %v3109_v8 = vmul.f32 1.442695, %v3049_v37 }
 0x4a6   : > { %v4041_v12 = vpop.permute.xlu1 %4040 }
 0x4a7   : > { %9117 = vpow2.f32 %v3109_v8  ;;  %4721 = vrot.lane.b32.xlu1 %v11154_v10, %s9540_s26  ;;  %8543 = vmatprep.subr.msk.mxu1 %vm757_vm1, %v4041_v12  ;;  %v3168_v10 = vsel %vm1456_vm2, %v11128_v28, 0.0 }
 0x4a8   : > { %v11251_v25 = vpop.eup %9109  ;;  %9119 = vpow2.f32 %v3111_v41  ;;  %3163 = vadd.xlane.f32.xlu0 %v3162_v58  ;;  %8544 = vmatpush3.xpose.msk.msra.mxu1 %vm757_vm1, %v4041_v12  ;;  %v11274_v28 = vpop.permute.xlu0 %4000 }
 0x4a9   : > { %v9112_v43 = vpop.eup %9111  ;;  %8467 = vmatprep.mubr.msk.f32.mxu1 %vm1456_vm2, %v11251_v25 }
 0x4aa   : > { %8468 = vmatmul.mubr.msk.f32.gmra.mxu1 %vm1456_vm2, %v9112_v43 }
 0x4ab   : > { %4717 = vrot.lane.b32.xlu1 %v10836_v34, %s9540_s26  ;;  %v3115_v34 = vmul.f32 1.442695, %v3052_v1 }
 0x4ac   : > { %3169 = vadd.xlane.f32.xlu0 %v3168_v10  ;;  %v11287_v41 = vpop.permute.xlu0 %4004 }
 0x4ad   : > { %9121 = vpow2.f32 %v3115_v34 }
 0x4af   : > { %4713 = vrot.lane.b32.xlu1 %v10934_v15, %s9540_s26  ;;  %v3180_v15 = vsel %vm1456_vm2, %v11162_v61, 0.0  ;;  %s326_s26 = sand.u32 1, %s9526_s28  }
 0x4b0   : > { %v11269_v50 = vpop.eup %9113  ;;  %3175 = vadd.xlane.f32.xlu0 %v3174_v14  ;;  %v11292_v61 = vpop.permute.xlu0 %4008  ;;  %s12696_s9 = scalar_lea.sflag [#allocation3], %s326_s26 }
 0x4b1   : > { %v9116_v37 = vpop.eup %9115  ;;  %8470 = vmatprep.mubr.msk.f32.mxu1 %vm1456_vm2, %v11269_v50 }
 0x4b2   : > { %8471 = vmatmul.mubr.msk.f32.gmra.mxu1 %vm1456_vm2, %v9116_v37  ;;  %v3198_v8 = vsel %vm1456_vm2, %v9116_v37, 0.0 }
 0x4b3   : > { %5520 = vrot.lane.b32.xlu1 %v11112_v6, %s9541_s10  ;;  %v3192_v6 = vsel %vm1456_vm2, %v9112_v43, 0.0 }
 0x4b4   : > { %v11280_v9 = vpop.eup %9117  ;;  %3181 = vadd.xlane.f32.xlu0 %v3180_v15  ;;  %v3120_v15 = vsel %vm1456_vm2, %v10966_v19, 0.0  ;;  %v3141_v19 = vsel %vm1456_vm2, %v11049_v42, 0.0  ;;  %v3153_v42 = vsel %vm1456_vm2, %v11074_v48, 0.0  ;;  %v3622_v48 = vld [vmem:[%s12741_s5 + $0x8] sm:$0xff] }
 0x4b5   : > { %v9120_v49 = vpop.eup %9119  ;;  %8473 = vmatprep.mubr.msk.f32.mxu1 %vm1456_vm2, %v11280_v9  ;;  %8479 = vmatprep.subr.mxu0 %v3622_v48 }
 0x4b6   : > { %8474 = vmatmul.mubr.msk.f32.gmra.mxu1 %vm1456_vm2, %v9120_v49  ;;  %v3204_v12 = vsel %vm1456_vm2, %v9120_v49, 0.0  ;;  %8480 = vmatpush3.msra.mxu0 %v3622_v48 }
 0x4b7   : > { %5518 = vrot.lane.b32.xlu1 %v9461_v44, %s9541_s10  ;;  %v11296_v44 = vpop.permute.xlu0 %4012 }
 0x4b8   : > { %3187 = vadd.xlane.f32.xlu0 %v3186_v56  ;;  %v3129_v56 = vsel %vm1456_vm2, %v11002_v20, 0.0 }
 0x4ba   : > { %v9122_v58 = vpop.eup %9121 }
 0x4bb   : > { %5514 = vrot.lane.b32.xlu1 %v10831_v2, %s9541_s10  ;;  %v3210_v32 = vsel %vm1456_vm2, %v9122_v58, 0.0  ;;  %v11299_v10 = vpop.permute.xlu0 %4016 }
 0x4bc   : > { %3193 = vadd.xlane.f32.xlu0 %v3192_v6 }
 0x4bf   : > { %v11301_v2 = vpop.permute.xlu0 %4020 }
 0x4c0   : > { %3199 = vadd.xlane.f32.xlu0 %v3198_v8 }
 0x4c3   : > { %v11303_v43 = vpop.permute.xlu0 %4024 }
 0x4c4   : > { %3205 = vadd.xlane.f32.xlu0 %v3204_v12 }
 0x4c7   : > { %v11306_v34 = vpop.permute.xlu0 %4028 }
 0x4c8   : > { %3211 = vadd.xlane.f32.xlu0 %v3210_v32 }
 0x4cb   : > { %v11312_v6 = vpop.permute.xlu0 %4032 }
 0x4d7   : > { %v3017_v62 = vpop.xlane.xlu1 %3016 }
 0x4d8   : > { %v3051_v1 = vsub.f32 %v11058_v45, %v3017_v62  ;;  %v3135_v45 = vsel %vm1456_vm2, %v11022_v35, 0.0  ;;  %v11318_v62 = vpop.permute.xlu0 %4036 }
 0x4da   : > { %v3113_v14 = vmul.f32 1.442695, %v3051_v1  ;;  %v3147_v1 = vsel %vm1456_vm2, %v11056_v33, 0.0  ;;  %v3159_v33 = vsel %vm1456_vm2, %v11094_v52, 0.0  ;;  %v3171_v52 = vsel %vm1456_vm2, %v11143_v30, 0.0 }
 0x4db   : > { %v3979_v37 = vpop.permute.xlu1 %3978 }
 0x4dc   : > { %9123 = vpow2.f32 %v3113_v14  ;;  %v11327_v35 = vpop.permute.xlu0 %4725 }
 0x4df   : > { %3121 = vadd.xlane.f32.xlu1 %v3120_v15  ;;  %v3983_v49 = vpop.permute.xlu1 %3982 }
 0x4e3   : > { %v3987_v8 = vpop.permute.xlu1 %3986  ;;  %3130 = vadd.xlane.f32.xlu1 %v3129_v56 }
 0x4e7   : > { %v3991_v12 = vpop.permute.xlu1 %3990  ;;  %3136 = vadd.xlane.f32.xlu1 %v3135_v45 }
 0x4e9   : > { %v11316_v32 = vpop.eup %9123 }
 0x4ea   : > { %8476 = vmatprep.mubr.msk.f32.mxu1 %vm1456_vm2, %v11316_v32 }
 0x4eb   : > { %v3995_v20 = vpop.permute.xlu1 %3994  ;;  %3142 = vadd.xlane.f32.xlu1 %v3141_v19  ;;  %8477 = vmatmul.mubr.msk.f32.gmra.mxu1 %vm1456_vm2, %v9122_v58 }
 0x4ec   : > { %8545 = vmatprep.mubr.msk.f32.mxu1 %vm757_vm1, %v11199_v18  ;;  %v11337_v18 = vpop.permute.xlu0 %4719 }
 0x4ef   : > { %v3999_v14 = vpop.permute.xlu1 %3998  ;;  %3148 = vadd.xlane.f32.xlu1 %v3147_v1  ;;  %8546 = vmatmul.mubr.msk.f32.vlgmr.msra.gmra.mxu1 %vm757_vm1, %v3979_v37 }
 0x4f0   : > { %8548 = vmatprep.mubr.msk.f32.mxu1 %vm757_vm1, %v11211_v27  ;;  %v11349_v27 = vpop.permute.xlu0 %4715 }
 0x4f3   : > { %v4003_v15 = vpop.permute.xlu1 %4002  ;;  %3154 = vadd.xlane.f32.xlu1 %v3153_v42  ;;  %8549 = vmatmul.mubr.msk.f32.gmra.mxu1 %vm757_vm1, %v3983_v49 }
 0x4f4   : > { %8551 = vmatprep.mubr.msk.f32.mxu1 %vm757_vm1, %v11218_v4  ;;  %v3165_v4 = vsel %vm1456_vm2, %v11125_v55, 0.0  ;;  %v3177_v55 = vsel %vm1456_vm2, %v11151_v54, 0.0  ;;  %v3189_v54 = vsel %vm1456_vm2, %v11251_v25, 0.0 }
 0x4f7   : > { %v4007_v58 = vpop.permute.xlu1 %4006  ;;  %3160 = vadd.xlane.f32.xlu1 %v3159_v33  ;;  %8552 = vmatmul.mubr.msk.f32.gmra.mxu1 %vm757_vm1, %v3987_v8 }
 0x4f8   : > { %8554 = vmatprep.mubr.msk.f32.mxu1 %vm757_vm1, %v11234_v13  ;;  %v11359_v13 = vpop.permute.xlu0 %5522 }
 0x4fb   : > { %v4011_v37 = vpop.permute.xlu1 %4010  ;;  %3166 = vadd.xlane.f32.xlu1 %v3165_v4  ;;  %8555 = vmatmul.mubr.msk.f32.gmra.mxu1 %vm757_vm1, %v3991_v12 }
 0x4fc   : > { %8557 = vmatprep.mubr.msk.f32.mxu1 %vm757_vm1, %v11244_v36  ;;  %v11368_v30 = vpop.permute.xlu0 %5516  ;;  %v3183_v36 = vsel %vm1456_vm2, %v11230_v22, 0.0  ;;  %v3195_v22 = vsel %vm1456_vm2, %v11269_v50, 0.0  ;;  %v3207_v50 = vsel %vm1456_vm2, %v11316_v32, 0.0 }
 0x4ff   : > { %v4015_v49 = vpop.permute.xlu1 %4014  ;;  %3172 = vadd.xlane.f32.xlu1 %v3171_v52  ;;  %8558 = vmatmul.mubr.msk.f32.gmra.mxu1 %vm757_vm1, %v3995_v20 }
 0x500   : > { %8560 = vmatprep.mubr.msk.f32.mxu1 %vm757_vm1, %v11261_v60 }
 0x503   : > { %v4019_v56 = vpop.permute.xlu1 %4018  ;;  %3178 = vadd.xlane.f32.xlu1 %v3177_v55  ;;  %8561 = vmatmul.mubr.msk.f32.gmra.mxu1 %vm757_vm1, %v3999_v14 }
 0x504   : > { %8563 = vmatprep.mubr.msk.f32.mxu1 %vm757_vm1, %v11274_v28  ;;  %v11378_v28 = vpop.permute.xlu0 %5512 }
 0x505   : > { %12946 = vst [vmem:[#allocation6_spill] sm:$0xff] %v11378_v28 }
 0x507   : > { %v4023_v8 = vpop.permute.xlu1 %4022  ;;  %3184 = vadd.xlane.f32.xlu1 %v3183_v36  ;;  %8564 = vmatmul.mubr.msk.f32.gmra.mxu1 %vm757_vm1, %v4003_v15 }
 0x508   : > { %8566 = vmatprep.mubr.msk.f32.mxu1 %vm757_vm1, %v11287_v41  ;;  %v3201_v41 = vsel %vm1456_vm2, %v11280_v9, 0.0 }
 0x50b   : > { %v4027_v60 = vpop.permute.xlu1 %4026  ;;  %3190 = vadd.xlane.f32.xlu1 %v3189_v54  ;;  %8567 = vmatmul.mubr.msk.f32.gmra.mxu1 %vm757_vm1, %v4007_v58 }
 0x50c   : > { %8569 = vmatprep.mubr.msk.f32.mxu1 %vm757_vm1, %v11292_v61 }
 0x50f   : > { %v4031_v45 = vpop.permute.xlu1 %4030  ;;  %3196 = vadd.xlane.f32.xlu1 %v3195_v22  ;;  %8570 = vmatmul.mubr.msk.f32.gmra.mxu1 %vm757_vm1, %v4011_v37 }
 0x510   : > { %8572 = vmatprep.mubr.msk.f32.mxu1 %vm757_vm1, %v11296_v44  ;;  %v11397_v44 = vpop.f32.mrf.mxu1 }
 0x511   : > { %v3119_v25 = vpop.xlane.xlu0 %3118  ;;  %12947 = vst [vmem:[#allocation8_spill] sm:$0xff] %v11397_v44 }
 0x512   : > { %9125 = vrcp.f32 %v3119_v25  ;;  %v8433_v9 = vpop.f32.mrf.mxu1 }
 0x513   : > { %v4035_v12 = vpop.permute.xlu1 %4034  ;;  %3202 = vadd.xlane.f32.xlu1 %v3201_v41  ;;  %8573 = vmatmul.mubr.msk.f32.gmra.mxu1 %vm757_vm1, %v4015_v49 }
 0x514   : > { %8575 = vmatprep.mubr.msk.f32.mxu1 %vm757_vm1, %v11299_v10  ;;  %v3431_v32 = vpop.f32.mrf.mxu1 }
 0x516   : > { %v8436_v1 = vpop.f32.mrf.mxu1 }
 0x517   : > { %v4039_v61 = vpop.permute.xlu1 %4038  ;;  %3208 = vadd.xlane.f32.xlu1 %v3207_v50  ;;  %8576 = vmatmul.mubr.msk.f32.gmra.mxu1 %vm757_vm1, %v4019_v56 }
 0x518   : > { %8578 = vmatprep.mubr.msk.f32.mxu1 %vm757_vm1, %v11301_v2  ;;  %v3441_v42 = vpop.f32.mrf.mxu1 }
 0x51b   : > { %8579 = vmatmul.mubr.msk.f32.gmra.mxu1 %vm757_vm1, %v4023_v8  ;;  %v11400_v19 = vpop.permute.xlu1 %4727 }
 0x51c   : > { %8581 = vmatprep.mubr.msk.f32.mxu1 %vm757_vm1, %v11303_v43  ;;  %8593 = vmatprep.subr.mxu0 %v11400_v19 }
 0x51f   : > { %v9126_v10 = vpop.eup %9125  ;;  %8582 = vmatmul.mubr.msk.f32.gmra.mxu1 %vm757_vm1, %v4027_v60  ;;  %v11416_v43 = vpop.permute.xlu1 %4723 }
 0x520   : > { %8584 = vmatprep.mubr.msk.f32.mxu1 %vm757_vm1, %v11306_v34  ;;  %v3590_v2 = vmul.f32 %v9126_v10, %v3431_v32  ;;  %v3128_v34 = vpop.xlane.xlu0 %3127 }
 0x522   : > { %8481 = vmatprep.mubr.msk.f32.mxu0 %vm757_vm1, %v3590_v2 }
 0x523   : > { %8585 = vmatmul.mubr.msk.f32.gmra.mxu1 %vm757_vm1, %v4031_v45  ;;  %v11418_v20 = vpop.permute.xlu1 %4721 }
 0x524   : > { %8587 = vmatprep.mubr.msk.f32.mxu1 %vm757_vm1, %v11312_v6  ;;  %v3125_v15 = vpop.xlane.xlu0 %3124  ;;  %v8439_v6 = vpop.f32.mrf.mxu1 }
 0x525   : > { %9127 = vrcp.f32 %v3125_v15 }
 0x526   : > { %v3451_v48 = vpop.f32.mrf.mxu1 }
 0x527   : > { %8588 = vmatmul.mubr.msk.f32.gmra.mxu1 %vm757_vm1, %v4035_v12  ;;  %v11420_v14 = vpop.permute.xlu1 %4717 }
 0x528   : > { %8590 = vmatprep.mubr.msk.f32.mxu1 %vm757_vm1, %v11318_v62  ;;  %v3134_v58 = vpop.xlane.xlu0 %3133  ;;  %v11426_v62 = vpop.f32.mrf.mxu1 }
 0x52a   : > { %v3461_v49 = vpop.f32.mrf.mxu1 }
 0x52b   : > { %8591 = vmatmul.mubr.msk.f32.gmra.mxu1 %vm757_vm1, %v4039_v61  ;;  %v11422_v33 = vpop.permute.xlu1 %4713 }
 0x52c   : > { %v3140_v37 = vpop.xlane.xlu0 %3139  ;;  %v11430_v55 = vpop.f32.mrf.mxu1 }
 0x52e   : > { %v11434_v8 = vpop.f32.mrf.mxu1 }
 0x52f   : > { %v11424_v4 = vpop.permute.xlu1 %5520 }
 0x530   : > { %v3146_v56 = vpop.xlane.xlu0 %3145  ;;  %v11436_v60 = vpop.f32.mrf.mxu1 }
 0x532   : > { %v11438_v45 = vpop.f32.mrf.mxu1  ;;  %v9128_v2 = vpop.eup %9127 }
 0x533   : > { %v11428_v52 = vpop.permute.xlu1 %5518 }
 0x534   : > { %v3152_v54 = vpop.xlane.xlu0 %3151  ;;  %v11440_v12 = vpop.f32.mrf.mxu1 }
 0x536   : > { %v11442_v10 = vpop.f32.mrf.mxu1 }
 0x537   : > { %v11432_v36 = vpop.permute.xlu1 %5514 }
 0x538   : > { %12948 = vst [vmem:[#allocation10_spill] sm:$0xff] %v11432_v36  ;;  %v3158_v25 = vpop.xlane.xlu0 %3157  ;;  %v3592_v36 = vmul.f32 %v9128_v2, %v3441_v42 }
 0x53c   : > { %v3164_v61 = vpop.xlane.xlu0 %3163 }
 0x540   : > { %v3170_v28 = vpop.xlane.xlu0 %3169 }
 0x568   : > { %v3122_v22 = vpop.xlane.xlu1 %3121 }
 0x569   : > { %9129 = vrcp.f32 %v3122_v22  ;;  %v11444_v22 = vpop.f32.mrf.mxu1 }
 0x56a   : > { %9131 = vrcp.f32 %v3128_v34 }
 0x56c   : > { %v3131_v41 = vpop.xlane.xlu1 %3130 }
 0x56d   : > { %9133 = vrcp.f32 %v3131_v41 }
 0x56e   : > { %9135 = vrcp.f32 %v3134_v58 }
 0x570   : > { %v3137_v50 = vpop.xlane.xlu1 %3136 }
 0x571   : > { %9137 = vrcp.f32 %v3137_v50 }
 0x572   : > { %9139 = vrcp.f32 %v3140_v37  ;;  %v11449_v37 = vpop.f32.mrf.mxu1 }
 0x574   : > { %v3143_v32 = vpop.xlane.xlu1 %3142  ;;  %v11453_v42 = vpop.f32.mrf.mxu1 }
 0x575   : > { %9141 = vrcp.f32 %v3143_v32 }
 0x576   : > { %v9130_v15 = vpop.eup %9129  ;;  %9143 = vrcp.f32 %v3146_v56 }
 0x577   : > { %v3591_v34 = vmul.f32 %v9130_v15, %v8433_v9  ;;  %v9132_v44 = vpop.eup %9131 }
 0x578   : > { %v3149_v41 = vpop.xlane.xlu1 %3148  ;;  %v3593_v50 = vmul.f32 %v9132_v44, %v8436_v1 }
 0x579   : > { %9145 = vrcp.f32 %v3149_v41  ;;  %8482 = vmatmul.mubr.msk.f32.vlgmr.msra.gmra.mxu0 %vm757_vm1, %v3591_v34 }
 0x57a   : > { %v9134_v58 = vpop.eup %9133  ;;  %8484 = vmatprep.mubr.msk.f32.mxu0 %vm757_vm1, %v3592_v36  ;;  %8594 = vmatpush3.msra.mxu0 %v11400_v19  ;;  %9147 = vrcp.f32 %v3152_v54  ;;  %v3176_v19 = vpop.xlane.xlu0 %3175 }
 0x57b   : > { %v3594_v32 = vmul.f32 %v9134_v58, %v3451_v48  ;;  %8595 = vmatprep.subr.mxu0 %v11327_v35  ;;  %v9136_v9 = vpop.eup %9135  ;;  %v3511_v54 = vpop.f32.mrf.mxu1 }
 0x57c   : > { %v3155_v56 = vpop.xlane.xlu1 %3154  ;;  %8596 = vmatpush3.msra.mxu0 %v11327_v35  ;;  %v3595_v44 = vmul.f32 %v9136_v9, %v8439_v6 }
 0x57d   : > { %9149 = vrcp.f32 %v3155_v56  ;;  %8485 = vmatmul.mubr.msk.f32.gmra.mxu0 %vm757_vm1, %v3593_v50  ;;  %8597 = vmatprep.subr.mxu0 %v11416_v43 }
 0x57e   : > { %v9138_v36 = vpop.eup %9137  ;;  %8487 = vmatprep.mubr.msk.f32.mxu0 %vm757_vm1, %v3594_v32  ;;  %8598 = vmatpush3.msra.mxu0 %v11416_v43  ;;  %9151 = vrcp.f32 %v3158_v25  ;;  %v11465_v43 = vpop.f32.mrf.mxu1 }
 0x57f   : > { %v3596_v1 = vmul.f32 %v9138_v36, %v3461_v49  ;;  %8599 = vmatprep.subr.mxu0 %v11418_v20  ;;  %v9140_v48 = vpop.eup %9139  ;;  %v3182_v25 = vpop.xlane.xlu0 %3181 }
 0x580   : > { %v3161_v35 = vpop.xlane.xlu1 %3160  ;;  %8600 = vmatpush3.msra.mxu0 %v11418_v20  ;;  %v3597_v6 = vmul.f32 %v9140_v48, %v11426_v62  ;;  %v3521_v62 = vpop.f32.mrf.mxu1 }
 0x581   : > { %9153 = vrcp.f32 %v3161_v35  ;;  %8488 = vmatmul.mubr.msk.f32.gmra.mxu0 %vm757_vm1, %v3595_v44  ;;  %8601 = vmatprep.subr.mxu0 %v11337_v18 }
 0x582   : > { %v9142_v2 = vpop.eup %9141  ;;  %8490 = vmatprep.mubr.msk.f32.mxu0 %vm757_vm1, %v3596_v1  ;;  %8602 = vmatpush3.msra.mxu0 %v11337_v18  ;;  %9155 = vrcp.f32 %v3164_v61 }
 0x583   : > { %v3598_v49 = vmul.f32 %v9142_v2, %v11434_v8  ;;  %8603 = vmatprep.subr.mxu0 %v11420_v14  ;;  %v9144_v20 = vpop.eup %9143 }
 0x584   : > { %v3167_v15 = vpop.xlane.xlu1 %3166  ;;  %8604 = vmatpush3.msra.mxu0 %v11420_v14  ;;  %v3599_v8 = vmul.f32 %v9144_v20, %v11430_v55 }
 0x585   : > { %9157 = vrcp.f32 %v3167_v15  ;;  %8491 = vmatmul.mubr.msk.f32.gmra.mxu0 %vm757_vm1, %v3597_v6  ;;  %8605 = vmatprep.subr.mxu0 %v11349_v27 }
 0x586   : > { %v9146_v18 = vpop.eup %9145  ;;  %8493 = vmatprep.mubr.msk.f32.mxu0 %vm757_vm1, %v3598_v49  ;;  %8606 = vmatpush3.msra.mxu0 %v11349_v27  ;;  %9159 = vrcp.f32 %v3170_v28  ;;  %v3188_v27 = vpop.xlane.xlu0 %3187 }
 0x587   : > { %v3600_v61 = vmul.f32 %v9146_v18, %v11438_v45  ;;  %8607 = vmatprep.subr.mxu0 %v11422_v33  ;;  %v9148_v34 = vpop.eup %9147  ;;  %v8463_v28 = vpop.f32.mrf.mxu1 }
 0x588   : > { %v3173_v14 = vpop.xlane.xlu1 %3172  ;;  %8608 = vmatpush3.msra.mxu0 %v11422_v33  ;;  %v3601_v55 = vmul.f32 %v9148_v34, %v11436_v60 }
 0x589   : > { %9161 = vrcp.f32 %v3173_v14  ;;  %8494 = vmatmul.mubr.msk.f32.gmra.mxu0 %vm757_vm1, %v3599_v8  ;;  %8707 = vmatprep.subr.msk.mxu0 %vm757_vm1, %v11359_v13  ;;  %v3531_v32 = vpop.f32.mrf.mxu1 }
 0x58a   : > { %v9150_v41 = vpop.eup %9149  ;;  %8496 = vmatprep.mubr.msk.f32.mxu0 %vm757_vm1, %v3600_v61  ;;  %9163 = vrcp.f32 %v3176_v19  ;;  %v3194_v19 = vpop.xlane.xlu0 %3193 }
 0x58b   : > { %v3602_v45 = vmul.f32 %v9150_v41, %v11442_v10  ;;  %v9152_v58 = vpop.eup %9151  ;;  %v8466_v60 = vpop.f32.mrf.mxu1 }
 0x58c   : > { %v3179_v50 = vpop.xlane.xlu1 %3178  ;;  %v3603_v9 = vmul.f32 %v9152_v58, %v11440_v12 }
 0x58d   : > { %9165 = vrcp.f32 %v3179_v50  ;;  %8497 = vmatmul.mubr.msk.f32.gmra.mxu0 %vm757_vm1, %v3601_v55  ;;  %v3541_v6 = vpop.f32.mrf.mxu1 }
 0x58e   : > { %v9154_v33 = vpop.eup %9153  ;;  %8499 = vmatprep.mubr.msk.f32.mxu0 %vm757_vm1, %v3602_v45  ;;  %9167 = vrcp.f32 %v3182_v25 }
 0x58f   : > { %v3604_v56 = vmul.f32 %v9154_v33, %v11449_v37  ;;  %v9156_v36 = vpop.eup %9155  ;;  %v3200_v37 = vpop.xlane.xlu0 %3199 }
 0x590   : > { %v3185_v44 = vpop.xlane.xlu1 %3184  ;;  %v3605_v1 = vmul.f32 %v9156_v36, %v11444_v22  ;;  %v8469_v49 = vpop.f32.mrf.mxu1 }
 0x591   : > { %9169 = vrcp.f32 %v3185_v44  ;;  %8500 = vmatmul.mubr.msk.f32.gmra.mxu0 %vm757_vm1, %v3603_v9 }
 0x592   : > { %v9158_v10 = vpop.eup %9157  ;;  %8502 = vmatprep.mubr.msk.f32.mxu0 %vm757_vm1, %v3604_v56  ;;  %9171 = vrcp.f32 %v3188_v27 }
 0x593   : > { %v3606_v48 = vmul.f32 %v9158_v10, %v3511_v54  ;;  %v9160_v35 = vpop.eup %9159  ;;  %v3551_v54 = vpop.f32.mrf.mxu1 }
 0x594   : > { %v3191_v2 = vpop.xlane.xlu1 %3190  ;;  %v3607_v20 = vmul.f32 %v9160_v35, %v11453_v42  ;;  %v3206_v14 = vpop.xlane.xlu0 %3205 }
 0x595   : > { %9173 = vrcp.f32 %v3191_v2  ;;  %8503 = vmatmul.mubr.msk.f32.gmra.mxu0 %vm757_vm1, %v3605_v1  ;;  %v8472_v27 = vpop.f32.mrf.mxu1 }
 0x596   : > { %v9162_v12 = vpop.eup %9161  ;;  %8505 = vmatprep.mubr.msk.f32.mxu0 %vm757_vm1, %v3606_v48  ;;  %9175 = vrcp.f32 %v3194_v19 }
 0x597   : > { %v3608_v25 = vmul.f32 %v9162_v12, %v3521_v62  ;;  %v9164_v15 = vpop.eup %9163  ;;  %v3561_v50 = vpop.f32.mrf.mxu1 }
 0x598   : > { %v3197_v18 = vpop.xlane.xlu1 %3196  ;;  %v3609_v8 = vmul.f32 %v9164_v15, %v11465_v43  ;;  %v3212_v33 = vpop.xlane.xlu0 %3211 }
 0x599   : > { %9177 = vrcp.f32 %v3197_v18  ;;  %8506 = vmatmul.mubr.msk.f32.gmra.mxu0 %vm757_vm1, %v3607_v20  ;;  %v8475_v36 = vpop.f32.mrf.mxu1 }
 0x59a   : > { %v9166_v22 = vpop.eup %9165  ;;  %8508 = vmatprep.mubr.msk.f32.mxu0 %vm757_vm1, %v3608_v25  ;;  %9179 = vrcp.f32 %v3200_v37 }
 0x59b   : > { %v3610_v61 = vmul.f32 %v9166_v22, %v3531_v32  ;;  %v9168_v34 = vpop.eup %9167  ;;  %v3571_v1 = vpop.f32.mrf.mxu1 }
 0x59c   : > { %v3203_v41 = vpop.xlane.xlu1 %3202  ;;  %v3611_v62 = vmul.f32 %v9168_v34, %v8463_v28 }
 0x59d   : > { %9181 = vrcp.f32 %v3203_v41  ;;  %8509 = vmatmul.mubr.msk.f32.gmra.mxu0 %vm757_vm1, %v3609_v8 }
 0x59e   : > { %v9170_v42 = vpop.eup %9169  ;;  %8511 = vmatprep.mubr.msk.f32.mxu0 %vm757_vm1, %v3610_v61  ;;  %9183 = vrcp.f32 %v3206_v14 }
 0x59f   : > { %v3612_v55 = vmul.f32 %v9170_v42, %v3541_v6  ;;  %v9172_v58 = vpop.eup %9171 }
 0x5a0   : > { %v3209_v45 = vpop.xlane.xlu1 %3208  ;;  %v3613_v32 = vmul.f32 %v9172_v58, %v8466_v60 }
 0x5a1   : > { %9185 = vrcp.f32 %v3209_v45  ;;  %8512 = vmatmul.mubr.msk.f32.gmra.mxu0 %vm757_vm1, %v3611_v62 }
 0x5a2   : > { %v9174_v43 = vpop.eup %9173  ;;  %8514 = vmatprep.mubr.msk.f32.mxu0 %vm757_vm1, %v3612_v55  ;;  %9187 = vrcp.f32 %v3212_v33 }
 0x5a3   : > { %v3614_v9 = vmul.f32 %v9174_v43, %v3551_v54  ;;  %v9176_v56 = vpop.eup %9175 }
 0x5a4   : > { %v3615_v19 = vmul.f32 %v9176_v56, %v8469_v49 }
 0x5a5   : > { %8515 = vmatmul.mubr.msk.f32.gmra.mxu0 %vm757_vm1, %v3613_v32 }
 0x5a6   : > { %v9178_v28 = vpop.eup %9177  ;;  %8517 = vmatprep.mubr.msk.f32.mxu0 %vm757_vm1, %v3614_v9 }
 0x5a7   : > { %v3616_v44 = vmul.f32 %v9178_v28, %v3561_v50  ;;  %v9180_v10 = vpop.eup %9179 }
 0x5a8   : > { %v3617_v35 = vmul.f32 %v9180_v10, %v8472_v27 }
 0x5a9   : > { %8518 = vmatmul.mubr.msk.f32.gmra.mxu0 %vm757_vm1, %v3615_v19 }
 0x5aa   : > { %v9182_v48 = vpop.eup %9181  ;;  %8520 = vmatprep.mubr.msk.f32.mxu0 %vm757_vm1, %v3616_v44 }
 0x5ab   : > { %v8478_v60 = vpop.f32.mrf.mxu1  ;;  %v3618_v2 = vmul.f32 %v9182_v48, %v3571_v1  ;;  %v9184_v6 = vpop.eup %9183 }
 0x5ac   : > { %v3619_v20 = vmul.f32 %v9184_v6, %v8475_v36 }
 0x5ad   : > { %v3581_v12 = vpop.f32.mrf.mxu1  ;;  %8521 = vmatmul.mubr.msk.f32.gmra.mxu0 %vm757_vm1, %v3617_v35 }
 0x5ae   : > { %v9186_v37 = vpop.eup %9185  ;;  %8523 = vmatprep.mubr.msk.f32.mxu0 %vm757_vm1, %v3618_v2 }
 0x5af   : > { %v3620_v49 = vmul.f32 %v9186_v37, %v3581_v12  ;;  %v8547_v25 = vpop.f32.mrf.mxu1  ;;  %v9188_v22 = vpop.eup %9187 }
 0x5b0   : > { %v11508_v15 = vmul.f32 0.35355338, %v8547_v25  ;;  %v3621_v61 = vmul.f32 %v9188_v22, %v8478_v60 }
 0x5b1   : > { %8524 = vmatmul.mubr.msk.f32.gmra.mxu0 %vm757_vm1, %v3619_v20  ;;  %v4202_v18 = vpop.f32.mrf.mxu1 }
 0x5b2   : > { %v11511_v54 = vmul.f32 0.35355338, %v4202_v18  ;;  %8526 = vmatprep.mubr.msk.f32.mxu0 %vm757_vm1, %v3620_v49  ;;  %v4396_v8 = vsel %vm1456_vm2, %v11508_v15, -inf }
 0x5b3   : > { %4397 = vmax.xlane.f32.xlu0 %v4396_v8  ;;  %v8550_v34 = vpop.f32.mrf.mxu1 }
 0x5b4   : > { %v11516_v14 = vmul.f32 0.35355338, %v8550_v34  ;;  %v4393_v41 = vsel %vm1456_vm2, %v11511_v54, -inf }
 0x5b5   : > { %4394 = vmax.xlane.f32.xlu1 %v4393_v41  ;;  %8527 = vmatmul.mubr.msk.f32.gmra.mxu0 %vm757_vm1, %v3621_v61  ;;  %v4212_v27 = vpop.f32.mrf.mxu1 }
 0x5b6   : > { %v11521_v42 = vmul.f32 0.35355338, %v4212_v27  ;;  %v4402_v62 = vsel %vm1456_vm2, %v11516_v14, -inf }
 0x5b7   : > { %4403 = vmax.xlane.f32.xlu0 %v4402_v62  ;;  %v8553_v55 = vpop.f32.mrf.mxu1 }
 0x5b8   : > { %v11525_v45 = vmul.f32 0.35355338, %v8553_v55  ;;  %v4399_v58 = vsel %vm1456_vm2, %v11521_v42, -inf }
 0x5b9   : > { %4400 = vmax.xlane.f32.xlu1 %v4399_v58  ;;  %v4222_v50 = vpop.f32.mrf.mxu1 }
 0x5ba   : > { %v11529_v43 = vmul.f32 0.35355338, %v4222_v50  ;;  %v4408_v33 = vsel %vm1456_vm2, %v11525_v45, -inf }
 0x5bb   : > { %4409 = vmax.xlane.f32.xlu0 %v4408_v33  ;;  %v8556_v32 = vpop.f32.mrf.mxu1 }
 0x5bc   : > { %v11533_v9 = vmul.f32 0.35355338, %v8556_v32  ;;  %v4405_v56 = vsel %vm1456_vm2, %v11529_v43, -inf }
 0x5bd   : > { %4406 = vmax.xlane.f32.xlu1 %v4405_v56  ;;  %v4232_v36 = vpop.f32.mrf.mxu1 }
 0x5be   : > { %v11537_v28 = vmul.f32 0.35355338, %v4232_v36  ;;  %v4414_v19 = vsel %vm1456_vm2, %v11533_v9, -inf }
 0x5bf   : > { %4415 = vmax.xlane.f32.xlu0 %v4414_v19  ;;  %v8559_v44 = vpop.f32.mrf.mxu1 }
 0x5c0   : > { %v11541_v10 = vmul.f32 0.35355338, %v8559_v44  ;;  %v4411_v1 = vsel %vm1456_vm2, %v11537_v28, -inf }
 0x5c1   : > { %4412 = vmax.xlane.f32.xlu1 %v4411_v1  ;;  %v4242_v48 = vpop.f32.mrf.mxu1 }
 0x5c2   : > { %v11545_v35 = vmul.f32 0.35355338, %v4242_v48  ;;  %v4420_v60 = vsel %vm1456_vm2, %v11541_v10, -inf }
 0x5c3   : > { %4421 = vmax.xlane.f32.xlu0 %v4420_v60  ;;  %v8562_v2 = vpop.f32.mrf.mxu1 }
 0x5c4   : > { %v11549_v12 = vmul.f32 0.35355338, %v8562_v2  ;;  %v4417_v20 = vsel %vm1456_vm2, %v11545_v35, -inf }
 0x5c5   : > { %v4252_v6 = vpop.f32.mrf.mxu1 }
 0x5c6   : > { %v11551_v37 = vmul.f32 0.35355338, %v4252_v6  ;;  %v4426_v61 = vsel %vm1456_vm2, %v11549_v12, -inf }
 0x5c7   : > { %4418 = vmax.xlane.f32.xlu0 %v4417_v20  ;;  %v8565_v49 = vpop.f32.mrf.mxu1 }
 0x5c8   : > { %v4423_v25 = vsel %vm1456_vm2, %v11551_v37, -inf  ;;  %v11557_v22 = vmul.f32 0.35355338, %v8565_v49 }
 0x5c9   : > { %4424 = vmax.xlane.f32.xlu1 %v4423_v25  ;;  %v4262_v18 = vpop.f32.mrf.mxu1 }
 0x5ca   : > { %v11559_v8 = vmul.f32 0.35355338, %v4262_v18  ;;  %v4432_v58 = vsel %vm1456_vm2, %v11557_v22, -inf }
 0x5cb   : > { %4427 = vmax.xlane.f32.xlu0 %v4426_v61  ;;  %v8568_v34 = vpop.f32.mrf.mxu1 }
 0x5cc   : > { %v4429_v41 = vsel %vm1456_vm2, %v11559_v8, -inf  ;;  %v11565_v62 = vmul.f32 0.35355338, %v8568_v34 }
 0x5cd   : > { %4430 = vmax.xlane.f32.xlu1 %v4429_v41  ;;  %v4272_v27 = vpop.f32.mrf.mxu1 }
 0x5ce   : > { %v11567_v55 = vmul.f32 0.35355338, %v4272_v27  ;;  %v4438_v36 = vsel %vm1456_vm2, %v11565_v62, -inf }
 0x5cf   : > { %4433 = vmax.xlane.f32.xlu0 %v4432_v58  ;;  %v8571_v50 = vpop.f32.mrf.mxu1 }
 0x5d0   : > { %v4435_v33 = vsel %vm1456_vm2, %v11567_v55, -inf  ;;  %v11573_v56 = vmul.f32 0.35355338, %v8571_v50 }
 0x5d1   : > { %4436 = vmax.xlane.f32.xlu1 %v4435_v33  ;;  %v4282_v32 = vpop.f32.mrf.mxu1 }
 0x5d2   : > { %v11579_v48 = vmul.f32 0.35355338, %v4282_v32  ;;  %v4444_v60 = vsel %vm1456_vm2, %v11573_v56, -inf }
 0x5d3   : > { %4439 = vmax.xlane.f32.xlu0 %v4438_v36  ;;  %v8574_v19 = vpop.f32.mrf.mxu1 }
 0x5d4   : > { %v11577_v44 = vmul.f32 0.35355338, %v8574_v19  ;;  %v4441_v25 = vsel %vm1456_vm2, %v11579_v48, -inf  ;;  %v11602_v19 = vld [vmem:[%s9680_s25 + $0x8] sm:$0xff] }
 0x5d5   : > { %v4292_v1 = vpop.f32.mrf.mxu1 }
 0x5d6   : > { %v4450_v2 = vsel %vm1456_vm2, %v11577_v44, -inf  ;;  %v11585_v49 = vmul.f32 0.35355338, %v4292_v1 }
 0x5d7   : > { %4445 = vmax.xlane.f32.xlu0 %v4444_v60  ;;  %4451 = vmax.xlane.f32.xlu1 %v4450_v2  ;;  %v8577_v6 = vpop.f32.mrf.mxu1 }
 0x5d8   : > { %v11589_v61 = vmul.f32 0.35355338, %v8577_v6  ;;  %v4447_v34 = vsel %vm1456_vm2, %v11585_v49, -inf }
 0x5d9   : > { %v4302_v20 = vpop.f32.mrf.mxu1 }
 0x5da   : > { %v11593_v27 = vmul.f32 0.35355338, %v4302_v20  ;;  %v4456_v58 = vsel %vm1456_vm2, %v11589_v61, -inf }
 0x5db   : > { %4442 = vmax.xlane.f32.xlu0 %v4441_v25  ;;  %v8580_v18 = vpop.f32.mrf.mxu1 }
 0x5dc   : > { %v11597_v33 = vmul.f32 0.35355338, %v8580_v18  ;;  %v4453_v32 = vsel %vm1456_vm2, %v11593_v27, -inf }
 0x5dd   : > { %v4312_v41 = vpop.f32.mrf.mxu1 }
 0x5de   : > { %v11606_v1 = vmul.f32 0.35355338, %v4312_v41  ;;  %v4462_v60 = vsel %vm1456_vm2, %v11597_v33, -inf }
 0x5df   : > { %4448 = vmax.xlane.f32.xlu0 %v4447_v34  ;;  %v8583_v50 = vpop.f32.mrf.mxu1 }
 0x5e0   : > { %12949 = vst [vmem:[#allocation14_spill] sm:$0xff] %v11606_v1  ;;  %v11610_v6 = vmul.f32 0.35355338, %v8583_v50  ;;  %v4459_v20 = vsel %vm1456_vm2, %v11606_v1, -inf }
 0x5e1   : > { %v4322_v36 = vpop.f32.mrf.mxu1 }
 0x5e2   : > { %12950 = vst [vmem:[#allocation18_spill] sm:$0xff] %v11610_v6  ;;  %v11614_v18 = vmul.f32 0.35355338, %v4322_v36  ;;  %v4468_v34 = vsel %vm1456_vm2, %v11610_v6, -inf }
 0x5e3   : > { %4457 = vmax.xlane.f32.xlu0 %v4456_v58  ;;  %v8586_v2 = vpop.f32.mrf.mxu1 }
 0x5e4   : > { %v11618_v41 = vmul.f32 0.35355338, %v8586_v2 }
 0x5e5   : > { %v4332_v25 = vpop.f32.mrf.mxu1 }
 0x5e6   : > { %12951 = vst [vmem:[#allocation21_spill] sm:$0xff] %v11618_v41  ;;  %v11622_v50 = vmul.f32 0.35355338, %v4332_v25  ;;  %v4474_v1 = vsel %vm1456_vm2, %v11618_v41, -inf }
 0x5e7   : > { %4454 = vmax.xlane.f32.xlu0 %v4453_v32  ;;  %v8589_v58 = vpop.f32.mrf.mxu1  ;;  %v4465_v32 = vsel %vm1456_vm2, %v11614_v18, -inf }
 0x5e8   : > { %5510 = vrot.lane.b32.xlu1 %v11602_v19, %s9541_s10  ;;  %v11636_v41 = vmul.f32 0.35355338, %v8589_v58  ;;  %v12953_v58 = vld [vmem:[#allocation7_spill] sm:$0xff] }
 0x5eb   : > { %4463 = vmax.xlane.f32.xlu0 %v4462_v60  ;;  %v4342_v60 = vpop.f32.mrf.mxu1 }
 0x5ec   : > { %v11626_v36 = vmul.f32 0.35355338, %v4342_v60  ;;  %v4480_v60 = vsel %vm1456_vm2, %v11636_v41, -inf }
 0x5ef   : > { %4460 = vmax.xlane.f32.xlu0 %v4459_v20  ;;  %v8592_v20 = vpop.f32.mrf.mxu1 }
 0x5f1   : > { %v4352_v2 = vpop.f32.mrf.mxu1 }
 0x5f2   : > { %v11630_v6 = vmul.f32 0.35355338, %v4352_v2  ;;  %v9463_v2 = vld [vmem:[%s9680_s25] sm:$0xff] }
 0x5f3   : > { %4469 = vmax.xlane.f32.xlu0 %v4468_v34  ;;  %v4471_v34 = vsel %vm1456_vm2, %v11622_v50, -inf }
 0x5f4   : > { %v4483_v25 = vsel %vm1456_vm2, %v11630_v6, -inf }
 0x5f7   : > { %4466 = vmax.xlane.f32.xlu0 %v4465_v32  ;;  %v4477_v32 = vsel %vm1456_vm2, %v11626_v36, -inf }
 0x5fb   : > { %4475 = vmax.xlane.f32.xlu0 %v4474_v1  ;;  %v11638_v1 = vmul.f32 0.35355338, %v8592_v20  ;;  %v12954_v20 = vld [vmem:[#allocation11_spill] sm:$0xff] }
 0x5ff   : > { %4472 = vmax.xlane.f32.xlu0 %v4471_v34  ;;  %v4486_v34 = vsel %vm1456_vm2, %v11638_v1, -inf }
 0x603   : > { %4478 = vmax.xlane.f32.xlu0 %v4477_v32  ;;  %v12952_v32 = vld [vmem:[#allocation5_spill] sm:$0xff] }
 0x607   : > { %4484 = vmax.xlane.f32.xlu0 %v4483_v25  ;;  %v12955_v25 = vld [vmem:[#allocation15_spill] sm:$0xff] }
 0x60c   : > { %4481 = vmax.xlane.f32.xlu1 %v4480_v60 }
 0x610   : > { %4487 = vmax.xlane.f32.xlu1 %v4486_v34 }
 0x61d   : > { %5508 = vrot.lane.b32.xlu0 %v9463_v2, %s9541_s10 }
 0x621   : > { %5444 = vrot.lane.b32.xlu1 %v12952_v32, %s9541_s10  ;;  %5446 = vrot.lane.b32.xlu0 %v12929_v26, %s9541_s10 }
 0x625   : > { %5448 = vrot.lane.b32.xlu1 %v12953_v58, %s9541_s10  ;;  %5450 = vrot.lane.b32.xlu0 %v12930_v17, %s9541_s10  ;;  %v12956_v17 = vld [vmem:[#allocation9_spill] sm:$0xff] }
 0x629   : > { %5452 = vrot.lane.b32.xlu1 %v12954_v20, %s9541_s10  ;;  %5454 = vrot.lane.b32.xlu0 %v12931_v21, %s9541_s10 }
 0x62d   : > { %5456 = vrot.lane.b32.xlu1 %v12955_v25, %s9541_s10  ;;  %5458 = vrot.lane.b32.xlu0 %v12932_v23, %s9541_s10 }
 0x631   : > { %5460 = vrot.lane.b32.xlu1 %v9932_v39, %s9541_s10  ;;  %5462 = vrot.lane.b32.xlu0 %v12933_v7, %s9541_s10 }
 0x635   : > { %5464 = vrot.lane.b32.xlu1 %v9946_v46, %s9541_s10  ;;  %5466 = vrot.lane.b32.xlu0 %v12934_v29, %s9541_s10 }
 0x639   : > { %5468 = vrot.lane.b32.xlu1 %v9960_v53, %s9541_s10  ;;  %5470 = vrot.lane.b32.xlu0 %v9955_v51, %s9541_s10  ;;  %v8483_v26 = vpop.f32.mrf.mxu0  ;;  %v12958_v53 = vld [vmem:[#allocation13_spill] sm:$0xff] }
 0x63a   : > { %v11675_v21 = vadd.f32 %v8483_v26, %v12956_v17 }
 0x63b   : > { %v11677_v39 = vpop.f32.mrf.mxu0 }
 0x63c   : > { %12957 = vst [vmem:[#allocation34_spill] sm:$0xff] %v11677_v39  ;;  %v4398_v23 = vpop.xlane.xlu0 %4397 }
 0x63d   : > { %v4490_v7 = vsub.f32 %v11508_v15, %v4398_v23  ;;  %5472 = vrot.lane.b32.xlu1 %v9974_v59, %s9541_s10  ;;  %5474 = vrot.lane.b32.xlu0 %v9969_v57, %s9541_s10  ;;  %v8486_v46 = vpop.f32.mrf.mxu0  ;;  %v12960_v59 = vld [vmem:[#allocation17_spill] sm:$0xff] }
 0x63e   : > { %v11685_v29 = vadd.f32 %v8486_v46, %v12958_v53  ;;  %v4395_v51 = vpop.xlane.xlu1 %4394 }
 0x63f   : > { %v4489_v60 = vsub.f32 %v11511_v54, %v4395_v51  ;;  %v11688_v34 = vpop.f32.mrf.mxu0  ;;  %v4523_v32 = vmul.f32 1.442695, %v4490_v7 }
 0x640   : > { %12959 = vst [vmem:[#allocation41_spill] sm:$0xff] %v11688_v34  ;;  %v4404_v2 = vpop.xlane.xlu0 %4403 }
 0x641   : > { %v4521_v58 = vmul.f32 1.442695, %v4489_v60  ;;  %v4492_v15 = vsub.f32 %v11516_v14, %v4404_v2  ;;  %5476 = vrot.lane.b32.xlu1 %v12868_v16, %s9541_s10  ;;  %5478 = vrot.lane.b32.xlu0 %v9983_v63, %s9541_s10  ;;  %v8489_v57 = vpop.f32.mrf.mxu0 }
 0x642   : > { %v11696_v20 = vadd.f32 %v8489_v57, %v12960_v59  ;;  %v4401_v25 = vpop.xlane.xlu1 %4400  ;;  %v12965_v59 = vld [vmem:[#allocation39_spill] sm:$0xff] }
 0x643   : > { %9189 = vpow2.f32 %v4521_v58  ;;  %v4491_v54 = vsub.f32 %v11521_v42, %v4401_v25  ;;  %v11699_v26 = vpop.f32.mrf.mxu0  ;;  %v4527_v23 = vmul.f32 1.442695, %v4492_v15 }
 0x644   : > { %12961 = vst [vmem:[#allocation45_spill] sm:$0xff] %v11699_v26  ;;  %v4410_v17 = vpop.xlane.xlu0 %4409  ;;  %9191 = vpow2.f32 %v4523_v32 }
 0x645   : > { %v4525_v14 = vmul.f32 1.442695, %v4491_v54  ;;  %v4494_v7 = vsub.f32 %v11525_v45, %v4410_v17  ;;  %5480 = vrot.lane.b32.xlu1 %v12869_v38, %s9541_s10  ;;  %5482 = vrot.lane.b32.xlu0 %v9997_v5, %s9541_s10  ;;  %v8492_v63 = vpop.f32.mrf.mxu0  ;;  %v12963_v38 = vld [vmem:[#allocation23_spill] sm:$0xff]  ;;  %v12967_v54 = vld [vmem:[#allocation25_spill] sm:$0xff] }
 0x646   : > { %v11707_v16 = vadd.f32 %v8492_v63, %v10916_v0  ;;  %v4407_v46 = vpop.xlane.xlu1 %4406  ;;  %v12969_v63 = vld [vmem:[#allocation43_spill] sm:$0xff] }
 0x647   : > { %9193 = vpow2.f32 %v4525_v14  ;;  %v4493_v42 = vsub.f32 %v11529_v43, %v4407_v46  ;;  %v11710_v53 = vpop.f32.mrf.mxu0  ;;  %v4531_v60 = vmul.f32 1.442695, %v4494_v7 }
 0x648   : > { %12962 = vst [vmem:[#allocation49_spill] sm:$0xff] %v11710_v53  ;;  %v4416_v51 = vpop.xlane.xlu0 %4415  ;;  %9195 = vpow2.f32 %v4527_v23 }
 0x649   : > { %v4529_v45 = vmul.f32 1.442695, %v4493_v42  ;;  %v4496_v2 = vsub.f32 %v11533_v9, %v4416_v51  ;;  %5484 = vrot.lane.b32.xlu1 %v12870_v47, %s9541_s10  ;;  %5486 = vrot.lane.b32.xlu0 %v12935_v3, %s9541_s10  ;;  %v8495_v5 = vpop.f32.mrf.mxu0  ;;  %v12966_v47 = vld [vmem:[#allocation38_spill] sm:$0xff]  ;;  %v12970_v51 = vld [vmem:[#allocation27_spill] sm:$0xff] }
 0x64a   : > { %v11718_v0 = vadd.f32 %v8495_v5, %v12963_v38  ;;  %v4413_v32 = vpop.xlane.xlu1 %4412 }
 0x64b   : > { %9197 = vpow2.f32 %v4529_v45  ;;  %v4495_v43 = vsub.f32 %v11537_v28, %v4413_v32  ;;  %v11721_v58 = vpop.f32.mrf.mxu0  ;;  %v4535_v57 = vmul.f32 1.442695, %v4496_v2 }
 0x64c   : > { %12964 = vst [vmem:[#allocation53_spill] sm:$0xff] %v11721_v58  ;;  %v4422_v15 = vpop.xlane.xlu0 %4421  ;;  %9199 = vpow2.f32 %v4531_v60 }
 0x64d   : > { %v4533_v9 = vmul.f32 1.442695, %v4495_v43  ;;  %5488 = vrot.lane.b32.xlu1 %v12965_v59, %s9541_s10  ;;  %5490 = vrot.lane.b32.xlu0 %v12966_v47, %s9541_s10  ;;  %v8498_v3 = vpop.f32.mrf.mxu0  ;;  %v4498_v25 = vsub.f32 %v11541_v10, %v4422_v15 }
 0x64e   : > { %v11729_v17 = vadd.f32 %v8498_v3, %v12967_v54 }
 0x64f   : > { %9201 = vpow2.f32 %v4533_v9  ;;  %v11731_v28 = vpop.f32.mrf.mxu0  ;;  %v4539_v42 = vmul.f32 1.442695, %v4498_v25  ;;  %v12973_v9 = vld [vmem:[#allocation30_spill] sm:$0xff] }
 0x650   : > { %12968 = vst [vmem:[#allocation35_spill] sm:$0xff] %v11731_v28  ;;  %v11733_v23 = vpop.eup %9189  ;;  %v4419_v14 = vpop.xlane.xlu0 %4418  ;;  %9203 = vpow2.f32 %v4535_v57 }
 0x651   : > { %v4497_v7 = vsub.f32 %v11545_v35, %v4419_v14  ;;  %5492 = vrot.lane.b32.xlu1 %v12969_v63, %s9541_s10  ;;  %5494 = vrot.lane.b32.xlu0 %v12937_v24, %s9541_s10  ;;  %v8501_v46 = vpop.f32.mrf.mxu0  ;;  %v11740_v10 = vpop.eup %9191 }
 0x652   : > { %v11743_v60 = vadd.f32 %v8501_v46, %v12970_v51  ;;  %8609 = vmatprep.mubr.msk.f32.mxu0 %vm1456_vm2, %v11733_v23  ;;  %v4425_v45 = vpop.xlane.xlu1 %4424  ;;  %v12976_v46 = vld [vmem:[#allocation33_spill] sm:$0xff]  ;;  %v4588_v26 = vsel %vm1456_vm2, %v11740_v10, 0.0 }
 0x653   : > { %v4537_v2 = vmul.f32 1.442695, %v4497_v7  ;;  %v4499_v35 = vsub.f32 %v11551_v37, %v4425_v45  ;;  %8610 = vmatmul.mubr.msk.f32.vlgmr.msra.gmra.mxu0 %vm1456_vm2, %v11740_v10  ;;  %v11750_v5 = vpop.f32.mrf.mxu0  ;;  %v12972_v37 = vld [vmem:[#allocation47_spill] sm:$0xff] }
 0x654   : > { %12971 = vst [vmem:[#allocation61_spill] sm:$0xff] %v11750_v5  ;;  %v11752_v24 = vpop.eup %9193  ;;  %8708 = vmatpush3.xpose.msk.msra.mxu0 %vm757_vm1, %v11359_v13  ;;  %v4428_v38 = vpop.xlane.xlu0 %4427 }
 0x655   : > { %9205 = vpow2.f32 %v4537_v2  ;;  %v4541_v32 = vmul.f32 1.442695, %v4499_v35  ;;  %8709 = vmatprep.subr.msk.mxu0 %vm757_vm1, %v11424_v4  ;;  %v4500_v43 = vsub.f32 %v11549_v12, %v4428_v38  ;;  %5496 = vrot.lane.b32.xlu1 %v12972_v37, %s9541_s10  ;;  %v8504_v15 = vpop.f32.mrf.mxu0  ;;  %v11761_v57 = vpop.eup %9195  ;;  %v12978_v37 = vld [vmem:[#allocation37_spill] sm:$0xff] }
 0x656   : > { %9207 = vpow2.f32 %v4539_v42  ;;  %5498 = vrot.lane.b32.xlu0 %v12938_v40, %s9541_s10  ;;  %v11766_v13 = vadd.f32 %v8504_v15, %v12973_v9  ;;  %8612 = vmatprep.mubr.msk.f32.mxu0 %vm1456_vm2, %v11752_v24  ;;  %v4431_v59 = vpop.xlane.xlu1 %4430  ;;  %v11823_v9 = vld [vmem:[%s12743_s7] ss:$0 sm:$0xff]  ;;  %v4594_v10 = vsel %vm1456_vm2, %v11761_v57, 0.0 }
 0x657   : > { %9209 = vpow2.f32 %v4541_v32  ;;  %v4543_v47 = vmul.f32 1.442695, %v4500_v43  ;;  %v4501_v12 = vsub.f32 %v11559_v8, %v4431_v59  ;;  %8613 = vmatmul.mubr.msk.f32.gmra.mxu0 %vm1456_vm2, %v11761_v57  ;;  %v11773_v3 = vpop.f32.mrf.mxu0  ;;  %v12975_v8 = vld [vmem:[#allocation51_spill] sm:$0xff] }
 0x658   : > { %12974 = vst [vmem:[#allocation28_spill] sm:$0xff] %v11773_v3  ;;  %v11775_v25 = vpop.eup %9197  ;;  %8710 = vmatpush3.xpose.msk.msra.mxu0 %vm757_vm1, %v11424_v4  ;;  %v4434_v40 = vpop.xlane.xlu0 %4433  ;;  %v9470_v3 = vld [vmem:[%s9680_s25 + $0x10] sm:$0xff] }
 0x659   : > { %9211 = vpow2.f32 %v4543_v47  ;;  %v4545_v54 = vmul.f32 1.442695, %v4501_v12  ;;  %8711 = vmatprep.subr.msk.mxu0 %vm757_vm1, %v11428_v52  ;;  %v4502_v14 = vsub.f32 %v11557_v22, %v4434_v40  ;;  %5500 = vrot.lane.b32.xlu1 %v12975_v8, %s9541_s10  ;;  %v8507_v7 = vpop.f32.mrf.mxu0  ;;  %v11784_v63 = vpop.eup %9199  ;;  %v12980_v12 = vld [vmem:[#allocation10_spill] sm:$0xff]  ;;  %v9465_v40 = vld [vmem:[%s9680_s25 + $0x30] sm:$0xff]  ;;  %v12981_v8 = vld [vmem:[#allocation72_spill] sm:$0xff] }
 0x65a   : > { %5502 = vrot.lane.b32.xlu0 %v12939_v31, %s9541_s10  ;;  %v11789_v42 = vadd.f32 %v8507_v7, %v12976_v46  ;;  %8615 = vmatprep.mubr.msk.f32.mxu0 %vm1456_vm2, %v11775_v25  ;;  %v4437_v4 = vpop.xlane.xlu1 %4436  ;;  %v4600_v57 = vsel %vm1456_vm2, %v11784_v63, 0.0 }
 0x65b   : > { %9213 = vpow2.f32 %v4545_v54  ;;  %v4547_v51 = vmul.f32 1.442695, %v4502_v14  ;;  %v4503_v22 = vsub.f32 %v11567_v55, %v4437_v4  ;;  %8616 = vmatmul.mubr.msk.f32.gmra.mxu0 %vm1456_vm2, %v11784_v63  ;;  %v11796_v45 = vpop.f32.mrf.mxu0  ;;  %v12977_v55 = vld [vmem:[#allocation55_spill] sm:$0xff] }
 0x65c   : > { %v11798_v2 = vpop.eup %9201  ;;  %8712 = vmatpush3.xpose.msk.msra.mxu0 %vm757_vm1, %v11428_v52  ;;  %v4440_v31 = vpop.xlane.xlu0 %4439 }
 0x65d   : > { %9215 = vpow2.f32 %v4547_v51  ;;  %v4549_v35 = vmul.f32 1.442695, %v4503_v22  ;;  %8713 = vmatprep.subr.msk.mxu0 %vm757_vm1, %v11368_v30  ;;  %v4504_v38 = vsub.f32 %v11565_v62, %v4440_v31  ;;  %5504 = vrot.lane.b32.xlu1 %v12977_v55, %s9541_s10  ;;  %v8510_v32 = vpop.f32.mrf.mxu0  ;;  %v11807_v43 = vpop.eup %9203  ;;  %v9466_v51 = vld [vmem:[%s9680_s25 + $0x38] sm:$0xff] }
 0x65e   : > { %5506 = vrot.lane.b32.xlu0 %v12940_v11, %s9541_s10  ;;  %v11812_v52 = vadd.f32 %v8510_v32, %v12978_v37  ;;  %8618 = vmatprep.mubr.msk.f32.mxu0 %vm1456_vm2, %v11798_v2  ;;  %v12979_v11 = vld [vmem:[#allocation44_spill] sm:$0xff]  ;;  %s7048_s10 = sshll.u32 %s326_s26, 8 }
 0x65f   : > { %9217 = vpow2.f32 %v4549_v35  ;;  %v4551_v15 = vmul.f32 1.442695, %v4504_v38  ;;  %8619 = vmatmul.mubr.msk.f32.gmra.mxu0 %vm1456_vm2, %v11807_v43  ;;  %v11818_v62 = vpop.f32.mrf.mxu0  ;;  %v1021_v59 = vadd.f32 %v11823_v9, %v12979_v11  ;;  %v12983_v55 = vld [vmem:[#allocation48_spill] sm:$0xff]  ;;  %s12558_s12 = scalar_lea.vmem [#allocation2], %s7048_s10  ;;  %s9480_s10 = scalar_lea.vmem %s9479_s24, 8192 }
 0x660   : > { %8714 = vmatpush3.xpose.msk.msra.mxu0 %vm757_vm1, %v11368_v30  ;;  %v4446_v47 = vpop.xlane.xlu0 %4445  ;;  %v4452_v46 = vpop.xlane.xlu1 %4451  ;;  %v12982_v30 = vld [vmem:[#allocation42_spill] sm:$0xff]  ;;  %v1031_v32 = vadd.f32 %v11823_v9, %v12983_v55 }
 0x661   : > { %9219 = vpow2.f32 %v4551_v15  ;;  %8715 = vmatprep.subr.msk.mxu0 %vm757_vm1, %v12980_v12  ;;  %6193 = vrot.lane.b32.xlu1 %v9465_v40, %s9542_s19  ;;  %v8513_v54 = vpop.f32.mrf.mxu0  ;;  %v2496_v7 = vadd.f32 %v12981_v8, %v1021_v59  ;;  %v4506_v4 = vsub.f32 %v11573_v56, %v4446_v47  ;;  %v12984_v15 = vld [vmem:[#allocation6_spill] sm:$0xff]  ;;  %v12985_v40 = vld [vmem:[#allocation73_spill] sm:$0xff]  ;;  %v4508_v8 = vsub.f32 %v11577_v44, %v4452_v46 }
 0x662   : > { %v11833_v14 = vpop.eup %9205  ;;  %6195 = vrot.lane.b32.xlu0 %v9466_v51, %s9542_s19  ;;  %v11840_v22 = vadd.f32 %v8513_v54, %v12982_v30  ;;  %v2498_v54 = vadd.f32 %v12985_v40, %v1031_v32  ;;  %v12986_v30 = vld [vmem:[#allocation46_spill] sm:$0xff]  ;;  %v12987_v32 = vld [vmem:[#allocation52_spill] sm:$0xff] }
 0x663   : > { %v11842_v31 = vpop.eup %9207  ;;  %v3885_v35 = vpop.f32.mrf.mxu0  ;;  %8621 = vmatprep.mubr.msk.f32.mxu0 %vm1456_vm2, %v11833_v14  ;;  %v4555_v51 = vmul.f32 1.442695, %v4506_v4  ;;  %v1041_v44 = vadd.f32 %v11823_v9, %v12987_v32  ;;  %v4559_v32 = vmul.f32 1.442695, %v4508_v8 }
 0x664   : > { %v11846_v38 = vpop.eup %9209  ;;  %8716 = vmatpush3.xpose.msk.msra.mxu0 %vm757_vm1, %v12980_v12  ;;  %v11852_v56 = vadd.f32 %v3885_v35, %v2496_v7  ;;  %v4443_v37 = vpop.xlane.xlu0 %4442  ;;  %v9467_v12 = vld [vmem:[%s9680_s25 + $0x18] sm:$0xff]  ;;  %v9468_v7 = vld [vmem:[%s9680_s25 + $0x28] sm:$0xff] }
 0x665   : > { %8717 = vmatprep.subr.msk.mxu0 %vm757_vm1, %v12984_v15  ;;  %8622 = vmatmul.mubr.msk.f32.gmra.mxu0 %vm1456_vm2, %v11842_v31  ;;  %v4505_v11 = vsub.f32 %v11579_v48, %v4443_v37  ;;  %v8516_v59 = vpop.f32.mrf.mxu0  ;;  %v5511_v46 = vpop.permute.xlu1 %5510 }
 0x666   : > { %v11859_v47 = vpop.eup %9211  ;;  %6187 = vrot.lane.b32.xlu1 %v9467_v12, %s9542_s19  ;;  %6191 = vrot.lane.b32.xlu0 %v9468_v7, %s9542_s19  ;;  %v11868_v35 = vadd.f32 %v8516_v59, %v12986_v30  ;;  %v12988_v7 = vld [vmem:[#allocation74_spill] sm:$0xff] }
 0x667   : > { %v4553_v55 = vmul.f32 1.442695, %v4505_v11  ;;  %8624 = vmatprep.mubr.msk.f32.mxu0 %vm1456_vm2, %v11846_v38  ;;  %v3895_v48 = vpop.f32.mrf.mxu0  ;;  %v2500_v30 = vadd.f32 %v12988_v7, %v1041_v44  ;;  %v12990_v44 = vld [vmem:[#allocation56_spill] sm:$0xff]  ;;  %v12991_v7 = vld [vmem:[#allocation75_spill] sm:$0xff] }
 0x668   : > { %v11872_v37 = vpop.eup %9213  ;;  %8718 = vmatpush3.xpose.msk.msra.mxu0 %vm757_vm1, %v12984_v15  ;;  %v11878_v4 = vadd.f32 %v3895_v48, %v2498_v54  ;;  %v4449_v40 = vpop.xlane.xlu0 %4448  ;;  %v9469_v15 = vld [vmem:[%s9680_s25 + $0x20] sm:$0xff]  ;;  %v12989_v54 = vld [vmem:[#allocation50_spill] sm:$0xff]  ;;  %v1051_v8 = vadd.f32 %v11823_v9, %v12990_v44 }
 0x669   : > { %9221 = vpow2.f32 %v4553_v55  ;;  %8719 = vmatprep.subr.msk.mxu0 %vm757_vm1, %v5511_v46  ;;  %8625 = vmatmul.mubr.msk.f32.gmra.mxu0 %vm1456_vm2, %v11859_v47  ;;  %v4507_v11 = vsub.f32 %v11585_v49, %v4449_v40  ;;  %v8519_v59 = vpop.f32.mrf.mxu0  ;;  %v12992_v44 = vld [vmem:[#allocation54_spill] sm:$0xff] }
 0x66a   : > { %v11884_v12 = vpop.eup %9215  ;;  %9223 = vpow2.f32 %v4555_v51  ;;  %6183 = vrot.lane.b32.xlu1 %v11602_v19, %s9542_s19  ;;  %6189 = vrot.lane.b32.xlu0 %v9469_v15, %s9542_s19  ;;  %v11892_v55 = vadd.f32 %v8519_v59, %v12989_v54  ;;  %v2502_v15 = vadd.f32 %v12991_v7, %v1051_v8 }
 0x66b   : > { %v4557_v48 = vmul.f32 1.442695, %v4507_v11  ;;  %8627 = vmatprep.mubr.msk.f32.mxu0 %vm1456_vm2, %v11872_v37  ;;  %v3905_v49 = vpop.f32.mrf.mxu0 }
 0x66c   : > { %v11896_v40 = vpop.eup %9217  ;;  %8720 = vmatpush3.xpose.msk.msra.mxu0 %vm757_vm1, %v5511_v46  ;;  %v11901_v19 = vadd.f32 %v3905_v49, %v2500_v30  ;;  %v4458_v51 = vpop.xlane.xlu0 %4457 }
 0x66d   : > { %9225 = vpow2.f32 %v4557_v48  ;;  %8628 = vmatmul.mubr.msk.f32.gmra.mxu0 %vm1456_vm2, %v11884_v12  ;;  %v8522_v59 = vpop.f32.mrf.mxu0  ;;  %v4510_v54 = vsub.f32 %v11589_v61, %v4458_v51  ;;  %v12993_v48 = vld [vmem:[#allocation58_spill] sm:$0xff] }
 0x66e   : > { %v11905_v11 = vpop.eup %9219  ;;  %9227 = vpow2.f32 %v4559_v32  ;;  %6185 = vrot.lane.b32.xlu0 %v9470_v3, %s9542_s19  ;;  %v11912_v46 = vadd.f32 %v8522_v59, %v12992_v44  ;;  %8630 = vmatprep.mubr.msk.f32.mxu0 %vm1456_vm2, %v11896_v40  ;;  %v1061_v49 = vadd.f32 %v11823_v9, %v12993_v48  ;;  %v12994_v3 = vld [vmem:[#allocation76_spill] sm:$0xff]  ;;  %v12995_v59 = vld [vmem:[#allocation57_spill] sm:$0xff] }
 0x66f   : > { %v3915_v30 = vpop.f32.mrf.mxu0  ;;  %v4563_v51 = vmul.f32 1.442695, %v4510_v54  ;;  %v12997_v54 = vld [vmem:[#allocation14_spill] sm:$0xff] }
 0x670   : > { %v11918_v5 = vadd.f32 %v3915_v30, %v2502_v15  ;;  %v4455_v28 = vpop.xlane.xlu0 %4454  ;;  %v2504_v8 = vadd.f32 %v12994_v3, %v1061_v49 }
 0x671   : > { %8631 = vmatmul.mubr.msk.f32.gmra.mxu0 %vm1456_vm2, %v11905_v11  ;;  %v4509_v61 = vsub.f32 %v11593_v27, %v4455_v28  ;;  %v8525_v32 = vpop.f32.mrf.mxu0  ;;  %v12996_v27 = vld [vmem:[#allocation59_spill] sm:$0xff] }
 0x672   : > { %v11925_v7 = vadd.f32 %v8525_v32, %v12995_v59  ;;  %v12998_v59 = vld [vmem:[#allocation18_spill] sm:$0xff] }
 0x673   : > { %v4561_v44 = vmul.f32 1.442695, %v4509_v61  ;;  %v3925_v58 = vpop.f32.mrf.mxu0 }
 0x674   : > { %v11927_v53 = vadd.f32 %v3925_v58, %v2504_v8  ;;  %v4464_v9 = vpop.xlane.xlu0 %4463 }
 0x675   : > { %9229 = vpow2.f32 %v4561_v44  ;;  %v8528_v15 = vpop.f32.mrf.mxu0  ;;  %v4512_v48 = vsub.f32 %v11597_v33, %v4464_v9 }
 0x676   : > { %v11929_v30 = vpop.eup %9221  ;;  %9231 = vpow2.f32 %v4563_v51  ;;  %v11933_v28 = vadd.f32 %v8528_v15, %v12996_v27 }
 0x677   : > { %v11935_v49 = vpop.eup %9223  ;;  %8633 = vmatprep.mubr.msk.f32.mxu0 %vm1456_vm2, %v11929_v30  ;;  %v4567_v3 = vmul.f32 1.442695, %v4512_v48 }
 0x678   : > { %8634 = vmatmul.mubr.msk.f32.gmra.mxu0 %vm1456_vm2, %v11935_v49  ;;  %v4461_v58 = vpop.xlane.xlu0 %4460 }
 0x679   : > { %v4511_v61 = vsub.f32 %v12997_v54, %v4461_v58 }
 0x67a   : > { %v11942_v32 = vpop.eup %9225 }
 0x67b   : > { %v11944_v8 = vpop.eup %9227  ;;  %v4565_v33 = vmul.f32 1.442695, %v4511_v61  ;;  %8636 = vmatprep.mubr.msk.f32.mxu0 %vm1456_vm2, %v11942_v32 }
 0x67c   : > { %8637 = vmatmul.mubr.msk.f32.gmra.mxu0 %vm1456_vm2, %v11944_v8  ;;  %v4470_v51 = vpop.xlane.xlu0 %4469 }
 0x67d   : > { %9233 = vpow2.f32 %v4565_v33  ;;  %v4514_v44 = vsub.f32 %v12998_v59, %v4470_v51 }
 0x67e   : > { %9235 = vpow2.f32 %v4567_v3  ;;  %v12999_v3 = vld [vmem:[#allocation21_spill] sm:$0xff] }
 0x67f   : > { %v4571_v48 = vmul.f32 1.442695, %v4514_v44 }
 0x680   : > { %v4467_v9 = vpop.xlane.xlu0 %4466 }
 0x681   : > { %v4513_v15 = vsub.f32 %v11614_v18, %v4467_v9 }
 0x682   : > { %v11952_v27 = vpop.eup %9229 }
 0x683   : > { %v11954_v58 = vpop.eup %9231  ;;  %v4569_v54 = vmul.f32 1.442695, %v4513_v15  ;;  %8639 = vmatprep.mubr.msk.f32.mxu0 %vm1456_vm2, %v11952_v27 }
 0x684   : > { %8640 = vmatmul.mubr.msk.f32.gmra.mxu0 %vm1456_vm2, %v11954_v58  ;;  %v4476_v61 = vpop.xlane.xlu0 %4475 }
 0x685   : > { %9237 = vpow2.f32 %v4569_v54  ;;  %v4516_v33 = vsub.f32 %v12999_v3, %v4476_v61  ;;  %v4585_v54 = vsel %vm1456_vm2, %v11733_v23, 0.0  ;;  %v4591_v3 = vsel %vm1456_vm2, %v11752_v24, 0.0 }
 0x686   : > { %9239 = vpow2.f32 %v4571_v48  ;;  %v4597_v23 = vsel %vm1456_vm2, %v11775_v25, 0.0  ;;  %v4603_v25 = vsel %vm1456_vm2, %v11798_v2, 0.0  ;;  %v4609_v2 = vsel %vm1456_vm2, %v11833_v14, 0.0 }
 0x687   : > { %v4575_v44 = vmul.f32 1.442695, %v4516_v33 }
 0x688   : > { %v4473_v51 = vpop.xlane.xlu0 %4472 }
 0x689   : > { %v4515_v18 = vsub.f32 %v11622_v50, %v4473_v51 }
 0x68a   : > { %v11962_v59 = vpop.eup %9233 }
 0x68b   : > { %v11964_v9 = vpop.eup %9235  ;;  %v4573_v15 = vmul.f32 1.442695, %v4515_v18  ;;  %8642 = vmatprep.mubr.msk.f32.mxu0 %vm1456_vm2, %v11962_v59 }
 0x68c   : > { %8643 = vmatmul.mubr.msk.f32.gmra.mxu0 %vm1456_vm2, %v11964_v9  ;;  %v4479_v48 = vpop.xlane.xlu0 %4478 }
 0x68d   : > { %9241 = vpow2.f32 %v4573_v15  ;;  %4589 = vadd.xlane.f32.xlu0 %v4588_v26  ;;  %v4517_v50 = vsub.f32 %v11626_v36, %v4479_v48 }
 0x68e   : > { %9243 = vpow2.f32 %v4575_v44  ;;  %4586 = vadd.xlane.f32.xlu1 %v4585_v54  ;;  %v4606_v54 = vsel %vm1456_vm2, %v11807_v43, 0.0 }
 0x68f   : > { %v4577_v61 = vmul.f32 1.442695, %v4517_v50 }
 0x690   : > { %v4485_v33 = vpop.xlane.xlu0 %4484 }
 0x691   : > { %9245 = vpow2.f32 %v4577_v61  ;;  %4592 = vadd.xlane.f32.xlu0 %v4591_v3  ;;  %v4519_v36 = vsub.f32 %v11630_v6, %v4485_v33 }
 0x692   : > { %v11979_v51 = vpop.eup %9237  ;;  %4595 = vadd.xlane.f32.xlu1 %v4594_v10 }
 0x693   : > { %v11981_v26 = vpop.eup %9239  ;;  %8645 = vmatprep.mubr.msk.f32.mxu0 %vm1456_vm2, %v11979_v51  ;;  %v4581_v6 = vmul.f32 1.442695, %v4519_v36  ;;  %v4615_v36 = vsel %vm1456_vm2, %v11846_v38, 0.0  ;;  %v5090_v38 = vld [vmem:[%s12741_s5 + $0x10] sm:$0xff] }
 0x694   : > { %8646 = vmatmul.mubr.msk.f32.gmra.mxu0 %vm1456_vm2, %v11981_v26  ;;  %v5509_v24 = vpop.permute.xlu0 %5508  ;;  %8657 = vmatprep.subr.mxu1 %v5090_v38 }
 0x695   : > { %4598 = vadd.xlane.f32.xlu0 %v4597_v23  ;;  %v4482_v18 = vpop.xlane.xlu1 %4481  ;;  %8721 = vmatprep.subr.msk.mxu0 %vm757_vm1, %v5509_v24 }
 0x696   : > { %v4518_v44 = vsub.f32 %v11636_v41, %v4482_v18  ;;  %4601 = vadd.xlane.f32.xlu1 %v4600_v57  ;;  %8722 = vmatpush3.xpose.msk.msra.mxu0 %vm757_vm1, %v5509_v24  ;;  %v4618_v24 = vsel %vm1456_vm2, %v11859_v47, 0.0  ;;  %v4627_v47 = vsel %vm1456_vm2, %v11896_v40, 0.0 }
 0x697   : > { %8658 = vmatpush3.msra.mxu1 %v5090_v38 }
 0x698   : > { %v4579_v15 = vmul.f32 1.442695, %v4518_v44  ;;  %v5447_v48 = vpop.permute.xlu0 %5446  ;;  %v4624_v44 = vsel %vm1456_vm2, %v11884_v12, 0.0  ;;  %v4630_v12 = vsel %vm1456_vm2, %v11905_v11, 0.0  ;;  %v4639_v11 = vsel %vm1456_vm2, %v11942_v32, 0.0 }
 0x699   : > { %4604 = vadd.xlane.f32.xlu0 %v4603_v25  ;;  %v4488_v50 = vpop.xlane.xlu1 %4487  ;;  %v4648_v32 = vsel %vm1456_vm2, %v11954_v58, 0.0  ;;  %v4657_v58 = vsel %vm1456_vm2, %v11979_v51, 0.0 }
 0x69a   : > { %v11999_v61 = vpop.eup %9241  ;;  %9247 = vpow2.f32 %v4579_v15  ;;  %v4520_v63 = vsub.f32 %v11638_v1, %v4488_v50  ;;  %4607 = vadd.xlane.f32.xlu1 %v4606_v54  ;;  %v4612_v1 = vsel %vm1456_vm2, %v11842_v31, 0.0  ;;  %v4621_v31 = vsel %vm1456_vm2, %v11872_v37, 0.0 }
 0x69b   : > { %v12002_v41 = vpop.eup %9243  ;;  %9249 = vpow2.f32 %v4581_v6  ;;  %8648 = vmatprep.mubr.msk.f32.mxu0 %vm1456_vm2, %v11999_v61  ;;  %v4633_v54 = vsel %vm1456_vm2, %v11929_v30, 0.0  ;;  %v4642_v30 = vsel %vm1456_vm2, %v11944_v8, 0.0  ;;  %v4651_v8 = vsel %vm1456_vm2, %v11962_v59, 0.0 }
 0x69c   : > { %v4583_v3 = vmul.f32 1.442695, %v4520_v63  ;;  %8649 = vmatmul.mubr.msk.f32.gmra.mxu0 %vm1456_vm2, %v12002_v41  ;;  %v5451_v43 = vpop.permute.xlu0 %5450  ;;  %v4660_v59 = vsel %vm1456_vm2, %v11981_v26, 0.0  ;;  %v4666_v51 = vsel %vm1456_vm2, %v12002_v41, 0.0 }
 0x69d   : > { %4610 = vadd.xlane.f32.xlu0 %v4609_v2  ;;  %v5445_v33 = vpop.permute.xlu1 %5444 }
 0x69e   : > { %v12012_v10 = vpop.eup %9245  ;;  %9251 = vpow2.f32 %v4583_v3  ;;  %4613 = vadd.xlane.f32.xlu1 %v4612_v1  ;;  %v4636_v3 = vsel %vm1456_vm2, %v11935_v49, 0.0  ;;  %v4645_v49 = vsel %vm1456_vm2, %v11952_v27, 0.0  ;;  %v4654_v27 = vsel %vm1456_vm2, %v11964_v9, 0.0 }
 0x69f   : > { %8651 = vmatprep.mubr.msk.f32.mxu0 %vm1456_vm2, %v12012_v10  ;;  %v4663_v9 = vsel %vm1456_vm2, %v11999_v61, 0.0  ;;  %v4669_v26 = vsel %vm1456_vm2, %v12012_v10, 0.0 }
 0x6a0   : > { %v5455_v14 = vpop.permute.xlu0 %5454 }
 0x6a1   : > { %4616 = vadd.xlane.f32.xlu0 %v4615_v36  ;;  %v5449_v23 = vpop.permute.xlu1 %5448 }
 0x6a2   : > { %4619 = vadd.xlane.f32.xlu1 %v4618_v24 }
 0x6a4   : > { %v5459_v18 = vpop.permute.xlu0 %5458 }
 0x6a5   : > { %4622 = vadd.xlane.f32.xlu0 %v4621_v31  ;;  %v5453_v57 = vpop.permute.xlu1 %5452 }
 0x6a6   : > { %4625 = vadd.xlane.f32.xlu1 %v4624_v44 }
 0x6a7   : > { %v12024_v6 = vpop.eup %9247 }
 0x6a8   : > { %v12029_v15 = vpop.eup %9249  ;;  %8652 = vmatmul.mubr.msk.f32.gmra.mxu0 %vm1456_vm2, %v12024_v6  ;;  %v5463_v37 = vpop.permute.xlu0 %5462  ;;  %v4672_v61 = vsel %vm1456_vm2, %v12024_v6, 0.0 }
 0x6a9   : > { %4628 = vadd.xlane.f32.xlu0 %v4627_v47  ;;  %v5457_v25 = vpop.permute.xlu1 %5456  ;;  %8654 = vmatprep.mubr.msk.f32.mxu0 %vm1456_vm2, %v12029_v15  ;;  %v4675_v41 = vsel %vm1456_vm2, %v12029_v15, 0.0 }
 0x6aa   : > { %4631 = vadd.xlane.f32.xlu1 %v4630_v12 }
 0x6ab   : > { %v9252_v50 = vpop.eup %9251 }
 0x6ac   : > { %8655 = vmatmul.mubr.msk.f32.gmra.mxu0 %vm1456_vm2, %v9252_v50  ;;  %v5467_v40 = vpop.permute.xlu0 %5466  ;;  %v4678_v44 = vsel %vm1456_vm2, %v9252_v50, 0.0 }
 0x6ad   : > { %4634 = vadd.xlane.f32.xlu0 %v4633_v54  ;;  %v5461_v63 = vpop.permute.xlu1 %5460  ;;  %8723 = vmatprep.mubr.msk.f32.mxu0 %vm757_vm1, %v5445_v33 }
 0x6ae   : > { %4637 = vadd.xlane.f32.xlu1 %v4636_v3 }
 0x6b0   : > { %8724 = vmatmul.mubr.msk.f32.vlgmr.msra.gmra.mxu0 %vm757_vm1, %v5447_v48  ;;  %v5471_v2 = vpop.permute.xlu0 %5470 }
 0x6b1   : > { %4640 = vadd.xlane.f32.xlu0 %v4639_v11  ;;  %v5465_v1 = vpop.permute.xlu1 %5464  ;;  %8726 = vmatprep.mubr.msk.f32.mxu0 %vm757_vm1, %v5449_v23 }
 0x6b2   : > { %4643 = vadd.xlane.f32.xlu1 %v4642_v30 }
 0x6b4   : > { %8727 = vmatmul.mubr.msk.f32.gmra.mxu0 %vm757_vm1, %v5451_v43  ;;  %v5475_v33 = vpop.permute.xlu0 %5474 }
 0x6b5   : > { %4646 = vadd.xlane.f32.xlu0 %v4645_v49  ;;  %v5469_v36 = vpop.permute.xlu1 %5468  ;;  %8729 = vmatprep.mubr.msk.f32.mxu0 %vm757_vm1, %v5453_v57 }
 0x6b6   : > { %4649 = vadd.xlane.f32.xlu1 %v4648_v32 }
 0x6b8   : > { %8730 = vmatmul.mubr.msk.f32.gmra.mxu0 %vm757_vm1, %v5455_v14  ;;  %v5479_v48 = vpop.permute.xlu0 %5478 }
 0x6b9   : > { %4652 = vadd.xlane.f32.xlu0 %v4651_v8  ;;  %v5473_v23 = vpop.permute.xlu1 %5472  ;;  %8732 = vmatprep.mubr.msk.f32.mxu0 %vm757_vm1, %v5457_v25 }
 0x6ba   : > { %4655 = vadd.xlane.f32.xlu1 %v4654_v27 }
 0x6bc   : > { %8733 = vmatmul.mubr.msk.f32.gmra.mxu0 %vm757_vm1, %v5459_v18  ;;  %v5483_v43 = vpop.permute.xlu0 %5482 }
 0x6bd   : > { %4658 = vadd.xlane.f32.xlu0 %v4657_v58  ;;  %8735 = vmatprep.mubr.msk.f32.mxu0 %vm757_vm1, %v5461_v63  ;;  %v5477_v14 = vpop.permute.xlu1 %5476 }
 0x6be   : > { %4661 = vadd.xlane.f32.xlu1 %v4660_v59 }
 0x6c0   : > { %8736 = vmatmul.mubr.msk.f32.gmra.mxu0 %vm757_vm1, %v5463_v37  ;;  %v5487_v24 = vpop.permute.xlu0 %5486 }
 0x6c1   : > { %4664 = vadd.xlane.f32.xlu0 %v4663_v9  ;;  %8738 = vmatprep.mubr.msk.f32.mxu0 %vm757_vm1, %v5465_v1  ;;  %v5481_v31 = vpop.permute.xlu1 %5480  ;;  %v12114_v1 = vpop.f32.mrf.mxu0 }
 0x6c2   : > { %4667 = vadd.xlane.f32.xlu1 %v4666_v51  ;;  %13000 = vst [vmem:[#allocation62_spill] sm:$0xff] %v12114_v1 }
 0x6c4   : > { %8739 = vmatmul.mubr.msk.f32.gmra.mxu0 %vm757_vm1, %v5467_v40  ;;  %v5491_v18 = vpop.permute.xlu0 %5490 }
 0x6c5   : > { %4670 = vadd.xlane.f32.xlu0 %v4669_v26  ;;  %8741 = vmatprep.mubr.msk.f32.mxu0 %vm757_vm1, %v5469_v36  ;;  %v5485_v10 = vpop.permute.xlu1 %5484 }
 0x6c6   : > { %4673 = vadd.xlane.f32.xlu1 %v4672_v61 }
 0x6c8   : > { %8742 = vmatmul.mubr.msk.f32.gmra.mxu0 %vm757_vm1, %v5471_v2  ;;  %v5495_v57 = vpop.permute.xlu0 %5494 }
 0x6c9   : > { %4676 = vadd.xlane.f32.xlu0 %v4675_v41  ;;  %8744 = vmatprep.mubr.msk.f32.mxu0 %vm757_vm1, %v5473_v23  ;;  %v5489_v6 = vpop.permute.xlu1 %5488 }
 0x6ca   : > { %4679 = vadd.xlane.f32.xlu1 %v4678_v44 }
 0x6cc   : > { %8745 = vmatmul.mubr.msk.f32.gmra.mxu0 %vm757_vm1, %v5475_v33  ;;  %v5499_v38 = vpop.permute.xlu0 %5498 }
 0x6cd   : > { %8747 = vmatprep.mubr.msk.f32.mxu0 %vm757_vm1, %v5477_v14  ;;  %v5493_v37 = vpop.permute.xlu1 %5492 }
 0x6d0   : > { %8748 = vmatmul.mubr.msk.f32.gmra.mxu0 %vm757_vm1, %v5479_v48  ;;  %v5503_v47 = vpop.permute.xlu0 %5502 }
 0x6d1   : > { %8750 = vmatprep.mubr.msk.f32.mxu0 %vm757_vm1, %v5481_v31  ;;  %v5497_v12 = vpop.permute.xlu1 %5496 }
 0x6d4   : > { %8751 = vmatmul.mubr.msk.f32.gmra.mxu0 %vm757_vm1, %v5483_v43  ;;  %v5507_v15 = vpop.permute.xlu0 %5506 }
 0x6d5   : > { %8753 = vmatprep.mubr.msk.f32.mxu0 %vm757_vm1, %v5485_v10  ;;  %v5501_v50 = vpop.permute.xlu1 %5500 }
 0x6d8   : > { %8754 = vmatmul.mubr.msk.f32.gmra.mxu0 %vm757_vm1, %v5487_v24  ;;  %v12093_v25 = vpop.permute.xlu0 %6195 }
 0x6d9   : > { %8756 = vmatprep.mubr.msk.f32.mxu0 %vm757_vm1, %v5489_v6  ;;  %8771 = vmatprep.subr.mxu1 %v12093_v25  ;;  %v5505_v54 = vpop.permute.xlu1 %5504 }
 0x6dc   : > { %8757 = vmatmul.mubr.msk.f32.gmra.mxu0 %vm757_vm1, %v5491_v18  ;;  %v12106_v40 = vpop.permute.xlu0 %6191 }
 0x6dd   : > { %8759 = vmatprep.mubr.msk.f32.mxu0 %vm757_vm1, %v5493_v37  ;;  %v6194_v63 = vpop.permute.xlu1 %6193 }
 0x6e0   : > { %8760 = vmatmul.mubr.msk.f32.gmra.mxu0 %vm757_vm1, %v5495_v57  ;;  %v12108_v3 = vpop.permute.xlu0 %6189 }
 0x6e1   : > { %8762 = vmatprep.mubr.msk.f32.mxu0 %vm757_vm1, %v5497_v12  ;;  %v12110_v11 = vpop.permute.xlu1 %6187 }
 0x6e4   : > { %8763 = vmatmul.mubr.msk.f32.gmra.mxu0 %vm757_vm1, %v5499_v38  ;;  %v12112_v2 = vpop.permute.xlu0 %6185 }
 0x6e5   : > { %8765 = vmatprep.mubr.msk.f32.mxu0 %vm757_vm1, %v5501_v50  ;;  %v12116_v30 = vpop.permute.xlu1 %6183 }
 0x6e8   : > { %8766 = vmatmul.mubr.msk.f32.gmra.mxu0 %vm757_vm1, %v5503_v47 }
 0x6e9   : > { %8768 = vmatprep.mubr.msk.f32.mxu0 %vm757_vm1, %v5505_v54 }
 0x6ec   : > { %8769 = vmatmul.mubr.msk.f32.gmra.mxu0 %vm757_vm1, %v5507_v15 }
 0x713   : > { %v8611_v49 = vpop.f32.mrf.mxu0 }
 0x715   : > { %v4899_v33 = vpop.f32.mrf.mxu0 }
 0x716   : > { %v4590_v36 = vpop.xlane.xlu0 %4589 }
 0x717   : > { %9253 = vrcp.f32 %v4590_v36  ;;  %v4587_v32 = vpop.xlane.xlu1 %4586  ;;  %v8614_v8 = vpop.f32.mrf.mxu0 }
 0x718   : > { %9255 = vrcp.f32 %v4587_v32 }
 0x719   : > { %v4909_v48 = vpop.f32.mrf.mxu0 }
 0x71a   : > { %v4593_v23 = vpop.xlane.xlu0 %4592 }
 0x71b   : > { %9257 = vrcp.f32 %v4593_v23  ;;  %v4596_v27 = vpop.xlane.xlu1 %4595  ;;  %v8617_v58 = vpop.f32.mrf.mxu0 }
 0x71c   : > { %9259 = vrcp.f32 %v4596_v27 }
 0x71d   : > { %v4919_v43 = vpop.f32.mrf.mxu0 }
 0x71e   : > { %v4599_v59 = vpop.xlane.xlu0 %4598 }
 0x71f   : > { %9261 = vrcp.f32 %v4599_v59  ;;  %v4602_v14 = vpop.xlane.xlu1 %4601  ;;  %v8620_v9 = vpop.f32.mrf.mxu0 }
 0x720   : > { %9263 = vrcp.f32 %v4602_v14 }
 0x721   : > { %v4929_v51 = vpop.f32.mrf.mxu0 }
 0x722   : > { %v4605_v24 = vpop.xlane.xlu0 %4604 }
 0x723   : > { %9265 = vrcp.f32 %v4605_v24  ;;  %v4608_v31 = vpop.xlane.xlu1 %4607 }
 0x724   : > { %v9254_v26 = vpop.eup %9253  ;;  %9267 = vrcp.f32 %v4608_v31 }
 0x725   : > { %v9256_v18 = vpop.eup %9255  ;;  %v8623_v61 = vpop.f32.mrf.mxu0  ;;  %v5059_v44 = vmul.f32 %v9254_v26, %v8611_v49 }
 0x726   : > { %v4611_v41 = vpop.xlane.xlu0 %4610  ;;  %v5058_v57 = vmul.f32 %v9256_v18, %v4899_v33 }
 0x727   : > { %9269 = vrcp.f32 %v4611_v41  ;;  %v4614_v10 = vpop.xlane.xlu1 %4613  ;;  %v4939_v38 = vpop.f32.mrf.mxu0 }
 0x728   : > { %v9258_v6 = vpop.eup %9257  ;;  %9271 = vrcp.f32 %v4614_v10  ;;  %8659 = vmatprep.mubr.msk.f32.mxu1 %vm757_vm1, %v5058_v57 }
 0x729   : > { %v9260_v47 = vpop.eup %9259  ;;  %v12119_v15 = vpop.f32.mrf.mxu0  ;;  %8660 = vmatmul.mubr.msk.f32.vlgmr.msra.gmra.mxu1 %vm757_vm1, %v5059_v44  ;;  %v5060_v37 = vmul.f32 %v9258_v6, %v4909_v48 }
 0x72a   : > { %v4617_v12 = vpop.xlane.xlu0 %4616  ;;  %v5061_v50 = vmul.f32 %v9260_v47, %v8614_v8  ;;  %8772 = vmatpush3.msra.mxu1 %v12093_v25 }
 0x72b   : > { %9273 = vrcp.f32 %v4617_v12  ;;  %v4949_v54 = vpop.f32.mrf.mxu0  ;;  %v4620_v49 = vpop.xlane.xlu1 %4619  ;;  %8662 = vmatprep.mubr.msk.f32.mxu1 %vm757_vm1, %v5060_v37  ;;  %8773 = vmatprep.subr.mxu1 %v6194_v63 }
 0x72c   : > { %v9262_v33 = vpop.eup %9261  ;;  %9275 = vrcp.f32 %v4620_v49  ;;  %8774 = vmatpush3.msra.mxu1 %v6194_v63 }
 0x72d   : > { %v9264_v36 = vpop.eup %9263  ;;  %v8629_v32 = vpop.f32.mrf.mxu0  ;;  %8663 = vmatmul.mubr.msk.f32.gmra.mxu1 %vm757_vm1, %v5061_v50  ;;  %v5062_v23 = vmul.f32 %v9262_v33, %v4919_v43  ;;  %8775 = vmatprep.subr.mxu1 %v12106_v40 }
 0x72e   : > { %v4623_v48 = vpop.xlane.xlu0 %4622  ;;  %v5063_v8 = vmul.f32 %v9264_v36, %v8617_v58  ;;  %8776 = vmatpush3.msra.mxu1 %v12106_v40 }
 0x72f   : > { %9277 = vrcp.f32 %v4623_v48  ;;  %v4959_v25 = vpop.f32.mrf.mxu0  ;;  %v4626_v27 = vpop.xlane.xlu1 %4625  ;;  %8665 = vmatprep.mubr.msk.f32.mxu1 %vm757_vm1, %v5062_v23  ;;  %8777 = vmatprep.subr.mxu1 %v12108_v3 }
 0x730   : > { %v9266_v59 = vpop.eup %9265  ;;  %9279 = vrcp.f32 %v4626_v27  ;;  %8778 = vmatpush3.msra.mxu1 %v12108_v3 }
 0x731   : > { %v9268_v63 = vpop.eup %9267  ;;  %8666 = vmatmul.mubr.msk.f32.gmra.mxu1 %vm757_vm1, %v5063_v8  ;;  %v5064_v43 = vmul.f32 %v9266_v59, %v4929_v51  ;;  %8779 = vmatprep.subr.mxu1 %v12110_v11  ;;  %v8632_v58 = vpop.f32.mrf.mxu0 }
 0x732   : > { %v4629_v14 = vpop.xlane.xlu0 %4628  ;;  %v5065_v40 = vmul.f32 %v9268_v63, %v8620_v9  ;;  %8780 = vmatpush3.msra.mxu1 %v12110_v11 }
 0x733   : > { %9281 = vrcp.f32 %v4629_v14  ;;  %v4632_v24 = vpop.xlane.xlu1 %4631  ;;  %8668 = vmatprep.mubr.msk.f32.mxu1 %vm757_vm1, %v5064_v43  ;;  %8781 = vmatprep.subr.mxu1 %v12112_v2  ;;  %v4969_v51 = vpop.f32.mrf.mxu0 }
 0x734   : > { %v9270_v31 = vpop.eup %9269  ;;  %9283 = vrcp.f32 %v4632_v24  ;;  %8782 = vmatpush3.msra.mxu1 %v12112_v2 }
 0x735   : > { %v9272_v3 = vpop.eup %9271  ;;  %v5066_v26 = vmul.f32 %v9270_v31, %v4939_v38  ;;  %8669 = vmatmul.mubr.msk.f32.gmra.mxu1 %vm757_vm1, %v5065_v40  ;;  %8783 = vmatprep.subr.mxu1 %v12116_v30 }
 0x736   : > { %v4635_v9 = vpop.xlane.xlu0 %4634  ;;  %v5067_v18 = vmul.f32 %v9272_v3, %v8623_v61  ;;  %8784 = vmatpush3.msra.mxu1 %v12116_v30 }
 0x737   : > { %9285 = vrcp.f32 %v4635_v9  ;;  %v4638_v11 = vpop.xlane.xlu1 %4637  ;;  %8671 = vmatprep.mubr.msk.f32.mxu1 %vm757_vm1, %v5066_v26 }
 0x738   : > { %v9274_v41 = vpop.eup %9273  ;;  %9287 = vrcp.f32 %v4638_v11  ;;  %v8635_v57 = vpop.f32.mrf.mxu0 }
 0x739   : > { %v9276_v44 = vpop.eup %9275  ;;  %v5068_v2 = vmul.f32 %v9274_v41, %v4949_v54  ;;  %8672 = vmatmul.mubr.msk.f32.gmra.mxu1 %vm757_vm1, %v5067_v18 }
 0x73a   : > { %v4641_v10 = vpop.xlane.xlu0 %4640  ;;  %v5069_v38 = vmul.f32 %v9276_v44, %v12119_v15  ;;  %v4979_v30 = vpop.f32.mrf.mxu0 }
 0x73b   : > { %9289 = vrcp.f32 %v4641_v10  ;;  %v4644_v6 = vpop.xlane.xlu1 %4643  ;;  %8674 = vmatprep.mubr.msk.f32.mxu1 %vm757_vm1, %v5068_v2 }
 0x73c   : > { %v9278_v61 = vpop.eup %9277  ;;  %9291 = vrcp.f32 %v4644_v6  ;;  %v8638_v33 = vpop.f32.mrf.mxu0 }
 0x73d   : > { %v9280_v47 = vpop.eup %9279  ;;  %v5070_v37 = vmul.f32 %v9278_v61, %v4959_v25  ;;  %8675 = vmatmul.mubr.msk.f32.gmra.mxu1 %vm757_vm1, %v5069_v38 }
 0x73e   : > { %v4647_v12 = vpop.xlane.xlu0 %4646  ;;  %v5071_v50 = vmul.f32 %v9280_v47, %v8629_v32  ;;  %v4989_v27 = vpop.f32.mrf.mxu0 }
 0x73f   : > { %9293 = vrcp.f32 %v4647_v12  ;;  %v4650_v54 = vpop.xlane.xlu1 %4649  ;;  %8677 = vmatprep.mubr.msk.f32.mxu1 %vm757_vm1, %v5070_v37 }
 0x740   : > { %v9282_v49 = vpop.eup %9281  ;;  %9295 = vrcp.f32 %v4650_v54 }
 0x741   : > { %v9284_v15 = vpop.eup %9283  ;;  %v5072_v36 = vmul.f32 %v9282_v49, %v4969_v51  ;;  %8678 = vmatmul.mubr.msk.f32.gmra.mxu1 %vm757_vm1, %v5071_v50 }
 0x742   : > { %v4653_v23 = vpop.xlane.xlu0 %4652  ;;  %v5073_v48 = vmul.f32 %v9284_v15, %v8632_v58 }
 0x743   : > { %9297 = vrcp.f32 %v4653_v23  ;;  %v4656_v8 = vpop.xlane.xlu1 %4655  ;;  %8680 = vmatprep.mubr.msk.f32.mxu1 %vm757_vm1, %v5072_v36 }
 0x744   : > { %v9286_v25 = vpop.eup %9285  ;;  %9299 = vrcp.f32 %v4656_v8  ;;  %v8641_v43 = vpop.f32.mrf.mxu0 }
 0x745   : > { %v9288_v32 = vpop.eup %9287  ;;  %v5074_v59 = vmul.f32 %v9286_v25, %v4979_v30  ;;  %8681 = vmatmul.mubr.msk.f32.gmra.mxu1 %vm757_vm1, %v5073_v48 }
 0x746   : > { %v5075_v63 = vmul.f32 %v9288_v32, %v8635_v57  ;;  %v4659_v14 = vpop.xlane.xlu0 %4658  ;;  %v4999_v26 = vpop.f32.mrf.mxu0 }
 0x747   : > { %v4662_v40 = vpop.xlane.xlu1 %4661  ;;  %8683 = vmatprep.mubr.msk.f32.mxu1 %vm757_vm1, %v5074_v59 }
 0x748   : > { %v9290_v24 = vpop.eup %9289  ;;  %9301 = vrcp.f32 %v4662_v40 }
 0x749   : > { %v9292_v58 = vpop.eup %9291  ;;  %v5076_v31 = vmul.f32 %v9290_v24, %v4989_v27  ;;  %9303 = vrcp.f32 %v4659_v14  ;;  %8684 = vmatmul.mubr.msk.f32.gmra.mxu1 %vm757_vm1, %v5075_v63 }
 0x74a   : > { %v5077_v3 = vmul.f32 %v9292_v58, %v8638_v33  ;;  %v4665_v57 = vpop.xlane.xlu0 %4664 }
 0x74b   : > { %8686 = vmatprep.mubr.msk.f32.mxu1 %vm757_vm1, %v5076_v31  ;;  %v4668_v2 = vpop.xlane.xlu1 %4667  ;;  %9305 = vrcp.f32 %v4665_v57 }
 0x74c   : > { %v9294_v51 = vpop.eup %9293  ;;  %v8644_v9 = vpop.f32.mrf.mxu0  ;;  %9307 = vrcp.f32 %v4668_v2 }
 0x74d   : > { %v9296_v18 = vpop.eup %9295  ;;  %v5078_v11 = vmul.f32 %v9294_v51, %v4999_v26  ;;  %8687 = vmatmul.mubr.msk.f32.gmra.mxu1 %vm757_vm1, %v5077_v3 }
 0x74e   : > { %v5079_v41 = vmul.f32 %v9296_v18, %v8641_v43  ;;  %v5009_v44 = vpop.f32.mrf.mxu0  ;;  %v4671_v54 = vpop.xlane.xlu0 %4670 }
 0x74f   : > { %8689 = vmatprep.mubr.msk.f32.mxu1 %vm757_vm1, %v5078_v11  ;;  %v4674_v33 = vpop.xlane.xlu1 %4673  ;;  %9309 = vrcp.f32 %v4671_v54 }
 0x750   : > { %v9298_v10 = vpop.eup %9297  ;;  %9311 = vrcp.f32 %v4674_v33 }
 0x751   : > { %v9300_v38 = vpop.eup %9299  ;;  %v5080_v6 = vmul.f32 %v9298_v10, %v5009_v44  ;;  %8690 = vmatmul.mubr.msk.f32.gmra.mxu1 %vm757_vm1, %v5079_v41 }
 0x752   : > { %v5081_v61 = vmul.f32 %v9300_v38, %v8644_v9  ;;  %v4677_v23 = vpop.xlane.xlu0 %4676 }
 0x753   : > { %8692 = vmatprep.mubr.msk.f32.mxu1 %vm757_vm1, %v5080_v6  ;;  %v4680_v25 = vpop.xlane.xlu1 %4679  ;;  %9313 = vrcp.f32 %v4677_v23 }
 0x754   : > { %v8647_v30 = vpop.f32.mrf.mxu0  ;;  %9315 = vrcp.f32 %v4680_v25 }
 0x755   : > { %v9302_v47 = vpop.eup %9301  ;;  %8693 = vmatmul.mubr.msk.f32.gmra.mxu1 %vm757_vm1, %v5081_v61 }
 0x756   : > { %v9304_v37 = vpop.eup %9303  ;;  %v5019_v12 = vpop.f32.mrf.mxu0  ;;  %v5083_v49 = vmul.f32 %v9302_v47, %v8647_v30 }
 0x757   : > { %v5082_v50 = vmul.f32 %v9304_v37, %v5019_v12 }
 0x758   : > { %v9306_v36 = vpop.eup %9305 }
 0x759   : > { %8695 = vmatprep.mubr.msk.f32.mxu1 %vm757_vm1, %v5082_v50  ;;  %v9308_v8 = vpop.eup %9307 }
 0x75a   : > { %8696 = vmatmul.mubr.msk.f32.gmra.mxu1 %vm757_vm1, %v5083_v49 }
 0x75c   : > { %v8650_v15 = vpop.f32.mrf.mxu0  ;;  %v9310_v63 = vpop.eup %9309 }
 0x75d   : > { %v5085_v32 = vmul.f32 %v9308_v8, %v8650_v15  ;;  %v9312_v14 = vpop.eup %9311 }
 0x75e   : > { %v5029_v48 = vpop.f32.mrf.mxu0 }
 0x75f   : > { %v5084_v27 = vmul.f32 %v9306_v36, %v5029_v48 }
 0x760   : > { %v9314_v31 = vpop.eup %9313 }
 0x761   : > { %8698 = vmatprep.mubr.msk.f32.mxu1 %vm757_vm1, %v5084_v27  ;;  %v9316_v26 = vpop.eup %9315 }
 0x762   : > { %8699 = vmatmul.mubr.msk.f32.gmra.mxu1 %vm757_vm1, %v5085_v32 }
 0x768   : > { %v8653_v59 = vpop.f32.mrf.mxu0 }
 0x769   : > { %v5087_v24 = vmul.f32 %v9312_v14, %v8653_v59 }
 0x76a   : > { %v5039_v43 = vpop.f32.mrf.mxu0 }
 0x76b   : > { %v5086_v40 = vmul.f32 %v9310_v63, %v5039_v43 }
 0x76c   : > { %v8656_v58 = vpop.f32.mrf.mxu0 }
 0x76d   : > { %8701 = vmatprep.mubr.msk.f32.mxu1 %vm757_vm1, %v5086_v40  ;;  %v5089_v9 = vmul.f32 %v9316_v26, %v8656_v58 }
 0x76e   : > { %v5049_v3 = vpop.f32.mrf.mxu0  ;;  %8702 = vmatmul.mubr.msk.f32.gmra.mxu1 %vm757_vm1, %v5087_v24 }
 0x76f   : > { %v5088_v51 = vmul.f32 %v9314_v31, %v5049_v3 }
 0x770   : > { %v8725_v18 = vpop.f32.mrf.mxu0 }
 0x771   : > { %v12162_v11 = vmul.f32 0.35355338, %v8725_v18  ;;  %8704 = vmatprep.mubr.msk.f32.mxu1 %vm757_vm1, %v5088_v51 }
 0x772   : > { %8705 = vmatmul.mubr.msk.f32.gmra.mxu1 %vm757_vm1, %v5089_v9  ;;  %v5670_v41 = vpop.f32.mrf.mxu0 }
 0x773   : > { %v12166_v57 = vmul.f32 0.35355338, %v5670_v41  ;;  %v5864_v44 = vsel %vm1456_vm2, %v12162_v11, -inf }
 0x774   : > { %5865 = vmax.xlane.f32.xlu1 %v5864_v44  ;;  %v8728_v2 = vpop.f32.mrf.mxu0 }
 0x775   : > { %v12170_v10 = vmul.f32 0.35355338, %v8728_v2  ;;  %v5861_v38 = vsel %vm1456_vm2, %v12166_v57, -inf }
 0x776   : > { %5862 = vmax.xlane.f32.xlu0 %v5861_v38  ;;  %v5680_v6 = vpop.f32.mrf.mxu0 }
 0x777   : > { %v12174_v61 = vmul.f32 0.35355338, %v5680_v6  ;;  %v5870_v30 = vsel %vm1456_vm2, %v12170_v10, -inf }
 0x778   : > { %5871 = vmax.xlane.f32.xlu1 %v5870_v30  ;;  %v8731_v47 = vpop.f32.mrf.mxu0 }
 0x779   : > { %v12178_v37 = vmul.f32 0.35355338, %v8731_v47  ;;  %v5867_v12 = vsel %vm1456_vm2, %v12174_v61, -inf }
 0x77a   : > { %5868 = vmax.xlane.f32.xlu0 %v5867_v12  ;;  %v5690_v50 = vpop.f32.mrf.mxu0 }
 0x77b   : > { %v12182_v54 = vmul.f32 0.35355338, %v5690_v50  ;;  %v5876_v49 = vsel %vm1456_vm2, %v12178_v37, -inf }
 0x77c   : > { %5877 = vmax.xlane.f32.xlu1 %v5876_v49  ;;  %v8734_v33 = vpop.f32.mrf.mxu0 }
 0x77d   : > { %v12186_v15 = vmul.f32 0.35355338, %v8734_v33  ;;  %v5873_v36 = vsel %vm1456_vm2, %v12182_v54, -inf }
 0x77e   : > { %5874 = vmax.xlane.f32.xlu0 %v5873_v36  ;;  %v5700_v23 = vpop.f32.mrf.mxu0 }
 0x77f   : > { %v12190_v48 = vmul.f32 0.35355338, %v5700_v23  ;;  %v5882_v8 = vsel %vm1456_vm2, %v12186_v15, -inf }
 0x780   : > { %5883 = vmax.xlane.f32.xlu1 %v5882_v8  ;;  %v8737_v25 = vpop.f32.mrf.mxu0 }
 0x781   : > { %v12194_v27 = vmul.f32 0.35355338, %v8737_v25  ;;  %v5879_v32 = vsel %vm1456_vm2, %v12190_v48, -inf }
 0x782   : > { %5880 = vmax.xlane.f32.xlu0 %v5879_v32  ;;  %v5710_v59 = vpop.f32.mrf.mxu0 }
 0x783   : > { %v12198_v63 = vmul.f32 0.35355338, %v5710_v59  ;;  %v5888_v43 = vsel %vm1456_vm2, %v12194_v27, -inf }
 0x784   : > { %5889 = vmax.xlane.f32.xlu1 %v5888_v43  ;;  %v8740_v14 = vpop.f32.mrf.mxu0 }
 0x785   : > { %v12202_v24 = vmul.f32 0.35355338, %v8740_v14  ;;  %v5885_v31 = vsel %vm1456_vm2, %v12198_v63, -inf }
 0x786   : > { %v5720_v40 = vpop.f32.mrf.mxu0 }
 0x787   : > { %v12204_v58 = vmul.f32 0.35355338, %v5720_v40  ;;  %v5894_v41 = vsel %vm1456_vm2, %v12202_v24, -inf }
 0x788   : > { %5886 = vmax.xlane.f32.xlu1 %v5885_v31  ;;  %v8743_v3 = vpop.f32.mrf.mxu0 }
 0x789   : > { %v5891_v26 = vsel %vm1456_vm2, %v12204_v58, -inf  ;;  %v12210_v9 = vmul.f32 0.35355338, %v8743_v3 }
 0x78a   : > { %5892 = vmax.xlane.f32.xlu0 %v5891_v26  ;;  %v5730_v51 = vpop.f32.mrf.mxu0 }
 0x78b   : > { %v12212_v18 = vmul.f32 0.35355338, %v5730_v51  ;;  %v5900_v47 = vsel %vm1456_vm2, %v12210_v9, -inf }
 0x78c   : > { %5895 = vmax.xlane.f32.xlu1 %v5894_v41  ;;  %v8746_v44 = vpop.f32.mrf.mxu0 }
 0x78d   : > { %v5897_v2 = vsel %vm1456_vm2, %v12212_v18, -inf  ;;  %v12218_v6 = vmul.f32 0.35355338, %v8746_v44 }
 0x78e   : > { %5898 = vmax.xlane.f32.xlu0 %v5897_v2  ;;  %v5740_v38 = vpop.f32.mrf.mxu0 }
 0x78f   : > { %v12220_v30 = vmul.f32 0.35355338, %v5740_v38  ;;  %v5906_v36 = vsel %vm1456_vm2, %v12218_v6, -inf }
 0x790   : > { %5901 = vmax.xlane.f32.xlu1 %v5900_v47  ;;  %v8749_v12 = vpop.f32.mrf.mxu0 }
 0x791   : > { %v5903_v50 = vsel %vm1456_vm2, %v12220_v30, -inf  ;;  %v12226_v33 = vmul.f32 0.35355338, %v8749_v12 }
 0x792   : > { %5904 = vmax.xlane.f32.xlu0 %v5903_v50  ;;  %v5750_v49 = vpop.f32.mrf.mxu0  ;;  %v9471_v50 = vld [vmem:[%s9680_s25] sm:$0xff]  ;;  %s12686_s25 = scalar_lea.hbm %s12744_s8, %s7545_s18 }
 0x793   : > { %v12230_v25 = vmul.f32 0.35355338, %v5750_v49  ;;  %v5912_v32 = vsel %vm1456_vm2, %v12226_v33, -inf }
 0x794   : > { %5907 = vmax.xlane.f32.xlu1 %v5906_v36  ;;  %v8752_v23 = vpop.f32.mrf.mxu0 }
 0x795   : > { %v12234_v14 = vmul.f32 0.35355338, %v8752_v23  ;;  %v5909_v40 = vsel %vm1456_vm2, %v12230_v25, -inf }
 0x796   : > { %v5760_v8 = vpop.f32.mrf.mxu0 }
 0x797   : > { %v12238_v3 = vmul.f32 0.35355338, %v5760_v8  ;;  %v5918_v26 = vsel %vm1456_vm2, %v12234_v14, -inf }
 0x798   : > { %5913 = vmax.xlane.f32.xlu1 %v5912_v32  ;;  %v8755_v59 = vpop.f32.mrf.mxu0 }
 0x799   : > { %v12242_v41 = vmul.f32 0.35355338, %v8755_v59  ;;  %v5915_v44 = vsel %vm1456_vm2, %v12238_v3, -inf }
 0x79a   : > { %v5770_v43 = vpop.f32.mrf.mxu0 }
 0x79b   : > { %v5924_v47 = vsel %vm1456_vm2, %v12242_v41, -inf }
 0x79c   : > { %5910 = vmax.xlane.f32.xlu1 %v5909_v40  ;;  %v8758_v31 = vpop.f32.mrf.mxu0 }
 0x79d   : > { %v12246_v38 = vmul.f32 0.35355338, %v8758_v31 }
 0x79e   : > { %v5780_v51 = vpop.f32.mrf.mxu0 }
 0x79f   : > { %v12252_v49 = vmul.f32 0.35355338, %v5780_v51  ;;  %v5930_v36 = vsel %vm1456_vm2, %v12246_v38, -inf }
 0x7a0   : > { %5919 = vmax.xlane.f32.xlu1 %v5918_v26  ;;  %v8761_v2 = vpop.f32.mrf.mxu0 }
 0x7a1   : > { %v12256_v8 = vmul.f32 0.35355338, %v8761_v2  ;;  %v5927_v32 = vsel %vm1456_vm2, %v12252_v49, -inf }
 0x7a2   : > { %v5790_v12 = vpop.f32.mrf.mxu0 }
 0x7a3   : > { %v12260_v40 = vmul.f32 0.35355338, %v5790_v12  ;;  %v5936_v31 = vsel %vm1456_vm2, %v12256_v8, -inf }
 0x7a4   : > { %5916 = vmax.xlane.f32.xlu1 %v5915_v44  ;;  %v8764_v23 = vpop.f32.mrf.mxu0 }
 0x7a5   : > { %v12264_v51 = vmul.f32 0.35355338, %v8764_v23  ;;  %v5933_v44 = vsel %vm1456_vm2, %v12260_v40, -inf  ;;  %v12276_v23 = vmul.f32 0.35355338, %v5770_v43 }
 0x7a6   : > { %v5800_v59 = vpop.f32.mrf.mxu0 }
 0x7a7   : > { %v12268_v2 = vmul.f32 0.35355338, %v5800_v59 }
 0x7a8   : > { %6181 = vrot.lane.b32.xlu0 %v9471_v50, %s9542_s19  ;;  %5925 = vmax.xlane.f32.xlu1 %v5924_v47  ;;  %v8767_v26 = vpop.f32.mrf.mxu0  ;;  %v5942_v50 = vsel %vm1456_vm2, %v12264_v51, -inf  ;;  %s6958_s19 = sshll.u32 %s12558_s12, 4  ;;  %s12688_s19 = int_to_ptr.vmem [resolvable:$true] %s6958_s19 }
 0x7a9   : > { %s9474_s22 = scalar_lea.vmem %s12688_s19, 4096  ;;  %p9481_p0 = scmp.lt.s32.totalorder %s12688_s19, %s9479_s24 }
 0x7aa   : > { %v5810_v47 = vpop.f32.mrf.mxu0  ;;  %p9475_p11 = scmp.ne.s32.totalorder %s12688_s19, %s9474_s22  ;;  %p9482_p1 = scmp.lt.s32.totalorder %s9480_s10, %s9474_s22 }
 0x7ab   : > { %v12272_v12 = vmul.f32 0.35355338, %v5810_v47 }
 0x7ac   : > { %5931 = vmax.xlane.f32.xlu1 %v5930_v36  ;;  %v8770_v36 = vpop.f32.mrf.mxu0  ;;  %p9476_p12 = pnand %p9475_p11, %p9629_p5  ;;  %p9483_p2 = por %p9482_p1, %p9481_p0 }
 0x7ad   : > { %13001 = vst [vmem:[#allocation31_spill] sm:$0xff] %v12272_v12  ;;  %v5945_v59 = vsel %vm1456_vm2, %v12272_v12, -inf  ;;  %v12288_v34 = vmul.f32 0.35355338, %v8770_v36 }
 0x7ae   : > { %p9477_p13 = pneg %p9476_p12 }
 0x7b0   : > { %5928 = vmax.xlane.f32.xlu1 %v5927_v32  ;;  %v5939_v32 = vsel %vm1456_vm2, %v12268_v2, -inf  ;;  %p9484_p3 = pnand %p9483_p2, %p9477_p13 }
 0x7b4   : > { %5937 = vmax.xlane.f32.xlu1 %v5936_v31  ;;  %v5820_v31 = vpop.f32.mrf.mxu0 }
 0x7b5   : > { %v12278_v1 = vmul.f32 0.35355338, %v5820_v31 }
 0x7b7   : > { %13002 = vst [vmem:[#allocation5_spill] sm:$0xff] %v12278_v1  ;;  %v5951_v47 = vsel %vm1456_vm2, %v12278_v1, -inf }
 0x7b8   : > { %5934 = vmax.xlane.f32.xlu1 %v5933_v44  ;;  %v12282_v44 = vmul.f32 0.35355338, %v8767_v26 }
 0x7ba   : > { %v5948_v43 = vsel %vm1456_vm2, %v12282_v44, -inf }
 0x7bc   : > { %5943 = vmax.xlane.f32.xlu1 %v5942_v50  ;;  %v5921_v50 = vsel %vm1456_vm2, %v12276_v23, -inf }
 0x7c0   : > { %5940 = vmax.xlane.f32.xlu1 %v5939_v32  ;;  %v5954_v32 = vsel %vm1456_vm2, %v12288_v34, -inf }
 0x7c4   : > { %5946 = vmax.xlane.f32.xlu1 %v5945_v59 }
 0x7c7   : > { %5922 = vmax.xlane.f32.xlu0 %v5921_v50 }
 0x7c8   : > { %5952 = vmax.xlane.f32.xlu1 %v5951_v47 }
 0x7cb   : > { %5949 = vmax.xlane.f32.xlu0 %v5948_v43 }
 0x7cf   : > { %5955 = vmax.xlane.f32.xlu0 %v5954_v32 }
 0x7e9   : > { %v8661_v26 = vpop.f32.mrf.mxu1 }
 0x7ea   : > { %v12295_v31 = vadd.f32 %v8661_v26, %v11675_v21 }
 0x7eb   : > { %v12297_v59 = vpop.f32.mrf.mxu1 }
 0x7ec   : > { %13003 = vst [vmem:[#allocation7_spill] sm:$0xff] %v12295_v31 }
 0x7ed   : > { %v8664_v50 = vpop.f32.mrf.mxu1 }
 0x7ee   : > { %v12300_v39 = vadd.f32 %v8664_v50, %v11685_v29 }
 0x7ef   : > { %v12302_v36 = vpop.f32.mrf.mxu1 }
 0x7f0   : > { %13004 = vst [vmem:[#allocation11_spill] sm:$0xff] %v12300_v39  ;;  %13005 = vst [vmem:[#allocation15_spill] sm:$0xff] %v12302_v36 }
 0x7f1   : > { %v8667_v47 = vpop.f32.mrf.mxu1 }
 0x7f2   : > { %v12305_v1 = vadd.f32 %v8667_v47, %v11696_v20 }
 0x7f3   : > { %v12307_v43 = vpop.f32.mrf.mxu1 }
 0x7f4   : > { %13006 = vst [vmem:[#allocation9_spill] sm:$0xff] %v12305_v1 }
 0x7f5   : > { %v8670_v12 = vpop.f32.mrf.mxu1 }
 0x7f6   : > { %v12310_v32 = vadd.f32 %v8670_v12, %v11707_v16 }
 0x7f7   : > { %v12312_v21 = vpop.f32.mrf.mxu1 }
 0x7f8   : > { %13007 = vst [vmem:[#allocation13_spill] sm:$0xff] %v12310_v32  ;;  %13008 = vst [vmem:[#allocation17_spill] sm:$0xff] %v12312_v21 }
 0x7f9   : > { %v8673_v26 = vpop.f32.mrf.mxu1 }
 0x7fa   : > { %v12315_v31 = vadd.f32 %v8673_v26, %v11718_v0 }
 0x7fb   : > { %v12317_v29 = vpop.f32.mrf.mxu1 }
 0x7fc   : > { %13009 = vst [vmem:[#allocation23_spill] sm:$0xff] %v12315_v31  ;;  %13010 = vst [vmem:[#allocation39_spill] sm:$0xff] %v12317_v29 }
 0x7fd   : > { %v8676_v50 = vpop.f32.mrf.mxu1  ;;  %v5866_v39 = vpop.xlane.xlu1 %5865 }
 0x7fe   : > { %v12320_v36 = vadd.f32 %v8676_v50, %v11729_v17  ;;  %v5958_v20 = vsub.f32 %v12162_v11, %v5866_v39 }
 0x7ff   : > { %v12323_v47 = vpop.f32.mrf.mxu1  ;;  %v5863_v1 = vpop.xlane.xlu0 %5862 }
 0x800   : > { %v5991_v16 = vmul.f32 1.442695, %v5958_v20  ;;  %v5957_v12 = vsub.f32 %v12166_v57, %v5863_v1  ;;  %v12336_v1 = vld [vmem:[%s12743_s7] ss:$0 sm:$0xff]  ;;  %v13013_v57 = vld [vmem:[#allocation36_spill] sm:$0xff] }
 0x801   : > { %v8679_v32 = vpop.f32.mrf.mxu1  ;;  %v5872_v21 = vpop.xlane.xlu1 %5871  ;;  %v1001_v50 = vadd.f32 %v12336_v1, %v13013_v57 }
 0x802   : > { %9317 = vpow2.f32 %v5991_v16  ;;  %v5989_v0 = vmul.f32 1.442695, %v5957_v12  ;;  %v12327_v26 = vadd.f32 %v8679_v32, %v11743_v60  ;;  %v5960_v31 = vsub.f32 %v12170_v10, %v5872_v21 }
 0x803   : > { %v12330_v29 = vpop.f32.mrf.mxu1  ;;  %v5869_v17 = vpop.xlane.xlu0 %5868 }
 0x804   : > { %13011 = vst [vmem:[#allocation38_spill] sm:$0xff] %v12327_v26  ;;  %13012 = vst [vmem:[#allocation25_spill] sm:$0xff] %v12330_v29  ;;  %9319 = vpow2.f32 %v5989_v0  ;;  %v5995_v39 = vmul.f32 1.442695, %v5960_v31  ;;  %v5959_v11 = vsub.f32 %v12174_v61, %v5869_v17  ;;  %v13014_v31 = vld [vmem:[#allocation70_spill] sm:$0xff]  ;;  %v13015_v26 = vld [vmem:[#allocation40_spill] sm:$0xff] }
 0x805   : > { %v8682_v20 = vpop.f32.mrf.mxu1  ;;  %v5878_v60 = vpop.xlane.xlu1 %5877  ;;  %v2492_v16 = vadd.f32 %v13014_v31, %v1001_v50  ;;  %v1011_v57 = vadd.f32 %v12336_v1, %v13015_v26 }
 0x806   : > { %9321 = vpow2.f32 %v5995_v39  ;;  %v5993_v32 = vmul.f32 1.442695, %v5959_v11  ;;  %v12341_v10 = vadd.f32 %v8682_v20, %v11766_v13  ;;  %v5962_v21 = vsub.f32 %v12178_v37, %v5878_v60  ;;  %v13016_v20 = vld [vmem:[#allocation71_spill] sm:$0xff] }
 0x807   : > { %v12345_v61 = vpop.f32.mrf.mxu1  ;;  %v5875_v12 = vpop.xlane.xlu0 %5874  ;;  %v3960_v39 = vadd.f32 %v11796_v45, %v2492_v16  ;;  %v2494_v60 = vadd.f32 %v13016_v20, %v1011_v57 }
 0x808   : > { %9323 = vpow2.f32 %v5993_v32  ;;  %v5999_v0 = vmul.f32 1.442695, %v5962_v21  ;;  %v5961_v17 = vsub.f32 %v12182_v54, %v5875_v12 }
 0x809   : > { %v8685_v11 = vpop.f32.mrf.mxu1  ;;  %v5884_v29 = vpop.xlane.xlu1 %5883  ;;  %v3962_v45 = vadd.f32 %v11818_v62, %v2494_v60 }
 0x80a   : > { %9325 = vpow2.f32 %v5999_v0  ;;  %v5997_v13 = vmul.f32 1.442695, %v5961_v17  ;;  %v12352_v37 = vadd.f32 %v8685_v11, %v11789_v42  ;;  %v5964_v50 = vsub.f32 %v12186_v15, %v5884_v29 }
 0x80b   : > { %v5333_v32 = vpop.f32.mrf.mxu1  ;;  %v5881_v21 = vpop.xlane.xlu0 %5880 }
 0x80c   : > { %9327 = vpow2.f32 %v5997_v13  ;;  %v6003_v54 = vmul.f32 1.442695, %v5964_v50  ;;  %v12356_v31 = vadd.f32 %v5333_v32, %v3960_v39  ;;  %v5963_v26 = vsub.f32 %v12190_v48, %v5881_v21 }
 0x80d   : > { %v8688_v16 = vpop.f32.mrf.mxu1  ;;  %v5890_v12 = vpop.xlane.xlu1 %5889 }
 0x80e   : > { %9329 = vpow2.f32 %v6003_v54  ;;  %v6001_v0 = vmul.f32 1.442695, %v5963_v26  ;;  %v12361_v42 = vadd.f32 %v8688_v16, %v11812_v52  ;;  %v5966_v15 = vsub.f32 %v12194_v27, %v5890_v12 }
 0x80f   : > { %v12364_v29 = vpop.eup %9317  ;;  %v5343_v17 = vpop.f32.mrf.mxu1 }
 0x810   : > { %9331 = vpow2.f32 %v6001_v0  ;;  %v6007_v57 = vmul.f32 1.442695, %v5966_v15  ;;  %v12366_v39 = vadd.f32 %v5343_v17, %v3962_v45  ;;  %v6056_v48 = vsel %vm1456_vm2, %v12364_v29, 0.0 }
 0x811   : > { %v9320_v62 = vpop.eup %9319  ;;  %v8691_v11 = vpop.f32.mrf.mxu1  ;;  %6057 = vadd.xlane.f32.xlu0 %v6056_v48 }
 0x812   : > { %v5887_v13 = vpop.xlane.xlu1 %5886  ;;  %9333 = vpow2.f32 %v6007_v57  ;;  %v12371_v52 = vadd.f32 %v8691_v11, %v11840_v22  ;;  %8787 = vmatprep.mubr.msk.f32.mxu1 %vm1456_vm2, %v9320_v62  ;;  %v6053_v50 = vsel %vm1456_vm2, %v9320_v62, 0.0 }
 0x813   : > { %v5965_v27 = vsub.f32 %v12198_v63, %v5887_v13  ;;  %v12376_v20 = vpop.eup %9321  ;;  %v5353_v60 = vpop.f32.mrf.mxu1  ;;  %6054 = vadd.xlane.f32.xlu1 %v6053_v50 }
 0x814   : > { %v5893_v32 = vpop.xlane.xlu0 %5892  ;;  %v12379_v54 = vadd.f32 %v5353_v60, %v11852_v56  ;;  %v6062_v22 = vsel %vm1456_vm2, %v12376_v20, 0.0 }
 0x815   : > { %v6005_v21 = vmul.f32 1.442695, %v5965_v27  ;;  %v5967_v26 = vsub.f32 %v12204_v58, %v5893_v32  ;;  %v9324_v45 = vpop.eup %9323  ;;  %v8694_v63 = vpop.f32.mrf.mxu1  ;;  %6063 = vadd.xlane.f32.xlu0 %v6062_v22 }
 0x816   : > { %v5896_v16 = vpop.xlane.xlu1 %5895  ;;  %v12385_v0 = vadd.f32 %v8694_v63, %v11868_v35  ;;  %v6059_v57 = vsel %vm1456_vm2, %v9324_v45, 0.0 }
 0x817   : > { %9335 = vpow2.f32 %v6005_v21  ;;  %v6009_v12 = vmul.f32 1.442695, %v5967_v26  ;;  %v5968_v15 = vsub.f32 %v12202_v24, %v5896_v16  ;;  %v12388_v17 = vpop.eup %9325  ;;  %v5363_v56 = vpop.f32.mrf.mxu1  ;;  %6060 = vadd.xlane.f32.xlu1 %v6059_v57 }
 0x818   : > { %v5899_v58 = vpop.xlane.xlu0 %5898  ;;  %v12392_v62 = vadd.f32 %v5363_v56, %v11878_v4  ;;  %v6068_v35 = vsel %vm1456_vm2, %v12388_v17, 0.0 }
 0x819   : > { %9337 = vpow2.f32 %v6009_v12  ;;  %v6011_v48 = vmul.f32 1.442695, %v5968_v15  ;;  %v5969_v11 = vsub.f32 %v12212_v18, %v5899_v58  ;;  %v9328_v13 = vpop.eup %9327  ;;  %6069 = vadd.xlane.f32.xlu0 %v6068_v35 }
 0x81a   : > { %v5902_v27 = vpop.xlane.xlu1 %5901  ;;  %v8697_v60 = vpop.f32.mrf.mxu1  ;;  %v6065_v32 = vsel %vm1456_vm2, %v9328_v13, 0.0 }
 0x81b   : > { %9339 = vpow2.f32 %v6011_v48  ;;  %v6013_v24 = vmul.f32 1.442695, %v5969_v11  ;;  %v5970_v50 = vsub.f32 %v12210_v9, %v5902_v27  ;;  %v12399_v21 = vpop.eup %9329  ;;  %v12402_v4 = vadd.f32 %v8697_v60, %v11892_v55  ;;  %6066 = vadd.xlane.f32.xlu1 %v6065_v32 }
 0x81c   : > { %v5905_v26 = vpop.xlane.xlu0 %5904  ;;  %v5373_v63 = vpop.f32.mrf.mxu1  ;;  %v6074_v16 = vsel %vm1456_vm2, %v12399_v21, 0.0 }
 0x81d   : > { %9341 = vpow2.f32 %v6013_v24  ;;  %v6015_v18 = vmul.f32 1.442695, %v5970_v50  ;;  %v5971_v22 = vsub.f32 %v12220_v30, %v5905_v26  ;;  %v9332_v9 = vpop.eup %9331  ;;  %v12408_v12 = vadd.f32 %v5373_v63, %v11901_v19  ;;  %6075 = vadd.xlane.f32.xlu0 %v6074_v16 }
 0x81e   : > { %v5908_v15 = vpop.xlane.xlu1 %5907  ;;  %v6071_v57 = vsel %vm1456_vm2, %v9332_v9, 0.0 }
 0x81f   : > { %9343 = vpow2.f32 %v6015_v18  ;;  %v6017_v56 = vmul.f32 1.442695, %v5971_v22  ;;  %v5972_v55 = vsub.f32 %v12218_v6, %v5908_v15  ;;  %v12412_v58 = vpop.eup %9333  ;;  %6072 = vadd.xlane.f32.xlu1 %v6071_v57 }
 0x820   : > { %v6182_v48 = vpop.permute.xlu0 %6181  ;;  %v6080_v11 = vsel %vm1456_vm2, %v12412_v58, 0.0 }
 0x821   : > { %9345 = vpow2.f32 %v6017_v56  ;;  %v6019_v30 = vmul.f32 1.442695, %v5972_v55  ;;  %8785 = vmatprep.subr.mxu1 %v6182_v48  ;;  %6081 = vadd.xlane.f32.xlu0 %v6080_v11 }
 0x822   : > { %v5914_v19 = vpop.xlane.xlu1 %5913  ;;  %8786 = vmatpush3.msra.mxu1 %v6182_v48  ;;  %v8700_v6 = vpop.f32.mrf.mxu1 }
 0x823   : > { %9347 = vpow2.f32 %v6019_v30  ;;  %v5974_v27 = vsub.f32 %v12226_v33, %v5914_v19  ;;  %8788 = vmatmul.mubr.msk.f32.vlgmr.msra.gmra.mxu1 %vm1456_vm2, %v12364_v29  ;;  %v12420_v24 = vadd.f32 %v8700_v6, %v11912_v46 }
 0x824   : > { %v9336_v35 = vpop.eup %9335  ;;  %8790 = vmatprep.mubr.msk.f32.mxu1 %vm1456_vm2, %v9324_v45  ;;  %v5383_v60 = vpop.f32.mrf.mxu1 }
 0x825   : > { %v6023_v50 = vmul.f32 1.442695, %v5974_v27  ;;  %v6077_v32 = vsel %vm1456_vm2, %v9336_v35, 0.0  ;;  %v12425_v18 = vadd.f32 %v5383_v60, %v11918_v5 }
 0x826   : > { %v9338_v26 = vpop.eup %9337  ;;  %v5911_v33 = vpop.xlane.xlu1 %5910  ;;  %6078 = vadd.xlane.f32.xlu1 %v6077_v32 }
 0x827   : > { %9349 = vpow2.f32 %v6023_v50  ;;  %v5973_v22 = vsub.f32 %v12230_v25, %v5911_v33  ;;  %8791 = vmatmul.mubr.msk.f32.gmra.mxu1 %vm1456_vm2, %v12376_v20  ;;  %v6083_v63 = vsel %vm1456_vm2, %v9338_v26, 0.0 }
 0x828   : > { %v9340_v46 = vpop.eup %9339  ;;  %8793 = vmatprep.mubr.msk.f32.mxu1 %vm1456_vm2, %v9328_v13 }
 0x829   : > { %v6021_v29 = vmul.f32 1.442695, %v5973_v22  ;;  %v6086_v45 = vsel %vm1456_vm2, %v9340_v46, 0.0 }
 0x82a   : > { %v9342_v16 = vpop.eup %9341  ;;  %v5920_v15 = vpop.xlane.xlu1 %5919  ;;  %6087 = vadd.xlane.f32.xlu0 %v6086_v45  ;;  %6084 = vadd.xlane.f32.xlu1 %v6083_v63  ;;  %v6558_v63 = vld [vmem:[%s12741_s5 + $0x18] sm:$0xff] }
 0x82b   : > { %9351 = vpow2.f32 %v6021_v29  ;;  %v5976_v5 = vsub.f32 %v12234_v14, %v5920_v15  ;;  %8794 = vmatmul.mubr.msk.f32.gmra.mxu1 %vm1456_vm2, %v12388_v17  ;;  %v6089_v56 = vsel %vm1456_vm2, %v9342_v16, 0.0  ;;  %8835 = vmatprep.subr.mxu0 %v6558_v63 }
 0x82c   : > { %v9344_v25 = vpop.eup %9343  ;;  %8796 = vmatprep.mubr.msk.f32.mxu1 %vm1456_vm2, %v9332_v9  ;;  %8836 = vmatpush3.msra.mxu0 %v6558_v63 }
 0x82d   : > { %v6027_v20 = vmul.f32 1.442695, %v5976_v5  ;;  %v6092_v13 = vsel %vm1456_vm2, %v9344_v25, 0.0 }
 0x82e   : > { %v9346_v55 = vpop.eup %9345  ;;  %v5917_v57 = vpop.xlane.xlu1 %5916  ;;  %6093 = vadd.xlane.f32.xlu0 %v6092_v13  ;;  %6090 = vadd.xlane.f32.xlu1 %v6089_v56 }
 0x82f   : > { %9353 = vpow2.f32 %v6027_v20  ;;  %v5975_v48 = vsub.f32 %v12238_v3, %v5917_v57  ;;  %v8703_v30 = vpop.f32.mrf.mxu1  ;;  %8797 = vmatmul.mubr.msk.f32.gmra.mxu1 %vm1456_vm2, %v12399_v21  ;;  %v6095_v27 = vsel %vm1456_vm2, %v9346_v55, 0.0 }
 0x830   : > { %v9348_v14 = vpop.eup %9347  ;;  %v12443_v17 = vadd.f32 %v8703_v30, %v11925_v7  ;;  %8799 = vmatprep.mubr.msk.f32.mxu1 %vm1456_vm2, %v9336_v35 }
 0x831   : > { %v6025_v9 = vmul.f32 1.442695, %v5975_v48  ;;  %v5393_v11 = vpop.f32.mrf.mxu1  ;;  %v6098_v19 = vsel %vm1456_vm2, %v9348_v14, 0.0 }
 0x832   : > { %v12449_v6 = vadd.f32 %v5393_v11, %v11927_v53  ;;  %v5926_v3 = vpop.xlane.xlu1 %5925  ;;  %6099 = vadd.xlane.f32.xlu0 %v6098_v19  ;;  %6096 = vadd.xlane.f32.xlu1 %v6095_v27 }
 0x833   : > { %9355 = vpow2.f32 %v6025_v9  ;;  %v5978_v21 = vsub.f32 %v12242_v41, %v5926_v3  ;;  %v8706_v50 = vpop.f32.mrf.mxu1  ;;  %8800 = vmatmul.mubr.msk.f32.gmra.mxu1 %vm1456_vm2, %v12412_v58 }
 0x834   : > { %v9350_v7 = vpop.eup %9349  ;;  %v12455_v35 = vadd.f32 %v8706_v50, %v11933_v28  ;;  %8802 = vmatprep.mubr.msk.f32.mxu1 %vm1456_vm2, %v9338_v26 }
 0x835   : > { %v6031_v60 = vmul.f32 1.442695, %v5978_v21  ;;  %v6104_v53 = vsel %vm1456_vm2, %v9350_v7, 0.0 }
 0x836   : > { %v5932_v32 = vpop.xlane.xlu1 %5931  ;;  %6105 = vadd.xlane.f32.xlu0 %v6104_v53 }
 0x837   : > { %9357 = vpow2.f32 %v6031_v60  ;;  %v5980_v33 = vsub.f32 %v12246_v38, %v5932_v32  ;;  %8803 = vmatmul.mubr.msk.f32.gmra.mxu1 %vm1456_vm2, %v9340_v46 }
 0x838   : > { %v9352_v41 = vpop.eup %9351  ;;  %8805 = vmatprep.mubr.msk.f32.mxu1 %vm1456_vm2, %v9342_v16 }
 0x839   : > { %v6035_v58 = vmul.f32 1.442695, %v5980_v33  ;;  %v6101_v22 = vsel %vm1456_vm2, %v9352_v41, 0.0 }
 0x83a   : > { %v5929_v28 = vpop.xlane.xlu1 %5928  ;;  %6102 = vadd.xlane.f32.xlu1 %v6101_v22 }
 0x83b   : > { %9359 = vpow2.f32 %v6035_v58  ;;  %8806 = vmatmul.mubr.msk.f32.gmra.mxu1 %vm1456_vm2, %v9344_v25  ;;  %v5979_v30 = vsub.f32 %v12252_v49, %v5929_v28  ;;  %v13017_v58 = vld [vmem:[#allocation31_spill] sm:$0xff] }
 0x83c   : > { %v9354_v26 = vpop.eup %9353  ;;  %8808 = vmatprep.mubr.msk.f32.mxu1 %vm1456_vm2, %v9346_v55 }
 0x83d   : > { %v6110_v29 = vsel %vm1456_vm2, %v9354_v26, 0.0  ;;  %v6033_v27 = vmul.f32 1.442695, %v5979_v30 }
 0x83e   : > { %v5938_v45 = vpop.xlane.xlu1 %5937  ;;  %6111 = vadd.xlane.f32.xlu0 %v6110_v29  ;;  %v13018_v29 = vld [vmem:[#allocation5_spill] sm:$0xff] }
 0x83f   : > { %v5982_v38 = vsub.f32 %v12256_v8, %v5938_v45  ;;  %8809 = vmatmul.mubr.msk.f32.gmra.mxu1 %vm1456_vm2, %v9348_v14 }
 0x840   : > { %v9356_v46 = vpop.eup %9355  ;;  %8811 = vmatprep.mubr.msk.f32.mxu1 %vm1456_vm2, %v9352_v41 }
 0x841   : > { %v6039_v16 = vmul.f32 1.442695, %v5982_v38  ;;  %v6107_v15 = vsel %vm1456_vm2, %v9356_v46, 0.0 }
 0x842   : > { %v5935_v5 = vpop.xlane.xlu1 %5934  ;;  %6108 = vadd.xlane.f32.xlu1 %v6107_v15 }
 0x843   : > { %9361 = vpow2.f32 %v6039_v16  ;;  %8812 = vmatmul.mubr.msk.f32.gmra.mxu1 %vm1456_vm2, %v9350_v7 }
 0x844   : > { %v9358_v8 = vpop.eup %9357  ;;  %8814 = vmatprep.mubr.msk.f32.mxu1 %vm1456_vm2, %v9356_v46 }
 0x845   : > { %v6116_v25 = vsel %vm1456_vm2, %v9358_v8, 0.0 }
 0x846   : > { %v5944_v20 = vpop.xlane.xlu1 %5943  ;;  %6117 = vadd.xlane.f32.xlu0 %v6116_v25 }
 0x847   : > { %v5984_v13 = vsub.f32 %v12264_v51, %v5944_v20  ;;  %8815 = vmatmul.mubr.msk.f32.gmra.mxu1 %vm1456_vm2, %v9354_v26  ;;  %v5981_v51 = vsub.f32 %v12260_v40, %v5935_v5 }
 0x848   : > { %v9360_v56 = vpop.eup %9359 }
 0x849   : > { %v6043_v55 = vmul.f32 1.442695, %v5984_v13  ;;  %v6122_v57 = vsel %vm1456_vm2, %v9360_v56, 0.0  ;;  %v6037_v53 = vmul.f32 1.442695, %v5981_v51 }
 0x84a   : > { %6123 = vadd.xlane.f32.xlu0 %v6122_v57  ;;  %v5941_v14 = vpop.xlane.xlu1 %5940 }
 0x84b   : > { %9363 = vpow2.f32 %v6043_v55  ;;  %v5983_v49 = vsub.f32 %v12268_v2, %v5941_v14 }
 0x84d   : > { %v6041_v40 = vmul.f32 1.442695, %v5983_v49 }
 0x84e   : > { %v5947_v7 = vpop.xlane.xlu1 %5946 }
 0x84f   : > { %v5985_v22 = vsub.f32 %v13017_v58, %v5947_v7 }
 0x850   : > { %v9362_v48 = vpop.eup %9361  ;;  %v5923_v9 = vpop.xlane.xlu0 %5922 }
 0x851   : > { %v6128_v11 = vsel %vm1456_vm2, %v9362_v48, 0.0  ;;  %v5977_v19 = vsub.f32 %v12276_v23, %v5923_v9  ;;  %v6045_v26 = vmul.f32 1.442695, %v5985_v22 }
 0x852   : > { %6129 = vadd.xlane.f32.xlu0 %v6128_v11 }
 0x853   : > { %v6029_v3 = vmul.f32 1.442695, %v5977_v19 }
 0x854   : > { %v5950_v21 = vpop.xlane.xlu0 %5949 }
 0x855   : > { %9365 = vpow2.f32 %v6029_v3  ;;  %v5986_v50 = vsub.f32 %v12282_v44, %v5950_v21  ;;  %v5953_v44 = vpop.xlane.xlu1 %5952 }
 0x856   : > { %9367 = vpow2.f32 %v6033_v27  ;;  %v5987_v45 = vsub.f32 %v13018_v29, %v5953_v44 }
 0x857   : > { %v6047_v32 = vmul.f32 1.442695, %v5986_v50 }
 0x858   : > { %v9364_v60 = vpop.eup %9363  ;;  %v5956_v33 = vpop.xlane.xlu0 %5955  ;;  %v6049_v38 = vmul.f32 1.442695, %v5987_v45 }
 0x859   : > { %v6134_v41 = vsel %vm1456_vm2, %v9364_v60, 0.0  ;;  %9369 = vpow2.f32 %v6047_v32  ;;  %v5988_v23 = vsub.f32 %v12288_v34, %v5956_v33 }
 0x85a   : > { %6135 = vadd.xlane.f32.xlu0 %v6134_v41  ;;  %9371 = vpow2.f32 %v6037_v53 }
 0x85b   : > { %v6051_v28 = vmul.f32 1.442695, %v5988_v23 }
 0x85d   : > { %9373 = vpow2.f32 %v6051_v28 }
 0x85e   : > { %9375 = vpow2.f32 %v6041_v40 }
 0x85f   : > { %9377 = vpow2.f32 %v6045_v26 }
 0x860   : > { %9379 = vpow2.f32 %v6049_v38 }
 0x862   : > { %v9366_v2 = vpop.eup %9365 }
 0x863   : > { %8817 = vmatprep.mubr.msk.f32.mxu1 %vm1456_vm2, %v9366_v2  ;;  %v6113_v46 = vsel %vm1456_vm2, %v9366_v2, 0.0  ;;  %v9368_v34 = vpop.eup %9367 }
 0x864   : > { %8818 = vmatmul.mubr.msk.f32.gmra.mxu1 %vm1456_vm2, %v9358_v8  ;;  %6114 = vadd.xlane.f32.xlu1 %v6113_v46  ;;  %v6119_v16 = vsel %vm1456_vm2, %v9368_v34, 0.0 }
 0x865   : > { %8820 = vmatprep.mubr.msk.f32.mxu1 %vm1456_vm2, %v9368_v34 }
 0x866   : > { %v9370_v63 = vpop.eup %9369 }
 0x867   : > { %v6140_v15 = vsel %vm1456_vm2, %v9370_v63, 0.0  ;;  %v9372_v5 = vpop.eup %9371 }
 0x868   : > { %8821 = vmatmul.mubr.msk.f32.gmra.mxu1 %vm1456_vm2, %v9360_v56  ;;  %6120 = vadd.xlane.f32.xlu1 %v6119_v16  ;;  %v6125_v20 = vsel %vm1456_vm2, %v9372_v5, 0.0 }
 0x869   : > { %6141 = vadd.xlane.f32.xlu0 %v6140_v15  ;;  %8823 = vmatprep.mubr.msk.f32.mxu1 %vm1456_vm2, %v9372_v5 }
 0x86a   : > { %v9374_v25 = vpop.eup %9373 }
 0x86b   : > { %v6146_v8 = vsel %vm1456_vm2, %v9374_v25, 0.0  ;;  %v9376_v13 = vpop.eup %9375 }
 0x86c   : > { %8824 = vmatmul.mubr.msk.f32.gmra.mxu1 %vm1456_vm2, %v9362_v48  ;;  %6126 = vadd.xlane.f32.xlu1 %v6125_v20  ;;  %v6131_v55 = vsel %vm1456_vm2, %v9376_v13, 0.0  ;;  %v9378_v57 = vpop.eup %9377 }
 0x86d   : > { %6147 = vadd.xlane.f32.xlu0 %v6146_v8  ;;  %8826 = vmatprep.mubr.msk.f32.mxu1 %vm1456_vm2, %v9376_v13  ;;  %v6137_v56 = vsel %vm1456_vm2, %v9378_v57, 0.0  ;;  %v9380_v30 = vpop.eup %9379 }
 0x86e   : > { %v6143_v48 = vsel %vm1456_vm2, %v9380_v30, 0.0 }
 0x870   : > { %8827 = vmatmul.mubr.msk.f32.gmra.mxu1 %vm1456_vm2, %v9364_v60  ;;  %6132 = vadd.xlane.f32.xlu1 %v6131_v55  ;;  %v12509_v60 = vpop.f32.mrf.mxu1 }
 0x871   : > { %8829 = vmatprep.mubr.msk.f32.mxu1 %vm1456_vm2, %v9378_v57 }
 0x874   : > { %6138 = vadd.xlane.f32.xlu1 %v6137_v56  ;;  %8830 = vmatmul.mubr.msk.f32.gmra.mxu1 %vm1456_vm2, %v9370_v63 }
 0x875   : > { %8832 = vmatprep.mubr.msk.f32.mxu1 %vm1456_vm2, %v9380_v30 }
 0x878   : > { %6144 = vadd.xlane.f32.xlu1 %v6143_v48  ;;  %8833 = vmatmul.mubr.msk.f32.gmra.mxu1 %vm1456_vm2, %v9374_v25 }
 0x89a   : > { %v6058_v14 = vpop.xlane.xlu0 %6057 }
 0x89c   : > { %v6055_v9 = vpop.xlane.xlu1 %6054 }
 0x89d   : > { %9381 = vrcp.f32 %v6055_v9 }
 0x89e   : > { %v6064_v11 = vpop.xlane.xlu0 %6063  ;;  %9383 = vrcp.f32 %v6058_v14 }
 0x8a0   : > { %v6061_v19 = vpop.xlane.xlu1 %6060 }
 0x8a1   : > { %9385 = vrcp.f32 %v6061_v19 }
 0x8a2   : > { %v6070_v27 = vpop.xlane.xlu0 %6069  ;;  %9387 = vrcp.f32 %v6064_v11 }
 0x8a4   : > { %v6067_v51 = vpop.xlane.xlu1 %6066 }
 0x8a5   : > { %9389 = vrcp.f32 %v6067_v51 }
 0x8a6   : > { %v6076_v3 = vpop.xlane.xlu0 %6075  ;;  %9391 = vrcp.f32 %v6070_v27 }
 0x8a8   : > { %v6073_v21 = vpop.xlane.xlu1 %6072 }
 0x8a9   : > { %9393 = vrcp.f32 %v6073_v21 }
 0x8aa   : > { %v6082_v7 = vpop.xlane.xlu0 %6081  ;;  %v9382_v32 = vpop.eup %9381  ;;  %9395 = vrcp.f32 %v6076_v3 }
 0x8ab   : > { %v9384_v23 = vpop.eup %9383 }
 0x8ae   : > { %v9386_v28 = vpop.eup %9385 }
 0x8af   : > { %v6079_v50 = vpop.xlane.xlu1 %6078  ;;  %v9388_v26 = vpop.eup %9387 }
 0x8b0   : > { %9397 = vrcp.f32 %v6079_v50 }
 0x8b1   : > { %9399 = vrcp.f32 %v6082_v7 }
 0x8b2   : > { %v9390_v34 = vpop.eup %9389 }
 0x8b3   : > { %v6088_v49 = vpop.xlane.xlu0 %6087  ;;  %v6085_v33 = vpop.xlane.xlu1 %6084 }
 0x8b4   : > { %9401 = vrcp.f32 %v6085_v33  ;;  %v9392_v16 = vpop.eup %9391 }
 0x8b5   : > { %9403 = vrcp.f32 %v6088_v49 }
 0x8b6   : > { %v9394_v8 = vpop.eup %9393 }
 0x8b7   : > { %v6094_v29 = vpop.xlane.xlu0 %6093  ;;  %v6091_v2 = vpop.xlane.xlu1 %6090 }
 0x8b8   : > { %9405 = vrcp.f32 %v6091_v2  ;;  %v9396_v57 = vpop.eup %9395 }
 0x8b9   : > { %9407 = vrcp.f32 %v6094_v29 }
 0x8bb   : > { %v6100_v20 = vpop.xlane.xlu0 %6099  ;;  %v6097_v13 = vpop.xlane.xlu1 %6096 }
 0x8bc   : > { %9409 = vrcp.f32 %v6097_v13 }
 0x8bd   : > { %v9398_v14 = vpop.eup %9397  ;;  %9411 = vrcp.f32 %v6100_v20 }
 0x8be   : > { %v9400_v19 = vpop.eup %9399 }
 0x8bf   : > { %v6106_v27 = vpop.xlane.xlu0 %6105 }
 0x8c1   : > { %v9402_v50 = vpop.eup %9401 }
 0x8c2   : > { %v9404_v49 = vpop.eup %9403 }
 0x8c3   : > { %v6103_v9 = vpop.xlane.xlu1 %6102 }
 0x8c4   : > { %9413 = vrcp.f32 %v6103_v9 }
 0x8c5   : > { %9415 = vrcp.f32 %v6106_v27 }
 0x8cb   : > { %v6109_v7 = vpop.xlane.xlu1 %6108 }
 0x8cc   : > { %9417 = vrcp.f32 %v6109_v7 }
 0x8e3   : > { %v8789_v53 = vpop.f32.mrf.mxu1 }
 0x8e4   : > { %v6527_v58 = vmul.f32 %v9384_v23, %v8789_v53 }
 0x8e5   : > { %v6367_v41 = vpop.f32.mrf.mxu1 }
 0x8e6   : > { %v6526_v40 = vmul.f32 %v9382_v32, %v6367_v41  ;;  %v6112_v32 = vpop.xlane.xlu0 %6111 }
 0x8e7   : > { %v8792_v22 = vpop.f32.mrf.mxu1  ;;  %9419 = vrcp.f32 %v6112_v32 }
 0x8e8   : > { %8837 = vmatprep.mubr.msk.f32.mxu0 %vm757_vm1, %v6526_v40  ;;  %v6529_v38 = vmul.f32 %v9388_v26, %v8792_v22  ;;  %v9406_v40 = vpop.eup %9405 }
 0x8e9   : > { %v6377_v44 = vpop.f32.mrf.mxu1  ;;  %8838 = vmatmul.mubr.msk.f32.vlgmr.msra.gmra.mxu0 %vm757_vm1, %v6527_v58  ;;  %v9408_v22 = vpop.eup %9407 }
 0x8ea   : > { %v6528_v45 = vmul.f32 %v9386_v28, %v6377_v44  ;;  %v9410_v29 = vpop.eup %9409 }
 0x8eb   : > { %v8795_v46 = vpop.f32.mrf.mxu1  ;;  %v9412_v2 = vpop.eup %9411 }
 0x8ec   : > { %8840 = vmatprep.mubr.msk.f32.mxu0 %vm757_vm1, %v6528_v45  ;;  %v6531_v5 = vmul.f32 %v9392_v16, %v8795_v46 }
 0x8ed   : > { %v6387_v63 = vpop.f32.mrf.mxu1  ;;  %8841 = vmatmul.mubr.msk.f32.gmra.mxu0 %vm757_vm1, %v6529_v38 }
 0x8ee   : > { %v6530_v15 = vmul.f32 %v9390_v34, %v6387_v63  ;;  %v9414_v63 = vpop.eup %9413 }
 0x8ef   : > { %v8798_v25 = vpop.f32.mrf.mxu1 }
 0x8f0   : > { %8843 = vmatprep.mubr.msk.f32.mxu0 %vm757_vm1, %v6530_v15  ;;  %v6533_v30 = vmul.f32 %v9396_v57, %v8798_v25  ;;  %v9416_v15 = vpop.eup %9415 }
 0x8f1   : > { %v6397_v55 = vpop.f32.mrf.mxu1  ;;  %8844 = vmatmul.mubr.msk.f32.gmra.mxu0 %vm757_vm1, %v6531_v5 }
 0x8f2   : > { %v6532_v56 = vmul.f32 %v9394_v8, %v6397_v55  ;;  %v9418_v8 = vpop.eup %9417 }
 0x8f3   : > { %v8801_v48 = vpop.f32.mrf.mxu1 }
 0x8f4   : > { %8846 = vmatprep.mubr.msk.f32.mxu0 %vm757_vm1, %v6532_v56  ;;  %v6535_v3 = vmul.f32 %v9400_v19, %v8801_v48  ;;  %v9420_v55 = vpop.eup %9419 }
 0x8f5   : > { %v6407_v11 = vpop.f32.mrf.mxu1  ;;  %8847 = vmatmul.mubr.msk.f32.gmra.mxu0 %vm757_vm1, %v6533_v30  ;;  %v6115_v30 = vpop.xlane.xlu1 %6114 }
 0x8f6   : > { %v6534_v51 = vmul.f32 %v9398_v14, %v6407_v11  ;;  %v6118_v14 = vpop.xlane.xlu0 %6117  ;;  %9421 = vrcp.f32 %v6115_v30 }
 0x8f7   : > { %v8804_v21 = vpop.f32.mrf.mxu1  ;;  %9423 = vrcp.f32 %v6118_v14 }
 0x8f8   : > { %8849 = vmatprep.mubr.msk.f32.mxu0 %vm757_vm1, %v6534_v51  ;;  %v6537_v41 = vmul.f32 %v9404_v49, %v8804_v21 }
 0x8f9   : > { %v6417_v53 = vpop.f32.mrf.mxu1  ;;  %8850 = vmatmul.mubr.msk.f32.gmra.mxu0 %vm757_vm1, %v6535_v3  ;;  %v6121_v48 = vpop.xlane.xlu1 %6120 }
 0x8fa   : > { %v6536_v33 = vmul.f32 %v9402_v50, %v6417_v53  ;;  %v6124_v11 = vpop.xlane.xlu0 %6123  ;;  %9425 = vrcp.f32 %v6121_v48 }
 0x8fb   : > { %v8807_v23 = vpop.f32.mrf.mxu1  ;;  %9427 = vrcp.f32 %v6124_v11 }
 0x8fc   : > { %8852 = vmatprep.mubr.msk.f32.mxu0 %vm757_vm1, %v6536_v33  ;;  %v6539_v44 = vmul.f32 %v9408_v22, %v8807_v23 }
 0x8fd   : > { %v6427_v58 = vpop.f32.mrf.mxu1  ;;  %8853 = vmatmul.mubr.msk.f32.gmra.mxu0 %vm757_vm1, %v6537_v41  ;;  %v6127_v9 = vpop.xlane.xlu1 %6126 }
 0x8fe   : > { %v6538_v28 = vmul.f32 %v9406_v40, %v6427_v58  ;;  %v6130_v19 = vpop.xlane.xlu0 %6129  ;;  %9429 = vrcp.f32 %v6127_v9 }
 0x8ff   : > { %v8810_v26 = vpop.f32.mrf.mxu1  ;;  %9431 = vrcp.f32 %v6130_v19 }
 0x900   : > { %8855 = vmatprep.mubr.msk.f32.mxu0 %vm757_vm1, %v6538_v28  ;;  %v6541_v46 = vmul.f32 %v9412_v2, %v8810_v26 }
 0x901   : > { %v6437_v45 = vpop.f32.mrf.mxu1  ;;  %8856 = vmatmul.mubr.msk.f32.gmra.mxu0 %vm757_vm1, %v6539_v44  ;;  %v6133_v27 = vpop.xlane.xlu1 %6132 }
 0x902   : > { %v6540_v38 = vmul.f32 %v9410_v29, %v6437_v45  ;;  %v6136_v51 = vpop.xlane.xlu0 %6135  ;;  %9433 = vrcp.f32 %v6133_v27 }
 0x903   : > { %v8813_v34 = vpop.f32.mrf.mxu1  ;;  %v9422_v7 = vpop.eup %9421  ;;  %9435 = vrcp.f32 %v6136_v51  ;;  %v13019_v51 = vld [vmem:[#allocation12_spill] sm:$0xff] }
 0x904   : > { %8858 = vmatprep.mubr.msk.f32.mxu0 %vm757_vm1, %v6540_v38  ;;  %v6543_v25 = vmul.f32 %v9416_v15, %v8813_v34  ;;  %v9424_v49 = vpop.eup %9423 }
 0x905   : > { %v6447_v16 = vpop.f32.mrf.mxu1  ;;  %8859 = vmatmul.mubr.msk.f32.gmra.mxu0 %vm757_vm1, %v6541_v46  ;;  %v6139_v3 = vpop.xlane.xlu1 %6138 }
 0x906   : > { %v6542_v5 = vmul.f32 %v9414_v63, %v6447_v16  ;;  %v6142_v50 = vpop.xlane.xlu0 %6141  ;;  %9437 = vrcp.f32 %v6139_v3  ;;  %v921_v3 = vadd.f32 %v12336_v1, %v13019_v51  ;;  %v13035_v51 = vld [vmem:[#allocation49_spill] sm:$0xff] }
 0x907   : > { %v8816_v20 = vpop.f32.mrf.mxu1  ;;  %v9426_v23 = vpop.eup %9425  ;;  %9439 = vrcp.f32 %v6142_v50 }
 0x908   : > { %8861 = vmatprep.mubr.msk.f32.mxu0 %vm757_vm1, %v6542_v5  ;;  %v6545_v56 = vmul.f32 %v9420_v55, %v8816_v20  ;;  %v9428_v22 = vpop.eup %9427 }
 0x909   : > { %v6457_v13 = vpop.f32.mrf.mxu1  ;;  %8862 = vmatmul.mubr.msk.f32.gmra.mxu0 %vm757_vm1, %v6543_v25  ;;  %v6145_v40 = vpop.xlane.xlu1 %6144 }
 0x90a   : > { %v6544_v57 = vmul.f32 %v9418_v8, %v6457_v13  ;;  %v6148_v28 = vpop.xlane.xlu0 %6147  ;;  %9441 = vrcp.f32 %v6145_v40 }
 0x90b   : > { %v9430_v45 = vpop.eup %9429  ;;  %9443 = vrcp.f32 %v6148_v28 }
 0x90c   : > { %8864 = vmatprep.mubr.msk.f32.mxu0 %vm757_vm1, %v6544_v57  ;;  %v9432_v38 = vpop.eup %9431 }
 0x90d   : > { %8865 = vmatmul.mubr.msk.f32.gmra.mxu0 %vm757_vm1, %v6545_v56 }
 0x90f   : > { %v9434_v16 = vpop.eup %9433 }
 0x910   : > { %v9436_v5 = vpop.eup %9435 }
 0x913   : > { %v9438_v13 = vpop.eup %9437 }
 0x914   : > { %v9440_v57 = vpop.eup %9439 }
 0x917   : > { %v9442_v14 = vpop.eup %9441 }
 0x918   : > { %v9444_v11 = vpop.eup %9443 }
 0x924   : > { %v8819_v21 = vpop.f32.mrf.mxu1 }
 0x925   : > { %v6547_v33 = vmul.f32 %v9424_v49, %v8819_v21  ;;  %v13020_v21 = vld [vmem:[#allocation63_spill] sm:$0xff]  ;;  %v13022_v49 = vld [vmem:[#allocation34_spill] sm:$0xff] }
 0x926   : > { %v6467_v53 = vpop.f32.mrf.mxu1  ;;  %v2476_v50 = vadd.f32 %v13020_v21, %v921_v3 }
 0x927   : > { %v6546_v32 = vmul.f32 %v9422_v7, %v6467_v53  ;;  %v13021_v7 = vld [vmem:[#allocation16_spill] sm:$0xff] }
 0x928   : > { %v8822_v41 = vpop.f32.mrf.mxu1  ;;  %v931_v53 = vadd.f32 %v12336_v1, %v13021_v7 }
 0x929   : > { %8867 = vmatprep.mubr.msk.f32.mxu0 %vm757_vm1, %v6546_v32  ;;  %v6549_v26 = vmul.f32 %v9428_v22, %v8822_v41  ;;  %v3944_v32 = vadd.f32 %v13022_v49, %v2476_v50  ;;  %v13023_v41 = vld [vmem:[#allocation64_spill] sm:$0xff]  ;;  %v13036_v50 = vld [vmem:[#allocation66_spill] sm:$0xff] }
 0x92a   : > { %v6477_v58 = vpop.f32.mrf.mxu1  ;;  %8868 = vmatmul.mubr.msk.f32.gmra.mxu0 %vm757_vm1, %v6547_v33 }
 0x92b   : > { %v6548_v44 = vmul.f32 %v9426_v23, %v6477_v58  ;;  %v2478_v23 = vadd.f32 %v13023_v41, %v931_v53  ;;  %v5412_v40 = vadd.f32 %v12297_v59, %v3944_v32  ;;  %v13024_v58 = vld [vmem:[#allocation7_spill] sm:$0xff]  ;;  %v13037_v53 = vld [vmem:[#allocation17_spill] sm:$0xff] }
 0x92c   : > { %v8825_v29 = vpop.f32.mrf.mxu1  ;;  %v13038_v32 = vld [vmem:[#allocation13_spill] sm:$0xff] }
 0x92d   : > { %8870 = vmatprep.mubr.msk.f32.mxu0 %vm757_vm1, %v6548_v44  ;;  %v6551_v34 = vmul.f32 %v9432_v38, %v8825_v29  ;;  %v13025_v44 = vld [vmem:[#allocation19_spill] sm:$0xff]  ;;  %v13026_v29 = vld [vmem:[#allocation41_spill] sm:$0xff] }
 0x92e   : > { %v6487_v2 = vpop.f32.mrf.mxu1  ;;  %8871 = vmatmul.mubr.msk.f32.gmra.mxu0 %vm757_vm1, %v6549_v26  ;;  %v941_v26 = vadd.f32 %v12336_v1, %v13025_v44 }
 0x92f   : > { %v6550_v46 = vmul.f32 %v9430_v45, %v6487_v2  ;;  %v3946_v45 = vadd.f32 %v13026_v29, %v2478_v23  ;;  %v13039_v23 = vld [vmem:[#allocation26_spill] sm:$0xff] }
 0x930   : > { %v8828_v63 = vpop.f32.mrf.mxu1 }
 0x931   : > { %8873 = vmatprep.mubr.msk.f32.mxu0 %vm757_vm1, %v6550_v46  ;;  %v6553_v20 = vmul.f32 %v9436_v5, %v8828_v63  ;;  %v13027_v46 = vld [vmem:[#allocation65_spill] sm:$0xff] }
 0x932   : > { %v6497_v15 = vpop.f32.mrf.mxu1  ;;  %8874 = vmatmul.mubr.msk.f32.gmra.mxu0 %vm757_vm1, %v6551_v34  ;;  %v2480_v59 = vadd.f32 %v13027_v46, %v941_v26  ;;  %v13028_v34 = vld [vmem:[#allocation15_spill] sm:$0xff] }
 0x933   : > { %v6552_v25 = vmul.f32 %v9434_v16, %v6497_v15  ;;  %v5414_v63 = vadd.f32 %v13028_v34, %v3946_v45  ;;  %v13029_v16 = vld [vmem:[#allocation11_spill] sm:$0xff]  ;;  %v13044_v34 = vld [vmem:[#allocation29_spill] sm:$0xff] }
 0x934   : > { %v8831_v8 = vpop.f32.mrf.mxu1  ;;  %v13041_v26 = vld [vmem:[#allocation67_spill] sm:$0xff] }
 0x935   : > { %8876 = vmatprep.mubr.msk.f32.mxu0 %vm757_vm1, %v6552_v25  ;;  %v6555_v30 = vmul.f32 %v9440_v57, %v8831_v8  ;;  %v13030_v25 = vld [vmem:[#allocation22_spill] sm:$0xff]  ;;  %v13031_v8 = vld [vmem:[#allocation45_spill] sm:$0xff]  ;;  %v13042_v45 = vld [vmem:[#allocation39_spill] sm:$0xff] }
 0x936   : > { %v6507_v55 = vpop.f32.mrf.mxu1  ;;  %8877 = vmatmul.mubr.msk.f32.gmra.mxu0 %vm757_vm1, %v6553_v20  ;;  %v951_v20 = vadd.f32 %v12336_v1, %v13030_v25  ;;  %v12580_v1 = vld [vmem:[%s12743_s7] ss:$0 sm:$0xff] }
 0x937   : > { %v6554_v56 = vmul.f32 %v9438_v13, %v6507_v55  ;;  %v3948_v13 = vadd.f32 %v13031_v8, %v2480_v59 }
 0x938   : > { %v8834_v48 = vpop.f32.mrf.mxu1 }
 0x939   : > { %8879 = vmatprep.mubr.msk.f32.mxu0 %vm757_vm1, %v6554_v56  ;;  %v6557_v27 = vmul.f32 %v9444_v11, %v8834_v48  ;;  %v13032_v56 = vld [vmem:[#allocation20_spill] sm:$0xff]  ;;  %v5416_v48 = vadd.f32 %v12307_v43, %v3948_v13 }
 0x93a   : > { %v6517_v9 = vpop.f32.mrf.mxu1  ;;  %8880 = vmatmul.mubr.msk.f32.gmra.mxu0 %vm757_vm1, %v6555_v30  ;;  %v2482_v30 = vadd.f32 %v13032_v56, %v951_v20  ;;  %v13046_v20 = vld [vmem:[#allocation68_spill] sm:$0xff] }
 0x93b   : > { %v6556_v19 = vmul.f32 %v9442_v14, %v6517_v9  ;;  %v13033_v14 = vld [vmem:[#allocation9_spill] sm:$0xff]  ;;  %v13047_v56 = vld [vmem:[#allocation32_spill] sm:$0xff] }
 0x93c   : > { %v3950_v3 = vadd.f32 %v13035_v51, %v2482_v30  ;;  %v991_v30 = vadd.f32 %v12580_v1, %v13047_v56  ;;  %v13050_v51 = vld [vmem:[#allocation25_spill] sm:$0xff] }
 0x93d   : > { %8882 = vmatprep.mubr.msk.f32.mxu0 %vm757_vm1, %v6556_v19  ;;  %v13034_v19 = vld [vmem:[#allocation24_spill] sm:$0xff] }
 0x93e   : > { %8883 = vmatmul.mubr.msk.f32.gmra.mxu0 %vm757_vm1, %v6557_v27  ;;  %v961_v27 = vadd.f32 %v12580_v1, %v13034_v19  ;;  %v5418_v49 = vadd.f32 %v13037_v53, %v3950_v3  ;;  %v13049_v19 = vld [vmem:[#allocation69_spill] sm:$0xff] }
 0x940   : > { %v2484_v7 = vadd.f32 %v13036_v50, %v961_v27  ;;  %v2490_v27 = vadd.f32 %v13049_v19, %v991_v30 }
 0x9a9   : > { %v8839_v33 = vpop.f32.mrf.mxu0 }
 0x9aa   : > { %v6881_v22 = vadd.f32 %v8839_v33, %v13024_v58  ;;  %v13040_v58 = vld [vmem:[#allocation53_spill] sm:$0xff] }
 0x9ab   : > { %v6721_v28 = vpop.f32.mrf.mxu0 }
 0x9ac   : > { %6913 = vst.msk [vmem:[%s12558_s12 + $0x8] sm:$0xff] %vm387_vm0, %v6881_v22  ;;  %v6880_v2 = vadd.f32 %v6721_v28, %v5412_v40  ;;  %v971_v40 = vadd.f32 %v12580_v1, %v13039_v23  ;;  %v3952_v22 = vadd.f32 %v13040_v58, %v2484_v7 }
 0x9ad   : > { %v8842_v38 = vpop.f32.mrf.mxu0 }
 0x9ae   : > { %6912 = vst.msk [vmem:[%s12558_s12] sm:$0xff] %vm387_vm0, %v6880_v2  ;;  %v6883_v15 = vadd.f32 %v8842_v38, %v13029_v16  ;;  %v2486_v29 = vadd.f32 %v13041_v26, %v971_v40  ;;  %v5420_v2 = vadd.f32 %v13042_v45, %v3952_v22  ;;  %v13043_v38 = vld [vmem:[#allocation23_spill] sm:$0xff] }
 0x9af   : > { %v6731_v5 = vpop.f32.mrf.mxu0  ;;  %v13045_v16 = vld [vmem:[#allocation35_spill] sm:$0xff] }
 0x9b0   : > { %6915 = vst.msk [vmem:[%s12558_s12 + $0x18] sm:$0xff] %vm387_vm0, %v6883_v15  ;;  %v6882_v55 = vadd.f32 %v6731_v5, %v5414_v63  ;;  %v981_v63 = vadd.f32 %v12580_v1, %v13044_v34  ;;  %v3954_v15 = vadd.f32 %v13045_v16, %v2486_v29  ;;  %v13053_v34 = vld [vmem:[#allocation60_spill] sm:$0xff] }
 0x9b1   : > { %v8845_v57 = vpop.f32.mrf.mxu0 }
 0x9b2   : > { %6914 = vst.msk [vmem:[%s12558_s12 + $0x10] sm:$0xff] %vm387_vm0, %v6882_v55  ;;  %v6885_v9 = vadd.f32 %v8845_v57, %v13033_v14  ;;  %v2488_v8 = vadd.f32 %v13046_v20, %v981_v63  ;;  %v5422_v13 = vadd.f32 %v12323_v47, %v3954_v15  ;;  %v1071_v63 = vadd.f32 %v12580_v1, %v13053_v34  ;;  %v13054_v15 = vld [vmem:[#allocation8_spill] sm:$0xff] }
 0x9b3   : > { %v6741_v11 = vpop.f32.mrf.mxu0 }
 0x9b4   : > { %6917 = vst.msk [vmem:[%s12558_s12 + $0x28] sm:$0xff] %vm387_vm0, %v6885_v9  ;;  %v6884_v43 = vadd.f32 %v6741_v11, %v5416_v48  ;;  %v13048_v48 = vld [vmem:[#allocation61_spill] sm:$0xff] }
 0x9b5   : > { %v8848_v21 = vpop.f32.mrf.mxu0  ;;  %v3956_v14 = vadd.f32 %v13048_v48, %v2488_v8 }
 0x9b6   : > { %6916 = vst.msk [vmem:[%s12558_s12 + $0x20] sm:$0xff] %vm387_vm0, %v6884_v43  ;;  %v6887_v33 = vadd.f32 %v8848_v21, %v13038_v32  ;;  %v13052_v21 = vld [vmem:[#allocation28_spill] sm:$0xff] }
 0x9b7   : > { %v6751_v41 = vpop.f32.mrf.mxu0  ;;  %v5424_v47 = vadd.f32 %v13050_v51, %v3956_v14  ;;  %v3958_v50 = vadd.f32 %v13052_v21, %v2490_v27 }
 0x9b8   : > { %6919 = vst.msk [vmem:[%s12558_s12 + $0x38] sm:$0xff] %vm387_vm0, %v6887_v33  ;;  %v6886_v28 = vadd.f32 %v6751_v41, %v5418_v49 }
 0x9b9   : > { %v8851_v44 = vpop.f32.mrf.mxu0  ;;  %v5426_v49 = vadd.f32 %v12345_v61, %v3958_v50 }
 0x9ba   : > { %6918 = vst.msk [vmem:[%s12558_s12 + $0x30] sm:$0xff] %vm387_vm0, %v6886_v28  ;;  %v6889_v46 = vadd.f32 %v8851_v44, %v13043_v38 }
 0x9bb   : > { %v6761_v59 = vpop.f32.mrf.mxu0 }
 0x9bc   : > { %6921 = vst.msk [vmem:[%s12558_s12 + $0x48] sm:$0xff] %vm387_vm0, %v6889_v46  ;;  %v6888_v5 = vadd.f32 %v6761_v59, %v5420_v2 }
 0x9bd   : > { %v8854_v25 = vpop.f32.mrf.mxu0 }
 0x9be   : > { %6920 = vst.msk [vmem:[%s12558_s12 + $0x40] sm:$0xff] %vm387_vm0, %v6888_v5  ;;  %v6891_v55 = vadd.f32 %v8854_v25, %v12320_v36  ;;  %v13051_v36 = vld [vmem:[#allocation38_spill] sm:$0xff]  ;;  %v2506_v5 = vadd.f32 %v13054_v15, %v1071_v63 }
 0x9bf   : > { %v6771_v57 = vpop.f32.mrf.mxu0 }
 0x9c0   : > { %6923 = vst.msk [vmem:[%s12558_s12 + $0x58] sm:$0xff] %vm387_vm0, %v6891_v55  ;;  %v6890_v9 = vadd.f32 %v6771_v57, %v5422_v13 }
 0x9c1   : > { %v8857_v11 = vpop.f32.mrf.mxu0 }
 0x9c2   : > { %6922 = vst.msk [vmem:[%s12558_s12 + $0x50] sm:$0xff] %vm387_vm0, %v6890_v9  ;;  %v6893_v3 = vadd.f32 %v8857_v11, %v13051_v36 }
 0x9c3   : > { %v6781_v43 = vpop.f32.mrf.mxu0 }
 0x9c4   : > { %6925 = vst.msk [vmem:[%s12558_s12 + $0x68] sm:$0xff] %vm387_vm0, %v6893_v3  ;;  %v6892_v7 = vadd.f32 %v6781_v43, %v5424_v47 }
 0x9c5   : > { %v8860_v53 = vpop.f32.mrf.mxu0 }
 0x9c6   : > { %6924 = vst.msk [vmem:[%s12558_s12 + $0x60] sm:$0xff] %vm387_vm0, %v6892_v7  ;;  %v6895_v32 = vadd.f32 %v8860_v53, %v12341_v10 }
 0x9c7   : > { %v6791_v33 = vpop.f32.mrf.mxu0 }
 0x9c8   : > { %6927 = vst.msk [vmem:[%s12558_s12 + $0x78] sm:$0xff] %vm387_vm0, %v6895_v32  ;;  %v6894_v41 = vadd.f32 %v6791_v33, %v5426_v49 }
 0x9c9   : > { %v8863_v23 = vpop.f32.mrf.mxu0 }
 0x9ca   : > { %6926 = vst.msk [vmem:[%s12558_s12 + $0x70] sm:$0xff] %vm387_vm0, %v6894_v41  ;;  %v6897_v40 = vadd.f32 %v8863_v23, %v12352_v37 }
 0x9cb   : > { %v6801_v58 = vpop.f32.mrf.mxu0 }
 0x9cc   : > { %6929 = vst.msk [vmem:[%s12558_s12 + $0x88] sm:$0xff] %vm387_vm0, %v6897_v40  ;;  %v6896_v61 = vadd.f32 %v6801_v58, %v12356_v31 }
 0x9cd   : > { %v8866_v22 = vpop.f32.mrf.mxu0 }
 0x9ce   : > { %6928 = vst.msk [vmem:[%s12558_s12 + $0x80] sm:$0xff] %vm387_vm0, %v6896_v61  ;;  %v6899_v10 = vadd.f32 %v8866_v22, %v12361_v42 }
 0x9cf   : > { %v6811_v28 = vpop.f32.mrf.mxu0 }
 0x9d0   : > { %6931 = vst.msk [vmem:[%s12558_s12 + $0x98] sm:$0xff] %vm387_vm0, %v6899_v10  ;;  %v6898_v44 = vadd.f32 %v6811_v28, %v12366_v39 }
 0x9d2   : > { %6930 = vst.msk [vmem:[%s12558_s12 + $0x90] sm:$0xff] %vm387_vm0, %v6898_v44 }
 0x9ea   : > { %v8869_v37 = vpop.f32.mrf.mxu0 }
 0x9eb   : > { %v6901_v26 = vadd.f32 %v8869_v37, %v12371_v52 }
 0x9ec   : > { %v6821_v29 = vpop.f32.mrf.mxu0 }
 0x9ed   : > { %6933 = vst.msk [vmem:[%s12558_s12 + $0xa8] sm:$0xff] %vm387_vm0, %v6901_v26  ;;  %v6900_v31 = vadd.f32 %v6821_v29, %v12379_v54 }
 0x9ee   : > { %v8872_v45 = vpop.f32.mrf.mxu0 }
 0x9ef   : > { %6932 = vst.msk [vmem:[%s12558_s12 + $0xa0] sm:$0xff] %vm387_vm0, %v6900_v31  ;;  %v6903_v42 = vadd.f32 %v8872_v45, %v12385_v0 }
 0x9f0   : > { %v6831_v2 = vpop.f32.mrf.mxu0 }
 0x9f1   : > { %6935 = vst.msk [vmem:[%s12558_s12 + $0xb8] sm:$0xff] %vm387_vm0, %v6903_v42  ;;  %v6902_v39 = vadd.f32 %v6831_v2, %v12392_v62 }
 0x9f2   : > { %v8875_v38 = vpop.f32.mrf.mxu0 }
 0x9f3   : > { %6934 = vst.msk [vmem:[%s12558_s12 + $0xb0] sm:$0xff] %vm387_vm0, %v6902_v39  ;;  %v6905_v52 = vadd.f32 %v8875_v38, %v12402_v4 }
 0x9f4   : > { %v6841_v46 = vpop.f32.mrf.mxu0 }
 0x9f5   : > { %6937 = vst.msk [vmem:[%s12558_s12 + $0xc8] sm:$0xff] %vm387_vm0, %v6905_v52  ;;  %v6904_v54 = vadd.f32 %v6841_v46, %v12408_v12 }
 0x9f6   : > { %v8878_v59 = vpop.f32.mrf.mxu0 }
 0x9f7   : > { %6936 = vst.msk [vmem:[%s12558_s12 + $0xc0] sm:$0xff] %vm387_vm0, %v6904_v54  ;;  %v6907_v0 = vadd.f32 %v8878_v59, %v12420_v24  ;;  %v13055_v24 = vld [vmem:[#allocation62_spill] sm:$0xff] }
 0x9f8   : > { %v6851_v62 = vpop.f32.mrf.mxu0  ;;  %v3974_v20 = vadd.f32 %v13055_v24, %v2506_v5 }
 0x9f9   : > { %6939 = vst.msk [vmem:[%s12558_s12 + $0xd8] sm:$0xff] %vm387_vm0, %v6907_v0  ;;  %v6906_v4 = vadd.f32 %v6851_v62, %v12425_v18 }
 0x9fa   : > { %v8881_v16 = vpop.f32.mrf.mxu0  ;;  %v5442_v8 = vadd.f32 %v12509_v60, %v3974_v20 }
 0x9fb   : > { %6938 = vst.msk [vmem:[%s12558_s12 + $0xd0] sm:$0xff] %vm387_vm0, %v6906_v4  ;;  %v6909_v12 = vadd.f32 %v8881_v16, %v12443_v17 }
 0x9fc   : > { %v6861_v25 = vpop.f32.mrf.mxu0 }
 0x9fd   : > { %6941 = vst.msk [vmem:[%s12558_s12 + $0xe8] sm:$0xff] %vm387_vm0, %v6909_v12  ;;  %v6908_v1 = vadd.f32 %v6861_v25, %v12449_v6 }
 0x9fe   : > { %v8884_v18 = vpop.f32.mrf.mxu0 }
 0x9ff   : > { %6940 = vst.msk [vmem:[%s12558_s12 + $0xe0] sm:$0xff] %vm387_vm0, %v6908_v1  ;;  %v6911_v13 = vadd.f32 %v8884_v18, %v12455_v35 }
 0xa00   : > { %v6871_v17 = vpop.f32.mrf.mxu0 }
 0xa01   : > { %6943 = vst.msk [vmem:[%s12558_s12 + $0xf8] sm:$0xff] %vm387_vm0, %v6911_v13  ;;  %v6910_v6 = vadd.f32 %v6871_v17, %v5442_v8 }
 0xa03   : > { %6942 = vst.msk [vmem:[%s12558_s12 + $0xf0] sm:$0xff] %vm387_vm0, %v6910_v6 }
 0xa04   : > { %9487 = shalt.err (!%p9484_p3)
}
 0xa05   : > { %s9488_s26 = scalar_lea.hbm %s12686_s25, 4096  ;;  %s9492_s17 = scalar_lea.hbm %s12744_s8, 8192 }
 0xa06   : > { %p9489_p4 = scmp.ne.s32.totalorder %s12686_s25, %s9488_s26  ;;  %p9493_p9 = scmp.lt.s32.totalorder %s12686_s25, %s12744_s8 }
 0xa07   : > { %p9494_p10 = scmp.lt.s32.totalorder %s9492_s17, %s9488_s26 }
 0xa08   : > { %p9490_p7 = pnand %p9489_p4, %p9629_p5 }
 0xa09   : > { %p9495_p11 = por %p9494_p10, %p9493_p9 }
 0xa0a   : > { %p9491_p8 = pneg %p9490_p7 }
 0xa0c   : > { %p9496_p12 = pnand %p9495_p11, %p9491_p8 }
 0xa0e   : > { %9499 = shalt.err (!%p9496_p12)
}
 0xa0f   : > { %s9544_s21 = smov 128   ;;  %s9545_s22 = smov 8  }
 0xa10   : > { %8885 = dma.vmem_to_hbm [thread:$0]  (%p9629_p5), %s12688_s19, 4096, %s12686_s25, %s12696_s9, %s9544_s21, %s9544_s21, %s9545_s22  }
 0xa11 PF: > { %p8891_p13 = scmp.ge.s32.totalorder %s9534_s30, 2  ;;  %s6973_s23 = sand.u32 1, %s9522_s27  }
 0xa12   : > { %s6974_s24 = scalar_lea.sflag [#allocation3], %s6973_s23 }
 0xa13   : > { %p8888_p0 = pnand %p8891_p13, %p9633_p6 }
 0xa15   : > { %p8889_p1 = pneg %p8888_p0 }
 0xa17   : > { %9517 = dma.done.wait (%p8889_p1), %s6974_s24, 4096  }
 0xa18   : > { %9519 = vsyncadd (%p8889_p1), %s6974_s24, 4294963200  ;;  %p18_p2 = scmp.ge.s32.totalorder %s9616_s11, 4   ;;  %s13056_s27 = smov %s9526_s28 }
 0xa19   : > { %s13057_s28 = smov %s9530_s29  ;;  %s13058_s29 = smov %s9627_s14 }
 0xa1a   : > { %s13059_s30 = smov %s9616_s11  ;;  %20 = sbr.rel (!%p18_p2) target bundleno = 3 (0x3), region = 93 }
 0xa1f   :  { %6979 = vsyncpa [#allocation3], 1 }
 0xa20   :  { %6981 = vsyncpa [#allocation3 + $0x1], 1 }

</bundles_post_ra>
